<compile_context>
chip_gen: v5e
topology: v5e:2x2
jax: 0.10.0
libtpu: 0.0.40
codegen_flags: <defaults>
</compile_context>

<pallas_src>
import numpy as np
import jax
import jax.numpy as jnp
from jax import lax
from jax.experimental import pallas as pl
from jax.experimental.pallas import tpu as pltpu

# ----------------------------- configuration (from the PyTorch module) --------------------------
NUM_MODELS = 2          # MultiBinaryCLIP(num_models) -- small value for the demo run
CONTEXT_LEN = 77        # CLIP text context_length
LP = ((CONTEXT_LEN + 7) // 8) * 8   # sequence padded to a sublane multiple (80)
VOCAB_SIZE = 49408
WIDTH = 64              # transformer_width
HEADS = 4               # transformer_heads
LAYERS = 12             # transformer_layers
EMBED_DIM = 1           # embed_dim (each binary model produces a single logit)

LAST_CONV_C = 576       # mobilenet_v3_small final feature channels
CLS_HIDDEN = 1024       # mobilenet_v3_small classifier hidden width

# mobilenet_v3_small inverted-residual config: (in_c, kernel, exp_c, out_c, use_se, act, stride)
BNECK_CFG = [
    (16, 3, 16, 16, True, 'RE', 2),
    (16, 3, 72, 24, False, 'RE', 2),
    (24, 3, 88, 24, False, 'RE', 1),
    (24, 5, 96, 40, True, 'HS', 2),
    (40, 5, 240, 40, True, 'HS', 1),
    (40, 5, 240, 40, True, 'HS', 1),
    (40, 5, 120, 48, True, 'HS', 1),
    (48, 5, 144, 48, True, 'HS', 1),
    (48, 5, 288, 96, True, 'HS', 2),
    (96, 5, 576, 96, True, 'HS', 1),
    (96, 5, 576, 96, True, 'HS', 1),
]

BN_EPS = 1e-5
# eval-mode BatchNorm with default init (weight=1, bias=0, running_mean=0, running_var=1)
# TODO(synk): for real pretrained weights, fold (gamma, beta, mean, var) into the conv instead.
BN_SCALE = 1.0 / np.sqrt(1.0 + BN_EPS)


# ----------------------------------- small math helpers -----------------------------------------
def _make_divisible(v, divisor=8, min_value=None):
    if min_value is None:
        min_value = divisor
    new_v = max(min_value, int(v + divisor / 2) // divisor * divisor)
    if new_v < 0.9 * v:
        new_v += divisor
    return new_v


def hardswish(x):
    return x * jnp.clip(x + 3.0, 0.0, 6.0) * (1.0 / 6.0)


def hardsigmoid(x):
    return jnp.clip(x + 3.0, 0.0, 6.0) * (1.0 / 6.0)


def _layernorm(x, g, b, eps=1e-5):
    # matches torch LayerNorm (biased variance); done in f32.
    x = x.astype(jnp.float32)
    mu = jnp.mean(x, axis=-1, keepdims=True)
    var = jnp.mean(jnp.square(x - mu), axis=-1, keepdims=True)
    return (x - mu) * lax.rsqrt(var + eps) * g + b


# --------------------------- fused text-transformer Pallas kernel --------------------------------
def make_fused_text_kernel(width, heads, layers, batch, lp):
    d = width // heads

    def kernel(x_ref,
               ln1g_ref, ln1b_ref,
               wqkv_ref, bqkv_ref,
               wo_ref, bo_ref,
               ln2g_ref, ln2b_ref,
               wfc_ref, bfc_ref, wpr_ref, bpr_ref,
               lnfg_ref, lnfb_ref, onehot_ref, tproj_ref,
               o_ref):
        # in-kernel causal mask for one batch block (pad rows 77..79 are causally isolated and
        # never selected by the EOT one-hot); generated from iota -> no HBM mask array.
        row = lax.broadcasted_iota(jnp.int32, (lp, lp), 0)
        col = lax.broadcasted_iota(jnp.int32, (lp, lp), 1)
        causal = jnp.where(col > row, jnp.float32(-1e30), jnp.float32(0.0))   # [LP, LP]

        def layer_body(l, x):
            # ---- attention branch: x + attn(ln_1(x)) ----
            h = _layernorm(x, ln1g_ref[l], ln1b_ref[l])                        # [R, W]
            hb = h.astype(jnp.bfloat16)
            # fused QKV projection (1/sqrt(d) already folded into the q columns/bias at init)
            qkv = jnp.dot(hb, wqkv_ref[l], preferred_element_type=jnp.float32) + bqkv_ref[l]

            ctx_rows = []
            for b in range(batch):                                             # static, tiny
                qkv_b = qkv[b * lp:(b + 1) * lp, :]                            # [LP, 3W]
                ctx_heads = []
                for hd in range(heads):                                        # static head count
                    qh = qkv_b[:, hd * d:(hd + 1) * d].astype(jnp.bfloat16)
                    kh = qkv_b[:, width + hd * d: width + (hd + 1) * d].astype(jnp.bfloat16)
                    vh = qkv_b[:, 2 * width + hd * d: 2 * width + (hd + 1) * d].astype(jnp.bfloat16)
                    s = lax.dot_general(qh, kh, (((1,), (1,)), ((), ())),
                                        preferred_element_type=jnp.float32)    # [LP, LP]
                    s = s + causal
                    s = s - jnp.max(s, axis=-1, keepdims=True)
                    p = jnp.exp(s)
                    p = p * pl.reciprocal(jnp.sum(p, axis=-1, keepdims=True), approx=True)
                    ctx_heads.append(jnp.dot(p.astype(jnp.bfloat16), vh,
                                             preferred_element_type=jnp.float32))  # [LP, d]
                ctx_rows.append(jnp.concatenate(ctx_heads, axis=-1))           # [LP, W]
            ctx = jnp.concatenate(ctx_rows, axis=0)                            # [R, W]
            attn = jnp.dot(ctx.astype(jnp.bfloat16), wo_ref[l],
                           preferred_element_type=jnp.float32) + bo_ref[l]     # fused out-proj
            x = x + attn

            # ---- MLP branch: x + mlp(ln_2(x)), QuickGELU ----
            h2 = _layernorm(x, ln2g_ref[l], ln2b_ref[l]).astype(jnp.bfloat16)
            f = jnp.dot(h2, wfc_ref[l], preferred_element_type=jnp.float32) + bfc_ref[l]
            f = f * jax.nn.sigmoid(1.702 * f)
            x = x + jnp.dot(f.astype(jnp.bfloat16), wpr_ref[l],
                            preferred_element_type=jnp.float32) + bpr_ref[l]
            return x

        x0 = x_ref[...].astype(jnp.float32)                                    # [R, W]
        x = lax.fori_loop(0, layers, layer_body, x0)

        # ---- epilogue: ln_final -> EOT-token select -> text_projection (EMBED_DIM=1 -> VPU) ----
        hf = _layernorm(x, lnfg_ref[...], lnfb_ref[...])                       # [R, W]
        sel = jnp.dot(onehot_ref[...], hf, preferred_element_type=jnp.float32) # [B, W]
        o_ref[...] = jnp.sum(sel * tproj_ref[...], axis=-1, keepdims=True)     # [B, 1]

    return kernel


def run_text_transformer(x_flat, tp, flat_onehot, batch):
    M, R, W = x_flat.shape
    kernel = make_fused_text_kernel(W, HEADS, LAYERS, batch, LP)

    def pspec(shape):   # per-model array: leading model axis squeezed, full trailing extent
        n = len(shape)
        return pl.BlockSpec((None,) + tuple(shape), lambda m, n=n: (m,) + (0,) * n)

    def sspec(shape):   # shared array: constant across the grid (single DMA)
        n = len(shape)
        return pl.BlockSpec(tuple(shape), lambda m, n=n: (0,) * n)

    return pl.pallas_call(
        kernel,
        out_shape=jax.ShapeDtypeStruct((M, batch, EMBED_DIM), jnp.float32),
        grid_spec=pltpu.PrefetchScalarGridSpec(
            num_scalar_prefetch=0,
            grid=(M,),
            in_specs=[
                pspec((R, W)),                                  # x (token + pos embeddings)
                pspec((LAYERS, 1, W)), pspec((LAYERS, 1, W)),   # ln_1 gamma / beta
                pspec((LAYERS, W, 3 * W)),                      # wqkv  [in, q|k|v], q pre-scaled
                pspec((LAYERS, 1, 3 * W)),                      # bqkv
                pspec((LAYERS, W, W)),                          # wo    [in, out]
                pspec((LAYERS, 1, W)),                          # bo
                pspec((LAYERS, 1, W)), pspec((LAYERS, 1, W)),   # ln_2 gamma / beta
                pspec((LAYERS, W, 4 * W)), pspec((LAYERS, 1, 4 * W)),   # c_fc, bias
                pspec((LAYERS, 4 * W, W)), pspec((LAYERS, 1, W)),       # c_proj, bias
                pspec((1, W)), pspec((1, W)),                   # ln_final gamma / beta
                sspec((batch, R)),                              # EOT one-hot over flattened rows
                pspec((1, W)),                                  # text_projection (row view)
            ],
            out_specs=pspec((batch, EMBED_DIM)),
        ),
        compiler_params=pltpu.CompilerParams(
            dimension_semantics=("parallel",),
            vmem_limit_bytes=32 << 20),
    )(x_flat,
      tp['ln1_g'], tp['ln1_b'],
      tp['wqkv'], tp['bqkv'],
      tp['wo'], tp['bo'],
      tp['ln2_g'], tp['ln2_b'],
      tp['wfc'], tp['bfc'], tp['wpr'], tp['bpr'],
      tp['lnf_g'], tp['lnf_b'], flat_onehot, tp['tproj'])


# ------------------------------------ vision head Pallas kernel ----------------------------------
def vision_head_kernel(f_ref, w1_ref, b1_ref, w2_ref, b2_ref, o_ref):
    f = f_ref[...].astype(jnp.float32)                          # [B, S, C]
    pooled = jnp.mean(f, axis=1)                                # adaptive avg pool -> [B, C]
    h = jnp.dot(pooled.astype(jnp.bfloat16), w1_ref[...],
                preferred_element_type=jnp.float32) + b1_ref[...]
    h = hardswish(h)                                            # classifier Hardswish
    # Dropout(p=0) is identity; final Linear(H,1) as a VPU multiply + reduce (N=1 MXU is wasteful)
    o_ref[...] = jnp.sum(h * w2_ref[...], axis=-1, keepdims=True) + b2_ref[...]


def run_vision_head(feats, w1, b1, w2, b2):
    M, B, S, C = feats.shape
    H = w1.shape[-1]

    def mspec(shape):
        n = len(shape)
        return pl.BlockSpec((None,) + tuple(shape), lambda m, n=n: (m,) + (0,) * n)

    return pl.pallas_call(
        vision_head_kernel,
        out_shape=jax.ShapeDtypeStruct((M, B, 1), jnp.float32),
        grid=(M,),
        in_specs=[
            mspec((B, S, C)),
            mspec((C, H)), mspec((1, H)),
            mspec((1, H)), mspec((1, 1)),
        ],
        out_specs=mspec((B, 1)),
        compiler_params=pltpu.CompilerParams(dimension_semantics=("parallel",)),
    )(feats, w1, b1, w2, b2)


# -------------------------- mobilenet_v3_small backbone (plain JAX glue) -------------------------
def conv2d(x, w, stride=1, groups=1):
    # x: [B, C, H, W]; w: [O, I/groups, kh, kw]
    k = w.shape[-1]
    pad = (k - 1) // 2
    return lax.conv_general_dilated(
        x, w, window_strides=(stride, stride),
        padding=[(pad, pad), (pad, pad)],
        feature_group_count=groups,
        dimension_numbers=('NCHW', 'OIHW', 'NCHW'))


def inverted_residual(x, cfg, bp):
    in_c, k, exp_c, out_c, use_se, act, stride = cfg
    act_fn = hardswish if act == 'HS' else jax.nn.relu
    h = x
    if exp_c != in_c:
        h = act_fn(conv2d(h, bp['exp_w']) * BN_SCALE)
    h = act_fn(conv2d(h, bp['dw_w'], stride=stride, groups=exp_c) * BN_SCALE)
    if use_se:
        s = jnp.mean(h, axis=(2, 3), keepdims=True)
        s = jax.nn.relu(conv2d(s, bp['se_w1']) + bp['se_b1'][None, :, None, None])
        s = hardsigmoid(conv2d(s, bp['se_w2']) + bp['se_b2'][None, :, None, None])
        h = h * s
    h = conv2d(h, bp['proj_w']) * BN_SCALE
    if stride == 1 and in_c == out_c:
        h = h + x
    return h


def mobilenet_backbone(p, x):
    h = hardswish(conv2d(x, p['stem_w'], stride=2) * BN_SCALE)
    for cfg, bp in zip(BNECK_CFG, p['blocks']):
        h = inverted_residual(h, cfg, bp)
    h = hardswish(conv2d(h, p['last_w']) * BN_SCALE)
    return h                                                    # [B, 576, Hf, Wf]


# --------------------------------- parameter initialization --------------------------------------
def _conv_init(key, out_c, in_c, k):
    fan = in_c * k * k
    return jax.random.normal(key, (out_c, in_c, k, k), jnp.float32) * np.sqrt(2.0 / fan)


def init_backbone_params(key):
    keys = iter(jax.random.split(key, 64))
    p = {'stem_w': _conv_init(next(keys), 16, 3, 3)}
    blocks = []
    for (in_c, k, exp_c, out_c, use_se, act, stride) in BNECK_CFG:
        bp = {}
        if exp_c != in_c:
            bp['exp_w'] = _conv_init(next(keys), exp_c, in_c, 1)
        bp['dw_w'] = _conv_init(next(keys), exp_c, 1, k)
        if use_se:
            sq = _make_divisible(exp_c // 4, 8)
            bp['se_w1'] = _conv_init(next(keys), sq, exp_c, 1)
            bp['se_b1'] = jnp.zeros((sq,), jnp.float32)
            bp['se_w2'] = _conv_init(next(keys), exp_c, sq, 1)
            bp['se_b2'] = jnp.zeros((exp_c,), jnp.float32)
        bp['proj_w'] = _conv_init(next(keys), out_c, exp_c, 1)
        blocks.append(bp)
    p['blocks'] = blocks
    p['last_w'] = _conv_init(next(keys), LAST_CONV_C, BNECK_CFG[-1][3], 1)
    return p


def init_vision_params(key, num_models):
    kb, kc = jax.random.split(key)
    per_model = [init_backbone_params(k) for k in jax.random.split(kb, num_models)]
    backbone = jax.tree_util.tree_map(lambda *xs: jnp.stack(xs), *per_model)
    k1, k2 = jax.random.split(kc)
    # classifier weights stored pre-transposed ([in, out]) vs torch's [out, in]; w1 in bf16
    w1 = (jax.random.normal(k1, (num_models, LAST_CONV_C, CLS_HIDDEN), jnp.float32)
          / np.sqrt(LAST_CONV_C)).astype(jnp.bfloat16)
    b1 = jnp.zeros((num_models, 1, CLS_HIDDEN), jnp.float32)
    # final Linear(1024 -> 1) stored as a row vector for the in-kernel VPU reduce
    w2 = jax.random.normal(k2, (num_models, 1, CLS_HIDDEN), jnp.float32) / np.sqrt(CLS_HIDDEN)
    b2 = jnp.zeros((num_models, 1, 1), jnp.float32)
    return {'backbone': backbone, 'w1': w1, 'b1': b1, 'w2': w2, 'b2': b2}


def init_text_params(key, num_models, vocab, ctx, width, layers, heads):
    d = width // heads
    q_scale = d ** -0.5                      # folded into the q projection (weights + bias)
    ks = jax.random.split(key, 10)
    attn_std = width ** -0.5
    proj_std = (width ** -0.5) * ((2 * layers) ** -0.5)
    fc_std = (2 * width) ** -0.5
    bf = jnp.bfloat16

    def nrm(k, shape, std, dtype=jnp.float32):
        return (jax.random.normal(k, shape, jnp.float32) * std).astype(dtype)

    # fused QKV weight, pre-transposed [in, q|k|v]; 1/sqrt(head_dim) folded into the q columns
    wq = jax.random.normal(ks[2], (num_models, layers, width, width), jnp.float32) * attn_std * q_scale
    wk = jax.random.normal(ks[3], (num_models, layers, width, width), jnp.float32) * attn_std
    wv = jax.random.normal(ks[4], (num_models, layers, width, width), jnp.float32) * attn_std
    wqkv = jnp.concatenate([wq, wk, wv], axis=-1).astype(bf)

    return {
        'tok_emb': nrm(ks[0], (num_models, vocab, width), 0.02, bf),     # bf16: halves HBM gather
        'pos_emb': nrm(ks[1], (num_models, ctx, width), 0.01),
        'ln1_g': jnp.ones((num_models, layers, 1, width), jnp.float32),
        'ln1_b': jnp.zeros((num_models, layers, 1, width), jnp.float32),
        'ln2_g': jnp.ones((num_models, layers, 1, width), jnp.float32),
        'ln2_b': jnp.zeros((num_models, layers, 1, width), jnp.float32),
        'wqkv': wqkv,
        'bqkv': jnp.zeros((num_models, layers, 1, 3 * width), jnp.float32),
        'wo': nrm(ks[5], (num_models, layers, width, width), proj_std, bf),
        'bo': jnp.zeros((num_models, layers, 1, width), jnp.float32),
        'wfc': nrm(ks[6], (num_models, layers, width, 4 * width), fc_std, bf),
        'bfc': jnp.zeros((num_models, layers, 1, 4 * width), jnp.float32),
        'wpr': nrm(ks[7], (num_models, layers, 4 * width, width), proj_std, bf),
        'bpr': jnp.zeros((num_models, layers, 1, width), jnp.float32),
        'lnf_g': jnp.ones((num_models, 1, width), jnp.float32),
        'lnf_b': jnp.zeros((num_models, 1, width), jnp.float32),
        # text_projection [W, 1] stored as its row view [1, W] for the in-kernel VPU reduce
        'tproj': nrm(ks[8], (num_models, 1, width), width ** -0.5),
    }


def init_params(key, num_models):
    kt, kv = jax.random.split(key)
    return {
        'text': init_text_params(kt, num_models, VOCAB_SIZE, CONTEXT_LEN, WIDTH, LAYERS, HEADS),
        'vision': init_vision_params(kv, num_models),
        'logit_scale': jnp.float32(np.log(1.0 / 0.07)),
    }


# ------------------------------------------ forward ----------------------------------------------
@jax.jit
def multi_binary_clip_forward(params, image, text):
    # ---- text branch (MultiBinaryText: per-model CLIP encode_text) ----
    tp = params['text']
    B, L = text.shape
    M = tp['tok_emb'].shape[0]

    x = jnp.take(tp['tok_emb'], text, axis=1).astype(jnp.float32)   # [M, B, L, W] token embedding
    x = x + tp['pos_emb'][:, None, :, :]                            # + positional embedding
    x = jnp.pad(x, ((0, 0), (0, 0), (0, LP - L), (0, 0)))           # pad seq 77 -> 80 (sublanes)
    x_flat = x.reshape(M, B * LP, WIDTH)                            # fold batch into matmul rows

    eot = jnp.argmax(text, axis=-1)                                 # EOT token position per sample
    flat_idx = jnp.arange(B) * LP + eot
    flat_onehot = jax.nn.one_hot(flat_idx, B * LP, dtype=jnp.float32)   # [B, B*LP]

    text_out = run_text_transformer(x_flat, tp, flat_onehot, B)     # [M, B, 1]
    text_embed = text_out[:, :, 0].T                                # torch.cat(dim=1) -> [B, M]

    # ---- vision branch (MultiBinaryVision: per-model mobilenet_v3_small(num_classes=1)) ----
    vp = params['vision']
    feats = jax.vmap(mobilenet_backbone, in_axes=(0, None))(vp['backbone'], image)  # [M,B,576,Hf,Wf]
    Mv, Bv, C, Hf, Wf = feats.shape
    feats = feats.reshape(Mv, Bv, C, Hf * Wf).transpose(0, 1, 3, 2)                 # [M, B, S, C]
    vis_out = run_vision_head(feats, vp['w1'], vp['b1'], vp['w2'], vp['b2'])        # [M, B, 1]
    image_embed = vis_out[:, :, 0].T                                # [B, M]

    return {'image_embed': image_embed,
            'text_embed': text_embed,
            'logit_scale': jnp.exp(params['logit_scale'])}


# ------------------------------------------ main --------------------------------------------------
if __name__ == "__main__":
    root = jax.random.PRNGKey(0)
    kp, ki, kt = jax.random.split(root, 3)

    params = init_params(kp, NUM_MODELS)

    batch = 2
    image = jax.random.normal(ki, (batch, 3, 32, 32), jnp.float32)       # NCHW, like PyTorch
    text = jax.random.randint(kt, (batch, CONTEXT_LEN), 0, VOCAB_SIZE, dtype=jnp.int32)

    out = multi_binary_clip_forward(params, image, text)
    jax.block_until_ready(out)

    assert out['image_embed'].shape == (batch, NUM_MODELS)
    assert out['text_embed'].shape == (batch, NUM_MODELS)
    assert out['logit_scale'].shape == ()
    assert np.all(np.isfinite(np.asarray(out['image_embed'])))
    assert np.all(np.isfinite(np.asarray(out['text_embed'])))

    print("KERNEL_OK")
</pallas_src>

<mosaic_0001>
module attributes {stable_mosaic.version = 11 : i64} {
  func.func @vision_head_kernel(%arg0: i32, %arg1: memref<1x2x1x576xf32, #tpu.memory_space<vmem>>, %arg2: memref<1x576x1024xbf16, #tpu.memory_space<vmem>>, %arg3: memref<1x1x1024xf32, #tpu.memory_space<vmem>>, %arg4: memref<1x1x1024xf32, #tpu.memory_space<vmem>>, %arg5: memref<1x1x1xf32, #tpu.memory_space<vmem>>, %arg6: memref<1x2x1xf32, #tpu.memory_space<vmem>>) attributes {dimension_semantics = [#tpu.dimension_semantics<parallel>], iteration_bounds = array<i64: 2>, scalar_prefetch = 0 : i64, scratch_operands = 0 : i64, tpu.core_type = #tpu.core_type<tc>, window_params = [{transform_indices = @transform_0, window_bounds = array<i64: 1, 2, 1, 576>}, {transform_indices = @transform_1, window_bounds = array<i64: 1, 576, 1024>}, {transform_indices = @transform_2, window_bounds = array<i64: 1, 1, 1024>}, {transform_indices = @transform_3, window_bounds = array<i64: 1, 1, 1024>}, {transform_indices = @transform_4, window_bounds = array<i64: 1, 1, 1>}, {transform_indices = @transform_5, window_bounds = array<i64: 1, 2, 1>}]} {
    %c0 = arith.constant 0 : index
    %c0_0 = arith.constant 0 : index
    %c0_1 = arith.constant 0 : index
    %c0_2 = arith.constant 0 : index
    %0 = vector.load %arg1[%c0, %c0_0, %c0_1, %c0_2] : memref<1x2x1x576xf32, #tpu.memory_space<vmem>>, vector<1x2x1x576xf32>
    %1 = vector.shape_cast %0 : vector<1x2x1x576xf32> to vector<2x1x576xf32>
    %cst = arith.constant dense<0.000000e+00> : vector<2x576xf32>
    %2 = vector.multi_reduction <add>, %1, %cst [1] : vector<2x1x576xf32> to vector<2x576xf32>
    %cst_3 = arith.constant 1.000000e+00 : f32
    %3 = vector.broadcast %cst_3 : f32 to vector<2x576xf32>
    %4 = arith.divf %2, %3 : vector<2x576xf32>
    %5 = arith.truncf %4 : vector<2x576xf32> to vector<2x576xbf16>
    %c0_4 = arith.constant 0 : index
    %c0_5 = arith.constant 0 : index
    %c0_6 = arith.constant 0 : index
    %6 = vector.load %arg2[%c0_4, %c0_5, %c0_6] : memref<1x576x1024xbf16, #tpu.memory_space<vmem>>, vector<1x576x1024xbf16>
    %7 = vector.shape_cast %6 : vector<1x576x1024xbf16> to vector<576x1024xbf16>
    %cst_7 = arith.constant dense<0.000000e+00> : vector<2x1024xf32>
    %8 = tpu.matmul %5, %7, %cst_7 {dimension_numbers = #tpu.dot_dimension_numbers<[1], [0], [0], [1], [0, 0, 1, 1], [], []>} : vector<2x576xbf16>, vector<576x1024xbf16>, vector<2x1024xf32> -> vector<2x1024xf32>
    %c0_8 = arith.constant 0 : index
    %c0_9 = arith.constant 0 : index
    %c0_10 = arith.constant 0 : index
    %9 = vector.load %arg3[%c0_8, %c0_9, %c0_10] : memref<1x1x1024xf32, #tpu.memory_space<vmem>>, vector<1x1x1024xf32>
    %10 = vector.shape_cast %9 : vector<1x1x1024xf32> to vector<1x1024xf32>
    %11 = vector.broadcast %10 : vector<1x1024xf32> to vector<2x1024xf32>
    %12 = arith.addf %8, %11 : vector<2x1024xf32>
    %cst_11 = arith.constant 3.000000e+00 : f32
    %13 = vector.broadcast %cst_11 : f32 to vector<2x1024xf32>
    %14 = arith.addf %12, %13 : vector<2x1024xf32>
    %cst_12 = arith.constant 0.000000e+00 : f32
    %cst_13 = arith.constant 6.000000e+00 : f32
    %15 = vector.broadcast %cst_12 : f32 to vector<2x1024xf32>
    %16 = arith.maximumf %15, %14 : vector<2x1024xf32>
    %17 = vector.broadcast %cst_13 : f32 to vector<2x1024xf32>
    %18 = arith.minimumf %17, %16 : vector<2x1024xf32>
    %19 = arith.mulf %12, %18 : vector<2x1024xf32>
    %cst_14 = arith.constant 0.166666672 : f32
    %20 = vector.broadcast %cst_14 : f32 to vector<2x1024xf32>
    %21 = arith.mulf %19, %20 : vector<2x1024xf32>
    %c0_15 = arith.constant 0 : index
    %c0_16 = arith.constant 0 : index
    %c0_17 = arith.constant 0 : index
    %22 = vector.load %arg4[%c0_15, %c0_16, %c0_17] : memref<1x1x1024xf32, #tpu.memory_space<vmem>>, vector<1x1x1024xf32>
    %23 = vector.shape_cast %22 : vector<1x1x1024xf32> to vector<1x1024xf32>
    %24 = vector.broadcast %23 : vector<1x1024xf32> to vector<2x1024xf32>
    %25 = arith.mulf %21, %24 : vector<2x1024xf32>
    %cst_18 = arith.constant dense<0.000000e+00> : vector<2xf32>
    %26 = vector.multi_reduction <add>, %25, %cst_18 [1] : vector<2x1024xf32> to vector<2xf32>
    %27 = vector.shape_cast %26 : vector<2xf32> to vector<2x1xf32>
    %c0_19 = arith.constant 0 : index
    %c0_20 = arith.constant 0 : index
    %c0_21 = arith.constant 0 : index
    %28 = vector.load %arg5[%c0_19, %c0_20, %c0_21] : memref<1x1x1xf32, #tpu.memory_space<vmem>>, vector<1x1x1xf32>
    %29 = vector.shape_cast %28 : vector<1x1x1xf32> to vector<1x1xf32>
    %30 = vector.broadcast %29 : vector<1x1xf32> to vector<2x1xf32>
    %31 = arith.addf %27, %30 : vector<2x1xf32>
    %c0_22 = arith.constant 0 : index
    %c0_23 = arith.constant 0 : index
    %c0_24 = arith.constant 0 : index
    %32 = vector.load %arg6[%c0_22, %c0_23, %c0_24] : memref<1x2x1xf32, #tpu.memory_space<vmem>>, vector<1x2x1xf32>
    %33 = vector.shape_cast %32 : vector<1x2x1xf32> to vector<2x1xf32>
    %34 = vector.shape_cast %31 : vector<2x1xf32> to vector<1x2x1xf32>
    tpu.vector_store %arg6[%c0_22, %c0_23, %c0_24], %34 {strides = array<i32>} : memref<1x2x1xf32, #tpu.memory_space<vmem>>, vector<1x2x1xf32>,
    return
  }
  func.func @transform_0(%arg0: i32) -> (i32, i32, i32, i32) {
    %c0_i32 = arith.constant 0 : i32
    %c0_i32_0 = arith.constant 0 : i32
    %c0_i32_1 = arith.constant 0 : i32
    %c0_i32_2 = arith.constant 0 : i32
    return %arg0, %c0_i32, %c0_i32_0, %c0_i32_1 : i32, i32, i32, i32
  }
  func.func @transform_1(%arg0: i32) -> (i32, i32, i32) {
    %c0_i32 = arith.constant 0 : i32
    %c0_i32_0 = arith.constant 0 : i32
    %c0_i32_1 = arith.constant 0 : i32
    return %arg0, %c0_i32, %c0_i32_0 : i32, i32, i32
  }
  func.func @transform_2(%arg0: i32) -> (i32, i32, i32) {
    %c0_i32 = arith.constant 0 : i32
    %c0_i32_0 = arith.constant 0 : i32
    %c0_i32_1 = arith.constant 0 : i32
    return %arg0, %c0_i32, %c0_i32_0 : i32, i32, i32
  }
  func.func @transform_3(%arg0: i32) -> (i32, i32, i32) {
    %c0_i32 = arith.constant 0 : i32
    %c0_i32_0 = arith.constant 0 : i32
    %c0_i32_1 = arith.constant 0 : i32
    return %arg0, %c0_i32, %c0_i32_0 : i32, i32, i32
  }
  func.func @transform_4(%arg0: i32) -> (i32, i32, i32) {
    %c0_i32 = arith.constant 0 : i32
    %c0_i32_0 = arith.constant 0 : i32
    %c0_i32_1 = arith.constant 0 : i32
    return %arg0, %c0_i32, %c0_i32_0 : i32, i32, i32
  }
  func.func @transform_5(%arg0: i32) -> (i32, i32, i32) {
    %c0_i32 = arith.constant 0 : i32
    %c0_i32_0 = arith.constant 0 : i32
    %c0_i32_1 = arith.constant 0 : i32
    return %arg0, %c0_i32, %c0_i32_0 : i32, i32, i32
  }
}

module attributes {stable_mosaic.version = 11 : i64} {
  func.func @kernel(%arg0: i32, %arg1: memref<1x160x64xf32, #tpu.memory_space<vmem>>, %arg2: memref<1x12x1x64xf32, #tpu.memory_space<vmem>>, %arg3: memref<1x12x1x64xf32, #tpu.memory_space<vmem>>, %arg4: memref<1x12x64x192xbf16, #tpu.memory_space<vmem>>, %arg5: memref<1x12x1x192xf32, #tpu.memory_space<vmem>>, %arg6: memref<1x12x64x64xbf16, #tpu.memory_space<vmem>>, %arg7: memref<1x12x1x64xf32, #tpu.memory_space<vmem>>, %arg8: memref<1x12x1x64xf32, #tpu.memory_space<vmem>>, %arg9: memref<1x12x1x64xf32, #tpu.memory_space<vmem>>, %arg10: memref<1x12x64x256xbf16, #tpu.memory_space<vmem>>, %arg11: memref<1x12x1x256xf32, #tpu.memory_space<vmem>>, %arg12: memref<1x12x256x64xbf16, #tpu.memory_space<vmem>>, %arg13: memref<1x12x1x64xf32, #tpu.memory_space<vmem>>, %arg14: memref<1x1x64xf32, #tpu.memory_space<vmem>>, %arg15: memref<1x1x64xf32, #tpu.memory_space<vmem>>, %arg16: memref<2x160xf32, #tpu.memory_space<vmem>>, %arg17: memref<1x1x64xf32, #tpu.memory_space<vmem>>, %arg18: memref<1x2x1xf32, #tpu.memory_space<vmem>>) attributes {dimension_semantics = [#tpu.dimension_semantics<parallel>], iteration_bounds = array<i64: 2>, scalar_prefetch = 0 : i64, scratch_operands = 0 : i64, tpu.core_type = #tpu.core_type<tc>, window_params = [{transform_indices = @transform_0, window_bounds = array<i64: 1, 160, 64>}, {transform_indices = @transform_1, window_bounds = array<i64: 1, 12, 1, 64>}, {transform_indices = @transform_2, window_bounds = array<i64: 1, 12, 1, 64>}, {transform_indices = @transform_3, window_bounds = array<i64: 1, 12, 64, 192>}, {transform_indices = @transform_4, window_bounds = array<i64: 1, 12, 1, 192>}, {transform_indices = @transform_5, window_bounds = array<i64: 1, 12, 64, 64>}, {transform_indices = @transform_6, window_bounds = array<i64: 1, 12, 1, 64>}, {transform_indices = @transform_7, window_bounds = array<i64: 1, 12, 1, 64>}, {transform_indices = @transform_8, window_bounds = array<i64: 1, 12, 1, 64>}, {transform_indices = @transform_9, window_bounds = array<i64: 1, 12, 64, 256>}, {transform_indices = @transform_10, window_bounds = array<i64: 1, 12, 1, 256>}, {transform_indices = @transform_11, window_bounds = array<i64: 1, 12, 256, 64>}, {transform_indices = @transform_12, window_bounds = array<i64: 1, 12, 1, 64>}, {transform_indices = @transform_13, window_bounds = array<i64: 1, 1, 64>}, {transform_indices = @transform_14, window_bounds = array<i64: 1, 1, 64>}, {pipeline_mode = #tpu.pipeline_mode<synchronous>, transform_indices = @transform_15, window_bounds = array<i64: 2, 160>}, {transform_indices = @transform_16, window_bounds = array<i64: 1, 1, 64>}, {transform_indices = @transform_17, window_bounds = array<i64: 1, 2, 1>}]} {
    %0 = tpu.iota {dimensions = array<i32: 0>} : vector<80x80xi32>
    %1 = tpu.iota {dimensions = array<i32: 1>} : vector<80x80xi32>
    %2 = arith.cmpi sgt, %1, %0 : vector<80x80xi32>
    %cst = arith.constant -1.000000e+30 : f32
    %cst_0 = arith.constant 0.000000e+00 : f32
    %3 = vector.broadcast %cst : f32 to vector<80x80xf32>
    %4 = vector.broadcast %cst_0 : f32 to vector<80x80xf32>
    %5 = arith.select %2, %3, %4 : vector<80x80xi1>, vector<80x80xf32>
    %c0 = arith.constant 0 : index
    %c0_1 = arith.constant 0 : index
    %c0_2 = arith.constant 0 : index
    %6 = vector.load %arg1[%c0, %c0_1, %c0_2] : memref<1x160x64xf32, #tpu.memory_space<vmem>>, vector<1x160x64xf32>
    %7 = vector.shape_cast %6 : vector<1x160x64xf32> to vector<160x64xf32>
    %c0_i32 = arith.constant 0 : i32
    %c12_i32 = arith.constant 12 : i32
    %8 = arith.addi %c0_i32, %c12_i32 : i32
    %c1_i32 = arith.constant 1 : i32
    %9 = scf.for %arg19 = %c0_i32 to %8 step %c1_i32 iter_args(%arg20 = %7) -> (vector<160x64xf32>)  : i32 {
      %c0_25 = arith.constant 0 : index
      %47 = arith.index_cast %arg19 : i32 to index
      %c0_26 = arith.constant 0 : index
      %c0_27 = arith.constant 0 : index
      %48 = vector.load %arg2[%c0_25, %47, %c0_26, %c0_27] : memref<1x12x1x64xf32, #tpu.memory_space<vmem>>, vector<1x1x1x64xf32>
      %49 = vector.shape_cast %48 : vector<1x1x1x64xf32> to vector<1x64xf32>
      %c0_28 = arith.constant 0 : index
      %50 = arith.index_cast %arg19 : i32 to index
      %c0_29 = arith.constant 0 : index
      %c0_30 = arith.constant 0 : index
      %51 = vector.load %arg3[%c0_28, %50, %c0_29, %c0_30] : memref<1x12x1x64xf32, #tpu.memory_space<vmem>>, vector<1x1x1x64xf32>
      %52 = vector.shape_cast %51 : vector<1x1x1x64xf32> to vector<1x64xf32>
      %cst_31 = arith.constant dense<0.000000e+00> : vector<160xf32>
      %53 = vector.multi_reduction <add>, %arg20, %cst_31 [1] : vector<160x64xf32> to vector<160xf32>
      %54 = vector.shape_cast %53 : vector<160xf32> to vector<160x1xf32>
      %cst_32 = arith.constant 6.400000e+01 : f32
      %55 = vector.broadcast %cst_32 : f32 to vector<160x1xf32>
      %56 = arith.divf %54, %55 : vector<160x1xf32>
      %57 = vector.broadcast %56 : vector<160x1xf32> to vector<160x64xf32>
      %58 = arith.subf %arg20, %57 : vector<160x64xf32>
      %59 = arith.mulf %58, %58 : vector<160x64xf32>
      %cst_33 = arith.constant dense<0.000000e+00> : vector<160xf32>
      %60 = vector.multi_reduction <add>, %59, %cst_33 [1] : vector<160x64xf32> to vector<160xf32>
      %61 = vector.shape_cast %60 : vector<160xf32> to vector<160x1xf32>
      %cst_34 = arith.constant 6.400000e+01 : f32
      %62 = vector.broadcast %cst_34 : f32 to vector<160x1xf32>
      %63 = arith.divf %61, %62 : vector<160x1xf32>
      %64 = vector.broadcast %56 : vector<160x1xf32> to vector<160x64xf32>
      %65 = arith.subf %arg20, %64 : vector<160x64xf32>
      %cst_35 = arith.constant 9.99999974E-6 : f32
      %66 = vector.broadcast %cst_35 : f32 to vector<160x1xf32>
      %67 = arith.addf %63, %66 : vector<160x1xf32>
      %68 = math.rsqrt %67 : vector<160x1xf32>
      %69 = vector.broadcast %68 : vector<160x1xf32> to vector<160x64xf32>
      %70 = arith.mulf %65, %69 : vector<160x64xf32>
      %71 = vector.broadcast %49 : vector<1x64xf32> to vector<160x64xf32>
      %72 = arith.mulf %70, %71 : vector<160x64xf32>
      %73 = vector.broadcast %52 : vector<1x64xf32> to vector<160x64xf32>
      %74 = arith.addf %72, %73 : vector<160x64xf32>
      %75 = arith.truncf %74 : vector<160x64xf32> to vector<160x64xbf16>
      %c0_36 = arith.constant 0 : index
      %76 = arith.index_cast %arg19 : i32 to index
      %c0_37 = arith.constant 0 : index
      %c0_38 = arith.constant 0 : index
      %77 = vector.load %arg4[%c0_36, %76, %c0_37, %c0_38] : memref<1x12x64x192xbf16, #tpu.memory_space<vmem>>, vector<1x1x64x192xbf16>
      %78 = vector.shape_cast %77 : vector<1x1x64x192xbf16> to vector<64x192xbf16>
      %cst_39 = arith.constant dense<0.000000e+00> : vector<160x192xf32>
      %79 = tpu.matmul %75, %78, %cst_39 {dimension_numbers = #tpu.dot_dimension_numbers<[1], [0], [0], [1], [0, 0, 1, 1], [], []>} : vector<160x64xbf16>, vector<64x192xbf16>, vector<160x192xf32> -> vector<160x192xf32>
      %c0_40 = arith.constant 0 : index
      %80 = arith.index_cast %arg19 : i32 to index
      %c0_41 = arith.constant 0 : index
      %c0_42 = arith.constant 0 : index
      %81 = vector.load %arg5[%c0_40, %80, %c0_41, %c0_42] : memref<1x12x1x192xf32, #tpu.memory_space<vmem>>, vector<1x1x1x192xf32>
      %82 = vector.shape_cast %81 : vector<1x1x1x192xf32> to vector<1x192xf32>
      %83 = vector.broadcast %82 : vector<1x192xf32> to vector<160x192xf32>
      %84 = arith.addf %79, %83 : vector<160x192xf32>
      %85 = vector.extract_strided_slice %84 {offsets = [0, 0], sizes = [80, 192], strides = [1, 1]} : vector<160x192xf32> to vector<80x192xf32>
      %86 = vector.extract_strided_slice %85 {offsets = [0, 0], sizes = [80, 16], strides = [1, 1]} : vector<80x192xf32> to vector<80x16xf32>
      %87 = arith.truncf %86 : vector<80x16xf32> to vector<80x16xbf16>
      %88 = vector.extract_strided_slice %85 {offsets = [0, 64], sizes = [80, 16], strides = [1, 1]} : vector<80x192xf32> to vector<80x16xf32>
      %89 = arith.truncf %88 : vector<80x16xf32> to vector<80x16xbf16>
      %90 = vector.extract_strided_slice %85 {offsets = [0, 128], sizes = [80, 16], strides = [1, 1]} : vector<80x192xf32> to vector<80x16xf32>
      %91 = arith.truncf %90 : vector<80x16xf32> to vector<80x16xbf16>
      %cst_43 = arith.constant dense<0.000000e+00> : vector<80x80xf32>
      %92 = tpu.matmul %87, %89, %cst_43 {dimension_numbers = #tpu.dot_dimension_numbers<[1], [1], [0], [0], [0, 0, 1, 0], [], []>} : vector<80x16xbf16>, vector<80x16xbf16>, vector<80x80xf32> -> vector<80x80xf32>
      %93 = arith.addf %92, %5 : vector<80x80xf32>
      %cst_44 = arith.constant dense<0xFF800000> : vector<80xf32>
      %94 = vector.multi_reduction <maximumf>, %93, %cst_44 [1] : vector<80x80xf32> to vector<80xf32>
      %95 = vector.shape_cast %94 : vector<80xf32> to vector<80x1xf32>
      %96 = vector.broadcast %95 : vector<80x1xf32> to vector<80x80xf32>
      %97 = arith.subf %93, %96 : vector<80x80xf32>
      %98 = math.exp %97 : vector<80x80xf32>
      %cst_45 = arith.constant dense<0.000000e+00> : vector<80xf32>
      %99 = vector.multi_reduction <add>, %98, %cst_45 [1] : vector<80x80xf32> to vector<80xf32>
      %100 = vector.shape_cast %99 : vector<80xf32> to vector<80x1xf32>
      %101 = tpu.reciprocal %100 {approx = true} : vector<80x1xf32> -> vector<80x1xf32>
      %102 = vector.broadcast %101 : vector<80x1xf32> to vector<80x80xf32>
      %103 = arith.mulf %98, %102 : vector<80x80xf32>
      %104 = arith.truncf %103 : vector<80x80xf32> to vector<80x80xbf16>
      %cst_46 = arith.constant dense<0.000000e+00> : vector<80x16xf32>
      %105 = tpu.matmul %104, %91, %cst_46 {dimension_numbers = #tpu.dot_dimension_numbers<[1], [0], [0], [1], [0, 0, 1, 1], [], []>} : vector<80x80xbf16>, vector<80x16xbf16>, vector<80x16xf32> -> vector<80x16xf32>
      %106 = vector.extract_strided_slice %85 {offsets = [0, 16], sizes = [80, 16], strides = [1, 1]} : vector<80x192xf32> to vector<80x16xf32>
      %107 = arith.truncf %106 : vector<80x16xf32> to vector<80x16xbf16>
      %108 = vector.extract_strided_slice %85 {offsets = [0, 80], sizes = [80, 16], strides = [1, 1]} : vector<80x192xf32> to vector<80x16xf32>
      %109 = arith.truncf %108 : vector<80x16xf32> to vector<80x16xbf16>
      %110 = vector.extract_strided_slice %85 {offsets = [0, 144], sizes = [80, 16], strides = [1, 1]} : vector<80x192xf32> to vector<80x16xf32>
      %111 = arith.truncf %110 : vector<80x16xf32> to vector<80x16xbf16>
      %cst_47 = arith.constant dense<0.000000e+00> : vector<80x80xf32>
      %112 = tpu.matmul %107, %109, %cst_47 {dimension_numbers = #tpu.dot_dimension_numbers<[1], [1], [0], [0], [0, 0, 1, 0], [], []>} : vector<80x16xbf16>, vector<80x16xbf16>, vector<80x80xf32> -> vector<80x80xf32>
      %113 = arith.addf %112, %5 : vector<80x80xf32>
      %cst_48 = arith.constant dense<0xFF800000> : vector<80xf32>
      %114 = vector.multi_reduction <maximumf>, %113, %cst_48 [1] : vector<80x80xf32> to vector<80xf32>
      %115 = vector.shape_cast %114 : vector<80xf32> to vector<80x1xf32>
      %116 = vector.broadcast %115 : vector<80x1xf32> to vector<80x80xf32>
      %117 = arith.subf %113, %116 : vector<80x80xf32>
      %118 = math.exp %117 : vector<80x80xf32>
      %cst_49 = arith.constant dense<0.000000e+00> : vector<80xf32>
      %119 = vector.multi_reduction <add>, %118, %cst_49 [1] : vector<80x80xf32> to vector<80xf32>
      %120 = vector.shape_cast %119 : vector<80xf32> to vector<80x1xf32>
      %121 = tpu.reciprocal %120 {approx = true} : vector<80x1xf32> -> vector<80x1xf32>
      %122 = vector.broadcast %121 : vector<80x1xf32> to vector<80x80xf32>
      %123 = arith.mulf %118, %122 : vector<80x80xf32>
      %124 = arith.truncf %123 : vector<80x80xf32> to vector<80x80xbf16>
      %cst_50 = arith.constant dense<0.000000e+00> : vector<80x16xf32>
      %125 = tpu.matmul %124, %111, %cst_50 {dimension_numbers = #tpu.dot_dimension_numbers<[1], [0], [0], [1], [0, 0, 1, 1], [], []>} : vector<80x80xbf16>, vector<80x16xbf16>, vector<80x16xf32> -> vector<80x16xf32>
      %126 = vector.extract_strided_slice %85 {offsets = [0, 32], sizes = [80, 16], strides = [1, 1]} : vector<80x192xf32> to vector<80x16xf32>
      %127 = arith.truncf %126 : vector<80x16xf32> to vector<80x16xbf16>
      %128 = vector.extract_strided_slice %85 {offsets = [0, 96], sizes = [80, 16], strides = [1, 1]} : vector<80x192xf32> to vector<80x16xf32>
      %129 = arith.truncf %128 : vector<80x16xf32> to vector<80x16xbf16>
      %130 = vector.extract_strided_slice %85 {offsets = [0, 160], sizes = [80, 16], strides = [1, 1]} : vector<80x192xf32> to vector<80x16xf32>
      %131 = arith.truncf %130 : vector<80x16xf32> to vector<80x16xbf16>
      %cst_51 = arith.constant dense<0.000000e+00> : vector<80x80xf32>
      %132 = tpu.matmul %127, %129, %cst_51 {dimension_numbers = #tpu.dot_dimension_numbers<[1], [1], [0], [0], [0, 0, 1, 0], [], []>} : vector<80x16xbf16>, vector<80x16xbf16>, vector<80x80xf32> -> vector<80x80xf32>
      %133 = arith.addf %132, %5 : vector<80x80xf32>
      %cst_52 = arith.constant dense<0xFF800000> : vector<80xf32>
      %134 = vector.multi_reduction <maximumf>, %133, %cst_52 [1] : vector<80x80xf32> to vector<80xf32>
      %135 = vector.shape_cast %134 : vector<80xf32> to vector<80x1xf32>
      %136 = vector.broadcast %135 : vector<80x1xf32> to vector<80x80xf32>
      %137 = arith.subf %133, %136 : vector<80x80xf32>
      %138 = math.exp %137 : vector<80x80xf32>
      %cst_53 = arith.constant dense<0.000000e+00> : vector<80xf32>
      %139 = vector.multi_reduction <add>, %138, %cst_53 [1] : vector<80x80xf32> to vector<80xf32>
      %140 = vector.shape_cast %139 : vector<80xf32> to vector<80x1xf32>
      %141 = tpu.reciprocal %140 {approx = true} : vector<80x1xf32> -> vector<80x1xf32>
      %142 = vector.broadcast %141 : vector<80x1xf32> to vector<80x80xf32>
      %143 = arith.mulf %138, %142 : vector<80x80xf32>
      %144 = arith.truncf %143 : vector<80x80xf32> to vector<80x80xbf16>
      %cst_54 = arith.constant dense<0.000000e+00> : vector<80x16xf32>
      %145 = tpu.matmul %144, %131, %cst_54 {dimension_numbers = #tpu.dot_dimension_numbers<[1], [0], [0], [1], [0, 0, 1, 1], [], []>} : vector<80x80xbf16>, vector<80x16xbf16>, vector<80x16xf32> -> vector<80x16xf32>
      %146 = vector.extract_strided_slice %85 {offsets = [0, 48], sizes = [80, 16], strides = [1, 1]} : vector<80x192xf32> to vector<80x16xf32>
      %147 = arith.truncf %146 : vector<80x16xf32> to vector<80x16xbf16>
      %148 = vector.extract_strided_slice %85 {offsets = [0, 112], sizes = [80, 16], strides = [1, 1]} : vector<80x192xf32> to vector<80x16xf32>
      %149 = arith.truncf %148 : vector<80x16xf32> to vector<80x16xbf16>
      %150 = vector.extract_strided_slice %85 {offsets = [0, 176], sizes = [80, 16], strides = [1, 1]} : vector<80x192xf32> to vector<80x16xf32>
      %151 = arith.truncf %150 : vector<80x16xf32> to vector<80x16xbf16>
      %cst_55 = arith.constant dense<0.000000e+00> : vector<80x80xf32>
      %152 = tpu.matmul %147, %149, %cst_55 {dimension_numbers = #tpu.dot_dimension_numbers<[1], [1], [0], [0], [0, 0, 1, 0], [], []>} : vector<80x16xbf16>, vector<80x16xbf16>, vector<80x80xf32> -> vector<80x80xf32>
      %153 = arith.addf %152, %5 : vector<80x80xf32>
      %cst_56 = arith.constant dense<0xFF800000> : vector<80xf32>
      %154 = vector.multi_reduction <maximumf>, %153, %cst_56 [1] : vector<80x80xf32> to vector<80xf32>
      %155 = vector.shape_cast %154 : vector<80xf32> to vector<80x1xf32>
      %156 = vector.broadcast %155 : vector<80x1xf32> to vector<80x80xf32>
      %157 = arith.subf %153, %156 : vector<80x80xf32>
      %158 = math.exp %157 : vector<80x80xf32>
      %cst_57 = arith.constant dense<0.000000e+00> : vector<80xf32>
      %159 = vector.multi_reduction <add>, %158, %cst_57 [1] : vector<80x80xf32> to vector<80xf32>
      %160 = vector.shape_cast %159 : vector<80xf32> to vector<80x1xf32>
      %161 = tpu.reciprocal %160 {approx = true} : vector<80x1xf32> -> vector<80x1xf32>
      %162 = vector.broadcast %161 : vector<80x1xf32> to vector<80x80xf32>
      %163 = arith.mulf %158, %162 : vector<80x80xf32>
      %164 = arith.truncf %163 : vector<80x80xf32> to vector<80x80xbf16>
      %cst_58 = arith.constant dense<0.000000e+00> : vector<80x16xf32>
      %165 = tpu.matmul %164, %151, %cst_58 {dimension_numbers = #tpu.dot_dimension_numbers<[1], [0], [0], [1], [0, 0, 1, 1], [], []>} : vector<80x80xbf16>, vector<80x16xbf16>, vector<80x16xf32> -> vector<80x16xf32>
      %166 = tpu.concatenate %105, %125, %145, %165 in 1 : vector<80x16xf32>, vector<80x16xf32>, vector<80x16xf32>, vector<80x16xf32> -> vector<80x64xf32>
      %167 = vector.extract_strided_slice %84 {offsets = [80, 0], sizes = [80, 192], strides = [1, 1]} : vector<160x192xf32> to vector<80x192xf32>
      %168 = vector.extract_strided_slice %167 {offsets = [0, 0], sizes = [80, 16], strides = [1, 1]} : vector<80x192xf32> to vector<80x16xf32>
      %169 = arith.truncf %168 : vector<80x16xf32> to vector<80x16xbf16>
      %170 = vector.extract_strided_slice %167 {offsets = [0, 64], sizes = [80, 16], strides = [1, 1]} : vector<80x192xf32> to vector<80x16xf32>
      %171 = arith.truncf %170 : vector<80x16xf32> to vector<80x16xbf16>
      %172 = vector.extract_strided_slice %167 {offsets = [0, 128], sizes = [80, 16], strides = [1, 1]} : vector<80x192xf32> to vector<80x16xf32>
      %173 = arith.truncf %172 : vector<80x16xf32> to vector<80x16xbf16>
      %cst_59 = arith.constant dense<0.000000e+00> : vector<80x80xf32>
      %174 = tpu.matmul %169, %171, %cst_59 {dimension_numbers = #tpu.dot_dimension_numbers<[1], [1], [0], [0], [0, 0, 1, 0], [], []>} : vector<80x16xbf16>, vector<80x16xbf16>, vector<80x80xf32> -> vector<80x80xf32>
      %175 = arith.addf %174, %5 : vector<80x80xf32>
      %cst_60 = arith.constant dense<0xFF800000> : vector<80xf32>
      %176 = vector.multi_reduction <maximumf>, %175, %cst_60 [1] : vector<80x80xf32> to vector<80xf32>
      %177 = vector.shape_cast %176 : vector<80xf32> to vector<80x1xf32>
      %178 = vector.broadcast %177 : vector<80x1xf32> to vector<80x80xf32>
      %179 = arith.subf %175, %178 : vector<80x80xf32>
      %180 = math.exp %179 : vector<80x80xf32>
      %cst_61 = arith.constant dense<0.000000e+00> : vector<80xf32>
      %181 = vector.multi_reduction <add>, %180, %cst_61 [1] : vector<80x80xf32> to vector<80xf32>
      %182 = vector.shape_cast %181 : vector<80xf32> to vector<80x1xf32>
      %183 = tpu.reciprocal %182 {approx = true} : vector<80x1xf32> -> vector<80x1xf32>
      %184 = vector.broadcast %183 : vector<80x1xf32> to vector<80x80xf32>
      %185 = arith.mulf %180, %184 : vector<80x80xf32>
      %186 = arith.truncf %185 : vector<80x80xf32> to vector<80x80xbf16>
      %cst_62 = arith.constant dense<0.000000e+00> : vector<80x16xf32>
      %187 = tpu.matmul %186, %173, %cst_62 {dimension_numbers = #tpu.dot_dimension_numbers<[1], [0], [0], [1], [0, 0, 1, 1], [], []>} : vector<80x80xbf16>, vector<80x16xbf16>, vector<80x16xf32> -> vector<80x16xf32>
      %188 = vector.extract_strided_slice %167 {offsets = [0, 16], sizes = [80, 16], strides = [1, 1]} : vector<80x192xf32> to vector<80x16xf32>
      %189 = arith.truncf %188 : vector<80x16xf32> to vector<80x16xbf16>
      %190 = vector.extract_strided_slice %167 {offsets = [0, 80], sizes = [80, 16], strides = [1, 1]} : vector<80x192xf32> to vector<80x16xf32>
      %191 = arith.truncf %190 : vector<80x16xf32> to vector<80x16xbf16>
      %192 = vector.extract_strided_slice %167 {offsets = [0, 144], sizes = [80, 16], strides = [1, 1]} : vector<80x192xf32> to vector<80x16xf32>
      %193 = arith.truncf %192 : vector<80x16xf32> to vector<80x16xbf16>
      %cst_63 = arith.constant dense<0.000000e+00> : vector<80x80xf32>
      %194 = tpu.matmul %189, %191, %cst_63 {dimension_numbers = #tpu.dot_dimension_numbers<[1], [1], [0], [0], [0, 0, 1, 0], [], []>} : vector<80x16xbf16>, vector<80x16xbf16>, vector<80x80xf32> -> vector<80x80xf32>
      %195 = arith.addf %194, %5 : vector<80x80xf32>
      %cst_64 = arith.constant dense<0xFF800000> : vector<80xf32>
      %196 = vector.multi_reduction <maximumf>, %195, %cst_64 [1] : vector<80x80xf32> to vector<80xf32>
      %197 = vector.shape_cast %196 : vector<80xf32> to vector<80x1xf32>
      %198 = vector.broadcast %197 : vector<80x1xf32> to vector<80x80xf32>
      %199 = arith.subf %195, %198 : vector<80x80xf32>
      %200 = math.exp %199 : vector<80x80xf32>
      %cst_65 = arith.constant dense<0.000000e+00> : vector<80xf32>
      %201 = vector.multi_reduction <add>, %200, %cst_65 [1] : vector<80x80xf32> to vector<80xf32>
      %202 = vector.shape_cast %201 : vector<80xf32> to vector<80x1xf32>
      %203 = tpu.reciprocal %202 {approx = true} : vector<80x1xf32> -> vector<80x1xf32>
      %204 = vector.broadcast %203 : vector<80x1xf32> to vector<80x80xf32>
      %205 = arith.mulf %200, %204 : vector<80x80xf32>
      %206 = arith.truncf %205 : vector<80x80xf32> to vector<80x80xbf16>
      %cst_66 = arith.constant dense<0.000000e+00> : vector<80x16xf32>
      %207 = tpu.matmul %206, %193, %cst_66 {dimension_numbers = #tpu.dot_dimension_numbers<[1], [0], [0], [1], [0, 0, 1, 1], [], []>} : vector<80x80xbf16>, vector<80x16xbf16>, vector<80x16xf32> -> vector<80x16xf32>
      %208 = vector.extract_strided_slice %167 {offsets = [0, 32], sizes = [80, 16], strides = [1, 1]} : vector<80x192xf32> to vector<80x16xf32>
      %209 = arith.truncf %208 : vector<80x16xf32> to vector<80x16xbf16>
      %210 = vector.extract_strided_slice %167 {offsets = [0, 96], sizes = [80, 16], strides = [1, 1]} : vector<80x192xf32> to vector<80x16xf32>
      %211 = arith.truncf %210 : vector<80x16xf32> to vector<80x16xbf16>
      %212 = vector.extract_strided_slice %167 {offsets = [0, 160], sizes = [80, 16], strides = [1, 1]} : vector<80x192xf32> to vector<80x16xf32>
      %213 = arith.truncf %212 : vector<80x16xf32> to vector<80x16xbf16>
      %cst_67 = arith.constant dense<0.000000e+00> : vector<80x80xf32>
      %214 = tpu.matmul %209, %211, %cst_67 {dimension_numbers = #tpu.dot_dimension_numbers<[1], [1], [0], [0], [0, 0, 1, 0], [], []>} : vector<80x16xbf16>, vector<80x16xbf16>, vector<80x80xf32> -> vector<80x80xf32>
      %215 = arith.addf %214, %5 : vector<80x80xf32>
      %cst_68 = arith.constant dense<0xFF800000> : vector<80xf32>
      %216 = vector.multi_reduction <maximumf>, %215, %cst_68 [1] : vector<80x80xf32> to vector<80xf32>
      %217 = vector.shape_cast %216 : vector<80xf32> to vector<80x1xf32>
      %218 = vector.broadcast %217 : vector<80x1xf32> to vector<80x80xf32>
      %219 = arith.subf %215, %218 : vector<80x80xf32>
      %220 = math.exp %219 : vector<80x80xf32>
      %cst_69 = arith.constant dense<0.000000e+00> : vector<80xf32>
      %221 = vector.multi_reduction <add>, %220, %cst_69 [1] : vector<80x80xf32> to vector<80xf32>
      %222 = vector.shape_cast %221 : vector<80xf32> to vector<80x1xf32>
      %223 = tpu.reciprocal %222 {approx = true} : vector<80x1xf32> -> vector<80x1xf32>
      %224 = vector.broadcast %223 : vector<80x1xf32> to vector<80x80xf32>
      %225 = arith.mulf %220, %224 : vector<80x80xf32>
      %226 = arith.truncf %225 : vector<80x80xf32> to vector<80x80xbf16>
      %cst_70 = arith.constant dense<0.000000e+00> : vector<80x16xf32>
      %227 = tpu.matmul %226, %213, %cst_70 {dimension_numbers = #tpu.dot_dimension_numbers<[1], [0], [0], [1], [0, 0, 1, 1], [], []>} : vector<80x80xbf16>, vector<80x16xbf16>, vector<80x16xf32> -> vector<80x16xf32>
      %228 = vector.extract_strided_slice %167 {offsets = [0, 48], sizes = [80, 16], strides = [1, 1]} : vector<80x192xf32> to vector<80x16xf32>
      %229 = arith.truncf %228 : vector<80x16xf32> to vector<80x16xbf16>
      %230 = vector.extract_strided_slice %167 {offsets = [0, 112], sizes = [80, 16], strides = [1, 1]} : vector<80x192xf32> to vector<80x16xf32>
      %231 = arith.truncf %230 : vector<80x16xf32> to vector<80x16xbf16>
      %232 = vector.extract_strided_slice %167 {offsets = [0, 176], sizes = [80, 16], strides = [1, 1]} : vector<80x192xf32> to vector<80x16xf32>
      %233 = arith.truncf %232 : vector<80x16xf32> to vector<80x16xbf16>
      %cst_71 = arith.constant dense<0.000000e+00> : vector<80x80xf32>
      %234 = tpu.matmul %229, %231, %cst_71 {dimension_numbers = #tpu.dot_dimension_numbers<[1], [1], [0], [0], [0, 0, 1, 0], [], []>} : vector<80x16xbf16>, vector<80x16xbf16>, vector<80x80xf32> -> vector<80x80xf32>
      %235 = arith.addf %234, %5 : vector<80x80xf32>
      %cst_72 = arith.constant dense<0xFF800000> : vector<80xf32>
      %236 = vector.multi_reduction <maximumf>, %235, %cst_72 [1] : vector<80x80xf32> to vector<80xf32>
      %237 = vector.shape_cast %236 : vector<80xf32> to vector<80x1xf32>
      %238 = vector.broadcast %237 : vector<80x1xf32> to vector<80x80xf32>
      %239 = arith.subf %235, %238 : vector<80x80xf32>
      %240 = math.exp %239 : vector<80x80xf32>
      %cst_73 = arith.constant dense<0.000000e+00> : vector<80xf32>
      %241 = vector.multi_reduction <add>, %240, %cst_73 [1] : vector<80x80xf32> to vector<80xf32>
      %242 = vector.shape_cast %241 : vector<80xf32> to vector<80x1xf32>
      %243 = tpu.reciprocal %242 {approx = true} : vector<80x1xf32> -> vector<80x1xf32>
      %244 = vector.broadcast %243 : vector<80x1xf32> to vector<80x80xf32>
      %245 = arith.mulf %240, %244 : vector<80x80xf32>
      %246 = arith.truncf %245 : vector<80x80xf32> to vector<80x80xbf16>
      %cst_74 = arith.constant dense<0.000000e+00> : vector<80x16xf32>
      %247 = tpu.matmul %246, %233, %cst_74 {dimension_numbers = #tpu.dot_dimension_numbers<[1], [0], [0], [1], [0, 0, 1, 1], [], []>} : vector<80x80xbf16>, vector<80x16xbf16>, vector<80x16xf32> -> vector<80x16xf32>
      %248 = tpu.concatenate %187, %207, %227, %247 in 1 : vector<80x16xf32>, vector<80x16xf32>, vector<80x16xf32>, vector<80x16xf32> -> vector<80x64xf32>
      %249 = tpu.concatenate %166, %248 in 0 : vector<80x64xf32>, vector<80x64xf32> -> vector<160x64xf32>
      %250 = arith.truncf %249 : vector<160x64xf32> to vector<160x64xbf16>
      %c0_75 = arith.constant 0 : index
      %251 = arith.index_cast %arg19 : i32 to index
      %c0_76 = arith.constant 0 : index
      %c0_77 = arith.constant 0 : index
      %252 = vector.load %arg6[%c0_75, %251, %c0_76, %c0_77] : memref<1x12x64x64xbf16, #tpu.memory_space<vmem>>, vector<1x1x64x64xbf16>
      %253 = vector.shape_cast %252 : vector<1x1x64x64xbf16> to vector<64x64xbf16>
      %cst_78 = arith.constant dense<0.000000e+00> : vector<160x64xf32>
      %254 = tpu.matmul %250, %253, %cst_78 {dimension_numbers = #tpu.dot_dimension_numbers<[1], [0], [0], [1], [0, 0, 1, 1], [], []>} : vector<160x64xbf16>, vector<64x64xbf16>, vector<160x64xf32> -> vector<160x64xf32>
      %c0_79 = arith.constant 0 : index
      %255 = arith.index_cast %arg19 : i32 to index
      %c0_80 = arith.constant 0 : index
      %c0_81 = arith.constant 0 : index
      %256 = vector.load %arg7[%c0_79, %255, %c0_80, %c0_81] : memref<1x12x1x64xf32, #tpu.memory_space<vmem>>, vector<1x1x1x64xf32>
      %257 = vector.shape_cast %256 : vector<1x1x1x64xf32> to vector<1x64xf32>
      %258 = vector.broadcast %257 : vector<1x64xf32> to vector<160x64xf32>
      %259 = arith.addf %254, %258 : vector<160x64xf32>
      %260 = arith.addf %arg20, %259 : vector<160x64xf32>
      %c0_82 = arith.constant 0 : index
      %261 = arith.index_cast %arg19 : i32 to index
      %c0_83 = arith.constant 0 : index
      %c0_84 = arith.constant 0 : index
      %262 = vector.load %arg8[%c0_82, %261, %c0_83, %c0_84] : memref<1x12x1x64xf32, #tpu.memory_space<vmem>>, vector<1x1x1x64xf32>
      %263 = vector.shape_cast %262 : vector<1x1x1x64xf32> to vector<1x64xf32>
      %c0_85 = arith.constant 0 : index
      %264 = arith.index_cast %arg19 : i32 to index
      %c0_86 = arith.constant 0 : index
      %c0_87 = arith.constant 0 : index
      %265 = vector.load %arg9[%c0_85, %264, %c0_86, %c0_87] : memref<1x12x1x64xf32, #tpu.memory_space<vmem>>, vector<1x1x1x64xf32>
      %266 = vector.shape_cast %265 : vector<1x1x1x64xf32> to vector<1x64xf32>
      %cst_88 = arith.constant dense<0.000000e+00> : vector<160xf32>
      %267 = vector.multi_reduction <add>, %260, %cst_88 [1] : vector<160x64xf32> to vector<160xf32>
      %268 = vector.shape_cast %267 : vector<160xf32> to vector<160x1xf32>
      %cst_89 = arith.constant 6.400000e+01 : f32
      %269 = vector.broadcast %cst_89 : f32 to vector<160x1xf32>
      %270 = arith.divf %268, %269 : vector<160x1xf32>
      %271 = vector.broadcast %270 : vector<160x1xf32> to vector<160x64xf32>
      %272 = arith.subf %260, %271 : vector<160x64xf32>
      %273 = arith.mulf %272, %272 : vector<160x64xf32>
      %cst_90 = arith.constant dense<0.000000e+00> : vector<160xf32>
      %274 = vector.multi_reduction <add>, %273, %cst_90 [1] : vector<160x64xf32> to vector<160xf32>
      %275 = vector.shape_cast %274 : vector<160xf32> to vector<160x1xf32>
      %cst_91 = arith.constant 6.400000e+01 : f32
      %276 = vector.broadcast %cst_91 : f32 to vector<160x1xf32>
      %277 = arith.divf %275, %276 : vector<160x1xf32>
      %278 = vector.broadcast %270 : vector<160x1xf32> to vector<160x64xf32>
      %279 = arith.subf %260, %278 : vector<160x64xf32>
      %cst_92 = arith.constant 9.99999974E-6 : f32
      %280 = vector.broadcast %cst_92 : f32 to vector<160x1xf32>
      %281 = arith.addf %277, %280 : vector<160x1xf32>
      %282 = math.rsqrt %281 : vector<160x1xf32>
      %283 = vector.broadcast %282 : vector<160x1xf32> to vector<160x64xf32>
      %284 = arith.mulf %279, %283 : vector<160x64xf32>
      %285 = vector.broadcast %263 : vector<1x64xf32> to vector<160x64xf32>
      %286 = arith.mulf %284, %285 : vector<160x64xf32>
      %287 = vector.broadcast %266 : vector<1x64xf32> to vector<160x64xf32>
      %288 = arith.addf %286, %287 : vector<160x64xf32>
      %289 = arith.truncf %288 : vector<160x64xf32> to vector<160x64xbf16>
      %c0_93 = arith.constant 0 : index
      %290 = arith.index_cast %arg19 : i32 to index
      %c0_94 = arith.constant 0 : index
      %c0_95 = arith.constant 0 : index
      %291 = vector.load %arg10[%c0_93, %290, %c0_94, %c0_95] : memref<1x12x64x256xbf16, #tpu.memory_space<vmem>>, vector<1x1x64x256xbf16>
      %292 = vector.shape_cast %291 : vector<1x1x64x256xbf16> to vector<64x256xbf16>
      %cst_96 = arith.constant dense<0.000000e+00> : vector<160x256xf32>
      %293 = tpu.matmul %289, %292, %cst_96 {dimension_numbers = #tpu.dot_dimension_numbers<[1], [0], [0], [1], [0, 0, 1, 1], [], []>} : vector<160x64xbf16>, vector<64x256xbf16>, vector<160x256xf32> -> vector<160x256xf32>
      %c0_97 = arith.constant 0 : index
      %294 = arith.index_cast %arg19 : i32 to index
      %c0_98 = arith.constant 0 : index
      %c0_99 = arith.constant 0 : index
      %295 = vector.load %arg11[%c0_97, %294, %c0_98, %c0_99] : memref<1x12x1x256xf32, #tpu.memory_space<vmem>>, vector<1x1x1x256xf32>
      %296 = vector.shape_cast %295 : vector<1x1x1x256xf32> to vector<1x256xf32>
      %297 = vector.broadcast %296 : vector<1x256xf32> to vector<160x256xf32>
      %298 = arith.addf %293, %297 : vector<160x256xf32>
      %cst_100 = arith.constant 1.702000e+00 : f32
      %299 = vector.broadcast %cst_100 : f32 to vector<160x256xf32>
      %300 = arith.mulf %299, %298 : vector<160x256xf32>
      %301 = arith.negf %300 : vector<160x256xf32>
      %302 = math.exp %301 : vector<160x256xf32>
      %cst_101 = arith.constant 1.000000e+00 : f32
      %303 = vector.broadcast %cst_101 : f32 to vector<160x256xf32>
      %304 = arith.addf %303, %302 : vector<160x256xf32>
      %305 = arith.divf %303, %304 : vector<160x256xf32>
      %306 = arith.mulf %298, %305 : vector<160x256xf32>
      %307 = arith.truncf %306 : vector<160x256xf32> to vector<160x256xbf16>
      %c0_102 = arith.constant 0 : index
      %308 = arith.index_cast %arg19 : i32 to index
      %c0_103 = arith.constant 0 : index
      %c0_104 = arith.constant 0 : index
      %309 = vector.load %arg12[%c0_102, %308, %c0_103, %c0_104] : memref<1x12x256x64xbf16, #tpu.memory_space<vmem>>, vector<1x1x256x64xbf16>
      %310 = vector.shape_cast %309 : vector<1x1x256x64xbf16> to vector<256x64xbf16>
      %cst_105 = arith.constant dense<0.000000e+00> : vector<160x64xf32>
      %311 = tpu.matmul %307, %310, %cst_105 {dimension_numbers = #tpu.dot_dimension_numbers<[1], [0], [0], [1], [0, 0, 1, 1], [], []>} : vector<160x256xbf16>, vector<256x64xbf16>, vector<160x64xf32> -> vector<160x64xf32>
      %312 = arith.addf %260, %311 : vector<160x64xf32>
      %c0_106 = arith.constant 0 : index
      %313 = arith.index_cast %arg19 : i32 to index
      %c0_107 = arith.constant 0 : index
      %c0_108 = arith.constant 0 : index
      %314 = vector.load %arg13[%c0_106, %313, %c0_107, %c0_108] : memref<1x12x1x64xf32, #tpu.memory_space<vmem>>, vector<1x1x1x64xf32>
      %315 = vector.shape_cast %314 : vector<1x1x1x64xf32> to vector<1x64xf32>
      %316 = vector.broadcast %315 : vector<1x64xf32> to vector<160x64xf32>
      %317 = arith.addf %312, %316 : vector<160x64xf32>
      scf.yield %317 : vector<160x64xf32>
    }
    %c12_i32_3 = arith.constant 12 : i32
    %c0_4 = arith.constant 0 : index
    %c0_5 = arith.constant 0 : index
    %c0_6 = arith.constant 0 : index
    %10 = vector.load %arg14[%c0_4, %c0_5, %c0_6] : memref<1x1x64xf32, #tpu.memory_space<vmem>>, vector<1x1x64xf32>
    %11 = vector.shape_cast %10 : vector<1x1x64xf32> to vector<1x64xf32>
    %c0_7 = arith.constant 0 : index
    %c0_8 = arith.constant 0 : index
    %c0_9 = arith.constant 0 : index
    %12 = vector.load %arg15[%c0_7, %c0_8, %c0_9] : memref<1x1x64xf32, #tpu.memory_space<vmem>>, vector<1x1x64xf32>
    %13 = vector.shape_cast %12 : vector<1x1x64xf32> to vector<1x64xf32>
    %cst_10 = arith.constant dense<0.000000e+00> : vector<160xf32>
    %14 = vector.multi_reduction <add>, %9, %cst_10 [1] : vector<160x64xf32> to vector<160xf32>
    %15 = vector.shape_cast %14 : vector<160xf32> to vector<160x1xf32>
    %cst_11 = arith.constant 6.400000e+01 : f32
    %16 = vector.broadcast %cst_11 : f32 to vector<160x1xf32>
    %17 = arith.divf %15, %16 : vector<160x1xf32>
    %18 = vector.broadcast %17 : vector<160x1xf32> to vector<160x64xf32>
    %19 = arith.subf %9, %18 : vector<160x64xf32>
    %20 = arith.mulf %19, %19 : vector<160x64xf32>
    %cst_12 = arith.constant dense<0.000000e+00> : vector<160xf32>
    %21 = vector.multi_reduction <add>, %20, %cst_12 [1] : vector<160x64xf32> to vector<160xf32>
    %22 = vector.shape_cast %21 : vector<160xf32> to vector<160x1xf32>
    %cst_13 = arith.constant 6.400000e+01 : f32
    %23 = vector.broadcast %cst_13 : f32 to vector<160x1xf32>
    %24 = arith.divf %22, %23 : vector<160x1xf32>
    %25 = vector.broadcast %17 : vector<160x1xf32> to vector<160x64xf32>
    %26 = arith.subf %9, %25 : vector<160x64xf32>
    %cst_14 = arith.constant 9.99999974E-6 : f32
    %27 = vector.broadcast %cst_14 : f32 to vector<160x1xf32>
    %28 = arith.addf %24, %27 : vector<160x1xf32>
    %29 = math.rsqrt %28 : vector<160x1xf32>
    %30 = vector.broadcast %29 : vector<160x1xf32> to vector<160x64xf32>
    %31 = arith.mulf %26, %30 : vector<160x64xf32>
    %32 = vector.broadcast %11 : vector<1x64xf32> to vector<160x64xf32>
    %33 = arith.mulf %31, %32 : vector<160x64xf32>
    %34 = vector.broadcast %13 : vector<1x64xf32> to vector<160x64xf32>
    %35 = arith.addf %33, %34 : vector<160x64xf32>
    %c0_15 = arith.constant 0 : index
    %c0_16 = arith.constant 0 : index
    %36 = vector.load %arg16[%c0_15, %c0_16] : memref<2x160xf32, #tpu.memory_space<vmem>>, vector<2x160xf32>
    %cst_17 = arith.constant dense<0.000000e+00> : vector<2x64xf32>
    %37 = tpu.matmul %36, %35, %cst_17 {dimension_numbers = #tpu.dot_dimension_numbers<[1], [0], [0], [1], [0, 0, 1, 1], [], []>} : vector<2x160xf32>, vector<160x64xf32>, vector<2x64xf32> -> vector<2x64xf32>
    %c0_18 = arith.constant 0 : index
    %c0_19 = arith.constant 0 : index
    %c0_20 = arith.constant 0 : index
    %38 = vector.load %arg17[%c0_18, %c0_19, %c0_20] : memref<1x1x64xf32, #tpu.memory_space<vmem>>, vector<1x1x64xf32>
    %39 = vector.shape_cast %38 : vector<1x1x64xf32> to vector<1x64xf32>
    %40 = vector.broadcast %39 : vector<1x64xf32> to vector<2x64xf32>
    %41 = arith.mulf %37, %40 : vector<2x64xf32>
    %cst_21 = arith.constant dense<0.000000e+00> : vector<2xf32>
    %42 = vector.multi_reduction <add>, %41, %cst_21 [1] : vector<2x64xf32> to vector<2xf32>
    %43 = vector.shape_cast %42 : vector<2xf32> to vector<2x1xf32>
    %c0_22 = arith.constant 0 : index
    %c0_23 = arith.constant 0 : index
    %c0_24 = arith.constant 0 : index
    %44 = vector.load %arg18[%c0_22, %c0_23, %c0_24] : memref<1x2x1xf32, #tpu.memory_space<vmem>>, vector<1x2x1xf32>
    %45 = vector.shape_cast %44 : vector<1x2x1xf32> to vector<2x1xf32>
    %46 = vector.shape_cast %43 : vector<2x1xf32> to vector<1x2x1xf32>
    tpu.vector_store %arg18[%c0_22, %c0_23, %c0_24], %46 {strides = array<i32>} : memref<1x2x1xf32, #tpu.memory_space<vmem>>, vector<1x2x1xf32>,
    return
  }
  func.func @transform_0(%arg0: i32) -> (i32, i32, i32) {
    %c0_i32 = arith.constant 0 : i32
    %c0_i32_0 = arith.constant 0 : i32
    %c0_i32_1 = arith.constant 0 : i32
    return %arg0, %c0_i32, %c0_i32_0 : i32, i32, i32
  }
  func.func @transform_1(%arg0: i32) -> (i32, i32, i32, i32) {
    %c0_i32 = arith.constant 0 : i32
    %c0_i32_0 = arith.constant 0 : i32
    %c0_i32_1 = arith.constant 0 : i32
    %c0_i32_2 = arith.constant 0 : i32
    return %arg0, %c0_i32, %c0_i32_0, %c0_i32_1 : i32, i32, i32, i32
  }
  func.func @transform_2(%arg0: i32) -> (i32, i32, i32, i32) {
    %c0_i32 = arith.constant 0 : i32
    %c0_i32_0 = arith.constant 0 : i32
    %c0_i32_1 = arith.constant 0 : i32
    %c0_i32_2 = arith.constant 0 : i32
    return %arg0, %c0_i32, %c0_i32_0, %c0_i32_1 : i32, i32, i32, i32
  }
  func.func @transform_3(%arg0: i32) -> (i32, i32, i32, i32) {
    %c0_i32 = arith.constant 0 : i32
    %c0_i32_0 = arith.constant 0 : i32
    %c0_i32_1 = arith.constant 0 : i32
    %c0_i32_2 = arith.constant 0 : i32
    return %arg0, %c0_i32, %c0_i32_0, %c0_i32_1 : i32, i32, i32, i32
  }
  func.func @transform_4(%arg0: i32) -> (i32, i32, i32, i32) {
    %c0_i32 = arith.constant 0 : i32
    %c0_i32_0 = arith.constant 0 : i32
    %c0_i32_1 = arith.constant 0 : i32
    %c0_i32_2 = arith.constant 0 : i32
    return %arg0, %c0_i32, %c0_i32_0, %c0_i32_1 : i32, i32, i32, i32
  }
  func.func @transform_5(%arg0: i32) -> (i32, i32, i32, i32) {
    %c0_i32 = arith.constant 0 : i32
    %c0_i32_0 = arith.constant 0 : i32
    %c0_i32_1 = arith.constant 0 : i32
    %c0_i32_2 = arith.constant 0 : i32
    return %arg0, %c0_i32, %c0_i32_0, %c0_i32_1 : i32, i32, i32, i32
  }
  func.func @transform_6(%arg0: i32) -> (i32, i32, i32, i32) {
    %c0_i32 = arith.constant 0 : i32
    %c0_i32_0 = arith.constant 0 : i32
    %c0_i32_1 = arith.constant 0 : i32
    %c0_i32_2 = arith.constant 0 : i32
    return %arg0, %c0_i32, %c0_i32_0, %c0_i32_1 : i32, i32, i32, i32
  }
  func.func @transform_7(%arg0: i32) -> (i32, i32, i32, i32) {
    %c0_i32 = arith.constant 0 : i32
    %c0_i32_0 = arith.constant 0 : i32
    %c0_i32_1 = arith.constant 0 : i32
    %c0_i32_2 = arith.constant 0 : i32
    return %arg0, %c0_i32, %c0_i32_0, %c0_i32_1 : i32, i32, i32, i32
  }
  func.func @transform_8(%arg0: i32) -> (i32, i32, i32, i32) {
    %c0_i32 = arith.constant 0 : i32
    %c0_i32_0 = arith.constant 0 : i32
    %c0_i32_1 = arith.constant 0 : i32
    %c0_i32_2 = arith.constant 0 : i32
    return %arg0, %c0_i32, %c0_i32_0, %c0_i32_1 : i32, i32, i32, i32
  }
  func.func @transform_9(%arg0: i32) -> (i32, i32, i32, i32) {
    %c0_i32 = arith.constant 0 : i32
    %c0_i32_0 = arith.constant 0 : i32
    %c0_i32_1 = arith.constant 0 : i32
    %c0_i32_2 = arith.constant 0 : i32
    return %arg0, %c0_i32, %c0_i32_0, %c0_i32_1 : i32, i32, i32, i32
  }
  func.func @transform_10(%arg0: i32) -> (i32, i32, i32, i32) {
    %c0_i32 = arith.constant 0 : i32
    %c0_i32_0 = arith.constant 0 : i32
    %c0_i32_1 = arith.constant 0 : i32
    %c0_i32_2 = arith.constant 0 : i32
    return %arg0, %c0_i32, %c0_i32_0, %c0_i32_1 : i32, i32, i32, i32
  }
  func.func @transform_11(%arg0: i32) -> (i32, i32, i32, i32) {
    %c0_i32 = arith.constant 0 : i32
    %c0_i32_0 = arith.constant 0 : i32
    %c0_i32_1 = arith.constant 0 : i32
    %c0_i32_2 = arith.constant 0 : i32
    return %arg0, %c0_i32, %c0_i32_0, %c0_i32_1 : i32, i32, i32, i32
  }
  func.func @transform_12(%arg0: i32) -> (i32, i32, i32, i32) {
    %c0_i32 = arith.constant 0 : i32
    %c0_i32_0 = arith.constant 0 : i32
    %c0_i32_1 = arith.constant 0 : i32
    %c0_i32_2 = arith.constant 0 : i32
    return %arg0, %c0_i32, %c0_i32_0, %c0_i32_1 : i32, i32, i32, i32
  }
  func.func @transform_13(%arg0: i32) -> (i32, i32, i32) {
    %c0_i32 = arith.constant 0 : i32
    %c0_i32_0 = arith.constant 0 : i32
    %c0_i32_1 = arith.constant 0 : i32
    return %arg0, %c0_i32, %c0_i32_0 : i32, i32, i32
  }
  func.func @transform_14(%arg0: i32) -> (i32, i32, i32) {
    %c0_i32 = arith.constant 0 : i32
    %c0_i32_0 = arith.constant 0 : i32
    %c0_i32_1 = arith.constant 0 : i32
    return %arg0, %c0_i32, %c0_i32_0 : i32, i32, i32
  }
  func.func @transform_15(%arg0: i32) -> (i32, i32) {
    %c0_i32 = arith.constant 0 : i32
    %c0_i32_0 = arith.constant 0 : i32
    %c0_i32_1 = arith.constant 0 : i32
    return %c0_i32, %c0_i32_0 : i32, i32
  }
  func.func @transform_16(%arg0: i32) -> (i32, i32, i32) {
    %c0_i32 = arith.constant 0 : i32
    %c0_i32_0 = arith.constant 0 : i32
    %c0_i32_1 = arith.constant 0 : i32
    return %arg0, %c0_i32, %c0_i32_0 : i32, i32, i32
  }
  func.func @transform_17(%arg0: i32) -> (i32, i32, i32) {
    %c0_i32 = arith.constant 0 : i32
    %c0_i32_0 = arith.constant 0 : i32
    %c0_i32_1 = arith.constant 0 : i32
    return %arg0, %c0_i32, %c0_i32_0 : i32, i32, i32
  }
}

</mosaic_0001>

<bundles_post_ra>
// kernel: multi_binary_clip_forward.3
= control target key start
LH: loop header
LB: loop body
LE: loop exit
PB: predicated region body
PF: predicated region fallthrough
CT: control target
= control target key end

     0   :  { %10 = vsyncpa [#allocation3], 0  ;;  %s5277_s0 = inlined_call_operand.vmem [shape: f32[2,2,1,576], index: 0, kind: input, shape index: {}]   ;;  %s5278_s1 = inlined_call_operand.hbm [shape: bf16[2,576,1024], index: 1, kind: input, shape index: {}]   ;;  %s5279_s2 = inlined_call_operand.vmem [shape: f32[2,1,1024], index: 2, kind: input, shape index: {}]   ;;  %s5280_s3 = inlined_call_operand.vmem [shape: f32[2,1,1024], index: 3, kind: input, shape index: {}]   ;;  %s5281_s4 = inlined_call_operand.vmem [shape: f32[2,1,1], index: 4, kind: input, shape index: {}]   ;;  %s5282_s5 = inlined_call_operand.vmem [shape: f32[2,2,1], index: 5, kind: output, shape index: {}]  }
   0x1   :  { %12 = vsyncpa [#allocation3 + $0x1], 0  ;;  %s4461_s18 = smov 0   ;;  %s4463_s19 = smov 0  }
   0x2   :  { %s4465_s20 = smov 0   ;;  %s4467_s21 = smov 0  }
   0x3 LB: > { %s4480_s22 = sadd.s32 4294967295, %s4427_s21   ;;  %s4483_s23 = sadd.s32 1, %s4427_s21   ;;  %s4427_s21 = sphi %s4467_s21, %s5288_s21   ;;  %s4423_s20 = sphi %s4465_s20, %s5287_s20   ;;  %s4419_s19 = sphi %s4463_s19, %s5286_s19   ;;  %s4415_s18 = sphi %s4461_s18, %s5285_s18  }
   0x4   : > { %s48_s24 = ssub.s32 %s4427_s21, %s4483_s23  ;;  %s51_s25 = sadd.s32 1, %s4423_s20 }
   0x5   : > { %p49_p0 = scmp.eq.s32.totalorder %s48_s24, 0  ;;  %p58_p1 = scmp.ne.s32.totalorder %s4423_s20, %s4419_s19 }
   0x6   : > { %p59_p2 = scmp.eq.s32.totalorder %s4427_s21, 0  ;;  %p64_p3 = scmp.ne.s32.totalorder %s4419_s19, %s4415_s18 }
   0x7   : > { %s4493_s26 = scalar_select %p49_p0, %s4423_s20, %s51_s25  }
   0x8   : > { %p60_p4 = por %p59_p2, %p58_p1  ;;  %p65_p5 = scmp.eq.s32.totalorder %s4480_s22, 0 }
   0x9   : > { %p4326_p6 = scmp.lt.s32.totalorder %s4427_s21, 2  ;;  %s199_s28 = sand.u32 1, %s4423_s20  }
   0xa   : > { %p4497_p7 = por %p65_p5, %p64_p3  ;;  %s4316_s29 = smul.u32 2304, %s199_s28 }
   0xb   : > { %s4317_s30 = smul.u32 2304, %s4427_s21  ;;  %p4503_p8 = pnand %p4326_p6, %p60_p4 }
   0xc   : > { %s203_s10 = scalar_lea.vmem [#allocation2], %s4316_s29  ;;  %p2862_p9 = scmp.ge.s32.totalorder %s4427_s21, 1 }
   0xd   : > { %s208_s9 = scalar_lea.hbm %s5278_s1, %s4317_s30  ;;  %s211_s11 = sshll.u32 %s203_s10, 4  ;;  %s212_s11 = int_to_ptr.vmem [resolvable:$true] %s211_s11 }
   0xe   : > { %s209_s12 = sshll.u32 %s208_s9, 4  ;;  %s200_s13 = scalar_lea.sflag [#allocation3], %s199_s28  ;;  %s210_s12 = int_to_ptr.hbm [resolvable:$true] %s209_s12 }
   0xf   : > { %s4363_s14 = sshra.s32 %s210_s12, 4  ;;  %p4367_p11 = pneg %p4503_p8  ;;  %s4364_s14 = int_to_ptr.hbm [resolvable:$true] %s4363_s14 }
  0x10   : > { %s4365_s15 = scalar_lea.hbm %s4364_s14, 2304  ;;  %s4370_s18 = scalar_lea.hbm %s5278_s1, 4608 }
  0x11   : > { %p4366_p10 = scmp.ne.s32.totalorder %s4364_s14, %s4365_s15  ;;  %p4371_p0 = scmp.lt.s32.totalorder %s4364_s14, %s5278_s1 }
  0x12   : > { %p4372_p1 = scmp.lt.s32.totalorder %s4370_s18, %s4365_s15 }
  0x13   : > { %p4368_p12 = pnand %p4367_p11, %p4366_p10 }
  0x14   : > { %p4373_p2 = por %p4372_p1, %p4371_p0 }
  0x15   : > { %p4369_p13 = pneg %p4368_p12 }
  0x17   : > { %p4374_p3 = pnand %p4373_p2, %p4369_p13 }
  0x19   : > { %4377 = shalt.err (!%p4374_p3)
}
  0x1a   : > { %s4429_s28 = smov 512   ;;  %s4430_s29 = smov 32  }
  0x1b   : > { %4325 = dma.hbm_to_vmem [thread:$0]  (!%p4503_p8), %s210_s12, 36864, %s212_s11, %s200_s13, %s4429_s28, %s4429_s28, %s4430_s29  }
  0x1c   : > { %p239_p4 = scmp.lt.s32.totalorder %s4427_s21, 3 }
  0x1e   : > { %p240_p5 = pnand %p2862_p9, %p239_p4 }
  0x1f   : > { %s245_s30 = sand.u32 (!%p240_p5), 1, %s4419_s19  }
  0x20   : > { %243 = sbr.rel (%p240_p5) target bundleno = 647 (0x287), region = 40  ;;  %s246_s8 = scalar_lea.sflag (!%p240_p5), [#allocation3], %s245_s30 }
  0x21   : > { %s4318_s7 = smul.u32 (!%p240_p5), 2304, %s245_s30 }
  0x23   : > { %s4525_s9 = scalar_lea.vmem (!%p240_p5), [#allocation2], %s4318_s7 }
  0x25   : > { %4410 = dma.done.wait (%p4497_p7), %s246_s8, 36864  }
  0x26   : > { %4412 = vsyncadd (%p4497_p7), %s246_s8, 4294930432  ;;  %p291_p6 = scmp.lt.s32.totalorder %s4480_s22, 1  ;;  %v3092_v0 = vld [vmem:[%s4525_s9 + $0x1c0] sm:$0xf]  ;;  %vm674_vm0 = vcmask 1041409   ;;  %vm2133_vm1 = vcmask 523264  }
  0x27   : > { %v4088_v1 = vld [vmem:[%s4525_s9 + $0x1dc] sm:$0xf0]  ;;  %vm2723_vm2 = vcmask 1041408   ;;  %vm2746_vm3 = vcmask 1024  }
  0x28   : > { %v3348_v2 = vld [vmem:[%s4525_s9 + $0x3c0] sm:$0xf]  ;;  %v3093_v3 = vor.u32 %v4088_v1, %v3092_v0  ;;  %s5290_s22 = smov (!%p291_p6, %s4480_s22), 1 }
  0x29   : > { %v4152_v4 = vld [vmem:[%s4525_s9 + $0x3dc] sm:$0xf0]  ;;  %s4319_s21 = smul.u32 10, %s5290_s22  ;;  %s2863_s11 = sshll.u32 %s5290_s22, 3 }
  0x2a   : > { %v3604_v5 = vld [vmem:[%s4525_s9 + $0x5c0] sm:$0xf]  ;;  %v3349_v7 = vor.u32 %v4152_v4, %v3348_v2  ;;  %2137 = vmatpush.bf16.msra.mxu0 %v3093_v3  ;;  %s4944_s14 = scalar_lea.vmem %s5279_s2, %s2863_s11  ;;  %s302_s17 = scalar_lea.vmem %s5280_s3, %s2863_s11 }
  0x2b   : > { %v4216_v6 = vld [vmem:[%s4525_s9 + $0x5dc] sm:$0xf0]  ;;  %s294_s10 = scalar_lea.vmem %s5277_s0, %s4319_s21  ;;  %s305_s25 = scalar_lea.vmem %s5281_s4, %s5290_s22 }
  0x2c   : > { %v3605_v8 = vor.u32 %v4216_v6, %v3604_v5  ;;  %v3860_v9 = vld [vmem:[%s4525_s9 + $0x7c0] sm:$0xf]  ;;  %2150 = vmatpush.bf16.msra.mxu1 %v3349_v7  ;;  %s2865_s28 = sshll.u32 %s5290_s22, 1 }
  0x2d   : > { %v4280_v10 = vld [vmem:[%s4525_s9 + $0x7dc] sm:$0xf0] }
  0x2e   : > { %v3060_v11 = vld [vmem:[%s4525_s9 + $0x180] sm:$0xf]  ;;  %v3861_v12 = vor.u32 %v4280_v10, %v3860_v9  ;;  %2163 = vmatpush.bf16.msra.mxu2 %v3605_v8 }
  0x2f   : > { %v4080_v13 = vld [vmem:[%s4525_s9 + $0x19c] sm:$0xf0] }
  0x30   : > { %v3316_v14 = vld [vmem:[%s4525_s9 + $0x380] sm:$0xf]  ;;  %v3061_v16 = vor.u32 %v4080_v13, %v3060_v11  ;;  %2176 = vmatpush.bf16.msra.mxu3 %v3861_v12 }
  0x31   : > { %v4144_v15 = vld [vmem:[%s4525_s9 + $0x39c] sm:$0xf0] }
  0x32   : > { %v3317_v17 = vor.u32 %v4144_v15, %v3316_v14  ;;  %v3572_v18 = vld [vmem:[%s4525_s9 + $0x580] sm:$0xf]  ;;  %2138 = vmatpush.bf16.msra.mxu0 %v3061_v16 }
  0x33   : > { %v4208_v19 = vld [vmem:[%s4525_s9 + $0x59c] sm:$0xf0] }
  0x34   : > { %v3828_v20 = vld [vmem:[%s4525_s9 + $0x780] sm:$0xf]  ;;  %v3573_v21 = vor.u32 %v4208_v19, %v3572_v18  ;;  %2151 = vmatpush.bf16.msra.mxu1 %v3317_v17 }
  0x35   : > { %v4272_v22 = vld [vmem:[%s4525_s9 + $0x79c] sm:$0xf0] }
  0x36   : > { %v3028_v23 = vld [vmem:[%s4525_s9 + $0x140] sm:$0xf]  ;;  %v3829_v25 = vor.u32 %v4272_v22, %v3828_v20  ;;  %2164 = vmatpush.bf16.msra.mxu2 %v3573_v21 }
  0x37   : > { %v4072_v24 = vld [vmem:[%s4525_s9 + $0x15c] sm:$0xf0] }
  0x38   : > { %v3284_v26 = vld [vmem:[%s4525_s9 + $0x340] sm:$0xf]  ;;  %v3029_v29 = vor.u32 %v4072_v24, %v3028_v23  ;;  %2177 = vmatpush.bf16.msra.mxu3 %v3829_v25 }
  0x39   : > { %v4136_v27 = vld [vmem:[%s4525_s9 + $0x35c] sm:$0xf0] }
  0x3a   : > { %v3540_v28 = vld [vmem:[%s4525_s9 + $0x540] sm:$0xf]  ;;  %v3285_v33 = vor.u32 %v4136_v27, %v3284_v26  ;;  %2139 = vmatpush.bf16.msra.mxu0 %v3029_v29 }
  0x3b   : > { %v4200_v30 = vld [vmem:[%s4525_s9 + $0x55c] sm:$0xf0] }
  0x3c   : > { %v3796_v31 = vld [vmem:[%s4525_s9 + $0x740] sm:$0xf]  ;;  %v3541_v34 = vor.u32 %v4200_v30, %v3540_v28  ;;  %2152 = vmatpush.bf16.msra.mxu1 %v3285_v33  ;;  %v4611_v30 = vld [vmem:[%s294_s10 + $0x5] sm:$0x1f] }
  0x3d   : > { %v4264_v32 = vld [vmem:[%s4525_s9 + $0x75c] sm:$0xf0]  ;;  %v3094_v33 = vld [vmem:[%s4525_s9 + $0x1e0] sm:$0xf0] }
  0x3e   : > { %v2996_v35 = vld [vmem:[%s4525_s9 + $0x100] sm:$0xf]  ;;  %v3797_v38 = vor.u32 %v4264_v32, %v3796_v31  ;;  %2165 = vmatpush.bf16.msra.mxu2 %v3541_v34  ;;  %v4084_v32 = vld [vmem:[%s4525_s9 + $0x1c4] sm:$0xf] }
  0x3f   : > { %v4064_v36 = vld [vmem:[%s4525_s9 + $0x11c] sm:$0xf0] }
  0x40   : > { %v3252_v37 = vld [vmem:[%s4525_s9 + $0x300] sm:$0xf]  ;;  %v2997_v44 = vor.u32 %v4064_v36, %v2996_v35  ;;  %2178 = vmatpush.bf16.msra.mxu3 %v3797_v38  ;;  %v322_v35 = vperm.slane %v4611_v30, 0  ;;  %v3350_v38 = vld [vmem:[%s4525_s9 + $0x3e0] sm:$0xf0] }
  0x41   : > { %v4128_v39 = vld [vmem:[%s4525_s9 + $0x31c] sm:$0xf0] }
  0x42   : > { %v3508_v40 = vld [vmem:[%s4525_s9 + $0x500] sm:$0xf]  ;;  %v3253_v45 = vor.u32 %v4128_v39, %v3252_v37  ;;  %2140 = vmatpush.bf16.msra.mxu0 %v2997_v44  ;;  %v4148_v37 = vld [vmem:[%s4525_s9 + $0x3c4] sm:$0xf]  ;;  %v342_v44 = vpack.c.bf16 %v322_v35, %v322_v35 }
  0x43   : > { %v4192_v41 = vld [vmem:[%s4525_s9 + $0x51c] sm:$0xf0]  ;;  %v4212_v39 = vld [vmem:[%s4525_s9 + $0x5c4] sm:$0xf] }
  0x44   : > { %v3764_v42 = vld [vmem:[%s4525_s9 + $0x700] sm:$0xf]  ;;  %v3509_v46 = vor.u32 %v4192_v41, %v3508_v40  ;;  %2153 = vmatpush.bf16.msra.mxu1 %v3253_v45 }
  0x45   : > { %v4256_v43 = vld [vmem:[%s4525_s9 + $0x71c] sm:$0xf0] }
  0x46   : > { %v2964_v47 = vld [vmem:[%s4525_s9 + $0xc0] sm:$0xf]  ;;  %v3765_v50 = vor.u32 %v4256_v43, %v3764_v42  ;;  %2166 = vmatpush.bf16.msra.mxu2 %v3509_v46  ;;  %v3606_v42 = vld [vmem:[%s4525_s9 + $0x5e0] sm:$0xf0] }
  0x47   : > { %v4056_v48 = vld [vmem:[%s4525_s9 + $0xdc] sm:$0xf0] }
  0x48   : > { %v3220_v49 = vld [vmem:[%s4525_s9 + $0x2c0] sm:$0xf]  ;;  %v2965_v56 = vor.u32 %v4056_v48, %v2964_v47  ;;  %2179 = vmatpush.bf16.msra.mxu3 %v3765_v50  ;;  %v3062_v50 = vld [vmem:[%s4525_s9 + $0x1a0] sm:$0xf0] }
  0x49   : > { %v4120_v51 = vld [vmem:[%s4525_s9 + $0x2dc] sm:$0xf0] }
  0x4a   : > { %v3476_v52 = vld [vmem:[%s4525_s9 + $0x4c0] sm:$0xf]  ;;  %v3221_v57 = vor.u32 %v4120_v51, %v3220_v49  ;;  %2141 = vmatpush.bf16.msra.mxu0 %v2965_v56  ;;  %v4624_v49 = vld [vmem:[%s4525_s9 + $0x184] sm:$0xf]  ;;  %v668_v56 = vunpack.c.l.b16 %v342_v44 }
  0x4b   : > { %v4184_v53 = vld [vmem:[%s4525_s9 + $0x4dc] sm:$0xf0] }
  0x4c   : > { %v3732_v54 = vld [vmem:[%s4525_s9 + $0x6c0] sm:$0xf]  ;;  %v3477_v58 = vor.u32 %v4184_v53, %v3476_v52  ;;  %2154 = vmatpush.bf16.msra.mxu1 %v3221_v57  ;;  %v324_v52 = vperm.slane %v4611_v30, 2  ;;  %v3097_v53 = vor.u32 %v4084_v32, %v3094_v33  ;;  %v3609_v57 = vor.u32 %v4212_v39, %v3606_v42  ;;  %v4124_v42 = vld [vmem:[%s4525_s9 + $0x304] sm:$0xf] }
  0x4d   : > { %v4248_v55 = vld [vmem:[%s4525_s9 + $0x6dc] sm:$0xf0] }
  0x4e   : > { %v2932_v59 = vld [vmem:[%s4525_s9 + $0x80] sm:$0xf]  ;;  %v3733_v62 = vor.u32 %v4248_v55, %v3732_v54  ;;  %2167 = vmatpush.bf16.msra.mxu2 %v3477_v58  ;;  %v3353_v54 = vor.u32 %v4148_v37, %v3350_v38  ;;  %v4140_v58 = vld [vmem:[%s4525_s9 + $0x384] sm:$0xf] }
  0x4f   : > { %v4048_v60 = vld [vmem:[%s4525_s9 + $0x9c] sm:$0xf0]  ;;  %v4060_v37 = vld [vmem:[%s4525_s9 + $0x104] sm:$0xf] }
  0x50   : > { %v3188_v61 = vld [vmem:[%s4525_s9 + $0x280] sm:$0xf]  ;;  %v2933_v5 = vor.u32 %v4048_v60, %v2932_v59  ;;  %2180 = vmatpush.bf16.msra.mxu3 %v3733_v62  ;;  %v3318_v59 = vld [vmem:[%s4525_s9 + $0x3a0] sm:$0xf0]  ;;  %v673_v62 = vrot.slane %v668_v56, 7 }
  0x51   : > { %v4112_v63 = vld [vmem:[%s4525_s9 + $0x29c] sm:$0xf0] }
  0x52   : > { %v3444_v0 = vld [vmem:[%s4525_s9 + $0x480] sm:$0xf]  ;;  %v3189_v9 = vor.u32 %v4112_v63, %v3188_v61  ;;  %2142 = vmatpush.bf16.msra.mxu0 %v2933_v5  ;;  %v344_v61 = vpack.c.bf16 %v324_v52, %v324_v52  ;;  %v3862_v52 = vld [vmem:[%s4525_s9 + $0x7e0] sm:$0xf0] }
  0x53   : > { %v4176_v1 = vld [vmem:[%s4525_s9 + $0x49c] sm:$0xf0] }
  0x54   : > { %v3700_v2 = vld [vmem:[%s4525_s9 + $0x680] sm:$0xf]  ;;  %v3445_v10 = vor.u32 %v4176_v1, %v3444_v0  ;;  %2155 = vmatpush.bf16.msra.mxu1 %v3189_v9  ;;  %v3065_v0 = vor.u32 %v4624_v49, %v3062_v50  ;;  %v670_v5 = vunpack.c.l.b16 %v344_v61  ;;  %v3321_v9 = vor.u32 %v4140_v58, %v3318_v59  ;;  %v3510_v50 = vld [vmem:[%s4525_s9 + $0x520] sm:$0xf0] }
  0x55   : > { %v4240_v3 = vld [vmem:[%s4525_s9 + $0x69c] sm:$0xf0]  ;;  %v4052_v59 = vld [vmem:[%s4525_s9 + $0xc4] sm:$0xf] }
  0x56   : > { %v2900_v4 = vld [vmem:[%s4525_s9 + $0x40] sm:$0xf]  ;;  %v3701_v14 = vor.u32 %v4240_v3, %v3700_v2  ;;  %2168 = vmatpush.bf16.msra.mxu2 %v3445_v10  ;;  %v4204_v2 = vld [vmem:[%s4525_s9 + $0x584] sm:$0xf] }
  0x57   : > { %v4040_v6 = vld [vmem:[%s4525_s9 + $0x5c] sm:$0xf0]  ;;  %v3574_v3 = vld [vmem:[%s4525_s9 + $0x5a0] sm:$0xf0] }
  0x58   : > { %v3156_v7 = vld [vmem:[%s4525_s9 + $0x240] sm:$0xf]  ;;  %v2901_v22 = vor.u32 %v4040_v6, %v2900_v4  ;;  %2181 = vmatpush.bf16.msra.mxu3 %v3701_v14  ;;  %v325_v6 = vperm.slane %v4611_v30, 3  ;;  %v678_v14 = vrot.slane %v670_v5, 7  ;;  %v4268_v5 = vld [vmem:[%s4525_s9 + $0x784] sm:$0xf] }
  0x59   : > { %v4104_v8 = vld [vmem:[%s4525_s9 + $0x25c] sm:$0xf0] }
  0x5a   : > { %v3412_v11 = vld [vmem:[%s4525_s9 + $0x440] sm:$0xf]  ;;  %v3157_v26 = vor.u32 %v4104_v8, %v3156_v7  ;;  %2143 = vmatpush.bf16.msra.mxu0 %v2901_v22  ;;  %v3286_v22 = vld [vmem:[%s4525_s9 + $0x360] sm:$0xf0] }
  0x5b   : > { %v4168_v12 = vld [vmem:[%s4525_s9 + $0x45c] sm:$0xf0] }
  0x5c   : > { %v3668_v13 = vld [vmem:[%s4525_s9 + $0x640] sm:$0xf]  ;;  %v3413_v27 = vor.u32 %v4168_v12, %v3412_v11  ;;  %2156 = vmatpush.bf16.msra.mxu1 %v3157_v26  ;;  %v323_v12 = vperm.slane %v4611_v30, 1  ;;  %v3542_v26 = vld [vmem:[%s4525_s9 + $0x560] sm:$0xf0] }
  0x5d   : > { %v4232_v15 = vld [vmem:[%s4525_s9 + $0x65c] sm:$0xf0] }
  0x5e   : > { %v2868_v16 = vld [vmem:[%s4525_s9] sm:$0xf]  ;;  %v3669_v31 = vor.u32 %v4232_v15, %v3668_v13  ;;  %2169 = vmatpush.bf16.msra.mxu2 %v3413_v27 }
  0x5f   : > { %v4032_v17 = vld [vmem:[%s4525_s9 + $0x1c] sm:$0xf0] }
  0x60   : > { %v3124_v18 = vld [vmem:[%s4525_s9 + $0x200] sm:$0xf]  ;;  %v2869_v36 = vor.u32 %v4032_v17, %v2868_v16  ;;  %2182 = vmatpush.bf16.msra.mxu3 %v3669_v31  ;;  %v4068_v16 = vld [vmem:[%s4525_s9 + $0x144] sm:$0xf]  ;;  %v345_v17 = vpack.c.bf16 %v325_v6, %v325_v6 }
  0x61   : > { %v4096_v19 = vld [vmem:[%s4525_s9 + $0x21c] sm:$0xf0]  ;;  %v3830_v6 = vld [vmem:[%s4525_s9 + $0x7a0] sm:$0xf0] }
  0x62   : > { %v3380_v20 = vld [vmem:[%s4525_s9 + $0x400] sm:$0xf]  ;;  %v3125_v40 = vor.u32 %v4096_v19, %v3124_v18  ;;  %2144 = vmatpush.bf16.msra.mxu0 %v2869_v36  ;;  %v3577_v19 = vor.u32 %v4204_v2, %v3574_v3 }
  0x63   : > { %v4160_v21 = vld [vmem:[%s4525_s9 + $0x41c] sm:$0xf0] }
  0x64   : > { %v3636_v23 = vld [vmem:[%s4525_s9 + $0x600] sm:$0xf]  ;;  %v3381_v41 = vor.u32 %v4160_v21, %v3380_v20  ;;  %2157 = vmatpush.bf16.msra.mxu1 %v3125_v40  ;;  %v3030_v20 = vld [vmem:[%s4525_s9 + $0x160] sm:$0xf0] }
  0x65   : > { %v4224_v24 = vld [vmem:[%s4525_s9 + $0x61c] sm:$0xf0]  ;;  %v4132_v21 = vld [vmem:[%s4525_s9 + $0x344] sm:$0xf]  ;;  %v3033_v38 = vor.u32 %v4068_v16, %v3030_v20 }
  0x66   : > { %v3988_v25 = vld [vmem:[%s4525_s9 + $0x8c0] sm:$0xf]  ;;  %v3637_v47 = vor.u32 %v4224_v24, %v3636_v23  ;;  %2170 = vmatpush.bf16.msra.mxu2 %v3381_v41  ;;  %v343_v23 = vpack.c.bf16 %v323_v12, %v323_v12  ;;  %v3289_v39 = vor.u32 %v4132_v21, %v3286_v22  ;;  %v2998_v41 = vld [vmem:[%s4525_s9 + $0x120] sm:$0xf0] }
  0x67   : > { %v4312_v28 = vld [vmem:[%s4525_s9 + $0x8dc] sm:$0xf0]  ;;  %v4108_v16 = vld [vmem:[%s4525_s9 + $0x284] sm:$0xf] }
  0x68   : > { %v4609_v29 = vld [vmem:[%s294_s10] sm:$0x1f]  ;;  %v3989_v48 = vor.u32 %v4312_v28, %v3988_v25  ;;  %2183 = vmatpush.bf16.msra.mxu3 %v3637_v47  ;;  %2202 = vmatpush.bf16.msrb.mxu1 %v3097_v53  ;;  %v671_v28 = vunpack.c.l.b16 %v345_v17 }
  0x69   : > { %v317_v34 = vperm.slane %v4609_v29, 0  ;;  %v3956_v45 = vld [vmem:[%s4525_s9 + $0x880] sm:$0xf]  ;;  %v319_v51 = vperm.slane %v4609_v29, 2  ;;  %v320_v1 = vperm.slane %v4609_v29, 3  ;;  %v318_v7 = vperm.slane %v4609_v29, 1 }
  0x6a   : > { %v4304_v46 = vld [vmem:[%s4525_s9 + $0x89c] sm:$0xf0]  ;;  %2193 = vmatpush.bf16.msrb.mxu0 %v3989_v48  ;;  %2215 = vmatpush.bf16.msrb.mxu2 %v3353_v54  ;;  %v4196_v25 = vld [vmem:[%s4525_s9 + $0x544] sm:$0xf]  ;;  %v680_v40 = vrot.slane %v671_v28, 7  ;;  %v326_v48 = vperm.slane %v4611_v30, 4 }
  0x6b   : > { %v337_v43 = vpack.c.bf16 %v317_v34, %v317_v34  ;;  %v339_v60 = vpack.c.bf16 %v319_v51, %v319_v51  ;;  %v3957_v63 = vor.u32 %v4304_v46, %v3956_v45  ;;  %v3924_v10 = vld [vmem:[%s4525_s9 + $0x840] sm:$0xf]  ;;  %v340_v11 = vpack.c.bf16 %v320_v1, %v320_v1  ;;  %v3254_v46 = vld [vmem:[%s4525_s9 + $0x320] sm:$0xf0] }
  0x6c   : > { %v4296_v15 = vld [vmem:[%s4525_s9 + $0x85c] sm:$0xf0]  ;;  %v338_v18 = vpack.c.bf16 %v318_v7, %v318_v7  ;;  %2228 = vmatpush.bf16.msrb.mxu3 %v3609_v57  ;;  %v669_v34 = vunpack.c.l.b16 %v343_v23  ;;  %2203 = vmatpush.bf16.msrb.mxu1 %v3065_v0  ;;  %v3545_v44 = vor.u32 %v4196_v25, %v3542_v26  ;;  %v4188_v47 = vld [vmem:[%s4525_s9 + $0x504] sm:$0xf]  ;;  %v346_v56 = vpack.c.bf16 %v326_v48, %v326_v48 }
  0x6d   : > { %v663_v55 = vunpack.c.l.b16 %v337_v43  ;;  %v665_v4 = vunpack.c.l.b16 %v339_v60  ;;  %v666_v27 = vunpack.c.l.b16 %v340_v11  ;;  %v3925_v32 = vor.u32 %v4296_v15, %v3924_v10  ;;  %v3892_v35 = vld [vmem:[%s4525_s9 + $0x800] sm:$0xf]  ;;  %v4276_v51 = vld [vmem:[%s4525_s9 + $0x7c4] sm:$0xf] }
  0x6e   : > { %2194 = vmatpush.bf16.msrb.mxu0 %v3957_v63  ;;  %v664_v33 = vunpack.c.l.b16 %v338_v18  ;;  %v4288_v36 = vld [vmem:[%s4525_s9 + $0x81c] sm:$0xf0]  ;;  %2216 = vmatpush.bf16.msrb.mxu2 %v3321_v9  ;;  %v321_v43 = vperm.slane %v4609_v29, 4  ;;  %v676_v45 = vrot.slane %v669_v34, 7  ;;  %v3001_v57 = vor.u32 %v4060_v37, %v2998_v41  ;;  %v2966_v60 = vld [vmem:[%s4525_s9 + $0xe0] sm:$0xf0] }
  0x6f   : > { %v675_v8 = vsel %vm674_vm0, %v673_v62, %v663_v55  ;;  %v679_v24 = vsel %vm674_vm0, %v678_v14, %v665_v4  ;;  %v681_v49 = vsel %vm674_vm0, %v680_v40, %v666_v27  ;;  %v3893_v55 = vor.u32 %v4288_v36, %v3892_v35  ;;  %v4116_v63 = vld [vmem:[%s4525_s9 + $0x2c4] sm:$0xf] }
  0x70   : > { %v4640_v13 = vpack.c.b16 %v675_v8, %v675_v8  ;;  %v4651_v31 = vpack.c.b16 %v679_v24, %v679_v24  ;;  %2229 = vmatpush.bf16.msrb.mxu3 %v3577_v19  ;;  %v341_v53 = vpack.c.bf16 %v321_v43, %v321_v43  ;;  %v4667_v29 = vpack.c.b16 %v681_v49, %v681_v49  ;;  %v3222_v0 = vld [vmem:[%s4525_s9 + $0x2e0] sm:$0xf0] }
  0x71   : > { %v677_v54 = vsel %vm674_vm0, %v676_v45, %v664_v33  ;;  %2204 = vmatpush.bf16.msrb.mxu1 %v3033_v38  ;;  %v3257_v58 = vor.u32 %v4124_v42, %v3254_v46  ;;  %v3513_v61 = vor.u32 %v4188_v47, %v3510_v50  ;;  %v3865_v62 = vor.u32 %v4276_v51, %v3862_v52  ;;  %v4180_v1 = vld [vmem:[%s4525_s9 + $0x4c4] sm:$0xf]  ;;  %v3100_v52 = vld [vmem:[%s4525_s9 + $0x1c8] sm:$0xf] }
  0x72   : > { %2145 = vmatmul.bf16.vlgmr.msra.gmra.mxu0 %v4640_v13  ;;  %2171 = vmatmul.bf16.vlgmr.msra.gmra.mxu2 %v4651_v31  ;;  %v4670_v30 = vpack.c.b16 %v677_v54, %v677_v54  ;;  %v667_v2 = vunpack.c.l.b16 %v341_v53  ;;  %v672_v3 = vunpack.c.l.b16 %v346_v56  ;;  %v3478_v4 = vld [vmem:[%s4525_s9 + $0x4e0] sm:$0xf0]  ;;  %v2969_v8 = vor.u32 %v4052_v59, %v2966_v60  ;;  %v4089_v53 = vld [vmem:[%s4525_s9 + $0x1e4] sm:$0xf0] }
  0x73   : > { %2195 = vmatpush.bf16.msrb.mxu0 %v3925_v32  ;;  %2217 = vmatpush.bf16.msrb.mxu2 %v3289_v39  ;;  %v3225_v9 = vor.u32 %v4116_v63, %v3222_v0  ;;  %v4044_v10 = vld [vmem:[%s4525_s9 + $0x84] sm:$0xf]  ;;  %v3481_v12 = vor.u32 %v4180_v1, %v3478_v4  ;;  %v3833_v14 = vor.u32 %v4268_v5, %v3830_v6  ;;  %v3356_v56 = vld [vmem:[%s4525_s9 + $0x3c8] sm:$0xf] }
  0x74   : > { %2230 = vmatpush.bf16.msrb.mxu3 %v3545_v44  ;;  %2158 = vmatmul.bf16.vlgmr.msra.gmra.mxu1 %v4670_v30  ;;  %v682_v7 = vrot.slane %v672_v3, 7  ;;  %v2934_v11 = vld [vmem:[%s4525_s9 + $0xa0] sm:$0xf0]  ;;  %v3068_v3 = vld [vmem:[%s4525_s9 + $0x188] sm:$0xf] }
  0x75   : > { %2184 = vmatmul.bf16.vlgmr.msra.gmra.mxu3 %v4667_v29  ;;  %2205 = vmatpush.bf16.msrb.mxu1 %v3001_v57  ;;  %v3190_v17 = vld [vmem:[%s4525_s9 + $0x2a0] sm:$0xf0]  ;;  %v2937_v23 = vor.u32 %v4044_v10, %v2934_v11  ;;  %v4153_v57 = vld [vmem:[%s4525_s9 + $0x3e4] sm:$0xf0] }
  0x76   : > { %v683_v15 = vsel %vm674_vm0, %v682_v7, %v667_v2  ;;  %v4172_v18 = vld [vmem:[%s4525_s9 + $0x484] sm:$0xf]  ;;  %v3193_v24 = vor.u32 %v4108_v16, %v3190_v17  ;;  %v3357_v1 = vor.u32 %v4153_v57, %v3356_v56  ;;  %v4081_v4 = vld [vmem:[%s4525_s9 + $0x1a4] sm:$0xf0] }
  0x77   : > { %2196 = vmatpush.bf16.msrb.mxu0 %v3893_v55  ;;  %2218 = vmatpush.bf16.msrb.mxu2 %v3257_v58  ;;  %v4688_v19 = vpack.c.b16 %v683_v15, %v683_v15  ;;  %v3446_v20 = vld [vmem:[%s4525_s9 + $0x4a0] sm:$0xf0]  ;;  %v3324_v5 = vld [vmem:[%s4525_s9 + $0x388] sm:$0xf] }
  0x78   : > { %2231 = vmatpush.bf16.msrb.mxu3 %v3513_v61  ;;  %v4260_v21 = vld [vmem:[%s4525_s9 + $0x744] sm:$0xf]  ;;  %v3449_v27 = vor.u32 %v4172_v18, %v3446_v20  ;;  %v3101_v61 = vor.u32 %v4089_v53, %v3100_v52  ;;  %v4145_v6 = vld [vmem:[%s4525_s9 + $0x3a4] sm:$0xf0] }
  0x79   : > { %v3798_v22 = vld [vmem:[%s4525_s9 + $0x760] sm:$0xf0]  ;;  %2206 = vmatpush.bf16.msrb.mxu1 %v2969_v8  ;;  %v3036_v16 = vld [vmem:[%s4525_s9 + $0x148] sm:$0xf] }
  0x7a   : > { %v4036_v25 = vld [vmem:[%s4525_s9 + $0x44] sm:$0xf]  ;;  %v3801_v28 = vor.u32 %v4260_v21, %v3798_v22  ;;  %v4073_v17 = vld [vmem:[%s4525_s9 + $0x164] sm:$0xf0] }
  0x7b   : > { %2241 = vmatpush.bf16.msra.mxu0 %v3865_v62  ;;  %2219 = vmatpush.bf16.msrb.mxu2 %v3225_v9  ;;  %v2902_v26 = vld [vmem:[%s4525_s9 + $0x60] sm:$0xf0]  ;;  %v3069_v9 = vor.u32 %v4081_v4, %v3068_v3  ;;  %v3292_v18 = vld [vmem:[%s4525_s9 + $0x348] sm:$0xf] }
  0x7c   : > { %2232 = vmatpush.bf16.msrb.mxu3 %v3481_v12  ;;  %v4100_v32 = vld [vmem:[%s4525_s9 + $0x244] sm:$0xf]  ;;  %v2905_v38 = vor.u32 %v4036_v25, %v2902_v26  ;;  %v4137_v20 = vld [vmem:[%s4525_s9 + $0x364] sm:$0xf0] }
  0x7d   : > { %v3158_v33 = vld [vmem:[%s4525_s9 + $0x260] sm:$0xf0]  ;;  %2207 = vmatpush.bf16.msrb.mxu1 %v2937_v23  ;;  %v3836_v52 = vld [vmem:[%s4525_s9 + $0x788] sm:$0xf] }
  0x7e   : > { %v4164_v34 = vld [vmem:[%s4525_s9 + $0x444] sm:$0xf]  ;;  %v3161_v39 = vor.u32 %v4100_v32, %v3158_v33  ;;  %v3004_v32 = vld [vmem:[%s4525_s9 + $0x108] sm:$0xf] }
  0x7f   : > { %2242 = vmatpush.bf16.msra.mxu0 %v3833_v14  ;;  %v3414_v35 = vld [vmem:[%s4525_s9 + $0x460] sm:$0xf0]  ;;  %2220 = vmatpush.bf16.msrb.mxu2 %v3193_v24  ;;  %v3325_v14 = vor.u32 %v4145_v6, %v3324_v5  ;;  %v3037_v24 = vor.u32 %v4073_v17, %v3036_v16  ;;  %v4065_v33 = vld [vmem:[%s4525_s9 + $0x124] sm:$0xf0] }
  0x80   : > { %v4252_v36 = vld [vmem:[%s4525_s9 + $0x704] sm:$0xf]  ;;  %2233 = vmatpush.bf16.msrb.mxu3 %v3449_v27  ;;  %v3417_v43 = vor.u32 %v4164_v34, %v3414_v35  ;;  %v3260_v34 = vld [vmem:[%s4525_s9 + $0x308] sm:$0xf] }
  0x81   : > { %v3766_v37 = vld [vmem:[%s4525_s9 + $0x720] sm:$0xf0]  ;;  %2208 = vmatpush.bf16.msrb.mxu1 %v2905_v38  ;;  %v4129_v35 = vld [vmem:[%s4525_s9 + $0x324] sm:$0xf0] }
  0x82   : > { %4018 = vmatmul.msk.bf16.vlgmr.msrb.gmra.mxu0 %vm2133_vm1, %v4688_v19  ;;  %v4028_v40 = vld [vmem:[%s4525_s9 + $0x4] sm:$0xf]  ;;  %v3769_v44 = vor.u32 %v4252_v36, %v3766_v37  ;;  %v3612_v36 = vld [vmem:[%s4525_s9 + $0x5c8] sm:$0xf] }
  0x83   : > { %v2870_v41 = vld [vmem:[%s4525_s9 + $0x20] sm:$0xf0]  ;;  %2243 = vmatpush.bf16.msra.mxu0 %v3801_v28  ;;  %2221 = vmatpush.bf16.msrb.mxu2 %v3161_v39  ;;  %v3293_v28 = vor.u32 %v4137_v20, %v3292_v18  ;;  %v4217_v37 = vld [vmem:[%s4525_s9 + $0x5e4] sm:$0xf0] }
  0x84   : > { %v4092_v42 = vld [vmem:[%s4525_s9 + $0x204] sm:$0xf]  ;;  %v2873_v54 = vor.u32 %v4028_v40, %v2870_v41  ;;  %2234 = vmatpush.bf16.msrb.mxu3 %v3417_v43  ;;  %v3868_v39 = vld [vmem:[%s4525_s9 + $0x7c8] sm:$0xf]  ;;  %v3261_v43 = vor.u32 %v4129_v35, %v3260_v34  ;;  %v4085_v34 = vld [vmem:[%s4525_s9 + $0x1cc] sm:$0xf] }
  0x85   : > { %v3126_v45 = vld [vmem:[%s4525_s9 + $0x220] sm:$0xf0]  ;;  %v4281_v40 = vld [vmem:[%s4525_s9 + $0x7e4] sm:$0xf0]  ;;  %v3102_v35 = vld [vmem:[%s4525_s9 + $0x1e8] sm:$0xf0] }
  0x86   : > { %v4156_v46 = vld [vmem:[%s4525_s9 + $0x404] sm:$0xf]  ;;  %v3129_v55 = vor.u32 %v4092_v42, %v3126_v45  ;;  %2209 = vmatpush.bf16.msrb.mxu1 %v2873_v54  ;;  %v3005_v42 = vor.u32 %v4065_v33, %v3004_v32  ;;  %v2972_v45 = vld [vmem:[%s4525_s9 + $0xc8] sm:$0xf] }
  0x87   : > { %v3382_v47 = vld [vmem:[%s4525_s9 + $0x420] sm:$0xf0]  ;;  %2244 = vmatpush.bf16.msra.mxu0 %v3769_v44  ;;  %v3613_v44 = vor.u32 %v4217_v37, %v3612_v36  ;;  %v4273_v53 = vld [vmem:[%s4525_s9 + $0x7a4] sm:$0xf0] }
  0x88   : > { %v4244_v48 = vld [vmem:[%s4525_s9 + $0x6c4] sm:$0xf]  ;;  %v3385_v58 = vor.u32 %v4156_v46, %v3382_v47  ;;  %2222 = vmatpush.bf16.msrb.mxu2 %v3129_v55  ;;  %v4057_v46 = vld [vmem:[%s4525_s9 + $0xe4] sm:$0xf0] }
  0x89   : > { %v3734_v49 = vld [vmem:[%s4525_s9 + $0x6e0] sm:$0xf0]  ;;  %2210 = vmatmul.bf16.vlgmr.msrb.gmra.mxu1 %v4640_v13  ;;  %v3228_v47 = vld [vmem:[%s4525_s9 + $0x2c8] sm:$0xf]  ;;  %v2973_v54 = vor.u32 %v4057_v46, %v2972_v45 }
  0x8a   : > { %v4308_v50 = vld [vmem:[%s4525_s9 + $0x8c4] sm:$0xf]  ;;  %v3737_v59 = vor.u32 %v4244_v48, %v3734_v49  ;;  %2235 = vmatpush.bf16.msrb.mxu3 %v3385_v58  ;;  %v3869_v48 = vor.u32 %v4281_v40, %v3868_v39  ;;  %v4121_v49 = vld [vmem:[%s4525_s9 + $0x2e4] sm:$0xf0] }
  0x8b   : > { %v3990_v51 = vld [vmem:[%s4525_s9 + $0x8e0] sm:$0xf0]  ;;  %2223 = vmatmul.bf16.vlgmr.msrb.gmra.mxu2 %v4670_v30  ;;  %v3229_v55 = vor.u32 %v4121_v49, %v3228_v47  ;;  %v2940_v57 = vld [vmem:[%s4525_s9 + $0x88] sm:$0xf]  ;;  %v4077_v47 = vld [vmem:[%s4525_s9 + $0x18c] sm:$0xf] }
  0x8c   : > { %v3993_v60 = vor.u32 %v4308_v50, %v3990_v51  ;;  %v4236_v62 = vld [vmem:[%s4525_s9 + $0x684] sm:$0xf]  ;;  %2245 = vmatpush.bf16.msra.mxu0 %v3737_v59  ;;  %2267 = vmatpush.bf16.msra.mxu2 %v3101_v61  ;;  %v3580_v50 = vld [vmem:[%s4525_s9 + $0x588] sm:$0xf] }
  0x8d   : > { %v3702_v63 = vld [vmem:[%s4525_s9 + $0x6a0] sm:$0xf0]  ;;  %2236 = vmatmul.bf16.vlgmr.msrb.gmra.mxu3 %v4651_v31  ;;  %v4209_v51 = vld [vmem:[%s4525_s9 + $0x5a4] sm:$0xf0] }
  0x8e   : > { %v4300_v0 = vld [vmem:[%s4525_s9 + $0x884] sm:$0xf]  ;;  %v3705_v7 = vor.u32 %v4236_v62, %v3702_v63  ;;  %2258 = vmatpush.bf16.msra.mxu1 %v3993_v60  ;;  %2280 = vmatpush.bf16.msra.mxu3 %v3357_v1  ;;  %v3581_v56 = vor.u32 %v4209_v51, %v3580_v50  ;;  %v4049_v58 = vld [vmem:[%s4525_s9 + $0xa4] sm:$0xf0]  ;;  %v3837_v60 = vor.u32 %v4273_v53, %v3836_v52 }
  0x8f   : > { %v3958_v2 = vld [vmem:[%s4525_s9 + $0x8a0] sm:$0xf0]  ;;  %v3196_v59 = vld [vmem:[%s4525_s9 + $0x288] sm:$0xf] }
  0x90   : > { %v3961_v8 = vor.u32 %v4300_v0, %v3958_v2  ;;  %v4228_v10 = vld [vmem:[%s4525_s9 + $0x644] sm:$0xf]  ;;  %2246 = vmatpush.bf16.msra.mxu0 %v3705_v7  ;;  %2268 = vmatpush.bf16.msra.mxu2 %v3069_v9  ;;  %v4113_v61 = vld [vmem:[%s4525_s9 + $0x2a4] sm:$0xf0]  ;;  %v2941_v2 = vor.u32 %v4049_v58, %v2940_v57 }
  0x91   : > { %v3670_v11 = vld [vmem:[%s4525_s9 + $0x660] sm:$0xf0]  ;;  %v3548_v62 = vld [vmem:[%s4525_s9 + $0x548] sm:$0xf]  ;;  %v3197_v3 = vor.u32 %v4113_v61, %v3196_v59  ;;  %v4069_v59 = vld [vmem:[%s4525_s9 + $0x14c] sm:$0xf] }
  0x92   : > { %v4292_v12 = vld [vmem:[%s4525_s9 + $0x844] sm:$0xf]  ;;  %v3673_v21 = vor.u32 %v4228_v10, %v3670_v11  ;;  %2259 = vmatpush.bf16.msra.mxu1 %v3961_v8  ;;  %2281 = vmatpush.bf16.msra.mxu3 %v3325_v14  ;;  %v4201_v63 = vld [vmem:[%s4525_s9 + $0x564] sm:$0xf0] }
  0x93   : > { %v3926_v15 = vld [vmem:[%s4525_s9 + $0x860] sm:$0xf0]  ;;  %v3804_v0 = vld [vmem:[%s4525_s9 + $0x748] sm:$0xf]  ;;  %v3549_v4 = vor.u32 %v4201_v63, %v3548_v62 }
  0x94   : > { %v4220_v22 = vld [vmem:[%s4525_s9 + $0x604] sm:$0xf]  ;;  %v3929_v23 = vor.u32 %v4292_v12, %v3926_v15  ;;  %2247 = vmatpush.bf16.msra.mxu0 %v3673_v21  ;;  %2269 = vmatpush.bf16.msra.mxu2 %v3037_v24  ;;  %v4265_v1 = vld [vmem:[%s4525_s9 + $0x764] sm:$0xf0] }
  0x95   : > { %v3638_v25 = vld [vmem:[%s4525_s9 + $0x620] sm:$0xf0]  ;;  %v2908_v5 = vld [vmem:[%s4525_s9 + $0x48] sm:$0xf]  ;;  %v3805_v8 = vor.u32 %v4265_v1, %v3804_v0 }
  0x96   : > { %v4284_v26 = vld [vmem:[%s4525_s9 + $0x804] sm:$0xf]  ;;  %v3641_v38 = vor.u32 %v4220_v22, %v3638_v25  ;;  %2260 = vmatpush.bf16.msra.mxu1 %v3929_v23  ;;  %2282 = vmatpush.bf16.msra.mxu3 %v3293_v28  ;;  %v4041_v6 = vld [vmem:[%s4525_s9 + $0x64] sm:$0xf0] }
  0x97   : > { %v3894_v27 = vld [vmem:[%s4525_s9 + $0x820] sm:$0xf0]  ;;  %v3164_v7 = vld [vmem:[%s4525_s9 + $0x248] sm:$0xf]  ;;  %v2909_v15 = vor.u32 %v4041_v6, %v2908_v5 }
  0x98   : > { %v3897_v41 = vor.u32 %v4284_v26, %v3894_v27  ;;  %2248 = vmatpush.bf16.msra.mxu0 %v3641_v38  ;;  %2270 = vmatpush.bf16.msra.mxu2 %v3005_v42  ;;  %v4105_v9 = vld [vmem:[%s4525_s9 + $0x264] sm:$0xf0] }
  0x99   : > { %v3516_v10 = vld [vmem:[%s4525_s9 + $0x508] sm:$0xf]  ;;  %v3165_v17 = vor.u32 %v4105_v9, %v3164_v7  ;;  %v4061_v7 = vld [vmem:[%s4525_s9 + $0x10c] sm:$0xf] }
  0x9a   : > { %2261 = vmatpush.bf16.msra.mxu1 %v3897_v41  ;;  %2283 = vmatpush.bf16.msra.mxu3 %v3261_v43  ;;  %v4193_v11 = vld [vmem:[%s4525_s9 + $0x524] sm:$0xf0]  ;;  %v3105_v43 = vor.u32 %v4085_v34, %v3102_v35  ;;  %v4149_v9 = vld [vmem:[%s4525_s9 + $0x3cc] sm:$0xf] }
  0x9b   : > { %2249 = vmatmul.bf16.vlgmr.msra.gmra.mxu0 %v4667_v29  ;;  %v3772_v12 = vld [vmem:[%s4525_s9 + $0x708] sm:$0xf]  ;;  %v3517_v18 = vor.u32 %v4193_v11, %v3516_v10  ;;  %v3358_v10 = vld [vmem:[%s4525_s9 + $0x3e8] sm:$0xf0] }
  0x9c   : > { %2293 = vmatpush.bf16.msrb.mxu0 %v3613_v44  ;;  %2271 = vmatpush.bf16.msra.mxu2 %v2973_v54  ;;  %v4257_v14 = vld [vmem:[%s4525_s9 + $0x724] sm:$0xf0]  ;;  %v4213_v11 = vld [vmem:[%s4525_s9 + $0x5cc] sm:$0xf] }
  0x9d   : > { %4019 = vmatmul.msk.bf16.vlgmr.msra.gmra.mxu1 %vm2133_vm1, %v4688_v19  ;;  %v2876_v16 = vld [vmem:[%s4525_s9 + $0x8] sm:$0xf]  ;;  %v3773_v23 = vor.u32 %v4257_v14, %v3772_v12  ;;  %v3614_v14 = vld [vmem:[%s4525_s9 + $0x5e8] sm:$0xf0] }
  0x9e   : > { %2306 = vmatpush.bf16.msrb.mxu1 %v3869_v48  ;;  %2284 = vmatpush.bf16.msra.mxu3 %v3229_v55  ;;  %v4033_v20 = vld [vmem:[%s4525_s9 + $0x24] sm:$0xf0]  ;;  %v3070_v48 = vld [vmem:[%s4525_s9 + $0x1a8] sm:$0xf0] }
  0x9f   : > { %v3132_v21 = vld [vmem:[%s4525_s9 + $0x208] sm:$0xf]  ;;  %v2877_v33 = vor.u32 %v4033_v20, %v2876_v16  ;;  %v3073_v55 = vor.u32 %v4077_v47, %v3070_v48  ;;  %v3870_v16 = vld [vmem:[%s4525_s9 + $0x7e8] sm:$0xf0] }
  0xa0   : > { %2294 = vmatpush.bf16.msrb.mxu0 %v3581_v56  ;;  %2272 = vmatpush.bf16.msra.mxu2 %v2941_v2  ;;  %v4097_v22 = vld [vmem:[%s4525_s9 + $0x224] sm:$0xf0]  ;;  %v3838_v34 = vld [vmem:[%s4525_s9 + $0x7a8] sm:$0xf0] }
  0xa1   : > { %v3484_v24 = vld [vmem:[%s4525_s9 + $0x4c8] sm:$0xf]  ;;  %v3133_v36 = vor.u32 %v4097_v22, %v3132_v21  ;;  %v3361_v21 = vor.u32 %v4149_v9, %v3358_v10  ;;  %v4053_v22 = vld [vmem:[%s4525_s9 + $0xcc] sm:$0xf] }
  0xa2   : > { %2307 = vmatpush.bf16.msrb.mxu1 %v3837_v60  ;;  %2285 = vmatpush.bf16.msra.mxu3 %v3197_v3  ;;  %v4185_v25 = vld [vmem:[%s4525_s9 + $0x4e4] sm:$0xf0]  ;;  %v3038_v60 = vld [vmem:[%s4525_s9 + $0x168] sm:$0xf0] }
  0xa3   : > { %v3740_v26 = vld [vmem:[%s4525_s9 + $0x6c8] sm:$0xf]  ;;  %v3485_v37 = vor.u32 %v4185_v25, %v3484_v24  ;;  %v3041_v5 = vor.u32 %v4069_v59, %v3038_v60  ;;  %v3617_v24 = vor.u32 %v4213_v11, %v3614_v14  ;;  %v4109_v14 = vld [vmem:[%s4525_s9 + $0x28c] sm:$0xf] }
  0xa4   : > { %2295 = vmatpush.bf16.msrb.mxu0 %v3549_v4  ;;  %v4249_v27 = vld [vmem:[%s4525_s9 + $0x6e4] sm:$0xf0]  ;;  %2273 = vmatpush.bf16.msra.mxu2 %v2909_v15  ;;  %v4277_v15 = vld [vmem:[%s4525_s9 + $0x7cc] sm:$0xf] }
  0xa5   : > { %v3996_v28 = vld [vmem:[%s4525_s9 + $0x8c8] sm:$0xf]  ;;  %v3741_v38 = vor.u32 %v4249_v27, %v3740_v26  ;;  %v3873_v25 = vor.u32 %v4277_v15, %v3870_v16  ;;  %v4141_v26 = vld [vmem:[%s4525_s9 + $0x38c] sm:$0xf] }
  0xa6   : > { %2308 = vmatpush.bf16.msrb.mxu1 %v3805_v8  ;;  %v4313_v32 = vld [vmem:[%s4525_s9 + $0x8e4] sm:$0xf0]  ;;  %2286 = vmatpush.bf16.msra.mxu3 %v3165_v17  ;;  %v3006_v8 = vld [vmem:[%s4525_s9 + $0x128] sm:$0xf0] }
  0xa7   : > { %v3997_v39 = vor.u32 %v4313_v32, %v3996_v28  ;;  %v3452_v40 = vld [vmem:[%s4525_s9 + $0x488] sm:$0xf]  ;;  %v3009_v20 = vor.u32 %v4061_v7, %v3006_v8  ;;  %v3326_v27 = vld [vmem:[%s4525_s9 + $0x3a8] sm:$0xf0] }
  0xa8   : > { %2296 = vmatpush.bf16.msrb.mxu0 %v3517_v18  ;;  %v4177_v41 = vld [vmem:[%s4525_s9 + $0x4a4] sm:$0xf0]  ;;  %2274 = vmatpush.bf16.msra.mxu2 %v2877_v33  ;;  %v4205_v28 = vld [vmem:[%s4525_s9 + $0x58c] sm:$0xf] }
  0xa9   : > { %v3708_v42 = vld [vmem:[%s4525_s9 + $0x688] sm:$0xf]  ;;  %v3453_v49 = vor.u32 %v4177_v41, %v3452_v40  ;;  %v3582_v32 = vld [vmem:[%s4525_s9 + $0x5a8] sm:$0xf0] }
  0xaa   : > { %2309 = vmatpush.bf16.msrb.mxu1 %v3773_v23  ;;  %v4241_v44 = vld [vmem:[%s4525_s9 + $0x6a4] sm:$0xf0]  ;;  %2287 = vmatpush.bf16.msra.mxu3 %v3133_v36  ;;  %v2974_v23 = vld [vmem:[%s4525_s9 + $0xe8] sm:$0xf0]  ;;  %v3329_v36 = vor.u32 %v4141_v26, %v3326_v27 }
  0xab   : > { %v3964_v45 = vld [vmem:[%s4525_s9 + $0x888] sm:$0xf]  ;;  %v3709_v50 = vor.u32 %v4241_v44, %v3708_v42  ;;  %2275 = vmatmul.bf16.vlgmr.msra.gmra.mxu2 %v4640_v13  ;;  %v4269_v33 = vld [vmem:[%s4525_s9 + $0x78c] sm:$0xf]  ;;  %v2977_v35 = vor.u32 %v4053_v22, %v2974_v23 }
  0xac   : > { %v4305_v46 = vld [vmem:[%s4525_s9 + $0x8a4] sm:$0xf0]  ;;  %2297 = vmatpush.bf16.msrb.mxu0 %v3485_v37  ;;  %2323 = vmatpush.bf16.msrb.mxu2 %v3997_v39  ;;  %v4045_v37 = vld [vmem:[%s4525_s9 + $0x8c] sm:$0xf]  ;;  %v3585_v39 = vor.u32 %v4205_v28, %v3582_v32  ;;  %v3841_v40 = vor.u32 %v4269_v33, %v3838_v34 }
  0xad   : > { %v3965_v51 = vor.u32 %v4305_v46, %v3964_v45  ;;  %v3420_v52 = vld [vmem:[%s4525_s9 + $0x448] sm:$0xf]  ;;  %2288 = vmatmul.bf16.vlgmr.msra.gmra.mxu3 %v4670_v30  ;;  %v4133_v41 = vld [vmem:[%s4525_s9 + $0x34c] sm:$0xf] }
  0xae   : > { %2310 = vmatpush.bf16.msrb.mxu1 %v3741_v38  ;;  %v4169_v53 = vld [vmem:[%s4525_s9 + $0x464] sm:$0xf0]  ;;  %2332 = vmatpush.bf16.msrb.mxu3 %v3105_v43  ;;  %v2942_v38 = vld [vmem:[%s4525_s9 + $0xa8] sm:$0xf0] }
  0xaf   : > { %v3676_v54 = vld [vmem:[%s4525_s9 + $0x648] sm:$0xf]  ;;  %v3421_v61 = vor.u32 %v4169_v53, %v3420_v52  ;;  %v3294_v42 = vld [vmem:[%s4525_s9 + $0x368] sm:$0xf0]  ;;  %v2945_v47 = vor.u32 %v4045_v37, %v2942_v38 }
  0xb0   : > { %v4233_v56 = vld [vmem:[%s4525_s9 + $0x664] sm:$0xf0]  ;;  %2298 = vmatpush.bf16.msrb.mxu0 %v3453_v49  ;;  %2324 = vmatpush.bf16.msrb.mxu2 %v3965_v51  ;;  %v4197_v43 = vld [vmem:[%s4525_s9 + $0x54c] sm:$0xf]  ;;  %v3297_v48 = vor.u32 %v4133_v41, %v3294_v42 }
  0xb1   : > { %v3932_v57 = vld [vmem:[%s4525_s9 + $0x848] sm:$0xf]  ;;  %v3677_v0 = vor.u32 %v4233_v56, %v3676_v54  ;;  %v3550_v44 = vld [vmem:[%s4525_s9 + $0x568] sm:$0xf0] }
  0xb2   : > { %v4297_v58 = vld [vmem:[%s4525_s9 + $0x864] sm:$0xf0]  ;;  %2311 = vmatpush.bf16.msrb.mxu1 %v3709_v50  ;;  %2333 = vmatpush.bf16.msrb.mxu3 %v3073_v55  ;;  %v4261_v45 = vld [vmem:[%s4525_s9 + $0x74c] sm:$0xf]  ;;  %v3553_v51 = vor.u32 %v4197_v43, %v3550_v44 }
  0xb3   : > { %v3388_v62 = vld [vmem:[%s4525_s9 + $0x408] sm:$0xf]  ;;  %v3933_v1 = vor.u32 %v4297_v58, %v3932_v57  ;;  %v3806_v46 = vld [vmem:[%s4525_s9 + $0x768] sm:$0xf0] }
  0xb4   : > { %v4161_v63 = vld [vmem:[%s4525_s9 + $0x424] sm:$0xf0]  ;;  %2299 = vmatpush.bf16.msrb.mxu0 %v3421_v61  ;;  %v4037_v49 = vld [vmem:[%s4525_s9 + $0x4c] sm:$0xf]  ;;  %v3809_v52 = vor.u32 %v4261_v45, %v3806_v46 }
  0xb5   : > { %v3644_v2 = vld [vmem:[%s4525_s9 + $0x608] sm:$0xf]  ;;  %v3389_v12 = vor.u32 %v4161_v63, %v3388_v62  ;;  %2325 = vmatpush.bf16.msrb.mxu2 %v3933_v1  ;;  %v2910_v50 = vld [vmem:[%s4525_s9 + $0x68] sm:$0xf0] }
  0xb6   : > { %v4225_v3 = vld [vmem:[%s4525_s9 + $0x624] sm:$0xf0]  ;;  %2312 = vmatpush.bf16.msrb.mxu1 %v3677_v0  ;;  %2334 = vmatpush.bf16.msrb.mxu3 %v3041_v5  ;;  %v4125_v53 = vld [vmem:[%s4525_s9 + $0x30c] sm:$0xf]  ;;  %v2913_v59 = vor.u32 %v4037_v49, %v2910_v50 }
  0xb7   : > { %v3900_v4 = vld [vmem:[%s4525_s9 + $0x808] sm:$0xf]  ;;  %v3645_v17 = vor.u32 %v4225_v3, %v3644_v2  ;;  %v3262_v54 = vld [vmem:[%s4525_s9 + $0x328] sm:$0xf0] }
  0xb8   : > { %v4289_v6 = vld [vmem:[%s4525_s9 + $0x824] sm:$0xf0]  ;;  %2300 = vmatpush.bf16.msrb.mxu0 %v3389_v12  ;;  %v4189_v55 = vld [vmem:[%s4525_s9 + $0x50c] sm:$0xf]  ;;  %v3265_v60 = vor.u32 %v4125_v53, %v3262_v54  ;;  %v3364_v53 = vld [vmem:[%s4525_s9 + $0x3d0] sm:$0xf] }
  0xb9   : > { %v3901_v18 = vor.u32 %v4289_v6, %v3900_v4  ;;  %v3518_v56 = vld [vmem:[%s4525_s9 + $0x528] sm:$0xf0] }
  0xba   : > { %2313 = vmatpush.bf16.msrb.mxu1 %v3645_v17  ;;  %2335 = vmatpush.bf16.msrb.mxu3 %v3009_v20  ;;  %v4253_v57 = vld [vmem:[%s4525_s9 + $0x70c] sm:$0xf]  ;;  %v3521_v63 = vor.u32 %v4189_v55, %v3518_v56  ;;  %v4154_v55 = vld [vmem:[%s4525_s9 + $0x3ec] sm:$0xf0] }
  0xbb   : > { %2326 = vmatpush.bf16.msrb.mxu2 %v3901_v18  ;;  %2301 = vmatmul.bf16.vlgmr.msrb.gmra.mxu0 %v4651_v31  ;;  %v3774_v58 = vld [vmem:[%s4525_s9 + $0x728] sm:$0xf0]  ;;  %v3620_v56 = vld [vmem:[%s4525_s9 + $0x5d0] sm:$0xf] }
  0xbc   : > { %2345 = vmatpush.bf16.msra.mxu0 %v3361_v21  ;;  %v4029_v61 = vld [vmem:[%s4525_s9 + $0xc] sm:$0xf]  ;;  %v3777_v0 = vor.u32 %v4253_v57, %v3774_v58  ;;  %v4218_v57 = vld [vmem:[%s4525_s9 + $0x5ec] sm:$0xf0] }
  0xbd   : > { %2314 = vmatmul.bf16.vlgmr.msrb.gmra.mxu1 %v4667_v29  ;;  %v2878_v62 = vld [vmem:[%s4525_s9 + $0x28] sm:$0xf0] }
  0xbe   : > { %2358 = vmatpush.bf16.msra.mxu1 %v3617_v24  ;;  %2336 = vmatpush.bf16.msrb.mxu3 %v2977_v35  ;;  %v4117_v1 = vld [vmem:[%s4525_s9 + $0x2cc] sm:$0xf]  ;;  %v2881_v9 = vor.u32 %v4029_v61, %v2878_v62  ;;  %v4282_v61 = vld [vmem:[%s4525_s9 + $0x7ec] sm:$0xf0] }
  0xbf   : > { %2371 = vmatpush.bf16.msra.mxu2 %v3873_v25  ;;  %v3230_v2 = vld [vmem:[%s4525_s9 + $0x2e8] sm:$0xf0] }
  0xc0   : > { %2346 = vmatpush.bf16.msra.mxu0 %v3329_v36  ;;  %4020 = vmatmul.msk.bf16.vlgmr.msrb.gmra.mxu2 %vm2133_vm1, %v4688_v19  ;;  %v4181_v3 = vld [vmem:[%s4525_s9 + $0x4cc] sm:$0xf]  ;;  %v3233_v10 = vor.u32 %v4117_v1, %v3230_v2  ;;  %v3621_v1 = vor.u32 %v4218_v57, %v3620_v56  ;;  %v3076_v2 = vld [vmem:[%s4525_s9 + $0x190] sm:$0xf] }
  0xc1   : > { %v3486_v4 = vld [vmem:[%s4525_s9 + $0x4e8] sm:$0xf0]  ;;  %v4050_v56 = vld [vmem:[%s4525_s9 + $0xac] sm:$0xf0] }
  0xc2   : > { %2359 = vmatpush.bf16.msra.mxu1 %v3585_v39  ;;  %2337 = vmatpush.bf16.msrb.mxu3 %v2945_v47  ;;  %v4245_v5 = vld [vmem:[%s4525_s9 + $0x6cc] sm:$0xf]  ;;  %v3489_v11 = vor.u32 %v4181_v3, %v3486_v4  ;;  %v4082_v3 = vld [vmem:[%s4525_s9 + $0x1ac] sm:$0xf0] }
  0xc3   : > { %2372 = vmatpush.bf16.msra.mxu2 %v3841_v40  ;;  %v3742_v6 = vld [vmem:[%s4525_s9 + $0x6e8] sm:$0xf0]  ;;  %v3332_v4 = vld [vmem:[%s4525_s9 + $0x390] sm:$0xf] }
  0xc4   : > { %2347 = vmatpush.bf16.msra.mxu0 %v3297_v48  ;;  %v4309_v7 = vld [vmem:[%s4525_s9 + $0x8cc] sm:$0xf]  ;;  %v3745_v12 = vor.u32 %v4245_v5, %v3742_v6  ;;  %v4146_v6 = vld [vmem:[%s4525_s9 + $0x3ac] sm:$0xf0] }
  0xc5   : > { %v3998_v8 = vld [vmem:[%s4525_s9 + $0x8e8] sm:$0xf0]  ;;  %v3204_v57 = vld [vmem:[%s4525_s9 + $0x290] sm:$0xf] }
  0xc6   : > { %2360 = vmatpush.bf16.msra.mxu1 %v3553_v51  ;;  %2338 = vmatpush.bf16.msrb.mxu3 %v2913_v59  ;;  %v3198_v15 = vld [vmem:[%s4525_s9 + $0x2a8] sm:$0xf0]  ;;  %v4001_v17 = vor.u32 %v4309_v7, %v3998_v8  ;;  %v3108_v51 = vld [vmem:[%s4525_s9 + $0x1d0] sm:$0xf] }
  0xc7   : > { %2373 = vmatpush.bf16.msra.mxu2 %v3809_v52  ;;  %v4173_v16 = vld [vmem:[%s4525_s9 + $0x48c] sm:$0xf]  ;;  %v3201_v24 = vor.u32 %v4109_v14, %v3198_v15  ;;  %v4090_v52 = vld [vmem:[%s4525_s9 + $0x1ec] sm:$0xf0] }
  0xc8   : > { %2348 = vmatpush.bf16.msra.mxu0 %v3265_v60  ;;  %v3454_v18 = vld [vmem:[%s4525_s9 + $0x4a8] sm:$0xf0]  ;;  %v3876_v60 = vld [vmem:[%s4525_s9 + $0x7d0] sm:$0xf] }
  0xc9   : > { %v4237_v20 = vld [vmem:[%s4525_s9 + $0x68c] sm:$0xf]  ;;  %v3457_v25 = vor.u32 %v4173_v16, %v3454_v18  ;;  %v3877_v5 = vor.u32 %v4282_v61, %v3876_v60  ;;  %v3588_v7 = vld [vmem:[%s4525_s9 + $0x590] sm:$0xf] }
  0xca   : > { %2361 = vmatpush.bf16.msra.mxu1 %v3521_v63  ;;  %v3710_v21 = vld [vmem:[%s4525_s9 + $0x6a8] sm:$0xf0]  ;;  %2339 = vmatpush.bf16.msrb.mxu3 %v2881_v9  ;;  %v3109_v63 = vor.u32 %v4090_v52, %v3108_v51  ;;  %v4210_v8 = vld [vmem:[%s4525_s9 + $0x5ac] sm:$0xf0] }
  0xcb   : > { %2374 = vmatpush.bf16.msra.mxu2 %v3777_v0  ;;  %v4301_v22 = vld [vmem:[%s4525_s9 + $0x88c] sm:$0xf]  ;;  %v3713_v26 = vor.u32 %v4237_v20, %v3710_v21  ;;  %v3365_v0 = vor.u32 %v4154_v55, %v3364_v53  ;;  %v3844_v9 = vld [vmem:[%s4525_s9 + $0x790] sm:$0xf]  ;;  %v3589_v14 = vor.u32 %v4210_v8, %v3588_v7 }
  0xcc   : > { %v3966_v23 = vld [vmem:[%s4525_s9 + $0x8a8] sm:$0xf0]  ;;  %2349 = vmatpush.bf16.msra.mxu0 %v3233_v10  ;;  %v4274_v10 = vld [vmem:[%s4525_s9 + $0x7ac] sm:$0xf0] }
  0xcd   : > { %v4101_v27 = vld [vmem:[%s4525_s9 + $0x24c] sm:$0xf]  ;;  %v3969_v33 = vor.u32 %v4301_v22, %v3966_v23  ;;  %2340 = vmatmul.bf16.vlgmr.msrb.gmra.mxu3 %v4640_v13  ;;  %v3044_v15 = vld [vmem:[%s4525_s9 + $0x150] sm:$0xf]  ;;  %v3845_v18 = vor.u32 %v4274_v10, %v3844_v9 }
  0xce   : > { %2362 = vmatpush.bf16.msra.mxu1 %v3489_v11  ;;  %v3166_v28 = vld [vmem:[%s4525_s9 + $0x268] sm:$0xf0]  ;;  %2388 = vmatpush.bf16.msra.mxu3 %v4001_v17  ;;  %v3077_v11 = vor.u32 %v4082_v3, %v3076_v2  ;;  %v4074_v16 = vld [vmem:[%s4525_s9 + $0x16c] sm:$0xf0] }
  0xcf   : > { %2375 = vmatpush.bf16.msra.mxu2 %v3745_v12  ;;  %v4165_v32 = vld [vmem:[%s4525_s9 + $0x44c] sm:$0xf]  ;;  %v3169_v39 = vor.u32 %v4101_v27, %v3166_v28  ;;  %v3333_v12 = vor.u32 %v4146_v6, %v3332_v4  ;;  %v3300_v17 = vld [vmem:[%s4525_s9 + $0x350] sm:$0xf] }
  0xd0   : > { %v3422_v34 = vld [vmem:[%s4525_s9 + $0x468] sm:$0xf0]  ;;  %2350 = vmatpush.bf16.msra.mxu0 %v3201_v24  ;;  %v4138_v20 = vld [vmem:[%s4525_s9 + $0x36c] sm:$0xf0] }
  0xd1   : > { %v4229_v35 = vld [vmem:[%s4525_s9 + $0x64c] sm:$0xf]  ;;  %v3425_v42 = vor.u32 %v4165_v32, %v3422_v34  ;;  %v3556_v21 = vld [vmem:[%s4525_s9 + $0x550] sm:$0xf] }
  0xd2   : > { %v3678_v36 = vld [vmem:[%s4525_s9 + $0x668] sm:$0xf0]  ;;  %2363 = vmatpush.bf16.msra.mxu1 %v3457_v25  ;;  %2389 = vmatpush.bf16.msra.mxu3 %v3969_v33  ;;  %v4202_v22 = vld [vmem:[%s4525_s9 + $0x56c] sm:$0xf0]  ;;  %v3045_v25 = vor.u32 %v4074_v16, %v3044_v15 }
  0xd3   : > { %v4293_v37 = vld [vmem:[%s4525_s9 + $0x84c] sm:$0xf]  ;;  %2376 = vmatpush.bf16.msra.mxu2 %v3713_v26  ;;  %v3681_v43 = vor.u32 %v4229_v35, %v3678_v36  ;;  %v3812_v23 = vld [vmem:[%s4525_s9 + $0x750] sm:$0xf]  ;;  %v3301_v26 = vor.u32 %v4138_v20, %v3300_v17  ;;  %v3557_v27 = vor.u32 %v4202_v22, %v3556_v21 }
  0xd4   : > { %v3934_v38 = vld [vmem:[%s4525_s9 + $0x868] sm:$0xf0]  ;;  %2351 = vmatpush.bf16.msra.mxu0 %v3169_v39  ;;  %v4266_v24 = vld [vmem:[%s4525_s9 + $0x76c] sm:$0xf0] }
  0xd5   : > { %v4093_v40 = vld [vmem:[%s4525_s9 + $0x20c] sm:$0xf]  ;;  %v3937_v47 = vor.u32 %v4293_v37, %v3934_v38  ;;  %v3012_v28 = vld [vmem:[%s4525_s9 + $0x110] sm:$0xf]  ;;  %v3813_v34 = vor.u32 %v4266_v24, %v3812_v23 }
  0xd6   : > { %v3134_v41 = vld [vmem:[%s4525_s9 + $0x228] sm:$0xf0]  ;;  %2364 = vmatpush.bf16.msra.mxu1 %v3425_v42  ;;  %v4066_v32 = vld [vmem:[%s4525_s9 + $0x12c] sm:$0xf0] }
  0xd7   : > { %v4157_v44 = vld [vmem:[%s4525_s9 + $0x40c] sm:$0xf]  ;;  %v3137_v54 = vor.u32 %v4093_v40, %v3134_v41  ;;  %2377 = vmatpush.bf16.msra.mxu2 %v3681_v43  ;;  %2390 = vmatpush.bf16.msra.mxu3 %v3937_v47  ;;  %v3268_v33 = vld [vmem:[%s4525_s9 + $0x310] sm:$0xf]  ;;  %v3013_v40 = vor.u32 %v4066_v32, %v3012_v28  ;;  %v4086_v32 = vld [vmem:[%s4525_s9 + $0x1d4] sm:$0xf] }
  0xd8   : > { %v3390_v45 = vld [vmem:[%s4525_s9 + $0x428] sm:$0xf0]  ;;  %v4130_v35 = vld [vmem:[%s4525_s9 + $0x32c] sm:$0xf0] }
  0xd9   : > { %v4221_v46 = vld [vmem:[%s4525_s9 + $0x60c] sm:$0xf]  ;;  %v3393_v58 = vor.u32 %v4157_v44, %v3390_v45  ;;  %2352 = vmatpush.bf16.msra.mxu0 %v3137_v54  ;;  %v3524_v36 = vld [vmem:[%s4525_s9 + $0x510] sm:$0xf]  ;;  %v3269_v41 = vor.u32 %v4130_v35, %v3268_v33  ;;  %v3110_v35 = vld [vmem:[%s4525_s9 + $0x1f0] sm:$0xf0] }
  0xda   : > { %v3646_v48 = vld [vmem:[%s4525_s9 + $0x628] sm:$0xf0]  ;;  %v4194_v37 = vld [vmem:[%s4525_s9 + $0x52c] sm:$0xf0] }
  0xdb   : > { %v4285_v49 = vld [vmem:[%s4525_s9 + $0x80c] sm:$0xf]  ;;  %v3649_v59 = vor.u32 %v4221_v46, %v3646_v48  ;;  %2365 = vmatpush.bf16.msra.mxu1 %v3393_v58  ;;  %v3780_v38 = vld [vmem:[%s4525_s9 + $0x710] sm:$0xf]  ;;  %v3525_v42 = vor.u32 %v4194_v37, %v3524_v36  ;;  %v4150_v36 = vld [vmem:[%s4525_s9 + $0x3d4] sm:$0xf] }
  0xdc   : > { %v3902_v50 = vld [vmem:[%s4525_s9 + $0x828] sm:$0xf0]  ;;  %2353 = vmatmul.bf16.vlgmr.msra.gmra.mxu0 %v4670_v30  ;;  %v4258_v39 = vld [vmem:[%s4525_s9 + $0x72c] sm:$0xf0]  ;;  %v3366_v37 = vld [vmem:[%s4525_s9 + $0x3f0] sm:$0xf0] }
  0xdd   : > { %v3905_v62 = vor.u32 %v4285_v49, %v3902_v50  ;;  %2378 = vmatpush.bf16.msra.mxu2 %v3649_v59  ;;  %2397 = vmatpush.bf16.msrb.mxu0 %v3109_v63  ;;  %v2980_v43 = vld [vmem:[%s4525_s9 + $0xd0] sm:$0xf]  ;;  %v3781_v46 = vor.u32 %v4258_v39, %v3780_v38 }
  0xde   : > { %2366 = vmatmul.bf16.vlgmr.msra.gmra.mxu1 %v4651_v31  ;;  %v4058_v44 = vld [vmem:[%s4525_s9 + $0xec] sm:$0xf0] }
  0xdf   : > { %2391 = vmatpush.bf16.msra.mxu3 %v3905_v62  ;;  %2410 = vmatpush.bf16.msrb.mxu1 %v3365_v0  ;;  %v3236_v45 = vld [vmem:[%s4525_s9 + $0x2d0] sm:$0xf]  ;;  %v2981_v52 = vor.u32 %v4058_v44, %v2980_v43 }
  0xe0   : > { %2379 = vmatmul.bf16.vlgmr.msra.gmra.mxu2 %v4667_v29  ;;  %v4122_v47 = vld [vmem:[%s4525_s9 + $0x2ec] sm:$0xf0] }
  0xe1   : > { %2423 = vmatpush.bf16.msrb.mxu2 %v3621_v1  ;;  %2398 = vmatpush.bf16.msrb.mxu0 %v3077_v11  ;;  %v3492_v48 = vld [vmem:[%s4525_s9 + $0x4d0] sm:$0xf]  ;;  %v3237_v53 = vor.u32 %v4122_v47, %v3236_v45  ;;  %v3113_v45 = vor.u32 %v4086_v32, %v3110_v35  ;;  %v4054_v35 = vld [vmem:[%s4525_s9 + $0xd4] sm:$0xf] }
  0xe2   : > { %4021 = vmatmul.msk.bf16.vlgmr.msra.gmra.mxu3 %vm2133_vm1, %v4688_v19  ;;  %v4186_v49 = vld [vmem:[%s4525_s9 + $0x4ec] sm:$0xf0] }
  0xe3   : > { %2436 = vmatpush.bf16.msrb.mxu3 %v3877_v5  ;;  %2411 = vmatpush.bf16.msrb.mxu1 %v3333_v12  ;;  %v3748_v50 = vld [vmem:[%s4525_s9 + $0x6d0] sm:$0xf]  ;;  %v3493_v54 = vor.u32 %v4186_v49, %v3492_v48  ;;  %v4078_v49 = vld [vmem:[%s4525_s9 + $0x194] sm:$0xf] }
  0xe4   : > { %v4250_v51 = vld [vmem:[%s4525_s9 + $0x6ec] sm:$0xf0] }
  0xe5   : > { %2424 = vmatpush.bf16.msrb.mxu2 %v3589_v14  ;;  %2399 = vmatpush.bf16.msrb.mxu0 %v3045_v25  ;;  %v2948_v55 = vld [vmem:[%s4525_s9 + $0x90] sm:$0xf]  ;;  %v3749_v58 = vor.u32 %v4250_v51, %v3748_v50  ;;  %v4952_v14 = vld [vmem:[%s4944_s14] sm:$0xff]  ;;  %v3078_v51 = vld [vmem:[%s4525_s9 + $0x1b0] sm:$0xf0] }
  0xe6   : > { %v4114_v59 = vld [vmem:[%s4525_s9 + $0x2ac] sm:$0xf0]  ;;  %v2949_v0 = vor.u32 %v4050_v56, %v2948_v55  ;;  %v637_v38 = vperm.slane %v4952_v14, 0  ;;  %v4206_v55 = vld [vmem:[%s4525_s9 + $0x594] sm:$0xf] }
  0xe7   : > { %2437 = vmatpush.bf16.msrb.mxu3 %v3845_v18  ;;  %2412 = vmatpush.bf16.msrb.mxu1 %v3301_v26  ;;  %v3460_v60 = vld [vmem:[%s4525_s9 + $0x490] sm:$0xf]  ;;  %v3205_v1 = vor.u32 %v4114_v59, %v3204_v57  ;;  %v3590_v56 = vld [vmem:[%s4525_s9 + $0x5b0] sm:$0xf0] }
  0xe8   : > { %v4178_v61 = vld [vmem:[%s4525_s9 + $0x4ac] sm:$0xf0] }
  0xe9   : > { %2425 = vmatpush.bf16.msrb.mxu2 %v3557_v27  ;;  %2400 = vmatpush.bf16.msrb.mxu0 %v3013_v40  ;;  %v3716_v62 = vld [vmem:[%s4525_s9 + $0x690] sm:$0xf]  ;;  %v3461_v2 = vor.u32 %v4178_v61, %v3460_v60 }
  0xea   : > { %v4242_v63 = vld [vmem:[%s4525_s9 + $0x6ac] sm:$0xf0] }
  0xeb   : > { %2438 = vmatpush.bf16.msrb.mxu3 %v3813_v34  ;;  %2413 = vmatpush.bf16.msrb.mxu1 %v3269_v41  ;;  %v2916_v3 = vld [vmem:[%s4525_s9 + $0x50] sm:$0xf]  ;;  %v3717_v6 = vor.u32 %v4242_v63, %v3716_v62  ;;  %v4214_v41 = vld [vmem:[%s4525_s9 + $0x5d4] sm:$0xf]  ;;  %v3593_v63 = vor.u32 %v4206_v55, %v3590_v56 }
  0xec   : > { %v4042_v4 = vld [vmem:[%s4525_s9 + $0x6c] sm:$0xf0]  ;;  %v4070_v62 = vld [vmem:[%s4525_s9 + $0x154] sm:$0xf] }
  0xed   : > { %2426 = vmatpush.bf16.msrb.mxu2 %v3525_v42  ;;  %2401 = vmatpush.bf16.msrb.mxu0 %v2981_v52  ;;  %v3172_v5 = vld [vmem:[%s4525_s9 + $0x250] sm:$0xf]  ;;  %v2917_v12 = vor.u32 %v4042_v4, %v2916_v3  ;;  %v3622_v42 = vld [vmem:[%s4525_s9 + $0x5f0] sm:$0xf0] }
  0xee   : > { %v4106_v7 = vld [vmem:[%s4525_s9 + $0x26c] sm:$0xf0]  ;;  %v3625_v50 = vor.u32 %v4214_v41, %v3622_v42  ;;  %v4142_v52 = vld [vmem:[%s4525_s9 + $0x394] sm:$0xf] }
  0xef   : > { %2439 = vmatpush.bf16.msrb.mxu3 %v3781_v46  ;;  %2414 = vmatpush.bf16.msrb.mxu1 %v3237_v53  ;;  %v3428_v8 = vld [vmem:[%s4525_s9 + $0x450] sm:$0xf]  ;;  %v3173_v17 = vor.u32 %v4106_v7, %v3172_v5  ;;  %v2146_v33 = vpop.f32.mrf.mxu0  ;;  %v3369_v46 = vor.u32 %v4150_v36, %v3366_v37  ;;  %v3334_v53 = vld [vmem:[%s4525_s9 + $0x3b0] sm:$0xf0] }
  0xf0   : > { %v4170_v9 = vld [vmem:[%s4525_s9 + $0x46c] sm:$0xf0]  ;;  %v3337_v59 = vor.u32 %v4142_v52, %v3334_v53  ;;  %v4134_v3 = vld [vmem:[%s4525_s9 + $0x354] sm:$0xf] }
  0xf1   : > { %2427 = vmatpush.bf16.msrb.mxu2 %v3493_v54  ;;  %v3684_v10 = vld [vmem:[%s4525_s9 + $0x650] sm:$0xf]  ;;  %2402 = vmatpush.bf16.msrb.mxu0 %v2949_v0  ;;  %v3429_v18 = vor.u32 %v4170_v9, %v3428_v8  ;;  %v2147_v54 = vadd.f32 %v2146_v33, %v637_v38  ;;  %v3302_v4 = vld [vmem:[%s4525_s9 + $0x370] sm:$0xf0] }
  0xf2   : > { %v4234_v11 = vld [vmem:[%s4525_s9 + $0x66c] sm:$0xf0]  ;;  %v3558_v7 = vld [vmem:[%s4525_s9 + $0x570] sm:$0xf0] }
  0xf3   : > { %2440 = vmatpush.bf16.msrb.mxu3 %v3749_v58  ;;  %v2884_v15 = vld [vmem:[%s4525_s9 + $0x10] sm:$0xf]  ;;  %2415 = vmatpush.bf16.msrb.mxu1 %v3205_v1  ;;  %v3685_v23 = vor.u32 %v4234_v11, %v3684_v10  ;;  %v3081_v58 = vor.u32 %v4078_v49, %v3078_v51  ;;  %v2159_v1 = vpop.f32.mrf.mxu1  ;;  %v2982_v36 = vld [vmem:[%s4525_s9 + $0xf0] sm:$0xf0] }
  0xf4   : > { %v4034_v16 = vld [vmem:[%s4525_s9 + $0x2c] sm:$0xf0]  ;;  %v2160_v5 = vadd.f32 %v2159_v1, %v2147_v54  ;;  %v3238_v41 = vld [vmem:[%s4525_s9 + $0x2f0] sm:$0xf0]  ;;  %v2985_v49 = vor.u32 %v4054_v35, %v2982_v36 }
  0xf5   : > { %2428 = vmatpush.bf16.msrb.mxu2 %v3461_v2  ;;  %v3140_v20 = vld [vmem:[%s4525_s9 + $0x210] sm:$0xf]  ;;  %2403 = vmatpush.bf16.msrb.mxu0 %v2917_v12  ;;  %v2885_v34 = vor.u32 %v4034_v16, %v2884_v15  ;;  %v3046_v2 = vld [vmem:[%s4525_s9 + $0x170] sm:$0xf0]  ;;  %v2172_v8 = vpop.f32.mrf.mxu2  ;;  %v3305_v12 = vor.u32 %v4134_v3, %v3302_v4 }
  0xf6   : > { %v4098_v21 = vld [vmem:[%s4525_s9 + $0x22c] sm:$0xf0]  ;;  %v3049_v11 = vor.u32 %v4070_v62, %v3046_v2  ;;  %v2173_v15 = vadd.f32 %v2172_v8, %v2160_v5  ;;  %v4182_v42 = vld [vmem:[%s4525_s9 + $0x4d4] sm:$0xf] }
  0xf7   : > { %v3396_v22 = vld [vmem:[%s4525_s9 + $0x410] sm:$0xf]  ;;  %2441 = vmatpush.bf16.msrb.mxu3 %v3717_v6  ;;  %2416 = vmatpush.bf16.msrb.mxu1 %v3173_v17  ;;  %v3141_v39 = vor.u32 %v4098_v21, %v3140_v20  ;;  %v2148_v0 = vpop.f32.mrf.mxu0  ;;  %v4198_v6 = vld [vmem:[%s4525_s9 + $0x554] sm:$0xf] }
  0xf8   : > { %v4162_v24 = vld [vmem:[%s4525_s9 + $0x42c] sm:$0xf0]  ;;  %v4062_v17 = vld [vmem:[%s4525_s9 + $0x114] sm:$0xf]  ;;  %v3561_v20 = vor.u32 %v4198_v6, %v3558_v7 }
  0xf9   : > { %v3652_v25 = vld [vmem:[%s4525_s9 + $0x610] sm:$0xf]  ;;  %2429 = vmatpush.bf16.msrb.mxu2 %v3429_v18  ;;  %v3397_v40 = vor.u32 %v4162_v24, %v3396_v22  ;;  %2404 = vmatpush.bf16.msrb.mxu0 %v2885_v34  ;;  %v3014_v18 = vld [vmem:[%s4525_s9 + $0x130] sm:$0xf0] }
  0xfa   : > { %v4226_v26 = vld [vmem:[%s4525_s9 + $0x62c] sm:$0xf0]  ;;  %v4126_v21 = vld [vmem:[%s4525_s9 + $0x314] sm:$0xf]  ;;  %v3017_v33 = vor.u32 %v4062_v17, %v3014_v18 }
  0xfb   : > { %v4004_v27 = vld [vmem:[%s4525_s9 + $0x8d0] sm:$0xf]  ;;  %2442 = vmatpush.bf16.msrb.mxu3 %v3685_v23  ;;  %v3653_v43 = vor.u32 %v4226_v26, %v3652_v25  ;;  %2417 = vmatpush.bf16.msrb.mxu1 %v3141_v39  ;;  %v3270_v22 = vld [vmem:[%s4525_s9 + $0x330] sm:$0xf0] }
  0xfc   : > { %v4314_v28 = vld [vmem:[%s4525_s9 + $0x8ec] sm:$0xf0]  ;;  %2405 = vmatmul.bf16.vlgmr.msrb.gmra.mxu0 %v4640_v13  ;;  %v4190_v23 = vld [vmem:[%s4525_s9 + $0x514] sm:$0xf]  ;;  %v3273_v34 = vor.u32 %v4126_v21, %v3270_v22 }
  0xfd   : > { %v4005_v44 = vor.u32 %v4314_v28, %v4004_v27  ;;  %v3972_v47 = vld [vmem:[%s4525_s9 + $0x890] sm:$0xf]  ;;  %2430 = vmatpush.bf16.msrb.mxu2 %v3397_v40  ;;  %v3526_v24 = vld [vmem:[%s4525_s9 + $0x530] sm:$0xf0]  ;;  %v2185_v27 = vpop.f32.mrf.mxu3 }
  0xfe   : > { %v4306_v48 = vld [vmem:[%s4525_s9 + $0x8ac] sm:$0xf0]  ;;  %2418 = vmatmul.bf16.vlgmr.msrb.gmra.mxu1 %v4670_v30  ;;  %v4278_v25 = vld [vmem:[%s4525_s9 + $0x7d4] sm:$0xf]  ;;  %v2186_v32 = vadd.f32 %v2185_v27, %v2173_v15  ;;  %v3529_v37 = vor.u32 %v4190_v23, %v3526_v24 }
  0xff   : > { %2443 = vmatpush.bf16.msrb.mxu3 %v3653_v43  ;;  %2453 = vmatpush.bf16.msra.mxu0 %v4005_v44  ;;  %v3973_v57 = vor.u32 %v4306_v48, %v3972_v47  ;;  %v3940_v60 = vld [vmem:[%s4525_s9 + $0x850] sm:$0xf]  ;;  %v3878_v26 = vld [vmem:[%s4525_s9 + $0x7f0] sm:$0xf0]  ;;  %v2198_v39 = vpop.f32.mrf.mxu0  ;;  %v2161_v43 = vpop.f32.mrf.mxu1 }
 0x100   : > { %2462 = vmatpush.bf16.msra.mxu1 %v3113_v45  ;;  %v4298_v61 = vld [vmem:[%s4525_s9 + $0x86c] sm:$0xf0]  ;;  %2431 = vmatmul.bf16.vlgmr.msrb.gmra.mxu2 %v4651_v31  ;;  %v3881_v38 = vor.u32 %v4278_v25, %v3878_v26  ;;  %v4118_v40 = vld [vmem:[%s4525_s9 + $0x2d4] sm:$0xf]  ;;  %v5006_v44 = vadd.f32 %v2198_v39, %v2186_v32  ;;  %v2174_v48 = vpop.f32.mrf.mxu2 }
 0x101   : > { %2475 = vmatpush.bf16.msra.mxu2 %v3369_v46  ;;  %v3941_v9 = vor.u32 %v4298_v61, %v3940_v60  ;;  %v3908_v10 = vld [vmem:[%s4525_s9 + $0x810] sm:$0xf]  ;;  %v3494_v45 = vld [vmem:[%s4525_s9 + $0x4f0] sm:$0xf0] }
 0x102   : > { %2444 = vmatmul.bf16.vlgmr.msrb.gmra.mxu3 %v4667_v29  ;;  %v4290_v16 = vld [vmem:[%s4525_s9 + $0x82c] sm:$0xf0]  ;;  %v4270_v46 = vld [vmem:[%s4525_s9 + $0x794] sm:$0xf]  ;;  %v3497_v53 = vor.u32 %v4182_v42, %v3494_v45 }
 0x103   : > { %2488 = vmatpush.bf16.msra.mxu3 %v3625_v50  ;;  %2454 = vmatpush.bf16.msra.mxu0 %v3973_v57  ;;  %v3909_v28 = vor.u32 %v4290_v16, %v3908_v10  ;;  %v3846_v47 = vld [vmem:[%s4525_s9 + $0x7b0] sm:$0xf0]  ;;  %v3241_v50 = vor.u32 %v4118_v40, %v3238_v41 }
 0x104   : > { %2463 = vmatpush.bf16.msra.mxu1 %v3081_v58  ;;  %v4046_v51 = vld [vmem:[%s4525_s9 + $0x94] sm:$0xf]  ;;  %v3849_v54 = vor.u32 %v4270_v46, %v3846_v47 }
 0x105   : > { %2476 = vmatpush.bf16.msra.mxu2 %v3337_v59  ;;  %v2950_v52 = vld [vmem:[%s4525_s9 + $0xb0] sm:$0xf0]  ;;  %v2187_v61 = vpop.f32.mrf.mxu3 }
 0x106   : > { %v4110_v55 = vld [vmem:[%s4525_s9 + $0x294] sm:$0xf]  ;;  %v2953_v62 = vor.u32 %v4046_v51, %v2950_v52  ;;  %v4083_v51 = vld [vmem:[%s4525_s9 + $0x1b4] sm:$0xf0] }
 0x107   : > { %2489 = vmatpush.bf16.msra.mxu3 %v3593_v63  ;;  %2455 = vmatpush.bf16.msra.mxu0 %v3941_v9  ;;  %v3206_v56 = vld [vmem:[%s4525_s9 + $0x2b0] sm:$0xf0]  ;;  %v2200_v7 = vpop.f32.mrf.mxu0  ;;  %v2211_v25 = vpop.f32.mrf.mxu1  ;;  %v3340_v52 = vld [vmem:[%s4525_s9 + $0x398] sm:$0xf] }
 0x108   : > { %2464 = vmatpush.bf16.msra.mxu1 %v3049_v11  ;;  %v4174_v57 = vld [vmem:[%s4525_s9 + $0x494] sm:$0xf]  ;;  %v3209_v63 = vor.u32 %v4110_v55, %v3206_v56  ;;  %v638_v11 = vperm.slane %v4952_v14, 1 }
 0x109   : > { %2477 = vmatpush.bf16.msra.mxu2 %v3305_v12  ;;  %v3462_v58 = vld [vmem:[%s4525_s9 + $0x4b0] sm:$0xf0] }
 0x10a   : > { %v4262_v59 = vld [vmem:[%s4525_s9 + $0x754] sm:$0xf]  ;;  %v3465_v2 = vor.u32 %v4174_v57, %v3462_v58  ;;  %v2212_v41 = vadd.f32 %v2211_v25, %v638_v11  ;;  %v2657_v58 = vadd.f32 3.0, %v5006_v44  ;;  %v4131_v25 = vld [vmem:[%s4525_s9 + $0x334] sm:$0xf0] }
 0x10b   : > { %2490 = vmatpush.bf16.msra.mxu3 %v3561_v20  ;;  %2456 = vmatpush.bf16.msra.mxu0 %v3909_v28  ;;  %v3814_v60 = vld [vmem:[%s4525_s9 + $0x770] sm:$0xf0] }
 0x10c   : > { %2465 = vmatpush.bf16.msra.mxu1 %v3017_v33  ;;  %v4038_v0 = vld [vmem:[%s4525_s9 + $0x54] sm:$0xf]  ;;  %v3817_v3 = vor.u32 %v4262_v59, %v3814_v60  ;;  %v3116_v33 = vld [vmem:[%s4525_s9 + $0x1d8] sm:$0xf]  ;;  %v2665_v11 = vmax.f32 %v2657_v58, 0.0 }
 0x10d   : > { %2478 = vmatpush.bf16.msra.mxu2 %v3273_v34  ;;  %v2918_v1 = vld [vmem:[%s4525_s9 + $0x70] sm:$0xf0]  ;;  %v4091_v34 = vld [vmem:[%s4525_s9 + $0x1f4] sm:$0xf0] }
 0x10e   : > { %v4102_v4 = vld [vmem:[%s4525_s9 + $0x254] sm:$0xf]  ;;  %4022 = vmatmul.msk.bf16.vlgmr.msra.gmra.mxu0 %vm2133_vm1, %v4688_v19  ;;  %v2921_v12 = vor.u32 %v4038_v0, %v2918_v1  ;;  %v3117_v43 = vor.u32 %v4091_v34, %v3116_v33  ;;  %v2224_v55 = vpop.f32.mrf.mxu2  ;;  %v4283_v33 = vld [vmem:[%s4525_s9 + $0x7f4] sm:$0xf0] }
 0x10f   : > { %2491 = vmatpush.bf16.msra.mxu3 %v3529_v37  ;;  %2501 = vmatpush.bf16.msrb.mxu0 %v3881_v38  ;;  %v3174_v5 = vld [vmem:[%s4525_s9 + $0x270] sm:$0xf0]  ;;  %v3372_v37 = vld [vmem:[%s4525_s9 + $0x3d8] sm:$0xf]  ;;  %v2213_v61 = vpop.f32.mrf.mxu1 }
 0x110   : > { %2466 = vmatpush.bf16.msra.mxu1 %v2985_v49  ;;  %v4166_v6 = vld [vmem:[%s4525_s9 + $0x454] sm:$0xf]  ;;  %v3177_v15 = vor.u32 %v4102_v4, %v3174_v5  ;;  %v4155_v38 = vld [vmem:[%s4525_s9 + $0x3f4] sm:$0xf0]  ;;  %v2237_v57 = vpop.f32.mrf.mxu3 }
 0x111   : > { %2479 = vmatpush.bf16.msra.mxu2 %v3241_v50  ;;  %v3430_v8 = vld [vmem:[%s4525_s9 + $0x470] sm:$0xf0]  ;;  %v3373_v48 = vor.u32 %v4155_v38, %v3372_v37  ;;  %v3084_v50 = vld [vmem:[%s4525_s9 + $0x198] sm:$0xf] }
 0x112   : > { %v4254_v9 = vld [vmem:[%s4525_s9 + $0x714] sm:$0xf]  ;;  %v3433_v20 = vor.u32 %v4166_v6, %v3430_v8  ;;  %v3085_v60 = vor.u32 %v4083_v51, %v3084_v50  ;;  %v4075_v4 = vld [vmem:[%s4525_s9 + $0x174] sm:$0xf0] }
 0x113   : > { %2492 = vmatpush.bf16.msra.mxu3 %v3497_v53  ;;  %2502 = vmatpush.bf16.msrb.mxu0 %v3849_v54  ;;  %v3782_v10 = vld [vmem:[%s4525_s9 + $0x730] sm:$0xf0]  ;;  %v4147_v53 = vld [vmem:[%s4525_s9 + $0x3b4] sm:$0xf0] }
 0x114   : > { %2467 = vmatpush.bf16.msra.mxu1 %v2953_v62  ;;  %v4030_v16 = vld [vmem:[%s4525_s9 + $0x14] sm:$0xf]  ;;  %v3785_v21 = vor.u32 %v4254_v9, %v3782_v10  ;;  %v2225_v62 = vadd.f32 %v2224_v55, %v2212_v41  ;;  %v3341_v1 = vor.u32 %v4147_v53, %v3340_v52  ;;  %v3308_v5 = vld [vmem:[%s4525_s9 + $0x358] sm:$0xf] }
 0x115   : > { %2480 = vmatpush.bf16.msra.mxu2 %v3209_v63  ;;  %v2886_v17 = vld [vmem:[%s4525_s9 + $0x30] sm:$0xf0]  ;;  %v4139_v6 = vld [vmem:[%s4525_s9 + $0x374] sm:$0xf0] }
 0x116   : > { %v4094_v18 = vld [vmem:[%s4525_s9 + $0x214] sm:$0xf]  ;;  %v2889_v35 = vor.u32 %v4030_v16, %v2886_v17  ;;  %v2238_v7 = vadd.f32 %v2237_v57, %v2225_v62  ;;  %v2226_v34 = vpop.f32.mrf.mxu2  ;;  %v2988_v41 = vld [vmem:[%s4525_s9 + $0xd8] sm:$0xf] }
 0x117   : > { %2493 = vmatpush.bf16.msra.mxu3 %v3465_v2  ;;  %2503 = vmatpush.bf16.msrb.mxu0 %v3817_v3  ;;  %v3142_v22 = vld [vmem:[%s4525_s9 + $0x230] sm:$0xf0]  ;;  %v3052_v3 = vld [vmem:[%s4525_s9 + $0x158] sm:$0xf] }
 0x118   : > { %v4158_v23 = vld [vmem:[%s4525_s9 + $0x414] sm:$0xf]  ;;  %2468 = vmatpush.bf16.msra.mxu1 %v2921_v12  ;;  %v3145_v36 = vor.u32 %v4094_v18, %v3142_v22  ;;  %v3309_v18 = vor.u32 %v4139_v6, %v3308_v5  ;;  %v4067_v22 = vld [vmem:[%s4525_s9 + $0x134] sm:$0xf0] }
 0x119   : > { %v3398_v24 = vld [vmem:[%s4525_s9 + $0x430] sm:$0xf0]  ;;  %2481 = vmatpush.bf16.msra.mxu2 %v3177_v15  ;;  %v3053_v15 = vor.u32 %v4075_v4, %v3052_v3  ;;  %v3852_v51 = vld [vmem:[%s4525_s9 + $0x798] sm:$0xf] }
 0x11a   : > { %v4246_v26 = vld [vmem:[%s4525_s9 + $0x6d4] sm:$0xf]  ;;  %v3401_v39 = vor.u32 %v4158_v23, %v3398_v24  ;;  %v3276_v23 = vld [vmem:[%s4525_s9 + $0x318] sm:$0xf] }
 0x11b   : > { %v3750_v27 = vld [vmem:[%s4525_s9 + $0x6f0] sm:$0xf0]  ;;  %2494 = vmatpush.bf16.msra.mxu3 %v3433_v20  ;;  %2504 = vmatpush.bf16.msrb.mxu0 %v3785_v21  ;;  %v2250_v20 = vpop.f32.mrf.mxu0  ;;  %v3020_v21 = vld [vmem:[%s4525_s9 + $0x118] sm:$0xf] }
 0x11c   : > { %v4310_v28 = vld [vmem:[%s4525_s9 + $0x8d4] sm:$0xf]  ;;  %v3753_v40 = vor.u32 %v4246_v26, %v3750_v27  ;;  %2469 = vmatpush.bf16.msra.mxu1 %v2889_v35  ;;  %v2251_v24 = vadd.f32 %v2250_v20, %v2238_v7  ;;  %v3628_v26 = vld [vmem:[%s4525_s9 + $0x5d8] sm:$0xf]  ;;  %v2239_v35 = vpop.f32.mrf.mxu3  ;;  %v3021_v38 = vor.u32 %v4067_v22, %v3020_v21 }
 0x11d   : > { %v4006_v32 = vld [vmem:[%s4525_s9 + $0x8f0] sm:$0xf0]  ;;  %2482 = vmatpush.bf16.msra.mxu2 %v3145_v36  ;;  %v4219_v27 = vld [vmem:[%s4525_s9 + $0x5f4] sm:$0xf0]  ;;  %v2673_v36 = vmin.f32 %v2665_v11, 6.0 }
 0x11e   : > { %v4009_v42 = vor.u32 %v4310_v28, %v4006_v32  ;;  %v4238_v45 = vld [vmem:[%s4525_s9 + $0x694] sm:$0xf]  ;;  %v3884_v32 = vld [vmem:[%s4525_s9 + $0x7d8] sm:$0xf] }
 0x11f   : > { %v3718_v46 = vld [vmem:[%s4525_s9 + $0x6b0] sm:$0xf0]  ;;  %2495 = vmatpush.bf16.msra.mxu3 %v3401_v39  ;;  %2505 = vmatpush.bf16.msrb.mxu0 %v3753_v40  ;;  %v3277_v39 = vor.u32 %v4131_v25, %v3276_v23  ;;  %v3629_v40 = vor.u32 %v4219_v27, %v3628_v26  ;;  %v4275_v52 = vld [vmem:[%s4525_s9 + $0x7b4] sm:$0xf0]  ;;  %v2681_v53 = vmul.f32 %v2673_v36, %v5006_v44 }
 0x120   : > { %v4302_v47 = vld [vmem:[%s4525_s9 + $0x894] sm:$0xf]  ;;  %v3721_v54 = vor.u32 %v4238_v45, %v3718_v46  ;;  %2518 = vmatpush.bf16.msrb.mxu1 %v4009_v42  ;;  %2483 = vmatmul.bf16.vlgmr.msra.gmra.mxu2 %v4670_v30  ;;  %v4059_v42 = vld [vmem:[%s4525_s9 + $0xf4] sm:$0xf0]  ;;  %v3885_v45 = vor.u32 %v4283_v33, %v3884_v32  ;;  %v2263_v46 = vpop.f32.mrf.mxu1  ;;  %v3853_v62 = vor.u32 %v4275_v52, %v3852_v51 }
 0x121   : > { %v3974_v49 = vld [vmem:[%s4525_s9 + $0x8b0] sm:$0xf0]  ;;  %2527 = vmatpush.bf16.msrb.mxu2 %v3117_v43  ;;  %2470 = vmatmul.bf16.vlgmr.msra.gmra.mxu1 %v4640_v13  ;;  %v3244_v43 = vld [vmem:[%s4525_s9 + $0x2d8] sm:$0xf]  ;;  %v2264_v50 = vadd.f32 %v2263_v46, %v2251_v24  ;;  %v2689_v5 = vmul.f32 0.16666667, %v2681_v53 }
 0x122   : > { %v4230_v56 = vld [vmem:[%s4525_s9 + $0x654] sm:$0xf]  ;;  %v3977_v59 = vor.u32 %v4302_v47, %v3974_v49  ;;  %2496 = vmatmul.bf16.vlgmr.msra.gmra.mxu3 %v4651_v31  ;;  %v4123_v47 = vld [vmem:[%s4525_s9 + $0x2f4] sm:$0xf0] }
 0x123   : > { %v3686_v63 = vld [vmem:[%s4525_s9 + $0x670] sm:$0xf0]  ;;  %2540 = vmatpush.bf16.msrb.mxu3 %v3373_v48  ;;  %2506 = vmatpush.bf16.msrb.mxu0 %v3721_v54  ;;  %v3596_v48 = vld [vmem:[%s4525_s9 + $0x598] sm:$0xf]  ;;  %v2989_v54 = vor.u32 %v4059_v42, %v2988_v41  ;;  %v2658_v57 = vadd.f32 3.0, %v2264_v50  ;;  %v3245_v58 = vor.u32 %v4123_v47, %v3244_v43  ;;  %v2252_v44 = vpop.f32.mrf.mxu0 }
 0x124   : > { %v4294_v0 = vld [vmem:[%s4525_s9 + $0x854] sm:$0xf]  ;;  %v3689_v8 = vor.u32 %v4230_v56, %v3686_v63  ;;  %2519 = vmatpush.bf16.msrb.mxu1 %v3977_v59  ;;  %v4211_v49 = vld [vmem:[%s4525_s9 + $0x5b4] sm:$0xf0]  ;;  %v5091_v56 = vld [vmem:[%s302_s17] sm:$0xff] }
 0x125   : > { %v3942_v2 = vld [vmem:[%s4525_s9 + $0x870] sm:$0xf0]  ;;  %2528 = vmatpush.bf16.msrb.mxu2 %v3085_v60  ;;  %v2956_v55 = vld [vmem:[%s4525_s9 + $0x98] sm:$0xf]  ;;  %v3597_v59 = vor.u32 %v4211_v49, %v3596_v48  ;;  %v2699_v6 = vperm.slane %v5091_v56, 0  ;;  %v2700_v23 = vperm.slane %v5091_v56, 1 }
 0x126   : > { %v4222_v9 = vld [vmem:[%s4525_s9 + $0x614] sm:$0xf]  ;;  %v3945_v12 = vor.u32 %v4294_v0, %v3942_v2  ;;  %v4051_v60 = vld [vmem:[%s4525_s9 + $0xb4] sm:$0xf0]  ;;  %v2666_v2 = vmax.f32 %v2658_v57, 0.0 }
 0x127   : > { %v3654_v10 = vld [vmem:[%s4525_s9 + $0x630] sm:$0xf0]  ;;  %2541 = vmatpush.bf16.msrb.mxu3 %v3341_v1  ;;  %2507 = vmatpush.bf16.msrb.mxu0 %v3689_v8  ;;  %v3212_v61 = vld [vmem:[%s4525_s9 + $0x298] sm:$0xf]  ;;  %v2957_v7 = vor.u32 %v4051_v60, %v2956_v55  ;;  %v2715_v26 = vmul.f32 %v2699_v6, %v2689_v5  ;;  %v4087_v49 = vld [vmem:[%s4525_s9 + $0x1dc] sm:$0xf] }
 0x128   : > { %v4286_v16 = vld [vmem:[%s4525_s9 + $0x814] sm:$0xf]  ;;  %v3657_v28 = vor.u32 %v4222_v9, %v3654_v10  ;;  %2520 = vmatpush.bf16.msrb.mxu1 %v3945_v12  ;;  %v4115_v63 = vld [vmem:[%s4525_s9 + $0x2b4] sm:$0xf0]  ;;  %v2674_v9 = vmin.f32 %v2666_v2, 6.0  ;;  %v2265_v21 = vpop.f32.mrf.mxu1 }
 0x129   : > { %v3910_v17 = vld [vmem:[%s4525_s9 + $0x830] sm:$0xf0]  ;;  %2529 = vmatpush.bf16.msrb.mxu2 %v3053_v15  ;;  %v3564_v0 = vld [vmem:[%s4525_s9 + $0x558] sm:$0xf]  ;;  %v3213_v10 = vor.u32 %v4115_v63, %v3212_v61  ;;  %v2724_v47 = vsel %vm2723_vm2, %v2715_v26, 0.0 }
 0x12a   : > { %v3913_v37 = vor.u32 %v4286_v16, %v3910_v17  ;;  %v4203_v1 = vld [vmem:[%s4525_s9 + $0x574] sm:$0xf0]  ;;  %v2682_v22 = vmul.f32 %v2674_v9, %v2264_v50  ;;  %v3118_v50 = vld [vmem:[%s4525_s9 + $0x1f8] sm:$0xf0] }
 0x12b   : > { %2542 = vmatpush.bf16.msrb.mxu3 %v3309_v18  ;;  %2508 = vmatpush.bf16.msrb.mxu0 %v3657_v28  ;;  %v3820_v3 = vld [vmem:[%s4525_s9 + $0x758] sm:$0xf]  ;;  %v3565_v11 = vor.u32 %v4203_v1, %v3564_v0  ;;  %v3121_v44 = vor.u32 %v4087_v49, %v3118_v50  ;;  %v4079_v2 = vld [vmem:[%s4525_s9 + $0x19c] sm:$0xf] }
 0x12c   : > { %2521 = vmatpush.bf16.msrb.mxu1 %v3913_v37  ;;  %v4267_v4 = vld [vmem:[%s4525_s9 + $0x774] sm:$0xf0]  ;;  %v2690_v33 = vmul.f32 0.16666667, %v2682_v22 }
 0x12d   : > { %2530 = vmatpush.bf16.msrb.mxu2 %v3021_v38  ;;  %v2924_v8 = vld [vmem:[%s4525_s9 + $0x58] sm:$0xf]  ;;  %v3821_v16 = vor.u32 %v4267_v4, %v3820_v3  ;;  %v3086_v3 = vld [vmem:[%s4525_s9 + $0x1b8] sm:$0xf0] }
 0x12e   : > { %2509 = vmatmul.bf16.vlgmr.msrb.gmra.mxu0 %v4667_v29  ;;  %v4043_v12 = vld [vmem:[%s4525_s9 + $0x74] sm:$0xf0]  ;;  %v2716_v42 = vmul.f32 %v2700_v23, %v2690_v33  ;;  %v2276_v1 = vpop.f32.mrf.mxu2 }
 0x12f   : > { %2543 = vmatpush.bf16.msrb.mxu3 %v3277_v39  ;;  %2553 = vmatpush.bf16.msra.mxu0 %v3629_v40  ;;  %v3180_v15 = vld [vmem:[%s4525_s9 + $0x258] sm:$0xf]  ;;  %v2925_v27 = vor.u32 %v4043_v12, %v2924_v8 }
 0x130   : > { %2566 = vmatpush.bf16.msra.mxu1 %v3885_v45  ;;  %v4107_v17 = vld [vmem:[%s4525_s9 + $0x274] sm:$0xf0]  ;;  %v2725_v51 = vsel %vm2723_vm2, %v2716_v42, 0.0  ;;  %v2289_v5 = vpop.f32.mrf.mxu3  ;;  %v3630_v42 = vld [vmem:[%s4525_s9 + $0x5f8] sm:$0xf0] }
 0x131   : > { %2531 = vmatpush.bf16.msrb.mxu2 %v2989_v54  ;;  %v3532_v18 = vld [vmem:[%s4525_s9 + $0x518] sm:$0xf]  ;;  %4023 = vmatmul.msk.bf16.vlgmr.msrb.gmra.mxu1 %vm2133_vm1, %v4688_v19  ;;  %v3181_v34 = vor.u32 %v4107_v17, %v3180_v15  ;;  %v639_v54 = vperm.slane %v4952_v14, 2  ;;  %v5128_v55 = vadd.f32 %v2725_v51, %v2724_v47 }
 0x132   : > { %v4195_v20 = vld [vmem:[%s4525_s9 + $0x534] sm:$0xf0] }
 0x133   : > { %2544 = vmatpush.bf16.msrb.mxu3 %v3245_v58  ;;  %2554 = vmatpush.bf16.msra.mxu0 %v3597_v59  ;;  %v3788_v24 = vld [vmem:[%s4525_s9 + $0x718] sm:$0xf]  ;;  %v3533_v35 = vor.u32 %v4195_v20, %v3532_v18  ;;  %v2277_v14 = vadd.f32 %v2276_v1, %v639_v54  ;;  %v4071_v18 = vld [vmem:[%s4525_s9 + $0x15c] sm:$0xf] }
 0x134   : > { %2567 = vmatpush.bf16.msra.mxu1 %v3853_v62  ;;  %v4259_v25 = vld [vmem:[%s4525_s9 + $0x734] sm:$0xf0]  ;;  %v3054_v20 = vld [vmem:[%s4525_s9 + $0x178] sm:$0xf0] }
 0x135   : > { %2532 = vmatpush.bf16.msrb.mxu2 %v2957_v7  ;;  %v2892_v28 = vld [vmem:[%s4525_s9 + $0x18] sm:$0xf]  ;;  %v3789_v38 = vor.u32 %v4259_v25, %v3788_v24  ;;  %v2290_v17 = vadd.f32 %v2289_v5, %v2277_v14  ;;  %v2990_v54 = vld [vmem:[%s4525_s9 + $0xf8] sm:$0xf0] }
 0x136   : > { %v4035_v32 = vld [vmem:[%s4525_s9 + $0x34] sm:$0xf0]  ;;  %v2958_v14 = vld [vmem:[%s4525_s9 + $0xb8] sm:$0xf0] }
 0x137   : > { %2545 = vmatpush.bf16.msrb.mxu3 %v3213_v10  ;;  %2555 = vmatpush.bf16.msra.mxu0 %v3565_v11  ;;  %v3148_v36 = vld [vmem:[%s4525_s9 + $0x218] sm:$0xf]  ;;  %v2893_v48 = vor.u32 %v4035_v32, %v2892_v28  ;;  %v3089_v11 = vor.u32 %v4079_v2, %v3086_v3  ;;  %v3057_v32 = vor.u32 %v4071_v18, %v3054_v20  ;;  %v4047_v3 = vld [vmem:[%s4525_s9 + $0x9c] sm:$0xf] }
 0x138   : > { %v4099_v37 = vld [vmem:[%s4525_s9 + $0x234] sm:$0xf0]  ;;  %2568 = vmatpush.bf16.msra.mxu1 %v3821_v16  ;;  %v2961_v18 = vor.u32 %v4047_v3, %v2958_v14  ;;  %v3726_v3 = vld [vmem:[%s4525_s9 + $0x6b8] sm:$0xf0] }
 0x139   : > { %v3500_v39 = vld [vmem:[%s4525_s9 + $0x4d8] sm:$0xf]  ;;  %2533 = vmatpush.bf16.msrb.mxu2 %v2925_v27  ;;  %v3149_v52 = vor.u32 %v4099_v37, %v3148_v36  ;;  %v2278_v36 = vpop.f32.mrf.mxu2  ;;  %v4151_v37 = vld [vmem:[%s4525_s9 + $0x3dc] sm:$0xf] }
 0x13a   : > { %v4187_v40 = vld [vmem:[%s4525_s9 + $0x4f4] sm:$0xf0]  ;;  %v2315_v47 = vpop.f32.mrf.mxu1  ;;  %v4303_v14 = vld [vmem:[%s4525_s9 + $0x89c] sm:$0xf] }
 0x13b   : > { %v3756_v41 = vld [vmem:[%s4525_s9 + $0x6d8] sm:$0xf]  ;;  %2546 = vmatpush.bf16.msrb.mxu3 %v3181_v34  ;;  %2556 = vmatpush.bf16.msra.mxu0 %v3533_v35  ;;  %v3501_v53 = vor.u32 %v4187_v40, %v3500_v39  ;;  %v4063_v34 = vld [vmem:[%s4525_s9 + $0x11c] sm:$0xf]  ;;  %v2302_v40 = vpop.f32.mrf.mxu0 }
 0x13c   : > { %v4251_v43 = vld [vmem:[%s4525_s9 + $0x6f4] sm:$0xf0]  ;;  %2569 = vmatpush.bf16.msra.mxu1 %v3789_v38  ;;  %v3022_v35 = vld [vmem:[%s4525_s9 + $0x138] sm:$0xf0] }
 0x13d   : > { %v4012_v45 = vld [vmem:[%s4525_s9 + $0x8d8] sm:$0xf]  ;;  %v3757_v57 = vor.u32 %v4251_v43, %v3756_v41  ;;  %2534 = vmatpush.bf16.msrb.mxu2 %v2893_v48  ;;  %v3374_v38 = vld [vmem:[%s4525_s9 + $0x3f8] sm:$0xf0]  ;;  %v2291_v48 = vpop.f32.mrf.mxu3  ;;  %v3025_v51 = vor.u32 %v4063_v34, %v3022_v35 }
 0x13e   : > { %v4315_v46 = vld [vmem:[%s4525_s9 + $0x8f4] sm:$0xf0]  ;;  %v4215_v39 = vld [vmem:[%s4525_s9 + $0x5dc] sm:$0xf] }
 0x13f   : > { %v4013_v58 = vor.u32 %v4315_v46, %v4012_v45  ;;  %v3468_v59 = vld [vmem:[%s4525_s9 + $0x498] sm:$0xf]  ;;  %2547 = vmatpush.bf16.msrb.mxu3 %v3149_v52  ;;  %2557 = vmatpush.bf16.msra.mxu0 %v3501_v53  ;;  %v4279_v43 = vld [vmem:[%s4525_s9 + $0x7dc] sm:$0xf]  ;;  %v2303_v46 = vadd.f32 %v2302_v40, %v2290_v17  ;;  %v3377_v52 = vor.u32 %v4151_v37, %v3374_v38 }
 0x140   : > { %v4179_v60 = vld [vmem:[%s4525_s9 + $0x4b4] sm:$0xf0]  ;;  %2570 = vmatpush.bf16.msra.mxu1 %v3757_v57  ;;  %2535 = vmatmul.bf16.vlgmr.msrb.gmra.mxu2 %v4640_v13  ;;  %v3886_v45 = vld [vmem:[%s4525_s9 + $0x7f8] sm:$0xf0] }
 0x141   : > { %v3724_v61 = vld [vmem:[%s4525_s9 + $0x698] sm:$0xf]  ;;  %v3469_v4 = vor.u32 %v4179_v60, %v3468_v59  ;;  %2583 = vmatpush.bf16.msra.mxu2 %v4013_v58  ;;  %v4055_v53 = vld [vmem:[%s4525_s9 + $0xdc] sm:$0xf]  ;;  %v2316_v57 = vadd.f32 %v2315_v47, %v2303_v46  ;;  %v3633_v58 = vor.u32 %v4215_v39, %v3630_v42  ;;  %v3889_v59 = vor.u32 %v4279_v43, %v3886_v45 }
 0x142   : > { %v4243_v62 = vld [vmem:[%s4525_s9 + $0x6b4] sm:$0xf0]  ;;  %2548 = vmatmul.bf16.vlgmr.msrb.gmra.mxu3 %v4670_v30  ;;  %v4143_v60 = vld [vmem:[%s4525_s9 + $0x39c] sm:$0xf]  ;;  %v2993_v1 = vor.u32 %v4055_v53, %v2990_v54  ;;  %v2701_v54 = vperm.slane %v5091_v56, 2 }
 0x143   : > { %v3980_v63 = vld [vmem:[%s4525_s9 + $0x898] sm:$0xf]  ;;  %v3725_v6 = vor.u32 %v4243_v62, %v3724_v61  ;;  %2592 = vmatpush.bf16.msra.mxu3 %v3121_v44  ;;  %2558 = vmatpush.bf16.msra.mxu0 %v3469_v4  ;;  %v3342_v61 = vld [vmem:[%s4525_s9 + $0x3b8] sm:$0xf0] }
 0x144   : > { %v4307_v0 = vld [vmem:[%s4525_s9 + $0x8b4] sm:$0xf0]  ;;  %v4207_v44 = vld [vmem:[%s4525_s9 + $0x59c] sm:$0xf]  ;;  %v3345_v2 = vor.u32 %v4143_v60, %v3342_v61 }
 0x145   : > { %v3981_v7 = vor.u32 %v4307_v0, %v3980_v63  ;;  %v3436_v8 = vld [vmem:[%s4525_s9 + $0x458] sm:$0xf]  ;;  %2571 = vmatpush.bf16.msra.mxu1 %v3725_v6  ;;  %v3598_v62 = vld [vmem:[%s4525_s9 + $0x5b8] sm:$0xf0] }
 0x146   : > { %v4171_v9 = vld [vmem:[%s4525_s9 + $0x474] sm:$0xf0]  ;;  %v4271_v63 = vld [vmem:[%s4525_s9 + $0x79c] sm:$0xf]  ;;  %v3601_v4 = vor.u32 %v4207_v44, %v3598_v62 }
 0x147   : > { %v3692_v10 = vld [vmem:[%s4525_s9 + $0x658] sm:$0xf]  ;;  %v3437_v21 = vor.u32 %v4171_v9, %v3436_v8  ;;  %2584 = vmatpush.bf16.msra.mxu2 %v3981_v7  ;;  %2593 = vmatpush.bf16.msra.mxu3 %v3089_v11  ;;  %v3854_v0 = vld [vmem:[%s4525_s9 + $0x7b8] sm:$0xf0]  ;;  %v2304_v9 = vpop.f32.mrf.mxu0 }
 0x148   : > { %v4235_v12 = vld [vmem:[%s4525_s9 + $0x674] sm:$0xf0]  ;;  %v3857_v5 = vor.u32 %v4271_v63, %v3854_v0  ;;  %v4135_v6 = vld [vmem:[%s4525_s9 + $0x35c] sm:$0xf] }
 0x149   : > { %v3948_v15 = vld [vmem:[%s4525_s9 + $0x858] sm:$0xf]  ;;  %v3693_v24 = vor.u32 %v4235_v12, %v3692_v10  ;;  %2559 = vmatpush.bf16.msra.mxu0 %v3437_v21  ;;  %v3310_v7 = vld [vmem:[%s4525_s9 + $0x378] sm:$0xf0] }
 0x14a   : > { %v4299_v16 = vld [vmem:[%s4525_s9 + $0x874] sm:$0xf0]  ;;  %v4199_v8 = vld [vmem:[%s4525_s9 + $0x55c] sm:$0xf]  ;;  %v3313_v20 = vor.u32 %v4135_v6, %v3310_v7  ;;  %v5210_v6 = vld [vmem:[%s4944_s14] sm:$0xff] }
 0x14b   : > { %v3404_v22 = vld [vmem:[%s4525_s9 + $0x418] sm:$0xf]  ;;  %v3949_v25 = vor.u32 %v4299_v16, %v3948_v15  ;;  %2572 = vmatpush.bf16.msra.mxu1 %v3693_v24  ;;  %2594 = vmatpush.bf16.msra.mxu3 %v3057_v32  ;;  %v3566_v10 = vld [vmem:[%s4525_s9 + $0x578] sm:$0xf0]  ;;  %v2317_v15 = vpop.f32.mrf.mxu1  ;;  %v2328_v16 = vpop.f32.mrf.mxu2  ;;  %v640_v7 = vperm.slane %v5210_v6, 3 }
 0x14c   : > { %v4163_v23 = vld [vmem:[%s4525_s9 + $0x434] sm:$0xf0]  ;;  %v4263_v11 = vld [vmem:[%s4525_s9 + $0x75c] sm:$0xf]  ;;  %v2329_v17 = vadd.f32 %v2328_v16, %v2316_v57  ;;  %v3569_v24 = vor.u32 %v4199_v8, %v3566_v10 }
 0x14d   : > { %v3660_v26 = vld [vmem:[%s4525_s9 + $0x618] sm:$0xf]  ;;  %v3405_v41 = vor.u32 %v4163_v23, %v3404_v22  ;;  %2585 = vmatpush.bf16.msra.mxu2 %v3949_v25  ;;  %v3822_v12 = vld [vmem:[%s4525_s9 + $0x778] sm:$0xf0] }
 0x14e   : > { %v4227_v27 = vld [vmem:[%s4525_s9 + $0x634] sm:$0xf0]  ;;  %v4039_v21 = vld [vmem:[%s4525_s9 + $0x5c] sm:$0xf]  ;;  %v3825_v25 = vor.u32 %v4263_v11, %v3822_v12  ;;  %v2659_v32 = vadd.f32 3.0, %v2329_v17 }
 0x14f   : > { %v3916_v28 = vld [vmem:[%s4525_s9 + $0x818] sm:$0xf]  ;;  %v3661_v49 = vor.u32 %v4227_v27, %v3660_v26  ;;  %2560 = vmatpush.bf16.msra.mxu0 %v3405_v41  ;;  %2595 = vmatpush.bf16.msra.mxu3 %v3025_v51  ;;  %v2926_v22 = vld [vmem:[%s4525_s9 + $0x78] sm:$0xf0] }
 0x150   : > { %v4291_v33 = vld [vmem:[%s4525_s9 + $0x834] sm:$0xf0]  ;;  %v4127_v23 = vld [vmem:[%s4525_s9 + $0x31c] sm:$0xf]  ;;  %v2667_v36 = vmax.f32 %v2659_v32, 0.0  ;;  %v2929_v37 = vor.u32 %v4039_v21, %v2926_v22  ;;  %v2341_v8 = vpop.f32.mrf.mxu3 }
 0x151   : > { %v3917_v50 = vor.u32 %v4291_v33, %v3916_v28  ;;  %2573 = vmatpush.bf16.msra.mxu1 %v3661_v49  ;;  %v3278_v26 = vld [vmem:[%s4525_s9 + $0x338] sm:$0xf0] }
 0x152   : > { %2561 = vmatmul.bf16.vlgmr.msra.gmra.mxu0 %v4651_v31  ;;  %v4191_v27 = vld [vmem:[%s4525_s9 + $0x51c] sm:$0xf]  ;;  %v3281_v38 = vor.u32 %v4127_v23, %v3278_v26  ;;  %v2675_v47 = vmin.f32 %v2667_v36, 6.0 }
 0x153   : > { %2586 = vmatpush.bf16.msra.mxu2 %v3917_v50  ;;  %2605 = vmatpush.bf16.msrb.mxu0 %v3377_v52  ;;  %v3534_v28 = vld [vmem:[%s4525_s9 + $0x538] sm:$0xf0]  ;;  %v2330_v52 = vpop.f32.mrf.mxu2 }
 0x154   : > { %2574 = vmatmul.bf16.vlgmr.msra.gmra.mxu1 %v4667_v29  ;;  %2596 = vmatpush.bf16.msra.mxu3 %v2993_v1  ;;  %v4255_v33 = vld [vmem:[%s4525_s9 + $0x71c] sm:$0xf]  ;;  %v3537_v41 = vor.u32 %v4191_v27, %v3534_v28  ;;  %v2683_v53 = vmul.f32 %v2675_v47, %v2329_v17  ;;  %v2342_v27 = vadd.f32 %v2341_v8, %v640_v7 }
 0x155   : > { %2618 = vmatpush.bf16.msrb.mxu1 %v3633_v58  ;;  %v3790_v34 = vld [vmem:[%s4525_s9 + $0x738] sm:$0xf0] }
 0x156   : > { %4024 = vmatmul.msk.bf16.vlgmr.msra.gmra.mxu2 %vm2133_vm1, %v4688_v19  ;;  %v4031_v35 = vld [vmem:[%s4525_s9 + $0x1c] sm:$0xf]  ;;  %v3793_v42 = vor.u32 %v4255_v33, %v3790_v34  ;;  %v2691_v0 = vmul.f32 0.16666667, %v2683_v53 }
 0x157   : > { %2631 = vmatpush.bf16.msrb.mxu2 %v3889_v59  ;;  %2606 = vmatpush.bf16.msrb.mxu0 %v3345_v2  ;;  %v2894_v39 = vld [vmem:[%s4525_s9 + $0x38] sm:$0xf0] }
 0x158   : > { %2597 = vmatpush.bf16.msra.mxu3 %v2961_v18  ;;  %v4119_v40 = vld [vmem:[%s4525_s9 + $0x2dc] sm:$0xf]  ;;  %v2897_v57 = vor.u32 %v4031_v35, %v2894_v39 }
 0x159   : > { %2619 = vmatpush.bf16.msrb.mxu1 %v3601_v4  ;;  %v3246_v43 = vld [vmem:[%s4525_s9 + $0x2f8] sm:$0xf0] }
 0x15a   : > { %v4183_v45 = vld [vmem:[%s4525_s9 + $0x4dc] sm:$0xf]  ;;  %v3249_v58 = vor.u32 %v4119_v40, %v3246_v43  ;;  %v2343_v40 = vpop.f32.mrf.mxu3 }
 0x15b   : > { %2632 = vmatpush.bf16.msrb.mxu2 %v3857_v5  ;;  %2607 = vmatpush.bf16.msrb.mxu0 %v3313_v20  ;;  %v3502_v46 = vld [vmem:[%s4525_s9 + $0x4f8] sm:$0xf0]  ;;  %v2717_v5 = vmul.f32 %v2701_v54, %v2691_v0  ;;  %v2367_v47 = vpop.f32.mrf.mxu1  ;;  %v641_v0 = vperm.slane %v5210_v6, 4 }
 0x15c   : > { %v4247_v48 = vld [vmem:[%s4525_s9 + $0x6dc] sm:$0xf]  ;;  %2598 = vmatpush.bf16.msra.mxu3 %v2929_v37  ;;  %v3505_v60 = vor.u32 %v4183_v45, %v3502_v46 }
 0x15d   : > { %2620 = vmatpush.bf16.msrb.mxu1 %v3569_v24  ;;  %v3758_v49 = vld [vmem:[%s4525_s9 + $0x6f8] sm:$0xf0]  ;;  %v2727_v18 = vsel %vm2723_vm2, %v2717_v5, 0.0 }
 0x15e   : > { %v4311_v50 = vld [vmem:[%s4525_s9 + $0x8dc] sm:$0xf]  ;;  %v3761_v61 = vor.u32 %v4247_v48, %v3758_v49  ;;  %v2728_v23 = vadd.f32 %v2727_v18, %v5128_v55 }
 0x15f   : > { %2633 = vmatpush.bf16.msrb.mxu2 %v3825_v25  ;;  %v4014_v51 = vld [vmem:[%s4525_s9 + $0x8f8] sm:$0xf0]  ;;  %2608 = vmatpush.bf16.msrb.mxu0 %v3281_v38 }
 0x160   : > { %v4111_v59 = vld [vmem:[%s4525_s9 + $0x29c] sm:$0xf]  ;;  %v4017_v1 = vor.u32 %v4311_v50, %v4014_v51  ;;  %2599 = vmatpush.bf16.msra.mxu3 %v2897_v57 }
 0x161   : > { %2621 = vmatpush.bf16.msrb.mxu1 %v3537_v41  ;;  %v3214_v44 = vld [vmem:[%s4525_s9 + $0x2b8] sm:$0xf0] }
 0x162   : > { %v4175_v62 = vld [vmem:[%s4525_s9 + $0x49c] sm:$0xf]  ;;  %v3217_v9 = vor.u32 %v4111_v59, %v3214_v44 }
 0x163   : > { %2634 = vmatpush.bf16.msrb.mxu2 %v3793_v42  ;;  %v3470_v63 = vld [vmem:[%s4525_s9 + $0x4b8] sm:$0xf0]  ;;  %2609 = vmatpush.bf16.msrb.mxu0 %v3249_v58  ;;  %v2354_v42 = vpop.f32.mrf.mxu0  ;;  %v2380_v50 = vpop.f32.mrf.mxu2 }
 0x164   : > { %v4239_v2 = vld [vmem:[%s4525_s9 + $0x69c] sm:$0xf]  ;;  %v3473_v11 = vor.u32 %v4175_v62, %v3470_v63  ;;  %2648 = vmatpush.bf16.msrb.mxu3 %v4017_v1  ;;  %v2355_v46 = vadd.f32 %v2354_v42, %v2342_v27  ;;  %v2369_v53 = vpop.f32.mrf.mxu1 }
 0x165   : > { %v3982_v4 = vld [vmem:[%s4525_s9 + $0x8b8] sm:$0xf0]  ;;  %2622 = vmatpush.bf16.msrb.mxu1 %v3505_v60  ;;  %v3729_v12 = vor.u32 %v4239_v2, %v3726_v3  ;;  %2600 = vmatmul.bf16.vlgmr.msra.gmra.mxu3 %v4640_v13  ;;  %v2393_v54 = vpop.f32.mrf.mxu3 }
 0x166   : > { %v4103_v10 = vld [vmem:[%s4525_s9 + $0x25c] sm:$0xf]  ;;  %v3985_v20 = vor.u32 %v4303_v14, %v3982_v4  ;;  %v2368_v49 = vadd.f32 %v2367_v47, %v2355_v46 }
 0x167   : > { %2635 = vmatpush.bf16.msrb.mxu2 %v3761_v61  ;;  %v3182_v15 = vld [vmem:[%s4525_s9 + $0x278] sm:$0xf0]  ;;  %2610 = vmatpush.bf16.msrb.mxu0 %v3217_v9 }
 0x168   : > { %v4167_v16 = vld [vmem:[%s4525_s9 + $0x45c] sm:$0xf]  ;;  %v3185_v26 = vor.u32 %v4103_v10, %v3182_v15  ;;  %2649 = vmatpush.bf16.msrb.mxu3 %v3985_v20  ;;  %v2381_v51 = vadd.f32 %v2380_v50, %v2368_v49  ;;  %v2704_v50 = vperm.slane %v5091_v56, 5 }
 0x169   : > { %v3438_v17 = vld [vmem:[%s4525_s9 + $0x478] sm:$0xf0]  ;;  %2623 = vmatpush.bf16.msrb.mxu1 %v3473_v11 }
 0x16a   : > { %v4231_v21 = vld [vmem:[%s4525_s9 + $0x65c] sm:$0xf]  ;;  %v3441_v28 = vor.u32 %v4167_v16, %v3438_v17  ;;  %v2394_v57 = vadd.f32 %v2393_v54, %v2381_v51 }
 0x16b   : > { %v3694_v22 = vld [vmem:[%s4525_s9 + $0x678] sm:$0xf0]  ;;  %2636 = vmatpush.bf16.msrb.mxu2 %v3729_v12  ;;  %2611 = vmatpush.bf16.msrb.mxu0 %v3185_v26  ;;  %v2356_v52 = vpop.f32.mrf.mxu0  ;;  %v2382_v59 = vpop.f32.mrf.mxu2  ;;  %v642_v26 = vperm.slane %v5210_v6, 5 }
 0x16c   : > { %v4295_v24 = vld [vmem:[%s4525_s9 + $0x85c] sm:$0xf]  ;;  %v3697_v32 = vor.u32 %v4231_v21, %v3694_v22  ;;  %v2660_v58 = vadd.f32 3.0, %v2394_v57 }
 0x16d   : > { %v3950_v25 = vld [vmem:[%s4525_s9 + $0x878] sm:$0xf0]  ;;  %2624 = vmatpush.bf16.msrb.mxu1 %v3441_v28  ;;  %v2395_v44 = vpop.f32.mrf.mxu3 }
 0x16e   : > { %v4095_v33 = vld [vmem:[%s4525_s9 + $0x21c] sm:$0xf]  ;;  %v3953_v55 = vor.u32 %v4295_v24, %v3950_v25  ;;  %v2668_v60 = vmax.f32 %v2660_v58, 0.0 }
 0x16f   : > { %v3150_v34 = vld [vmem:[%s4525_s9 + $0x238] sm:$0xf0]  ;;  %2637 = vmatpush.bf16.msrb.mxu2 %v3697_v32 }
 0x170   : > { %v4159_v35 = vld [vmem:[%s4525_s9 + $0x41c] sm:$0xf]  ;;  %v3153_v41 = vor.u32 %v4095_v33, %v3150_v34  ;;  %2650 = vmatpush.bf16.msrb.mxu3 %v3953_v55  ;;  %v2676_v61 = vmin.f32 %v2668_v60, 6.0 }
 0x171   : > { %v3406_v36 = vld [vmem:[%s4525_s9 + $0x438] sm:$0xf0] }
 0x172   : > { %v4223_v13 = vld [vmem:[%s4525_s9 + $0x61c] sm:$0xf]  ;;  %v3409_v43 = vor.u32 %v4159_v35, %v3406_v36  ;;  %2612 = vmatpush.bf16.msrb.mxu0 %v3153_v41  ;;  %v2684_v62 = vmul.f32 %v2676_v61, %v2394_v57 }
 0x173   : > { %v3662_v37 = vld [vmem:[%s4525_s9 + $0x638] sm:$0xf0] }
 0x174   : > { %v4287_v38 = vld [vmem:[%s4525_s9 + $0x81c] sm:$0xf]  ;;  %v3665_v45 = vor.u32 %v4223_v13, %v3662_v37  ;;  %2625 = vmatpush.bf16.msrb.mxu1 %v3409_v43  ;;  %v2692_v63 = vmul.f32 0.16666667, %v2684_v62  ;;  %v643_v62 = vperm.slane %v5210_v6, 6 }
 0x175   : > { %v3918_v39 = vld [vmem:[%s4525_s9 + $0x838] sm:$0xf0]  ;;  %2613 = vmatmul.bf16.vlgmr.msrb.gmra.mxu0 %v4670_v30  ;;  %v2702_v30 = vperm.slane %v5091_v56, 3  ;;  %s309_s9 = scalar_lea.vmem %s5282_s5, %s2865_s28 }
 0x176   : > { %v3921_v48 = vor.u32 %v4287_v38, %v3918_v39  ;;  %2638 = vmatpush.bf16.msrb.mxu2 %v3665_v45 }
 0x177   : > { %2626 = vmatmul.bf16.vlgmr.msrb.gmra.mxu1 %v4651_v31  ;;  %v2718_v31 = vmul.f32 %v2702_v30, %v2692_v63 }
 0x178   : > { %2651 = vmatpush.bf16.msrb.mxu3 %v3921_v48 }
 0x179   : > { %2639 = vmatmul.bf16.vlgmr.msrb.gmra.mxu2 %v4667_v29  ;;  %v2729_v29 = vsel %vm2723_vm2, %v2718_v31, 0.0  ;;  %v2406_v2 = vpop.f32.mrf.mxu0 }
 0x17a   : > { %v2730_v1 = vadd.f32 %v2729_v29, %v2728_v23  ;;  %v2407_v3 = vadd.f32 %v2406_v2, %v641_v0  ;;  %v2703_v23 = vperm.slane %v5091_v56, 4 }
 0x17b   : > { %4025 = vmatmul.msk.bf16.vlgmr.msrb.gmra.mxu3 %vm2133_vm1, %v4688_v19  ;;  %v2419_v19 = vpop.f32.mrf.mxu1 }
 0x17c   : > { %v2420_v14 = vadd.f32 %v2419_v19, %v2407_v3 }
 0x181   : > { %v2408_v7 = vpop.f32.mrf.mxu0 }
 0x183   : > { %v2432_v4 = vpop.f32.mrf.mxu2  ;;  %v2421_v10 = vpop.f32.mrf.mxu1 }
 0x184   : > { %v2433_v8 = vadd.f32 %v2432_v4, %v2420_v14  ;;  %v644_v4 = vperm.slane %v5210_v6, 7  ;;  %v2705_v6 = vperm.slane %v5091_v56, 6 }
 0x185   : > { %v2445_v5 = vpop.f32.mrf.mxu3 }
 0x186   : > { %v2446_v9 = vadd.f32 %v2445_v5, %v2433_v8 }
 0x18b   : > { %v2434_v11 = vpop.f32.mrf.mxu2  ;;  %v2458_v15 = vpop.f32.mrf.mxu0 }
 0x18c   : > { %v2459_v16 = vadd.f32 %v2458_v15, %v2446_v9 }
 0x18d   : > { %v2447_v12 = vpop.f32.mrf.mxu3 }
 0x18e   : > { %v2661_v17 = vadd.f32 3.0, %v2459_v16 }
 0x190   : > { %v2669_v18 = vmax.f32 %v2661_v17, 0.0 }
 0x192   : > { %v2677_v20 = vmin.f32 %v2669_v18, 6.0 }
 0x193   : > { %v2460_v21 = vpop.f32.mrf.mxu0 }
 0x194   : > { %v2685_v22 = vmul.f32 %v2677_v20, %v2459_v16 }
 0x196   : > { %v2693_v24 = vmul.f32 0.16666667, %v2685_v22 }
 0x198   : > { %v2719_v25 = vmul.f32 %v2703_v23, %v2693_v24 }
 0x19a   : > { %v2731_v28 = vsel %vm2723_vm2, %v2719_v25, 0.0 }
 0x19b   : > { %v2732_v32 = vadd.f32 %v2731_v28, %v2730_v1 }
 0x19e   : > { %v2471_v27 = vpop.f32.mrf.mxu1 }
 0x19f   : > { %v2472_v33 = vadd.f32 %v2471_v27, %v642_v26 }
 0x1a3   : > { %v2484_v34 = vpop.f32.mrf.mxu2 }
 0x1a4   : > { %v2485_v36 = vadd.f32 %v2484_v34, %v2472_v33 }
 0x1a5   : > { %v2497_v35 = vpop.f32.mrf.mxu3 }
 0x1a6   : > { %v2473_v55 = vpop.f32.mrf.mxu1  ;;  %v2498_v13 = vadd.f32 %v2497_v35, %v2485_v36 }
 0x1a7   : > { %v2706_v55 = vperm.slane %v5091_v56, 7 }
 0x1ab   : > { %v2510_v37 = vpop.f32.mrf.mxu0  ;;  %v2486_v39 = vpop.f32.mrf.mxu2 }
 0x1ac   : > { %v2511_v38 = vadd.f32 %v2510_v37, %v2498_v13 }
 0x1ad   : > { %v2499_v40 = vpop.f32.mrf.mxu3 }
 0x1ae   : > { %v2523_v41 = vpop.f32.mrf.mxu1 }
 0x1af   : > { %v2524_v42 = vadd.f32 %v2523_v41, %v2511_v38  ;;  %v4361_v41 = vld [vmem:[%s305_s25] ss:$0 sm:$0xff] }
 0x1b1   : > { %v2662_v43 = vadd.f32 3.0, %v2524_v42 }
 0x1b3   : > { %v2512_v45 = vpop.f32.mrf.mxu0  ;;  %v2670_v46 = vmax.f32 %v2662_v43, 0.0 }
 0x1b5   : > { %v2678_v47 = vmin.f32 %v2670_v46, 6.0 }
 0x1b6   : > { %v2525_v48 = vpop.f32.mrf.mxu1 }
 0x1b7   : > { %v2686_v49 = vmul.f32 %v2678_v47, %v2524_v42 }
 0x1b9   : > { %v2694_v51 = vmul.f32 0.16666667, %v2686_v49 }
 0x1bb   : > { %v2720_v52 = vmul.f32 %v2704_v50, %v2694_v51 }
 0x1bd   : > { %v2733_v53 = vsel %vm2723_vm2, %v2720_v52, 0.0 }
 0x1be   : > { %v2734_v54 = vadd.f32 %v2733_v53, %v2732_v32 }
 0x1c3   : > { %v2536_v57 = vpop.f32.mrf.mxu2 }
 0x1c4   : > { %v2537_v30 = vadd.f32 %v2536_v57, %v643_v62 }
 0x1c5   : > { %v2549_v58 = vpop.f32.mrf.mxu3 }
 0x1c6   : > { %v2550_v29 = vadd.f32 %v2549_v58, %v2537_v30 }
 0x1cb   : > { %v2538_v59 = vpop.f32.mrf.mxu2 }
 0x1cd   : > { %v2551_v61 = vpop.f32.mrf.mxu3 }
 0x1cf   : > { %v2562_v60 = vpop.f32.mrf.mxu0 }
 0x1d0   : > { %v2563_v1 = vadd.f32 %v2562_v60, %v2550_v29 }
 0x1d1   : > { %v2575_v44 = vpop.f32.mrf.mxu1 }
 0x1d2   : > { %v2576_v2 = vadd.f32 %v2575_v44, %v2563_v1 }
 0x1d7   : > { %v2564_v63 = vpop.f32.mrf.mxu0 }
 0x1d9   : > { %v2577_v31 = vpop.f32.mrf.mxu1  ;;  %v2588_v0 = vpop.f32.mrf.mxu2 }
 0x1da   : > { %v2589_v19 = vadd.f32 %v2588_v0, %v2576_v2 }
 0x1dc   : > { %v2663_v5 = vadd.f32 3.0, %v2589_v19 }
 0x1de   : > { %v2671_v9 = vmax.f32 %v2663_v5, 0.0 }
 0x1e0   : > { %v2679_v15 = vmin.f32 %v2671_v9, 6.0 }
 0x1e1   : > { %v2590_v3 = vpop.f32.mrf.mxu2 }
 0x1e2   : > { %v2687_v21 = vmul.f32 %v2679_v15, %v2589_v19 }
 0x1e4   : > { %v2695_v25 = vmul.f32 0.16666667, %v2687_v21 }
 0x1e6   : > { %v2721_v33 = vmul.f32 %v2705_v6, %v2695_v25 }
 0x1e8   : > { %v2601_v14 = vpop.f32.mrf.mxu3  ;;  %v2735_v13 = vsel %vm2723_vm2, %v2721_v33, 0.0 }
 0x1e9   : > { %v2602_v7 = vadd.f32 %v2601_v14, %v644_v4  ;;  %v2736_v38 = vadd.f32 %v2735_v13, %v2734_v54 }
 0x1f0   : > { %v2603_v12 = vpop.f32.mrf.mxu3 }
 0x1f2   : > { %v2614_v8 = vpop.f32.mrf.mxu0 }
 0x1f3   : > { %v2615_v11 = vadd.f32 %v2614_v8, %v2602_v7 }
 0x1f4   : > { %v2627_v10 = vpop.f32.mrf.mxu1 }
 0x1f5   : > { %v2628_v16 = vadd.f32 %v2627_v10, %v2615_v11 }
 0x1fa   : > { %v2616_v20 = vpop.f32.mrf.mxu0 }
 0x1fc   : > { %v2640_v17 = vpop.f32.mrf.mxu2  ;;  %v2629_v22 = vpop.f32.mrf.mxu1 }
 0x1fd   : > { %v2641_v18 = vadd.f32 %v2640_v17, %v2628_v16 }
 0x1fe   : > { %v2653_v23 = vpop.f32.mrf.mxu3 }
 0x1ff   : > { %v2654_v24 = vadd.f32 %v2653_v23, %v2641_v18 }
 0x201   : > { %v2664_v26 = vadd.f32 3.0, %v2654_v24 }
 0x203   : > { %v2672_v27 = vmax.f32 %v2664_v26, 0.0 }
 0x204   : > { %v2642_v28 = vpop.f32.mrf.mxu2 }
 0x205   : > { %v2680_v32 = vmin.f32 %v2672_v27, 6.0 }
 0x206   : > { %v2655_v34 = vpop.f32.mrf.mxu3 }
 0x207   : > { %v2688_v35 = vmul.f32 %v2680_v32, %v2654_v24 }
 0x209   : > { %v2696_v36 = vmul.f32 0.16666667, %v2688_v35 }
 0x20b   : > { %v2722_v37 = vmul.f32 %v2706_v55, %v2696_v36 }
 0x20d   : > { %v2737_v39 = vsel %vm2723_vm2, %v2722_v37, 0.0 }
 0x20e   : > { %v2738_v40 = vadd.f32 %v2737_v39, %v2736_v38 }
 0x210   : > { %2739 = vadd.xlane.f32.xlu0 %v2738_v40 }
 0x283   : > { %v2740_v56 = vpop.xlane.xlu0 %2739 }
 0x284   : > { %v2745_v42 = vadd.f32 %v4361_v41, %v2740_v56 }
 0x286   : > { %2747 = vst.msk [vmem:[%s309_s9] sm:$0x3] %vm2746_vm3, %v2745_v42 }
 0x287 PF: > { %p15_p7 = scmp.ge.s32.totalorder %s4483_s23, 4   ;;  %s5285_s18 = smov %s4419_s19 }
 0x288   : > { %s5286_s19 = smov %s4423_s20  ;;  %s5287_s20 = smov %s4493_s26 }
 0x289   : > { %s5288_s21 = smov %s4483_s23  ;;  %17 = sbr.rel (!%p15_p7) target bundleno = 3 (0x3), region = 92 }
 0x28e   :  { %2767 = vsyncpa [#allocation3], 1 }
 0x28f   :  { %2769 = vsyncpa [#allocation3 + $0x1], 1 }

// kernel: multi_binary_clip_forward.2
= control target key start
LH: loop header
LB: loop body
LE: loop exit
PB: predicated region body
PF: predicated region fallthrough
CT: control target
= control target key end

     0   :  { %s8493_s24 = smov 0   ;;  %s13468_s0 = inlined_call_operand.vmem [shape: f32[2,160,64], index: 0, kind: input, shape index: {}]   ;;  %s13469_s1 = inlined_call_operand.vmem [shape: f32[2,12,1,64], index: 1, kind: input, shape index: {}]   ;;  %s13470_s2 = inlined_call_operand.vmem [shape: f32[2,12,1,64], index: 2, kind: input, shape index: {}]   ;;  %s13471_s3 = inlined_call_operand.vmem [shape: bf16[2,12,64,192], index: 3, kind: input, shape index: {}]   ;;  %s13472_s4 = inlined_call_operand.vmem [shape: f32[2,12,1,192], index: 4, kind: input, shape index: {}]   ;;  %s13473_s5 = inlined_call_operand.vmem [shape: bf16[2,12,64,64], index: 5, kind: input, shape index: {}]   ;;  %s13474_s6 = inlined_call_operand.vmem [shape: f32[2,12,1,64], index: 6, kind: input, shape index: {}]   ;;  %s13475_s7 = inlined_call_operand.vmem [shape: f32[2,12,1,64], index: 7, kind: input, shape index: {}]   ;;  %s13476_s8 = inlined_call_operand.vmem [shape: f32[2,12,1,64], index: 8, kind: input, shape index: {}]   ;;  %s13477_s9 = inlined_call_operand.vmem [shape: bf16[2,12,64,256], index: 9, kind: input, shape index: {}]   ;;  %s13478_s10 = inlined_call_operand.vmem [shape: f32[2,12,1,256], index: 10, kind: input, shape index: {}]   ;;  %s13479_s11 = inlined_call_operand.vmem [shape: bf16[2,12,256,64], index: 11, kind: input, shape index: {}]   ;;  %s13480_s12 = inlined_call_operand.vmem [shape: f32[2,12,1,64], index: 12, kind: input, shape index: {}]   ;;  %s13481_s13 = inlined_call_operand.vmem [shape: f32[2,1,64], index: 13, kind: input, shape index: {}]   ;;  %s13482_s14 = inlined_call_operand.vmem [shape: f32[2,1,64], index: 14, kind: input, shape index: {}]   ;;  %s13483_s15 = inlined_call_operand.vmem [shape: f32[2,160], index: 15, kind: input, shape index: {}]   ;;  %s13484_s16 = inlined_call_operand.vmem [shape: f32[2,1,64], index: 16, kind: input, shape index: {}]   ;;  %s13485_s17 = inlined_call_operand.vmem [shape: f32[2,2,1], index: 17, kind: output, shape index: {}]  }
   0x1   :  { %13543 = sst [smem:[#allocation65_spill]] %s13468_s0 }
   0x2   :  { %13544 = sst [smem:[#allocation66_spill]] %s13469_s1 }
   0x3   :  { %13545 = sst [smem:[#allocation67_spill]] %s13471_s3 }
   0x4   :  { %13546 = sst [smem:[#allocation68_spill]] %s13472_s4 }
   0x5   :  { %13547 = sst [smem:[#allocation69_spill]] %s13473_s5 }
   0x6   :  { %13548 = sst [smem:[#allocation70_spill]] %s13477_s9 }
   0x7   :  { %13549 = sst [smem:[#allocation71_spill]] %s13478_s10 }
   0x8   :  { %13550 = sst [smem:[#allocation72_spill]] %s13483_s15 }
   0x9 LB: > { %13551 = sst [smem:[#allocation2_spill]] %s8308_s24  ;;  %s6879_s25 = sadd.s32 4294967295, %s8308_s24   ;;  %s8308_s24 = sphi %s8493_s24, %s27_s24  }
   0xa   : > { %p6883_p0 = scmp.ge.s32.totalorder %s8308_s24, 1  ;;  %p623_p1 = scmp.lt.s32.totalorder %s8308_s24, 3 }
   0xc   : > { %p624_p2 = pnand %p6883_p0, %p623_p1 }
   0xe   : > { %627 = sbr.rel (%p624_p2) target bundleno = 3930 (0xf5a), region = 88 }
  0x13   : > { %p735_p3 = scmp.lt.s32.totalorder %s6879_s25, 1  ;;  %v806_v0 = vlaneseq  ;;  %s13552_s21 = sld [smem:[#allocation65_spill]]  ;;  %v8394_v15 = vmov 0.0  }
  0x14   : > { %s13554_s3 = sld [smem:[#allocation67_spill]] }
  0x15   : > { %s13930_s25 = smov (!%p735_p3, %s6879_s25), 1  ;;  %v807_v1 = vshrl.u32 %v806_v0, 7  ;;  %v818_v2 = vand.u32 127, %v806_v0  ;;  %s13558_s4 = sld [smem:[#allocation68_spill]] }
  0x16   : > { %s7263_s26 = smul.u32 160, %s13930_s25  ;;  %s13562_s5 = sld [smem:[#allocation69_spill]] }
  0x17   : > { %v808_v3 = vadd.s32 8, %v807_v1  ;;  %v809_v4 = vadd.s32 16, %v807_v1  ;;  %v810_v5 = vadd.s32 24, %v807_v1  ;;  %v811_v6 = vadd.s32 32, %v807_v1  ;;  %s8509_s0 = smul.u32 12, %s13930_s25  ;;  %s13566_s9 = sld [smem:[#allocation70_spill]] }
  0x18   : > { %v812_v7 = vadd.s32 40, %v807_v1  ;;  %v813_v8 = vadd.s32 48, %v807_v1  ;;  %v814_v9 = vadd.s32 56, %v807_v1  ;;  %v815_v10 = vadd.s32 64, %v807_v1  ;;  %s7265_s23 = smul.u32 768, %s13930_s25  ;;  %s13567_s10 = sld [smem:[#allocation71_spill]] }
  0x19   : > { %s8518_s22 = scalar_lea.vmem %s13552_s21, %s7263_s26  ;;  %v816_v11 = vadd.s32 72, %v807_v1  ;;  %vm819_vm0 = vcmp.gt.s32.totalorder %v818_v2, %v807_v1  ;;  %vm820_vm1 = vcmp.gt.s32.totalorder %v818_v2, %v808_v3  ;;  %vm821_vm2 = vcmp.gt.s32.totalorder %v818_v2, %v809_v4  ;;  %s7266_s19 = smul.u32 24, %s13930_s25 }
  0x1a   : > { %vm822_vm3 = vcmp.gt.s32.totalorder %v818_v2, %v810_v5  ;;  %vm823_vm4 = vcmp.gt.s32.totalorder %v818_v2, %v811_v6  ;;  %vm824_vm5 = vcmp.gt.s32.totalorder %v818_v2, %v812_v7  ;;  %v8530_v12 = vld [vmem:[%s8518_s22] sm:$0xff]   ;;  %v8533_v13 = vld [vmem:[%s8518_s22 + $0x8] sm:$0xff]   ;;  %v8536_v14 = vld [vmem:[%s8518_s22 + $0x10] sm:$0xff]   ;;  %s8543_s29 = scalar_lea.vmem %s13554_s3, %s7265_s23  ;;  %vm825_vm6 = vcmp.gt.s32.totalorder %v818_v2, %v813_v8  ;;  %s7267_s21 = smul.u32 384, %s13930_s25 }
  0x1b   : > { %vm826_vm7 = vcmp.gt.s32.totalorder %v818_v2, %v814_v9  ;;  %vm827_vm8 = vcmp.gt.s32.totalorder %v818_v2, %v815_v10  ;;  %v8547_v16 = vsel %vm819_vm0, -1e+30, %v8394_v15  ;;  %v842_v17 = vld [vmem:[%s8518_s22 + $0x18] sm:$0xff]   ;;  %v843_v18 = vld [vmem:[%s8518_s22 + $0x20] sm:$0xff]   ;;  %v844_v19 = vld [vmem:[%s8518_s22 + $0x28] sm:$0xff]   ;;  %vm828_vm9 = vcmp.gt.s32.totalorder %v818_v2, %v816_v11  ;;  %s8567_s1 = scalar_lea.vmem %s13558_s4, %s7266_s19  ;;  %s7268_s3 = smul.u32 1536, %s13930_s25 }
  0x1c   : > { %13555 = vst [vmem:[#allocation3_spill] sm:$0xff] %v8547_v16  ;;  %v8558_v20 = vsel %vm820_vm1, -1e+30, %v8394_v15  ;;  %v8561_v21 = vsel %vm821_vm2, -1e+30, %v8394_v15  ;;  %v845_v22 = vld [vmem:[%s8518_s22 + $0x30] sm:$0xff]   ;;  %s8585_s30 = scalar_lea.vmem %s13562_s5, %s7267_s21 }
  0x1d   : > { %13556 = vst [vmem:[#allocation4_spill] sm:$0xff] %v8558_v20  ;;  %v8574_v23 = vsel %vm822_vm3, -1e+30, %v8394_v15  ;;  %v8577_v24 = vsel %vm823_vm4, -1e+30, %v8394_v15  ;;  %s8605_s20 = scalar_lea.vmem %s13566_s9, %s7265_s23  ;;  %v846_v30 = vld [vmem:[%s8518_s22 + $0x38] sm:$0xff]   ;;  %s791_s23 = scalar_lea.vmem %s13480_s12, %s8509_s0 }
  0x1e   : > { %13557 = vst [vmem:[#allocation5_spill] sm:$0xff] %v8561_v21  ;;  %v8580_v25 = vsel %vm824_vm5, -1e+30, %v8394_v15  ;;  %v8592_v26 = vsel %vm825_vm6, -1e+30, %v8394_v15  ;;  %s8610_s28 = scalar_lea.vmem %s13567_s10, %s7266_s19  ;;  %v847_v31 = vld [vmem:[%s8518_s22 + $0x40] sm:$0xff]   ;;  %s8637_s10 = scalar_lea.vmem %s13479_s11, %s7268_s3 }
  0x1f   : > { %13559 = vst [vmem:[#allocation6_spill] sm:$0xff] %v8574_v23  ;;  %v8595_v27 = vsel %vm826_vm7, -1e+30, %v8394_v15  ;;  %v8598_v28 = vsel %vm827_vm8, -1e+30, %v8394_v15  ;;  %v848_v32 = vld [vmem:[%s8518_s22 + $0x48] sm:$0xff]  }
  0x20   : > { %13560 = vst [vmem:[#allocation7_spill] sm:$0xff] %v8577_v24  ;;  %v8613_v29 = vsel %vm828_vm9, -1e+30, %v8394_v15  ;;  %v849_v33 = vld [vmem:[%s8518_s22 + $0x50] sm:$0xff]   ;;  %v850_v34 = vld [vmem:[%s8518_s22 + $0x58] sm:$0xff]   ;;  %v851_v35 = vld [vmem:[%s8518_s22 + $0x60] sm:$0xff]  }
  0x21   : > { %13561 = vst [vmem:[#allocation8_spill] sm:$0xff] %v8580_v25  ;;  %s6889_s4 = sshll.u32 %s13930_s25, 1  ;;  %v852_v36 = vld [vmem:[%s8518_s22 + $0x68] sm:$0xff]   ;;  %v853_v37 = vld [vmem:[%s8518_s22 + $0x70] sm:$0xff]   ;;  %v854_v38 = vld [vmem:[%s8518_s22 + $0x78] sm:$0xff]   ;;  %s8691_s3 = smov 0  }
  0x22   : > { %13563 = vst [vmem:[#allocation9_spill] sm:$0xff] %v8592_v26  ;;  %s8642_s21 = scalar_lea.vmem %s13485_s17, %s6889_s4  ;;  %v855_v39 = vld [vmem:[%s8518_s22 + $0x80] sm:$0xff]   ;;  %v856_v40 = vld [vmem:[%s8518_s22 + $0x88] sm:$0xff]   ;;  %v857_v41 = vld [vmem:[%s8518_s22 + $0x90] sm:$0xff]  }
  0x23   : > { %13564 = vst [vmem:[#allocation10_spill] sm:$0xff] %v8595_v27  ;;  %v858_v42 = vld [vmem:[%s8518_s22 + $0x98] sm:$0xff]  }
  0x24   : > { %13565 = vst [vmem:[#allocation11_spill] sm:$0xff] %v8598_v28 }
  0x25   : > { %13568 = vst [vmem:[#allocation12_spill] sm:$0xff] %v8613_v29 }
  0x26 LB: >> { %v13572_v23 = vld [vmem:[#allocation6_spill] sm:$0xff]  ;;  %v13573_v21 = vld [vmem:[#allocation5_spill] sm:$0xff]  ;;  %v13574_v20 = vld [vmem:[#allocation4_spill] sm:$0xff]  ;;  %13579 = vst [vmem:[#allocation13_spill] sm:$0xff] %v8312_v42  ;;  %vm889_vm10 = vcmask 523264   ;;  %v8395_v50 = vmov 64.0   ;;  %s13602_s19 = scalar_lea.vmem %s13470_s2, %s8509_s0  ;;  %v8348_v33 = vphi %v849_v33, %v13881_v33   ;;  %v8344_v34 = vphi %v850_v34, %v13880_v34   ;;  %v8340_v35 = vphi %v851_v35, %v13879_v35   ;;  %v8336_v36 = vphi %v852_v36, %v13878_v36   ;;  %v8332_v37 = vphi %v853_v37, %v13877_v37   ;;  %v8328_v38 = vphi %v854_v38, %v13876_v38   ;;  %v8324_v39 = vphi %v855_v39, %v13875_v39   ;;  %v8320_v40 = vphi %v856_v40, %v13874_v40   ;;  %v8316_v41 = vphi %v857_v41, %v13873_v41   ;;  %v8312_v42 = vphi %v858_v42, %v13872_v42   ;;  %s8392_s3 = sphi %s8691_s3, %s864_s3   ;;  %v8388_v12 = vphi %v8530_v12, %v13891_v12   ;;  %v8384_v13 = vphi %v8533_v13, %v13890_v13   ;;  %v8380_v14 = vphi %v8536_v14, %v13889_v14   ;;  %v8376_v17 = vphi %v842_v17, %v13888_v17   ;;  %v8372_v18 = vphi %v843_v18, %v13887_v18   ;;  %v8368_v19 = vphi %v844_v19, %v13886_v19   ;;  %v8364_v22 = vphi %v845_v22, %v13885_v22   ;;  %v8360_v30 = vphi %v846_v30, %v13884_v30   ;;  %v8356_v31 = vphi %v847_v31, %v13883_v31   ;;  %v8352_v32 = vphi %v848_v32, %v13882_v32  }
  0x27   : >> { %v13571_v24 = vld [vmem:[#allocation7_spill] sm:$0xff]  ;;  %13580 = vst [vmem:[#allocation14_spill] sm:$0xff] %v8316_v41  ;;  %v890_v43 = vsel %vm889_vm10, %v8388_v12, 0.0  ;;  %v896_v44 = vsel %vm889_vm10, %v8380_v14, 0.0  ;;  %v902_v45 = vsel %vm889_vm10, %v8372_v18, 0.0  ;;  %v893_v46 = vsel %vm889_vm10, %v8384_v13, 0.0  ;;  %s8824_s18 = scalar_lea.vmem %s13602_s19, %s8392_s3 }
  0x28   : >> { %v13570_v25 = vld [vmem:[#allocation8_spill] sm:$0xff]  ;;  %v13576_v16 = vld [vmem:[#allocation3_spill] sm:$0xff]  ;;  %13581 = vst [vmem:[#allocation15_spill] sm:$0xff] %v8320_v40  ;;  %891 = vadd.xlane.f32.xlu0 %v890_v43  ;;  %897 = vadd.xlane.f32.xlu1 %v896_v44  ;;  %v899_v47 = vsel %vm889_vm10, %v8376_v17, 0.0  ;;  %v905_v48 = vsel %vm889_vm10, %v8368_v19, 0.0  ;;  %v908_v49 = vsel %vm889_vm10, %v8364_v22, 0.0  ;;  %7610 = vrcp.f32 %v8395_v50 }
  0x29   : >> { %v13578_v26 = vld [vmem:[#allocation9_spill] sm:$0xff]  ;;  %13582 = vst [vmem:[#allocation16_spill] sm:$0xff] %v8324_v39  ;;  %903 = vadd.xlane.f32.xlu2 %v902_v45  ;;  %v911_v43 = vsel %vm889_vm10, %v8360_v30, 0.0  ;;  %s13600_s9 = sld [smem:[#allocation66_spill]]  ;;  %s7215_s4 = sshll.u32 %s8392_s3, 6 }
  0x2a   : >> { %v13569_v27 = vld [vmem:[#allocation10_spill] sm:$0xff]  ;;  %13583 = vst [vmem:[#allocation17_spill] sm:$0xff] %v8328_v38  ;;  %s8847_s5 = scalar_lea.vmem %s8543_s29, %s7215_s4  ;;  %s8397_s22 = smov 48  }
  0x2b   : >> { %v13577_v28 = vld [vmem:[#allocation11_spill] sm:$0xff]  ;;  %13584 = vst [vmem:[#allocation18_spill] sm:$0xff] %v8332_v37  ;;  %s8398_s26 = smov 112   ;;  %s8399_s19 = smov 16  }
  0x2c   : >> { %v13575_v29 = vld [vmem:[#allocation12_spill] sm:$0xff]  ;;  %13585 = vst [vmem:[#allocation19_spill] sm:$0xff] %v8336_v36 }
  0x2d   : >> { %13586 = vst [vmem:[#allocation20_spill] sm:$0xff] %v8340_v35 }
  0x2e   : >> { %13587 = vst [vmem:[#allocation21_spill] sm:$0xff] %v8344_v34  ;;  %v7611_v51 = vpop.eup %7610 }
  0x2f   : >> { %13588 = vst [vmem:[#allocation22_spill] sm:$0xff] %v8348_v33  ;;  %v951_v52 = vmul.f32 64.0, %v7611_v51  ;;  %vm955_vm11 = vweird.f32 %v7611_v51  ;;  %s13601_s15 = scalar_lea.vmem %s13600_s9, %s8509_s0  ;;  %s6892_s9 = sshll.u32 %s8392_s3, 1 }
  0x30   : >> { %13589 = vst [vmem:[#allocation23_spill] sm:$0xff] %v8352_v32  ;;  %894 = vadd.xlane.f32.xlu0 %v893_v46  ;;  %900 = vadd.xlane.f32.xlu1 %v899_v47  ;;  %s8814_s24 = scalar_lea.vmem %s13601_s15, %s8392_s3  ;;  %s1405_s15 = scalar_lea.vmem %s8567_s1, %s6892_s9 }
  0x31   : >> { %13590 = vst [vmem:[#allocation24_spill] sm:$0xff] %v8356_v31  ;;  %906 = vadd.xlane.f32.xlu2 %v905_v48  ;;  %v952_v53 = vsub.f32 1.0, %v951_v52  ;;  %v914_v52 = vsel %vm889_vm10, %v8356_v31, 0.0 }
  0x32   : >> { %13591 = vst [vmem:[#allocation25_spill] sm:$0xff] %v8360_v30 }
  0x33   : >> { %13592 = vst [vmem:[#allocation26_spill] sm:$0xff] %v8364_v22  ;;  %v953_v54 = vmul.f32 %v7611_v51, %v952_v53 }
  0x34   : >> { %13593 = vst [vmem:[#allocation27_spill] sm:$0xff] %v8368_v19 }
  0x35   : >> { %13594 = vst [vmem:[#allocation28_spill] sm:$0xff] %v8372_v18  ;;  %v954_v55 = vadd.f32 %v7611_v51, %v953_v54 }
  0x36   : >> { %13595 = vst [vmem:[#allocation29_spill] sm:$0xff] %v8376_v17 }
  0x37   : >> { %13596 = vst [vmem:[#allocation30_spill] sm:$0xff] %v8380_v14  ;;  %v8770_v56 = vsel %vm955_vm11, %v7611_v51, %v954_v55 }
  0x38   : >> { %13597 = vst [vmem:[#allocation31_spill] sm:$0xff] %v8384_v13 }
  0x39   : >> { %13598 = vst [vmem:[#allocation32_spill] sm:$0xff] %v8388_v12  ;;  %909 = vadd.xlane.f32.xlu2 %v908_v49 }
  0x3a   : >> { %13599 = vst [vmem:[#allocation33_spill] sm:$0xff] %v8770_v56 }
  0x9b   : >> { %v892_v57 = vpop.xlane.xlu0 %891  ;;  %v898_v58 = vpop.xlane.xlu1 %897 }
  0x9c   : >> { %v957_v59 = vmul.f32 %v8770_v56, %v892_v57  ;;  %v904_v61 = vpop.xlane.xlu2 %903  ;;  %v959_v2 = vmul.f32 %v8770_v56, %v898_v58  ;;  %v917_v58 = vsel %vm889_vm10, %v8352_v32, 0.0 }
  0x9d   : >> { %v961_v5 = vmul.f32 %v8770_v56, %v904_v61 }
  0x9e   : >> { %v8774_v60 = vsub.f32 %v8388_v12, %v957_v59  ;;  %v8790_v9 = vsub.f32 %v8380_v14, %v959_v2 }
  0x9f   : >> { %v8795_v11 = vsub.f32 %v8372_v18, %v961_v5  ;;  %v6911_v5 = vld [vmem:[%s8847_s5 + $0x20] sm:$0xf] }
  0xa0   : >> { %v997_v62 = vmul.f32 %v8774_v60, %v8774_v60  ;;  %v999_v46 = vmul.f32 %v8790_v9, %v8790_v9 }
  0xa1   : >> { %v1001_v47 = vmul.f32 %v8795_v11, %v8795_v11 }
  0xa2   : >> { %v1017_v63 = vsel %vm889_vm10, %v997_v62, 0.0  ;;  %v1023_v49 = vsel %vm889_vm10, %v999_v46, 0.0  ;;  %v7219_v46 = vld [vmem:[%s8847_s5 + $0x14] sm:$0xf0] }
  0xa3   : >> { %1018 = vadd.xlane.f32.xlu0 %v1017_v63  ;;  %v895_v0 = vpop.xlane.xlu0 %894  ;;  %v901_v1 = vpop.xlane.xlu1 %900  ;;  %v1029_v50 = vsel %vm889_vm10, %v1001_v47, 0.0  ;;  %v6919_v63 = vld [vmem:[%s8847_s5 + $0x30] sm:$0xf]  ;;  %v7218_v47 = vld [vmem:[%s8847_s5 + $0x14] sm:$0xf] }
  0xa4   : >> { %v958_v3 = vmul.f32 %v8770_v56, %v895_v0  ;;  %v960_v4 = vmul.f32 %v8770_v56, %v901_v1  ;;  %v907_v8 = vpop.xlane.xlu2 %906  ;;  %v7223_v0 = vld [vmem:[%s8847_s5 + $0x34] sm:$0xf0]  ;;  %v7222_v1 = vld [vmem:[%s8847_s5 + $0x34] sm:$0xf] }
  0xa5   : >> { %v962_v48 = vmul.f32 %v8770_v56, %v907_v8  ;;  %v6920_v2 = vor.u32 %v7223_v0, %v6919_v63  ;;  %v7221_v8 = vld [vmem:[%s8847_s5 + $0x24] sm:$0xf0] }
  0xa6   : >> { %v8784_v6 = vsub.f32 %v8384_v13, %v958_v3  ;;  %v8787_v7 = vsub.f32 %v8376_v17, %v960_v4  ;;  %v6921_v3 = vld [vmem:[%s8847_s5 + $0x38] sm:$0xf0] }
  0xa7   : >> { %v8827_v51 = vsub.f32 %v8368_v19, %v962_v48  ;;  %v6924_v4 = vor.u32 %v7222_v1, %v6921_v3  ;;  %1486 = vmatpush.bf16.msra.mxu0 %v6920_v2  ;;  %7255 = vmatpush.bf16.msra.mxu3 %v6920_v2 }
  0xa8   : >> { %v998_v10 = vmul.f32 %v8784_v6, %v8784_v6  ;;  %v1000_v15 = vmul.f32 %v8787_v7, %v8787_v7 }
  0xa9   : >> { %v1002_v55 = vmul.f32 %v8827_v51, %v8827_v51  ;;  %1545 = vmatpush.bf16.msra.mxu1 %v6924_v4  ;;  %7259 = vmatpush.bf16.msra.mxu2 %v6924_v4 }
  0xaa   : >> { %v1020_v44 = vsel %vm889_vm10, %v998_v10, 0.0  ;;  %v1026_v45 = vsel %vm889_vm10, %v1000_v15, 0.0  ;;  %v7220_v10 = vld [vmem:[%s8847_s5 + $0x24] sm:$0xf]  ;;  %v6912_v15 = vor.u32 %v7221_v8, %v6911_v5 }
  0xab   : >> { %1021 = vadd.xlane.f32.xlu1 %v1020_v44  ;;  %1027 = vadd.xlane.f32.xlu2 %v1026_v45  ;;  %v1032_v59 = vsel %vm889_vm10, %v1002_v55, 0.0  ;;  %v6903_v45 = vld [vmem:[%s8847_s5 + $0x10] sm:$0xf]  ;;  %v6895_v55 = vld [vmem:[%s8847_s5] sm:$0xf] }
  0xac   : >> { %912 = vadd.xlane.f32.xlu0 %v911_v43  ;;  %v910_v53 = vpop.xlane.xlu2 %909  ;;  %v6913_v43 = vld [vmem:[%s8847_s5 + $0x28] sm:$0xf0]  ;;  %1487 = vmatpush.bf16.msra.mxu0 %v6912_v15 }
  0xad   : >> { %v963_v54 = vmul.f32 %v8770_v56, %v910_v53  ;;  %v6916_v44 = vor.u32 %v7220_v10, %v6913_v43  ;;  %7256 = vmatpush.bf16.msra.mxu3 %v6912_v15 }
  0xaf   : >> { %v8835_v57 = vsub.f32 %v8364_v22, %v963_v54  ;;  %1546 = vmatpush.bf16.msra.mxu1 %v6916_v44  ;;  %7260 = vmatpush.bf16.msra.mxu2 %v6916_v44 }
  0xb1   : >> { %v1003_v61 = vmul.f32 %v8835_v57, %v8835_v57 }
  0xb3   : >> { %1024 = vadd.xlane.f32.xlu1 %v1023_v49  ;;  %1030 = vadd.xlane.f32.xlu2 %v1029_v50  ;;  %v1035_v62 = vsel %vm889_vm10, %v1003_v61, 0.0  ;;  %v6904_v49 = vor.u32 %v7219_v46, %v6903_v45  ;;  %v6905_v50 = vld [vmem:[%s8847_s5 + $0x18] sm:$0xf0]  ;;  %v7216_v61 = vld [vmem:[%s8847_s5 + $0x4] sm:$0xf] }
  0xb4   : >> { %915 = vadd.xlane.f32.xlu0 %v914_v52  ;;  %v6908_v53 = vor.u32 %v7218_v47, %v6905_v50 }
  0xb5   : >> { %1488 = vmatpush.bf16.msra.mxu0 %v6904_v49  ;;  %7257 = vmatpush.bf16.msra.mxu3 %v6904_v49 }
  0xb6   : >> { %1547 = vmatpush.bf16.msra.mxu1 %v6908_v53  ;;  %7261 = vmatpush.bf16.msra.mxu2 %v6908_v53 }
  0xbb   : >> { %918 = vadd.xlane.f32.xlu1 %v917_v58  ;;  %v7217_v58 = vld [vmem:[%s8847_s5 + $0x4] sm:$0xf0] }
  0xbc   : >> { %1033 = vadd.xlane.f32.xlu0 %v1032_v59  ;;  %v6896_v59 = vor.u32 %v7217_v58, %v6895_v55 }
  0xbe   : >> { %1489 = vmatpush.bf16.msra.mxu0 %v6896_v59  ;;  %7258 = vmatpush.bf16.msra.mxu3 %v6896_v59 }
  0xc3   : >> { %1036 = vadd.xlane.f32.xlu1 %v1035_v62  ;;  %v6897_v62 = vld [vmem:[%s8847_s5 + $0x8] sm:$0xf0]  ;;  %s8401_s5 = smov 96  }
  0xc4   : >> { %v6900_v63 = vor.u32 %v7216_v61, %v6897_v62 }
  0xc6   : >> { %1548 = vmatpush.bf16.msra.mxu1 %v6900_v63  ;;  %7262 = vmatpush.bf16.msra.mxu2 %v6900_v63 }
 0x116   : >> { %v1019_v48 = vpop.xlane.xlu0 %1018 }
 0x117   : >> { %v1077_v52 = vmul.f32 %v1019_v48, %v8770_v56 }
 0x119   : >> { %v1097_v54 = vadd.f32 1e-05, %v1077_v52 }
 0x11b   : >> { %7612 = vrsqrt.f32 %v1097_v54  ;;  %vm1123_vm13 = vweird.f32 %v1097_v54 }
 0x11e   : >> { %v1022_v0 = vpop.xlane.xlu1 %1021  ;;  %v1028_v1 = vpop.xlane.xlu2 %1027 }
 0x11f   : >> { %v1078_v2 = vmul.f32 %v1022_v0, %v8770_v56  ;;  %v1080_v3 = vmul.f32 %v1028_v1, %v8770_v56  ;;  %v913_v4 = vpop.xlane.xlu0 %912 }
 0x120   : >> { %v964_v5 = vmul.f32 %v8770_v56, %v913_v4 }
 0x121   : >> { %v7613_v8 = vpop.eup %7612  ;;  %v1098_v10 = vadd.f32 1e-05, %v1078_v2  ;;  %v8869_v15 = vadd.f32 1e-05, %v1080_v3 }
 0x122   : >> { %v1118_v43 = vmul.f32 %v7613_v8, %v1097_v54  ;;  %v8872_v44 = vsub.f32 %v8360_v30, %v964_v5  ;;  %vm1124_vm12 = vweird.f32 %v7613_v8  ;;  %v938_v5 = vsel %vm889_vm10, %v8324_v39, 0.0 }
 0x123   : >> { %7614 = vrsqrt.f32 %v1098_v10  ;;  %vm8897_vm14 = vmor %vm1123_vm13, %vm1124_vm12  ;;  %vm1133_vm15 = vweird.f32 %v1098_v10  ;;  %vm1153_vm2 = vweird.f32 %v8869_v15 }
 0x124   : >> { %v1119_v45 = vmul.f32 %v7613_v8, %v1118_v43  ;;  %7616 = vrsqrt.f32 %v8869_v15  ;;  %v1004_v46 = vmul.f32 %v8872_v44, %v8872_v44 }
 0x126   : >> { %v1120_v47 = vmul.f32 0.5, %v1119_v45  ;;  %v1025_v48 = vpop.xlane.xlu1 %1024  ;;  %v1031_v49 = vpop.xlane.xlu2 %1030  ;;  %v1038_v50 = vsel %vm889_vm10, %v1004_v46, 0.0 }
 0x127   : >> { %v1079_v52 = vmul.f32 %v1025_v48, %v8770_v56  ;;  %1039 = vadd.xlane.f32.xlu2 %v1038_v50  ;;  %v916_v53 = vpop.xlane.xlu0 %915  ;;  %v1081_v62 = vmul.f32 %v1031_v49, %v8770_v56 }
 0x128   : >> { %v1121_v55 = vsub.f32 1.5, %v1120_v47  ;;  %v965_v58 = vmul.f32 %v8770_v56, %v916_v53 }
 0x129   : >> { %v7615_v59 = vpop.eup %7614  ;;  %v8880_v61 = vadd.f32 1e-05, %v1079_v52  ;;  %v8893_v43 = vadd.f32 1e-05, %v1081_v62 }
 0x12a   : >> { %v8883_v63 = vpop.eup %7616  ;;  %v1128_v0 = vmul.f32 %v7615_v59, %v1098_v10  ;;  %v8886_v1 = vsub.f32 %v8356_v31, %v965_v58  ;;  %v1122_v2 = vmul.f32 %v7613_v8, %v1121_v55  ;;  %vm1134_vm0 = vweird.f32 %v7615_v59 }
 0x12b   : >> { %v1148_v3 = vmul.f32 %v8883_v63, %v8869_v15  ;;  %7618 = vrsqrt.f32 %v8880_v61  ;;  %vm1135_vm1 = vmor %vm1133_vm15, %vm1134_vm0  ;;  %vm1154_vm3 = vweird.f32 %v8883_v63  ;;  %vm1143_vm4 = vweird.f32 %v8880_v61 }
 0x12c   : >> { %v1129_v4 = vmul.f32 %v7615_v59, %v1128_v0  ;;  %v1005_v45 = vmul.f32 %v8886_v1, %v8886_v1  ;;  %v1126_v49 = vsel %vm8897_vm14, %v7613_v8, %v1122_v2  ;;  %7620 = vrsqrt.f32 %v8893_v43  ;;  %vm8940_vm6 = vmor %vm1153_vm2, %vm1154_vm3 }
 0x12d   : >> { %v1149_v50 = vmul.f32 %v8883_v63, %v1148_v3  ;;  %vm1163_vm11 = vweird.f32 %v8893_v43 }
 0x12e   : >> { %v1130_v47 = vmul.f32 0.5, %v1129_v4  ;;  %v919_v48 = vpop.xlane.xlu1 %918  ;;  %v1041_v52 = vsel %vm889_vm10, %v1005_v45, 0.0  ;;  %v1317_v4 = vmul.f32 %v1126_v49, %v8774_v60 }
 0x12f   : >> { %v1034_v54 = vpop.xlane.xlu0 %1033  ;;  %v966_v53 = vmul.f32 %v8770_v56, %v919_v48  ;;  %939 = vadd.xlane.f32.xlu2 %v938_v5  ;;  %1042 = vadd.xlane.f32.xlu0 %v1041_v52  ;;  %v8916_v5 = vld [vmem:[%s8814_s24] ss:$0 sm:$0xff]  ;;  %v1150_v10 = vmul.f32 0.5, %v1149_v50  ;;  %v947_v48 = vsel %vm889_vm10, %v8312_v42, 0.0  ;;  %s8396_s24 = smov 64  }
 0x130   : >> { %v1131_v55 = vsub.f32 1.5, %v1130_v47  ;;  %v1082_v58 = vmul.f32 %v1034_v54, %v8770_v56  ;;  %v941_v54 = vsel %vm889_vm10, %v8320_v40, 0.0  ;;  %v1340_v50 = vmul.f32 %v8916_v5, %v1317_v4 }
 0x131   : >> { %v7619_v62 = vpop.eup %7618  ;;  %v8909_v8 = vsub.f32 %v8352_v32, %v966_v53  ;;  %v8929_v53 = vld [vmem:[%s8824_s18] ss:$0 sm:$0xff]  ;;  %s8400_s18 = smov 32  }
 0x132   : >> { %v1132_v0 = vmul.f32 %v7615_v59, %v1131_v55  ;;  %v1138_v2 = vmul.f32 %v7619_v62, %v8880_v61  ;;  %v8912_v3 = vadd.f32 1e-05, %v1082_v58  ;;  %v1151_v55 = vsub.f32 1.5, %v1150_v10 }
 0x133   : >> { %v1006_v45 = vmul.f32 %v8909_v8, %v8909_v8  ;;  %vm1144_vm5 = vweird.f32 %v7619_v62 }
 0x134   : >> { %v1136_v46 = vsel %vm1135_vm1, %v7615_v59, %v1132_v0  ;;  %v1139_v47 = vmul.f32 %v7619_v62, %v1138_v2  ;;  %7622 = vrsqrt.f32 %v8912_v3  ;;  %v8931_v59 = vpop.eup %7620  ;;  %v1152_v10 = vmul.f32 %v8883_v63, %v1151_v55  ;;  %vm1145_vm7 = vmor %vm1143_vm4, %vm1144_vm5 }
 0x135   : >> { %v1044_v52 = vsel %vm889_vm10, %v1006_v45, 0.0  ;;  %v1318_v60 = vmul.f32 %v1136_v46, %v8784_v6  ;;  %v1363_v45 = vadd.f32 %v8929_v53, %v1340_v50  ;;  %v1158_v15 = vmul.f32 %v8931_v59, %v8893_v43 }
 0x136   : >> { %v1140_v49 = vmul.f32 0.5, %v1139_v47  ;;  %1045 = vadd.xlane.f32.xlu1 %v1044_v52  ;;  %v923_v52 = vsel %vm889_vm10, %v8344_v34, 0.0  ;;  %v1156_v50 = vsel %vm8940_vm6, %v8883_v63, %v1152_v10  ;;  %v935_v10 = vsel %vm889_vm10, %v8328_v38, 0.0 }
 0x137   : >> { %948 = vadd.xlane.f32.xlu2 %v947_v48  ;;  %v1341_v58 = vmul.f32 %v8916_v5, %v1318_v60  ;;  %942 = vadd.xlane.f32.xlu0 %v941_v54  ;;  %v944_v48 = vsel %vm889_vm10, %v8316_v41, 0.0  ;;  %v1159_v55 = vmul.f32 %v8931_v59, %v1158_v15  ;;  %vm1173_vm8 = vweird.f32 %v8912_v3 }
 0x138   : >> { %v1141_v0 = vsub.f32 1.5, %v1140_v49  ;;  %v920_v49 = vsel %vm889_vm10, %v8348_v33, 0.0  ;;  %vm1164_vm12 = vweird.f32 %v8931_v59 }
 0x139   : >> { %v1364_v6 = vadd.f32 %v8929_v53, %v1341_v58  ;;  %vm1165_vm14 = vmor %vm1163_vm11, %vm1164_vm12 }
 0x13a   : >> { %v7623_v2 = vpop.eup %7622  ;;  %v1142_v4 = vmul.f32 %v7619_v62, %v1141_v0  ;;  %v1320_v0 = vmul.f32 %v1156_v50, %v8787_v7 }
 0x13b   : >> { %v1168_v47 = vmul.f32 %v7623_v2, %v8912_v3  ;;  %v1383_v61 = vpack.c.bf16 %v1364_v6, %v1363_v45  ;;  %v1160_v6 = vmul.f32 0.5, %v1159_v55  ;;  %v926_v45 = vsel %vm889_vm10, %v8340_v35, 0.0 }
 0x13c   : >> { %v1146_v54 = vsel %vm1145_vm7, %v7619_v62, %v1142_v4  ;;  %v929_v4 = vsel %vm889_vm10, %v8336_v36, 0.0  ;;  %v1343_v15 = vmul.f32 %v8916_v5, %v1320_v0  ;;  %vm1174_vm9 = vweird.f32 %v7623_v2  ;;  %v1037_v0 = vpop.xlane.xlu1 %1036 }
 0x13d   : >> { %v1169_v60 = vmul.f32 %v7623_v2, %v1168_v47  ;;  %6925 = vmatmul.msk.bf16.vlgmr.msra.gmra.mxu0 %vm889_vm10, %v1383_v61  ;;  %6935 = vmatmul.msk.bf16.vlgmr.msra.gmra.mxu1 %vm889_vm10, %v1383_v61  ;;  %v1319_v58 = vmul.f32 %v1146_v54, %v8790_v9  ;;  %v1161_v47 = vsub.f32 1.5, %v1160_v6  ;;  %vm1175_vm13 = vmor %vm1173_vm8, %vm1174_vm9  ;;  %v932_v3 = vsel %vm889_vm10, %v8332_v37, 0.0 }
 0x13e   : >> { %945 = vadd.xlane.f32.xlu1 %v944_v48  ;;  %v1366_v61 = vadd.f32 %v8929_v53, %v1343_v15 }
 0x13f   : >> { %924 = vadd.xlane.f32.xlu2 %v923_v52  ;;  %921 = vadd.xlane.f32.xlu0 %v920_v49  ;;  %v1170_v62 = vmul.f32 0.5, %v1169_v60  ;;  %v1342_v46 = vmul.f32 %v8916_v5, %v1319_v58  ;;  %v1162_v48 = vmul.f32 %v8931_v59, %v1161_v47 }
 0x141   : >> { %v1171_v63 = vsub.f32 1.5, %v1170_v62  ;;  %v1365_v7 = vadd.f32 %v8929_v53, %v1342_v46  ;;  %v1166_v43 = vsel %vm1165_vm14, %v8931_v59, %v1162_v48  ;;  %v1083_v59 = vmul.f32 %v1037_v0, %v8770_v56 }
 0x142   : >> { %v1321_v49 = vmul.f32 %v1166_v43, %v8795_v11 }
 0x143   : >> { %v1172_v9 = vmul.f32 %v7623_v2, %v1171_v63  ;;  %v1384_v52 = vpack.c.bf16 %v1366_v61, %v1365_v7  ;;  %v1103_v6 = vadd.f32 1e-05, %v1083_v59 }
 0x144   : >> { %v1344_v55 = vmul.f32 %v8916_v5, %v1321_v49 }
 0x145   : >> { %v1176_v54 = vsel %vm1175_vm13, %v7623_v2, %v1172_v9  ;;  %7624 = vrsqrt.f32 %v1103_v6  ;;  %vm1183_vm15 = vweird.f32 %v1103_v6 }
 0x146   : >> { %930 = vadd.xlane.f32.xlu1 %v929_v4  ;;  %v1322_v60 = vmul.f32 %v1176_v54, %v8827_v51  ;;  %v1367_v62 = vadd.f32 %v8929_v53, %v1344_v55 }
 0x147   : >> { %927 = vadd.xlane.f32.xlu2 %v926_v45  ;;  %936 = vadd.xlane.f32.xlu0 %v935_v10 }
 0x148   : >> { %v1345_v50 = vmul.f32 %v8916_v5, %v1322_v60 }
 0x14a   : >> { %v1368_v58 = vadd.f32 %v8929_v53, %v1345_v50 }
 0x14b   : >> { %v7625_v51 = vpop.eup %7624 }
 0x14c   : >> { %v1385_v2 = vpack.c.bf16 %v1368_v58, %v1367_v62  ;;  %v1178_v11 = vmul.f32 %v7625_v51, %v1103_v6  ;;  %vm1184_vm0 = vweird.f32 %v7625_v51 }
 0x14d   : >> { %6926 = vmatmul.msk.bf16.gmra.mxu0 %vm889_vm10, %v1384_v52  ;;  %6936 = vmatmul.msk.bf16.gmra.mxu1 %vm889_vm10, %v1384_v52  ;;  %vm8995_vm1 = vmor %vm1183_vm15, %vm1184_vm0 }
 0x14e   : >> { %933 = vadd.xlane.f32.xlu1 %v932_v3  ;;  %v1179_v4 = vmul.f32 %v7625_v51, %v1178_v11 }
 0x150   : >> { %v1180_v10 = vmul.f32 0.5, %v1179_v4 }
 0x152   : >> { %v1181_v15 = vsub.f32 1.5, %v1180_v10 }
 0x154   : >> { %v1182_v3 = vmul.f32 %v7625_v51, %v1181_v15 }
 0x156   : >> { %v1186_v62 = vsel %vm8995_vm1, %v7625_v51, %v1182_v3 }
 0x157   : >> { %v1323_v15 = vmul.f32 %v1186_v62, %v8835_v57 }
 0x15d   : >> { %6927 = vmatmul.msk.bf16.gmra.mxu0 %vm889_vm10, %v1385_v2  ;;  %6937 = vmatmul.msk.bf16.gmra.mxu1 %vm889_vm10, %v1385_v2 }
 0x19a   : >> { %v1040_v45 = vpop.xlane.xlu2 %1039 }
 0x19b   : >> { %v1084_v46 = vmul.f32 %v1040_v45, %v8770_v56 }
 0x19d   : >> { %v1104_v63 = vadd.f32 1e-05, %v1084_v46 }
 0x19f   : >> { %7626 = vrsqrt.f32 %v1104_v63  ;;  %vm1193_vm3 = vweird.f32 %v1104_v63 }
 0x1a2   : >> { %v940_v47 = vpop.xlane.xlu2 %939  ;;  %v1043_v7 = vpop.xlane.xlu0 %1042 }
 0x1a3   : >> { %v973_v9 = vmul.f32 %v8770_v56, %v940_v47  ;;  %v1085_v61 = vmul.f32 %v1043_v7, %v8770_v56 }
 0x1a5   : >> { %v7627_v48 = vpop.eup %7626  ;;  %v8993_v52 = vsub.f32 %v8324_v39, %v973_v9  ;;  %v1105_v43 = vadd.f32 1e-05, %v1085_v61 }
 0x1a6   : >> { %v1188_v54 = vmul.f32 %v7627_v48, %v1104_v63  ;;  %vm1194_vm2 = vweird.f32 %v7627_v48 }
 0x1a7   : >> { %v1013_v49 = vmul.f32 %v8993_v52, %v8993_v52  ;;  %7628 = vrsqrt.f32 %v1105_v43  ;;  %vm1195_vm4 = vmor %vm1193_vm3, %vm1194_vm2  ;;  %vm1203_vm6 = vweird.f32 %v1105_v43 }
 0x1a8   : >> { %v1189_v50 = vmul.f32 %v7627_v48, %v1188_v54 }
 0x1a9   : >> { %v1046_v55 = vpop.xlane.xlu1 %1045  ;;  %v1065_v58 = vsel %vm889_vm10, %v1013_v49, 0.0 }
 0x1aa   : >> { %v1190_v2 = vmul.f32 0.5, %v1189_v50  ;;  %v1086_v0 = vmul.f32 %v1046_v55, %v8770_v56  ;;  %1066 = vadd.xlane.f32.xlu0 %v1065_v58  ;;  %v949_v59 = vpop.xlane.xlu2 %948  ;;  %v943_v6 = vpop.xlane.xlu0 %942  ;;  %v1346_v58 = vmul.f32 %v8916_v5, %v1323_v15 }
 0x1ab   : >> { %v976_v11 = vmul.f32 %v8770_v56, %v949_v59  ;;  %v974_v46 = vmul.f32 %v8770_v56, %v943_v6 }
 0x1ac   : >> { %v1191_v4 = vsub.f32 1.5, %v1190_v2  ;;  %v9006_v45 = vadd.f32 1e-05, %v1086_v0 }
 0x1ad   : >> { %v9010_v10 = vsub.f32 %v8312_v42, %v976_v11  ;;  %v7629_v51 = vpop.eup %7628  ;;  %v9015_v7 = vsub.f32 %v8320_v40, %v974_v46 }
 0x1ae   : >> { %v1192_v47 = vmul.f32 %v7627_v48, %v1191_v4  ;;  %7630 = vrsqrt.f32 %v9006_v45  ;;  %v1198_v9 = vmul.f32 %v7629_v51, %v1105_v43  ;;  %vm1204_vm5 = vweird.f32 %v7629_v51 }
 0x1af   : >> { %v1016_v61 = vmul.f32 %v9010_v10, %v9010_v10  ;;  %v1014_v54 = vmul.f32 %v9015_v7, %v9015_v7  ;;  %vm9040_vm7 = vmor %vm1203_vm6, %vm1204_vm5  ;;  %vm1213_vm8 = vweird.f32 %v9006_v45 }
 0x1b0   : >> { %v1196_v3 = vsel %vm1195_vm4, %v7627_v48, %v1192_v47  ;;  %v1199_v60 = vmul.f32 %v7629_v51, %v1198_v9  ;;  %v1369_v47 = vadd.f32 %v8929_v53, %v1346_v58 }
 0x1b1   : >> { %v1074_v57 = vsel %vm889_vm10, %v1016_v61, 0.0  ;;  %v1324_v49 = vmul.f32 %v1196_v3, %v8872_v44  ;;  %v1068_v63 = vsel %vm889_vm10, %v1014_v54, 0.0  ;;  %v946_v50 = vpop.xlane.xlu1 %945 }
 0x1b2   : >> { %1075 = vadd.xlane.f32.xlu0 %v1074_v57  ;;  %v925_v55 = vpop.xlane.xlu2 %924  ;;  %v1200_v62 = vmul.f32 0.5, %v1199_v60  ;;  %v922_v2 = vpop.xlane.xlu0 %921  ;;  %1069 = vadd.xlane.f32.xlu1 %v1068_v63  ;;  %v975_v48 = vmul.f32 %v8770_v56, %v946_v50 }
 0x1b3   : >> { %v1347_v0 = vmul.f32 %v8916_v5, %v1324_v49  ;;  %v967_v6 = vmul.f32 %v8770_v56, %v922_v2  ;;  %v968_v11 = vmul.f32 %v8770_v56, %v925_v55 }
 0x1b4   : >> { %v7631_v59 = vpop.eup %7630  ;;  %v1201_v44 = vsub.f32 1.5, %v1200_v62  ;;  %v9031_v46 = vsub.f32 %v8316_v41, %v975_v48 }
 0x1b5   : >> { %v1208_v4 = vmul.f32 %v7631_v59, %v9006_v45  ;;  %v9034_v15 = vsub.f32 %v8348_v33, %v967_v6  ;;  %v1370_v9 = vadd.f32 %v8929_v53, %v1347_v0  ;;  %v9045_v57 = vsub.f32 %v8344_v34, %v968_v11 }
 0x1b6   : >> { %v1202_v61 = vmul.f32 %v7629_v51, %v1201_v44  ;;  %v1015_v54 = vmul.f32 %v9031_v46, %v9031_v46  ;;  %vm1214_vm9 = vweird.f32 %v7631_v59 }
 0x1b7   : >> { %v1209_v3 = vmul.f32 %v7631_v59, %v1208_v4  ;;  %v1386_v49 = vpack.c.bf16 %v1370_v9, %v1369_v47  ;;  %v1007_v63 = vmul.f32 %v9034_v15, %v9034_v15  ;;  %v1008_v11 = vmul.f32 %v9045_v57, %v9045_v57  ;;  %vm1215_vm11 = vmor %vm1213_vm8, %vm1214_vm9 }
 0x1b8   : >> { %v1206_v50 = vsel %vm9040_vm7, %v7629_v51, %v1202_v61  ;;  %v1071_v43 = vsel %vm889_vm10, %v1015_v54, 0.0 }
 0x1b9   : >> { %v1210_v55 = vmul.f32 0.5, %v1209_v3  ;;  %6928 = vmatmul.msk.bf16.gmra.mxu0 %vm889_vm10, %v1386_v49  ;;  %6938 = vmatmul.msk.bf16.gmra.mxu1 %vm889_vm10, %v1386_v49  ;;  %v931_v58 = vpop.xlane.xlu1 %930  ;;  %v1047_v62 = vsel %vm889_vm10, %v1007_v63, 0.0  ;;  %v1325_v44 = vmul.f32 %v1206_v50, %v8886_v1  ;;  %v9073_v3 = vld [vmem:[%s1405_s15] sm:$0x3]  ;;  %v1050_v54 = vsel %vm889_vm10, %v1008_v11, 0.0  ;;  %s8402_s15 = smov 80  }
 0x1ba   : >> { %v928_v2 = vpop.xlane.xlu2 %927  ;;  %1072 = vadd.xlane.f32.xlu2 %v1071_v43  ;;  %1048 = vadd.xlane.f32.xlu0 %v1047_v62  ;;  %v1491_v0 = vpop.f32.mrf.mxu0  ;;  %v970_v6 = vmul.f32 %v8770_v56, %v931_v58 }
 0x1bb   : >> { %v1211_v48 = vsub.f32 1.5, %v1210_v55  ;;  %v969_v51 = vmul.f32 %v8770_v56, %v928_v2  ;;  %v1348_v60 = vmul.f32 %v8916_v5, %v1325_v44  ;;  %v937_v63 = vpop.xlane.xlu0 %936  ;;  %v9081_v55 = vperm.slane %v9073_v3, 0 }
 0x1bc   : >> { %v9071_v61 = vsub.f32 %v8336_v36, %v970_v6  ;;  %v972_v2 = vmul.f32 %v8770_v56, %v937_v63 }
 0x1bd   : >> { %v1212_v4 = vmul.f32 %v7631_v59, %v1211_v48  ;;  %v9063_v47 = vsub.f32 %v8340_v35, %v969_v51  ;;  %v1371_v62 = vadd.f32 %v8929_v53, %v1348_v60 }
 0x1be   : >> { %v1010_v48 = vmul.f32 %v9071_v61, %v9071_v61 }
 0x1bf   : >> { %v1216_v45 = vsel %vm1215_vm11, %v7631_v59, %v1212_v4  ;;  %v1009_v9 = vmul.f32 %v9063_v47, %v9063_v47  ;;  %v1492_v4 = vadd.f32 %v1491_v0, %v9081_v55 }
 0x1c0   : >> { %v1326_v1 = vmul.f32 %v1216_v45, %v8909_v8  ;;  %v9097_v45 = vsub.f32 %v8328_v38, %v972_v2 }
 0x1c1   : >> { %v1053_v49 = vsel %vm889_vm10, %v1009_v9, 0.0  ;;  %v934_v50 = vpop.xlane.xlu1 %933  ;;  %v1056_v9 = vsel %vm889_vm10, %v1010_v48, 0.0 }
 0x1c2   : >> { %v1349_v59 = vmul.f32 %v8916_v5, %v1326_v1  ;;  %v971_v43 = vmul.f32 %v8770_v56, %v934_v50  ;;  %1051 = vadd.xlane.f32.xlu2 %v1050_v54  ;;  %1054 = vadd.xlane.f32.xlu0 %v1053_v49  ;;  %v1493_v58 = vpop.f32.mrf.mxu0  ;;  %v1012_v0 = vmul.f32 %v9097_v45, %v9097_v45 }
 0x1c3   : >> { %v1494_v6 = vadd.f32 %v1493_v58, %v9081_v55 }
 0x1c4   : >> { %v1372_v8 = vadd.f32 %v8929_v53, %v1349_v59  ;;  %v9090_v51 = vsub.f32 %v8332_v37, %v971_v43  ;;  %v1062_v49 = vsel %vm889_vm10, %v1012_v0, 0.0 }
 0x1c5   : >> { %v9101_v1 = vpack.c.bf16 %v1494_v6, %v1492_v4  ;;  %v9134_v6 = vpop.f32.mrf.mxu1 }
 0x1c6   : >> { %v1387_v11 = vpack.c.bf16 %v1372_v8, %v1371_v62  ;;  %v1011_v44 = vmul.f32 %v9090_v51, %v9090_v51 }
 0x1c8   : >> { %v1059_v54 = vsel %vm889_vm10, %v1011_v44, 0.0 }
 0x1c9   : >> { %6929 = vmatmul.msk.bf16.gmra.mxu0 %vm889_vm10, %v1387_v11  ;;  %6939 = vmatmul.msk.bf16.gmra.mxu1 %vm889_vm10, %v1387_v11 }
 0x1ca   : >> { %1057 = vadd.xlane.f32.xlu2 %v1056_v9  ;;  %1060 = vadd.xlane.f32.xlu0 %v1059_v54  ;;  %v1496_v60 = vpop.f32.mrf.mxu0 }
 0x1cb   : >> { %1615 = vrot.lane.b32.xlu1 %v9101_v1, %s8396_s24  ;;  %v1497_v50 = vadd.f32 %v1496_v60, %v9081_v55 }
 0x1cd   : >> { %v9138_v11 = vpop.f32.mrf.mxu1 }
 0x1d2   : >> { %1063 = vadd.xlane.f32.xlu2 %v1062_v49  ;;  %v1498_v63 = vpop.f32.mrf.mxu0 }
 0x1d3   : >> { %v1499_v59 = vadd.f32 %v1498_v63, %v9081_v55 }
 0x1d5   : >> { %v9112_v43 = vpack.c.bf16 %v1499_v59, %v1497_v50  ;;  %v9140_v44 = vpop.f32.mrf.mxu1 }
 0x1d7   : >> { %1867 = vrot.lane.b32.xlu1 %v9112_v43, %s8397_s22 }
 0x1da   : >> { %v1501_v58 = vpop.f32.mrf.mxu0 }
 0x1db   : >> { %v1502_v8 = vadd.f32 %v1501_v58, %v9081_v55 }
 0x1dd   : >> { %v9142_v4 = vpop.f32.mrf.mxu1 }
 0x1de   : >> { %1855 = vrot.lane.b32.xlu0 %v9101_v1, %s8398_s26 }
 0x1e2   : >> { %v1503_v62 = vpop.f32.mrf.mxu0 }
 0x1e3   : >> { %v1504_v2 = vadd.f32 %v1503_v62, %v9081_v55 }
 0x1e5   : >> { %v9120_v48 = vpack.c.bf16 %v1504_v2, %v1502_v8  ;;  %v9145_v0 = vpop.f32.mrf.mxu1 }
 0x1e7   : >> { %1619 = vrot.lane.b32.xlu0 %v9120_v48, %s8396_s24 }
 0x1ea   : >> { %1865 = vrot.lane.b32.xlu2 %v9101_v1, %s8397_s22 }
 0x1ed   : >> { %v9152_v40 = vpop.f32.mrf.mxu1 }
 0x1ef   : >> { %1869 = vrot.lane.b32.xlu0 %v9120_v48, %s8397_s22 }
 0x1f2   : >> { %1617 = vrot.lane.b32.xlu2 %v9112_v43, %s8396_s24 }
 0x1f7   : >> { %1859 = vrot.lane.b32.xlu0 %v9120_v48, %s8398_s26 }
 0x1fa   : >> { %1857 = vrot.lane.b32.xlu2 %v9112_v43, %s8398_s26 }
 0x1ff   : >> { %2400 = vrot.lane.b32.xlu0 %v9120_v48, %s8399_s19 }
 0x21d   : >> { %v1067_v9 = vpop.xlane.xlu0 %1066 }
 0x21e   : >> { %v1093_v54 = vmul.f32 %v1067_v9, %v8770_v56 }
 0x220   : >> { %v1113_v60 = vadd.f32 1e-05, %v1093_v54 }
 0x222   : >> { %7632 = vrsqrt.f32 %v1113_v60  ;;  %vm1283_vm12 = vweird.f32 %v1113_v60 }
 0x225   : >> { %v1076_v49 = vpop.xlane.xlu0 %1075  ;;  %v1070_v63 = vpop.xlane.xlu1 %1069 }
 0x226   : >> { %v1096_v50 = vmul.f32 %v1076_v49, %v8770_v56  ;;  %v1094_v59 = vmul.f32 %v1070_v63, %v8770_v56 }
 0x228   : >> { %v7633_v58 = vpop.eup %7632  ;;  %v9149_v62 = vadd.f32 1e-05, %v1096_v50  ;;  %v1114_v2 = vadd.f32 1e-05, %v1094_v59 }
 0x229   : >> { %v1278_v8 = vmul.f32 %v7633_v58, %v1113_v60  ;;  %vm1284_vm13 = vweird.f32 %v7633_v58 }
 0x22a   : >> { %7634 = vrsqrt.f32 %v9149_v62  ;;  %vm9171_vm14 = vmor %vm1283_vm12, %vm1284_vm13  ;;  %vm1293_vm0 = vweird.f32 %v1114_v2  ;;  %vm1313_vm2 = vweird.f32 %v9149_v62 }
 0x22b   : >> { %v1279_v41 = vmul.f32 %v7633_v58, %v1278_v8  ;;  %7636 = vrsqrt.f32 %v1114_v2 }
 0x22d   : >> { %v1280_v9 = vmul.f32 0.5, %v1279_v41  ;;  %v1049_v54 = vpop.xlane.xlu0 %1048  ;;  %v1073_v42 = vpop.xlane.xlu2 %1072 }
 0x22e   : >> { %v1087_v39 = vmul.f32 %v1049_v54, %v8770_v56  ;;  %v1095_v49 = vmul.f32 %v1073_v42, %v8770_v56 }
 0x22f   : >> { %v1281_v50 = vsub.f32 1.5, %v1280_v9 }
 0x230   : >> { %v9156_v38 = vpop.eup %7634  ;;  %v9160_v37 = vadd.f32 1e-05, %v1087_v39  ;;  %v9162_v35 = vadd.f32 1e-05, %v1095_v49 }
 0x231   : >> { %v7637_v63 = vpop.eup %7636  ;;  %v1308_v59 = vmul.f32 %v9156_v38, %v9149_v62  ;;  %v1282_v54 = vmul.f32 %v7633_v58, %v1281_v50  ;;  %vm1314_vm3 = vweird.f32 %v9156_v38 }
 0x232   : >> { %v1288_v8 = vmul.f32 %v7637_v63, %v1114_v2  ;;  %7638 = vrsqrt.f32 %v9160_v37  ;;  %vm1294_vm15 = vweird.f32 %v7637_v63  ;;  %vm1223_vm4 = vweird.f32 %v9160_v37  ;;  %vm9220_vm7 = vmor %vm1313_vm2, %vm1314_vm3 }
 0x233   : >> { %7640 = vrsqrt.f32 %v9162_v35  ;;  %v1309_v42 = vmul.f32 %v9156_v38, %v1308_v59  ;;  %v1286_v50 = vsel %vm9171_vm14, %v7633_v58, %v1282_v54  ;;  %vm1295_vm1 = vmor %vm1293_vm0, %vm1294_vm15  ;;  %vm1303_vm5 = vweird.f32 %v9162_v35 }
 0x234   : >> { %v1289_v41 = vmul.f32 %v7637_v63, %v1288_v8 }
 0x235   : >> { %v1055_v9 = vpop.xlane.xlu0 %1054  ;;  %v1052_v36 = vpop.xlane.xlu2 %1051  ;;  %v1310_v59 = vmul.f32 0.5, %v1309_v42 }
 0x236   : >> { %v1290_v33 = vmul.f32 0.5, %v1289_v41  ;;  %v1089_v34 = vmul.f32 %v1055_v9, %v8770_v56  ;;  %v1088_v39 = vmul.f32 %v1052_v36, %v8770_v56  ;;  %v1506_v32 = vpop.f32.mrf.mxu0  ;;  %v9169_v49 = vpop.f32.mrf.mxu1 }
 0x237   : >> { %v1311_v54 = vsub.f32 1.5, %v1310_v59  ;;  %v1507_v59 = vadd.f32 %v1506_v32, %v9081_v55 }
 0x238   : >> { %v1291_v8 = vsub.f32 1.5, %v1290_v33  ;;  %v9175_v60 = vpop.eup %7638  ;;  %v9179_v41 = vadd.f32 1e-05, %v1089_v34  ;;  %v9181_v9 = vadd.f32 1e-05, %v1088_v39  ;;  %v1333_v34 = vmul.f32 %v1286_v50, %v8993_v52 }
 0x239   : >> { %v9183_v36 = vpop.eup %7640  ;;  %v1218_v22 = vmul.f32 %v9175_v60, %v9160_v37  ;;  %v1312_v19 = vmul.f32 %v9156_v38, %v1311_v54  ;;  %vm1224_vm6 = vweird.f32 %v9175_v60 }
 0x23a   : >> { %v1292_v30 = vmul.f32 %v7637_v63, %v1291_v8  ;;  %v1298_v33 = vmul.f32 %v9183_v36, %v9162_v35  ;;  %7642 = vrsqrt.f32 %v9179_v41  ;;  %vm1304_vm8 = vweird.f32 %v9183_v36  ;;  %vm9230_vm9 = vmor %vm1223_vm4, %vm1224_vm6 }
 0x23b   : >> { %v1219_v58 = vmul.f32 %v9175_v60, %v1218_v22  ;;  %7644 = vrsqrt.f32 %v9181_v9  ;;  %vm9244_vm11 = vmor %vm1303_vm5, %vm1304_vm8  ;;  %vm1233_vm12 = vweird.f32 %v9181_v9  ;;  %vm1243_vm15 = vweird.f32 %v9179_v41 }
 0x23c   : >> { %v1296_v31 = vsel %vm1295_vm1, %v7637_v63, %v1292_v30  ;;  %v1299_v42 = vmul.f32 %v9183_v36, %v1298_v33 }
 0x23d   : >> { %v1334_v2 = vmul.f32 %v1296_v31, %v9015_v7  ;;  %v1220_v39 = vmul.f32 0.5, %v1219_v58  ;;  %v1061_v8 = vpop.xlane.xlu0 %1060  ;;  %v1058_v22 = vpop.xlane.xlu2 %1057  ;;  %v1356_v31 = vmul.f32 %v8916_v5, %v1333_v34 }
 0x23e   : >> { %v1300_v30 = vmul.f32 0.5, %v1299_v42  ;;  %v1508_v63 = vpop.f32.mrf.mxu0  ;;  %v1090_v7 = vmul.f32 %v1058_v22, %v8770_v56  ;;  %v9202_v33 = vpop.f32.mrf.mxu1  ;;  %v1091_v32 = vmul.f32 %v1061_v8, %v8770_v56 }
 0x23f   : >> { %v1357_v52 = vmul.f32 %v8916_v5, %v1334_v2  ;;  %v1221_v50 = vsub.f32 1.5, %v1220_v39  ;;  %v1509_v18 = vadd.f32 %v1508_v63, %v9081_v55  ;;  %v1379_v62 = vadd.f32 %v8929_v53, %v1356_v31 }
 0x240   : >> { %v9205_v58 = vpop.eup %7642  ;;  %v1301_v42 = vsub.f32 1.5, %v1300_v30  ;;  %v9213_v39 = vadd.f32 1e-05, %v1090_v7  ;;  %v9249_v14 = vadd.f32 1e-05, %v1091_v32 }
 0x241   : >> { %v7645_v13 = vpop.eup %7644  ;;  %v1238_v2 = vmul.f32 %v9205_v58, %v9179_v41  ;;  %v1380_v22 = vadd.f32 %v8929_v53, %v1357_v52  ;;  %v1222_v54 = vmul.f32 %v9175_v60, %v1221_v50  ;;  %v9237_v50 = vpack.c.bf16 %v1509_v18, %v1507_v59 }
 0x242   : >> { %v1302_v30 = vmul.f32 %v9183_v36, %v1301_v42  ;;  %v1228_v8 = vmul.f32 %v7645_v13, %v9181_v9  ;;  %7646 = vrsqrt.f32 %v9213_v39  ;;  %v1316_v42 = vsel %vm9220_vm7, %v9156_v38, %v1312_v19 }
 0x243   : >> { %v1239_v52 = vmul.f32 %v9205_v58, %v1238_v2  ;;  %v1391_v31 = vpack.c.bf16 %v1380_v22, %v1379_v62  ;;  %v1226_v18 = vsel %vm9230_vm9, %v9175_v60, %v1222_v54  ;;  %vm1234_vm13 = vweird.f32 %v7645_v13  ;;  %2402 = vrot.lane.b32.xlu1 %v9237_v50, %s8399_s19  ;;  %1621 = vrot.lane.b32.xlu2 %v9237_v50, %s8396_s24 }
 0x244   : >> { %v1229_v7 = vmul.f32 %v7645_v13, %v1228_v8  ;;  %v1306_v59 = vsel %vm9244_vm11, %v9183_v36, %v1302_v30  ;;  %1861 = vrot.lane.b32.xlu0 %v9237_v50, %s8398_s26  ;;  %v1336_v22 = vmul.f32 %v1316_v42, %v9010_v10  ;;  %vm1235_vm14 = vmor %vm1233_vm12, %vm1234_vm13  ;;  %7648 = vrsqrt.f32 %v9249_v14 }
 0x245   : >> { %v1064_v35 = vpop.xlane.xlu2 %1063  ;;  %6933 = vmatmul.msk.bf16.vlgmr.msra.gmra.mxu3 %vm889_vm10, %v1391_v31  ;;  %v1240_v32 = vmul.f32 0.5, %v1239_v52  ;;  %6943 = vmatmul.msk.bf16.vlgmr.msra.gmra.mxu2 %vm889_vm10, %v1391_v31  ;;  %v1327_v30 = vmul.f32 %v1226_v18, %v9034_v15  ;;  %v1335_v8 = vmul.f32 %v1306_v59, %v9031_v46  ;;  %v9279_v52 = vperm.slane %v9073_v3, 1 }
 0x246   : >> { %v1230_v19 = vmul.f32 0.5, %v1229_v7  ;;  %v1511_v38 = vpop.f32.mrf.mxu0  ;;  %v1092_v60 = vmul.f32 %v1064_v35, %v8770_v56  ;;  %v1570_v2 = vpop.f32.mrf.mxu1  ;;  %v1359_v37 = vmul.f32 %v8916_v5, %v1336_v22  ;;  %vm1253_vm0 = vweird.f32 %v9213_v39 }
 0x247   : >> { %v1241_v10 = vsub.f32 1.5, %v1240_v32  ;;  %v1350_v15 = vmul.f32 %v8916_v5, %v1327_v30  ;;  %v1358_v46 = vmul.f32 %v8916_v5, %v1335_v8  ;;  %v1568_v3 = vadd.f32 %v9202_v33, %v9279_v52 }
 0x248   : >> { %v1231_v36 = vsub.f32 1.5, %v1230_v19  ;;  %v9267_v34 = vpop.eup %7646  ;;  %v9272_v54 = vadd.f32 1e-05, %v1092_v60  ;;  %vm1244_vm2 = vweird.f32 %v9205_v58  ;;  %v1571_v32 = vadd.f32 %v1570_v2, %v9279_v52 }
 0x249   : >> { %v1248_v62 = vmul.f32 %v9267_v34, %v9213_v39  ;;  %vm1254_vm1 = vweird.f32 %v9267_v34  ;;  %v1242_v33 = vmul.f32 %v9205_v58, %v1241_v10  ;;  %v1373_v8 = vadd.f32 %v8929_v53, %v1350_v15  ;;  %vm9331_vm4 = vmor %vm1243_vm15, %vm1244_vm2 }
 0x24a   : >> { %v1232_v63 = vmul.f32 %v7645_v13, %v1231_v36  ;;  %7650 = vrsqrt.f32 %v9272_v54  ;;  %v9294_v18 = vpop.eup %7648  ;;  %vm9311_vm3 = vmor %vm1253_vm0, %vm1254_vm1  ;;  %v1381_v2 = vadd.f32 %v8929_v53, %v1358_v46  ;;  %v1382_v15 = vadd.f32 %v8929_v53, %v1359_v37 }
 0x24b   : >> { %v1249_v7 = vmul.f32 %v9267_v34, %v1248_v62  ;;  %1871 = vrot.lane.b32.xlu2 %v9237_v50, %s8397_s22  ;;  %v1258_v62 = vmul.f32 %v9294_v18, %v9249_v14  ;;  %v1566_v46 = vadd.f32 %v9169_v49, %v9279_v52  ;;  %v1246_v49 = vsel %vm9331_vm4, %v9205_v58, %v1242_v33 }
 0x24c   : >> { %v1236_v9 = vsel %vm1235_vm14, %v7645_v13, %v1232_v63  ;;  %2398 = vrot.lane.b32.xlu0 %v9112_v43, %s8399_s19  ;;  %v1392_v41 = vpack.c.bf16 %v1382_v15, %v1381_v2  ;;  %v1329_v58 = vmul.f32 %v1246_v49, %v9063_v47  ;;  %v1553_v47 = vadd.f32 %v9138_v11, %v9279_v52 }
 0x24d   : >> { %v1328_v42 = vmul.f32 %v1236_v9, %v9045_v57  ;;  %v1250_v31 = vmul.f32 0.5, %v1249_v7  ;;  %v1512_v57 = vadd.f32 %v1511_v38, %v9081_v55  ;;  %v1259_v37 = vmul.f32 %v9294_v18, %v1258_v62 }
 0x24e   : >> { %v1513_v13 = vpop.f32.mrf.mxu0  ;;  %v1572_v19 = vpop.f32.mrf.mxu1  ;;  %vm1273_vm5 = vweird.f32 %v9272_v54  ;;  %v1551_v11 = vadd.f32 %v9134_v6, %v9279_v52  ;;  %vm1263_vm7 = vweird.f32 %v9249_v14  ;;  %vm1264_vm8 = vweird.f32 %v9294_v18 }
 0x24f   : >> { %v1514_v59 = vadd.f32 %v1513_v13, %v9081_v55  ;;  %v1351_v35 = vmul.f32 %v8916_v5, %v1328_v42  ;;  %v1251_v60 = vsub.f32 1.5, %v1250_v31  ;;  %v1573_v36 = vadd.f32 %v1572_v19, %v9279_v52  ;;  %vm1265_vm11 = vmor %vm1263_vm7, %vm1264_vm8 }
 0x250   : >> { %v9305_v22 = vpop.eup %7650  ;;  %v1260_v33 = vmul.f32 0.5, %v1259_v37  ;;  %vm1625_vm12 = vcmask 130048   ;;  %vm1690_vm13 = vcmask 654336   ;;  %vm13542_vm14 = vcmask 261120  }
 0x251   : >> { %v9315_v30 = vpack.c.bf16 %v1514_v59, %v1512_v57  ;;  %v1374_v63 = vadd.f32 %v8929_v53, %v1351_v35  ;;  %v1252_v10 = vmul.f32 %v9267_v34, %v1251_v60  ;;  %v1268_v39 = vmul.f32 %v9305_v22, %v9272_v54 }
 0x252   : >> { %v9325_v9 = vpack.c.bf16 %v1573_v36, %v1571_v32  ;;  %v1563_v57 = vadd.f32 %v9152_v40, %v9279_v52  ;;  %v9353_v59 = vpack.c.bf16 %v1568_v3, %v1566_v46  ;;  %v1561_v40 = vadd.f32 %v9145_v0, %v9279_v52 }
 0x253   : >> { %1623 = vrot.lane.b32.xlu1 %v9315_v30, %s8396_s24  ;;  %v1388_v42 = vpack.c.bf16 %v1374_v63, %v1373_v8  ;;  %v1256_v31 = vsel %vm9311_vm3, %v9267_v34, %v1252_v10  ;;  %v1269_v13 = vmul.f32 %v9305_v22, %v1268_v39  ;;  %2396 = vrot.lane.b32.xlu2 %v9101_v1, %s8399_s19  ;;  %v1261_v36 = vsub.f32 1.5, %v1260_v33 }
 0x254   : >> { %1824 = vmatpush.bf16.msrb.mxu3 %v9325_v9  ;;  %2135 = vrot.lane.b32.xlu0 %v9112_v43, %s8400_s18  ;;  %v1330_v34 = vmul.f32 %v1256_v31, %v9071_v61  ;;  %v1558_v3 = vadd.f32 %v9142_v4, %v9279_v52  ;;  %v9368_v35 = vpack.c.bf16 %v1563_v57, %v1561_v40  ;;  %vm1274_vm6 = vweird.f32 %v9305_v22  ;;  %v9434_v57 = vpop.permute.xlu0 %1855 }
 0x255   : >> { %6930 = vmatmul.msk.bf16.gmra.mxu0 %vm889_vm10, %v1388_v42  ;;  %6940 = vmatmul.msk.bf16.gmra.mxu1 %vm889_vm10, %v1388_v42  ;;  %v1270_v19 = vmul.f32 0.5, %v1269_v13  ;;  %v1556_v0 = vadd.f32 %v9140_v44, %v9279_v52  ;;  %v1352_v32 = vmul.f32 %v8916_v5, %v1329_v58  ;;  %vm1275_vm9 = vmor %vm1273_vm5, %vm1274_vm6  ;;  %v9395_v8 = vpack.c.bf16 %v1553_v47, %v1551_v11 }
 0x256   : >> { %6934 = vmatmul.msk.bf16.gmra.mxu3 %vm889_vm10, %v1392_v41  ;;  %6944 = vmatmul.msk.bf16.gmra.mxu2 %vm889_vm10, %v1392_v41  ;;  %v1353_v61 = vmul.f32 %v8916_v5, %v1330_v34  ;;  %v1262_v63 = vmul.f32 %v9294_v18, %v1261_v36  ;;  %vm2790_vm15 = vcmask 392192  }
 0x257   : >> { %v1271_v60 = vsub.f32 1.5, %v1270_v19  ;;  %v9379_v4 = vpack.c.bf16 %v1558_v3, %v1556_v0  ;;  %v1375_v38 = vadd.f32 %v8929_v53, %v1352_v32 }
 0x258   : >> { %1825 = vmatpush.bf16.msrb.mxu3 %v9353_v59  ;;  %v1376_v44 = vadd.f32 %v8929_v53, %v1353_v61  ;;  %v1266_v2 = vsel %vm1265_vm11, %v9294_v18, %v1262_v63 }
 0x259   : >> { %v1272_v54 = vmul.f32 %v9305_v22, %v1271_v60  ;;  %v1331_v10 = vmul.f32 %v1266_v2, %v9090_v51 }
 0x25a   : >> { %v1389_v6 = vpack.c.bf16 %v1376_v44, %v1375_v38 }
 0x25b   : >> { %2139 = vrot.lane.b32.xlu1 %v9237_v50, %s8400_s18  ;;  %2133 = vrot.lane.b32.xlu2 %v9101_v1, %s8400_s18  ;;  %v1276_v14 = vsel %vm1275_vm9, %v9305_v22, %v1272_v54  ;;  %v1354_v39 = vmul.f32 %v8916_v5, %v1331_v10 }
 0x25c   : >> { %1826 = vmatpush.bf16.msrb.mxu3 %v9368_v35  ;;  %2123 = vrot.lane.b32.xlu0 %v9101_v1, %s8401_s5  ;;  %v1332_v62 = vmul.f32 %v1276_v14, %v9097_v45  ;;  %v1616_v45 = vpop.permute.xlu1 %1615  ;;  %v1620_v40 = vpop.permute.xlu0 %1619 }
 0x25d   : >> { %v1377_v7 = vadd.f32 %v8929_v53, %v1354_v39  ;;  %v1648_v33 = vsel %vm1625_vm12, %v1620_v40, 0  ;;  %v1642_v44 = vsel %vm1625_vm12, %v1616_v45, 0 }
 0x25e   : >> { %v1355_v22 = vmul.f32 %v8916_v5, %v1332_v62  ;;  %v9425_v5 = vpop.permute.xlu2 %1865 }
 0x260   : >> { %1827 = vmatpush.bf16.msrb.mxu3 %v9379_v4  ;;  %v1378_v18 = vadd.f32 %v8929_v53, %v1355_v22 }
 0x262   : >> { %v1390_v51 = vpack.c.bf16 %v1378_v18, %v1377_v7 }
 0x263   : >> { %2137 = vrot.lane.b32.xlu1 %v9120_v48, %s8400_s18  ;;  %2125 = vrot.lane.b32.xlu2 %v9112_v43, %s8401_s5 }
 0x264   : >> { %1828 = vmatpush.bf16.msrb.mxu3 %v9395_v8  ;;  %2390 = vrot.lane.b32.xlu0 %v9120_v48, %s8402_s15  ;;  %v9427_v42 = vpop.permute.xlu1 %1867  ;;  %v9466_v11 = vpop.permute.xlu0 %1869 }
 0x265   : >> { %6931 = vmatmul.msk.bf16.gmra.mxu0 %vm889_vm10, %v1389_v6  ;;  %6941 = vmatmul.msk.bf16.gmra.mxu1 %vm889_vm10, %v1389_v6 }
 0x266   : >> { %v1618_v15 = vpop.permute.xlu2 %1617 }
 0x267   : >> { %v1645_v0 = vsel %vm1625_vm12, %v1618_v15, 0 }
 0x26b   : >> { %2386 = vrot.lane.b32.xlu1 %v9101_v1, %s8402_s15  ;;  %2127 = vrot.lane.b32.xlu2 %v9120_v48, %s8401_s5 }
 0x26c   : >> { %2392 = vrot.lane.b32.xlu0 %v9237_v50, %s8402_s15  ;;  %v9474_v54 = vpop.permute.xlu0 %1859 }
 0x26d   : >> { %13623 = vst [vmem:[#allocation34_spill] sm:$0xff] %v9474_v54  ;;  %v1894_v54 = vsel %vm1625_vm12, %v9427_v42, 0 }
 0x26e   : >> { %v9431_v31 = vpop.permute.xlu2 %1857 }
 0x273   : >> { %2388 = vrot.lane.b32.xlu1 %v9112_v43, %s8402_s15 }
 0x275   : >> { %6932 = vmatmul.msk.bf16.gmra.mxu0 %vm889_vm10, %v1390_v51  ;;  %6942 = vmatmul.msk.bf16.gmra.mxu1 %vm889_vm10, %v1390_v51 }
 0x29d   : >> { %v1622_v49 = vpop.permute.xlu2 %1621 }
 0x29e   : >> { %v1651_v37 = vsel %vm1625_vm12, %v1622_v49, 0 }
 0x2b5   : >> { %v9429_v46 = vpop.permute.xlu1 %2402 }
 0x2c5   : >> { %v1624_v13 = vpop.permute.xlu1 %1623 }
 0x2c6   : >> { %v1654_v53 = vsel %vm1625_vm12, %v1624_v13, 0 }
 0x2c7   : >> { %1659 = vmatpush.bf16.xpose.msrb.mxu2 %v1654_v53 }
 0x2c8   : >> { %v1531_v41 = vpop.f32.mrf.mxu3 }
 0x2c9   : >> { %v1532_v19 = vadd.f32 %v1531_v41, %v9081_v55 }
 0x2cd   : >> { %v9548_v51 = vpop.permute.xlu1 %2139 }
 0x2cf   : >> { %1660 = vmatpush.bf16.xpose.msrb.mxu2 %v1651_v37 }
 0x2d0   : >> { %v1533_v34 = vpop.f32.mrf.mxu3 }
 0x2d1   : >> { %v1534_v58 = vadd.f32 %v1533_v34, %v9081_v55 }
 0x2d2   : >> { %v1516_v63 = vpop.f32.mrf.mxu0 }
 0x2d3   : >> { %v9439_v3 = vpack.c.bf16 %v1534_v58, %v1532_v19  ;;  %v1517_v62 = vadd.f32 %v1516_v63, %v9081_v55 }
 0x2d5   : >> { %3060 = vrot.lane.b32.xlu0 %v9439_v3, %s8398_s26  ;;  %v9564_v41 = vpop.permute.xlu1 %2137 }
 0x2d7   : >> { %1661 = vmatpush.bf16.xpose.msrb.mxu2 %v1648_v33 }
 0x2d9   : >> { %v1536_v61 = vpop.f32.mrf.mxu3 }
 0x2da   : >> { %v1537_v47 = vadd.f32 %v1536_v61, %v9081_v55  ;;  %v1518_v2 = vpop.f32.mrf.mxu0 }
 0x2dd   : >> { %3328 = vrot.lane.b32.xlu0 %v9439_v3, %s8401_s5 }
 0x2df   : >> { %1662 = vmatpush.bf16.xpose.msrb.mxu2 %v1645_v0 }
 0x2e1   : >> { %v1538_v60 = vpop.f32.mrf.mxu3 }
 0x2e2   : >> { %v1539_v32 = vadd.f32 %v1538_v60, %v9081_v55  ;;  %v1521_v39 = vpop.f32.mrf.mxu0  ;;  %v9588_v60 = vpop.f32.mrf.mxu2 }
 0x2e3   : >> { %v1522_v15 = vadd.f32 %v1521_v39, %v9081_v55 }
 0x2e4   : >> { %v9449_v36 = vpack.c.bf16 %v1539_v32, %v1537_v47 }
 0x2e6   : >> { %3330 = vrot.lane.b32.xlu0 %v9449_v36, %s8401_s5  ;;  %2824 = vrot.lane.b32.xlu2 %v9449_v36, %s8396_s24 }
 0x2e7   : >> { %3072 = vrot.lane.b32.xlu1 %v9449_v36, %s8397_s22  ;;  %1663 = vmatpush.bf16.xpose.msrb.mxu2 %v1642_v44 }
 0x2ea   : >> { %v1523_v7 = vpop.f32.mrf.mxu0 }
 0x2ee   : >> { %2328 = vrot.lane.b32.xlu0 %v9353_v59, %s8401_s5  ;;  %2822 = vrot.lane.b32.xlu2 %v9439_v3, %s8396_s24 }
 0x2ef   : >> { %3070 = vrot.lane.b32.xlu1 %v9439_v3, %s8397_s22  ;;  %6945 = vmatmul.msk.bf16.vlgmr.msrb.gmra.mxu2 %vm1625_vm12, %v9101_v1  ;;  %v9484_v1 = vpop.permute.xlu0 %2400 }
 0x2f2   : >> { %v1526_v13 = vpop.f32.mrf.mxu0 }
 0x2f3   : >> { %v1527_v0 = vadd.f32 %v1526_v13, %v9081_v55 }
 0x2f6   : >> { %2587 = vrot.lane.b32.xlu0 %v9379_v4, %s8402_s15  ;;  %3601 = vrot.lane.b32.xlu2 %v9439_v3, %s8399_s19 }
 0x2f7   : >> { %2129 = vrot.lane.b32.xlu1 %v9237_v50, %s8401_s5  ;;  %v9492_v38 = vpop.permute.xlu0 %1861 }
 0x2f8   : >> { %13624 = vst [vmem:[#allocation35_spill] sm:$0xff] %v9492_v38 }
 0x2fa   : >> { %v1528_v40 = vpop.f32.mrf.mxu0 }
 0x2fb   : >> { %v1529_v19 = vadd.f32 %v1528_v40, %v9081_v55 }
 0x2fd   : >> { %v9590_v47 = vpack.c.bf16 %v1529_v19, %v1527_v0 }
 0x2fe   : >> { %2585 = vrot.lane.b32.xlu0 %v9395_v8, %s8402_s15  ;;  %3338 = vrot.lane.b32.xlu2 %v9439_v3, %s8400_s18 }
 0x2ff   : >> { %3603 = vrot.lane.b32.xlu1 %v9449_v36, %s8399_s19  ;;  %6946 = vmatmul.msk.bf16.gmra.mxu2 %vm1625_vm12, %v9112_v43  ;;  %v9502_v43 = vpop.permute.xlu2 %1871  ;;  %v9510_v6 = vpop.permute.xlu0 %2398 }
 0x306   : >> { %2324 = vrot.lane.b32.xlu0 %v9379_v4, %s8401_s5  ;;  %3062 = vrot.lane.b32.xlu2 %v9449_v36, %s8398_s26 }
 0x307   : >> { %3340 = vrot.lane.b32.xlu1 %v9449_v36, %s8400_s18  ;;  %v9512_v14 = vpop.permute.xlu2 %2396 }
 0x30e   : >> { %1873 = vrot.lane.b32.xlu0 %v9315_v30, %s8397_s22  ;;  %2063 = vrot.lane.b32.xlu2 %v9368_v35, %s8398_s26 }
 0x30f   : >> { %2065 = vrot.lane.b32.xlu1 %v9353_v59, %s8398_s26  ;;  %6947 = vmatmul.msk.bf16.gmra.mxu2 %vm1625_vm12, %v9120_v48  ;;  %v1519_v48 = vadd.f32 %v1518_v2, %v9081_v55  ;;  %v9526_v10 = vpop.permute.xlu2 %2133 }
 0x311   : >> { %v9528_v22 = vpack.c.bf16 %v1519_v48, %v1517_v62 }
 0x316   : >> { %2394 = vrot.lane.b32.xlu0 %v9315_v30, %s8402_s15  ;;  %2061 = vrot.lane.b32.xlu2 %v9379_v4, %s8398_s26  ;;  %v9523_v4 = vpop.permute.xlu0 %2135 }
 0x317   : >> { %2059 = vrot.lane.b32.xlu1 %v9395_v8, %s8398_s26  ;;  %v9538_v18 = vpop.permute.xlu2 %2125 }
 0x31e   : >> { %2067 = vrot.lane.b32.xlu0 %v9325_v9, %s8398_s26  ;;  %3593 = vrot.lane.b32.xlu2 %v9449_v36, %s8402_s15 }
 0x31f   : >> { %3591 = vrot.lane.b32.xlu1 %v9439_v3, %s8402_s15  ;;  %6948 = vmatmul.msk.bf16.gmra.mxu2 %vm1625_vm12, %v9237_v50  ;;  %v9536_v50 = vpop.permute.xlu0 %2123  ;;  %v9558_v45 = vpop.permute.xlu2 %2127 }
 0x326   : >> { %2589 = vrot.lane.b32.xlu2 %v9368_v35, %s8402_s15  ;;  %3064 = vrot.lane.b32.xlu0 %v9528_v22, %s8397_s22 }
 0x327   : >> { %2591 = vrot.lane.b32.xlu1 %v9353_v59, %s8402_s15  ;;  %v9550_v59 = vpop.permute.xlu0 %2390 }
 0x328   : >> { %13625 = vst [vmem:[#allocation36_spill] sm:$0xff] %v9550_v59 }
 0x32e   : >> { %2404 = vrot.lane.b32.xlu2 %v9315_v30, %s8399_s19  ;;  %3054 = vrot.lane.b32.xlu0 %v9528_v22, %s8398_s26 }
 0x32f   : >> { %2326 = vrot.lane.b32.xlu1 %v9368_v35, %s8401_s5  ;;  %6949 = vmatmul.msk.bf16.gmra.mxu2 %vm1625_vm12, %v9315_v30  ;;  %v1524_v35 = vadd.f32 %v1523_v7, %v9081_v55  ;;  %v9572_v49 = vpop.permute.xlu0 %2392  ;;  %v9604_v55 = vpop.f32.mrf.mxu2 }
 0x330   : >> { %13626 = vst [vmem:[#allocation37_spill] sm:$0xff] %v9572_v49 }
 0x331   : >> { %v9562_v53 = vpack.c.bf16 %v1524_v35, %v1522_v15 }
 0x336   : >> { %2141 = vrot.lane.b32.xlu2 %v9315_v30, %s8400_s18  ;;  %3595 = vrot.lane.b32.xlu0 %v9528_v22, %s8399_s19 }
 0x337   : >> { %2131 = vrot.lane.b32.xlu1 %v9315_v30, %s8401_s5  ;;  %v9620_v62 = vpop.f32.mrf.mxu2 }
 0x33e   : >> { %1863 = vrot.lane.b32.xlu2 %v9315_v30, %s8398_s26  ;;  %3334 = vrot.lane.b32.xlu0 %v9562_v53, %s8400_s18  ;;  %v9579_v30 = vpop.permute.xlu1 %2386 }
 0x33f   : >> { %2593 = vrot.lane.b32.xlu1 %v9325_v9, %s8402_s15  ;;  %13627 = vst [vmem:[#allocation38_spill] sm:$0xff] %v9579_v30 }
 0x340   : >> { %v2825_v37 = vpop.permute.xlu2 %2824 }
 0x341   : >> { %v2854_v34 = vsel %vm1625_vm12, %v2825_v37, 0 }
 0x342   : >> { %2859 = vmatpush.bf16.xpose.msrb.mxu0 %v2854_v34  ;;  %v9636_v34 = vpop.f32.mrf.mxu2 }
 0x346   : >> { %3585 = vrot.lane.b32.xlu2 %v9528_v22, %s8402_s15  ;;  %3587 = vrot.lane.b32.xlu0 %v9562_v53, %s8402_s15  ;;  %v9602_v44 = vpop.permute.xlu1 %2388 }
 0x347   : >> { %2330 = vrot.lane.b32.xlu1 %v9325_v9, %s8401_s5  ;;  %v9584_v58 = vpop.permute.xlu0 %3060  ;;  %13630 = vst [vmem:[#allocation41_spill] sm:$0xff] %v9602_v44 }
 0x348   : >> { %13628 = vst [vmem:[#allocation39_spill] sm:$0xff] %v9584_v58  ;;  %v2823_v33 = vpop.permute.xlu2 %2822 }
 0x349   : >> { %v2851_v61 = vsel %vm1625_vm12, %v2823_v33, 0 }
 0x34a   : >> { %2860 = vmatpush.bf16.xpose.msrb.mxu0 %v2851_v61 }
 0x34e   : >> { %3332 = vrot.lane.b32.xlu2 %v9528_v22, %s8400_s18  ;;  %3068 = vrot.lane.b32.xlu0 %v9590_v47, %s8397_s22 }
 0x34f   : >> { %2816 = vrot.lane.b32.xlu1 %v9528_v22, %s8396_s24  ;;  %v9598_v9 = vpop.permute.xlu0 %3328 }
 0x350   : >> { %v9600_v32 = vpop.permute.xlu2 %3601 }
 0x351   : >> { %13629 = vst [vmem:[#allocation40_spill] sm:$0xff] %v9600_v32 }
 0x356   : >> { %3322 = vrot.lane.b32.xlu2 %v9528_v22, %s8401_s5  ;;  %3589 = vrot.lane.b32.xlu0 %v9590_v47, %s8402_s15 }
 0x357   : >> { %3066 = vrot.lane.b32.xlu1 %v9562_v53, %s8397_s22 }
 0x358   : >> { %v9612_v63 = vpop.permute.xlu0 %3330  ;;  %v9614_v2 = vpop.permute.xlu2 %3338 }
 0x359   : >> { %v9616_v48 = vpop.permute.xlu1 %3072 }
 0x35e   : >> { %2818 = vrot.lane.b32.xlu2 %v9562_v53, %s8396_s24 }
 0x35f   : >> { %3324 = vrot.lane.b32.xlu1 %v9562_v53, %s8401_s5 }
 0x360   : >> { %v9624_v39 = vpop.permute.xlu0 %2328  ;;  %v9626_v7 = vpop.permute.xlu2 %3062 }
 0x361   : >> { %13631 = vst [vmem:[#allocation42_spill] sm:$0xff] %v9626_v7  ;;  %v9628_v35 = vpop.permute.xlu1 %3070 }
 0x366   : >> { %3056 = vrot.lane.b32.xlu2 %v9562_v53, %s8398_s26 }
 0x368   : >> { %v9632_v15 = vpop.permute.xlu0 %2587  ;;  %v2064_v13 = vpop.permute.xlu2 %2063 }
 0x369   : >> { %v9634_v37 = vpop.permute.xlu1 %2129 }
 0x36e   : >> { %3597 = vrot.lane.b32.xlu2 %v9562_v53, %s8399_s19 }
 0x370   : >> { %v9640_v40 = vpop.permute.xlu0 %2585  ;;  %v2062_v19 = vpop.permute.xlu2 %2061 }
 0x371   : >> { %v9642_v33 = vpop.permute.xlu1 %3603 }
 0x372   : >> { %13632 = vst [vmem:[#allocation43_spill] sm:$0xff] %v9642_v33  ;;  %v9644_v61 = vpop.f32.mrf.mxu2  ;;  %v1900_v33 = vsel %vm1625_vm12, %v9502_v43, 0 }
 0x376   : >> { %2820 = vrot.lane.b32.xlu2 %v9590_v47, %s8396_s24  ;;  %s7224_s24 = sshll.u32 %s8392_s3, 5 }
 0x378   : >> { %v9648_v0 = vpop.permute.xlu0 %2324  ;;  %v9650_v56 = vpop.permute.xlu2 %3593 }
 0x379   : >> { %13633 = vst [vmem:[#allocation44_spill] sm:$0xff] %v9650_v56  ;;  %v9652_v17 = vpop.permute.xlu1 %3340 }
 0x37a   : >> { %v1667_v12 = vpop.f32.mrf.mxu2 }
 0x37b   : >> { %v9655_v7 = vadd.f32 %v1667_v12, %v13574_v20 }
 0x37d   : >> { %v1694_v58 = vsel %vm1690_vm13, %v9655_v7, -inf }
 0x37e   : >> { %3058 = vrot.lane.b32.xlu2 %v9590_v47, %s8398_s26 }
 0x380   : >> { %v1874_v49 = vpop.permute.xlu0 %1873  ;;  %1695 = vmax.xlane.f32.xlu0 %v1694_v58  ;;  %v2590_v59 = vpop.permute.xlu2 %2589 }
 0x381   : >> { %v1903_v44 = vsel %vm1625_vm12, %v1874_v49, 0  ;;  %v2066_v32 = vpop.permute.xlu1 %2065 }
 0x382   : >> { %1908 = vmatpush.bf16.xpose.msra.mxu3 %v1903_v44  ;;  %v1897_v44 = vsel %vm1625_vm12, %v9466_v11, 0 }
 0x386   : >> { %3599 = vrot.lane.b32.xlu2 %v9590_v47, %s8399_s19 }
 0x388   : >> { %v9664_v56 = vpop.permute.xlu0 %2394  ;;  %v9666_v12 = vpop.permute.xlu2 %2404 }
 0x389   : >> { %13634 = vst [vmem:[#allocation45_spill] sm:$0xff] %v9664_v56  ;;  %v2060_v30 = vpop.permute.xlu1 %2059 }
 0x38a   : >> { %1909 = vmatpush.bf16.xpose.msra.mxu3 %v1900_v33 }
 0x38e   : >> { %3336 = vrot.lane.b32.xlu2 %v9590_v47, %s8400_s18 }
 0x390   : >> { %v2068_v58 = vpop.permute.xlu0 %2067  ;;  %v2142_v38 = vpop.permute.xlu2 %2141 }
 0x391   : >> { %v9672_v49 = vpop.permute.xlu1 %3591  ;;  %2092 = vmatpush.bf16.msra.mxu2 %v2068_v58  ;;  %v2171_v56 = vsel %vm1625_vm12, %v2142_v38, 0  ;;  %v2168_v58 = vsel %vm1625_vm12, %v9548_v51, 0  ;;  %v1891_v38 = vsel %vm1625_vm12, %v9425_v5, 0  ;;  %v2162_v51 = vsel %vm1625_vm12, %v9523_v4, 0 }
 0x392   : >> { %13635 = vst [vmem:[#allocation46_spill] sm:$0xff] %v9672_v49  ;;  %1910 = vmatpush.bf16.xpose.msra.mxu3 %v1897_v44  ;;  %2176 = vmatpush.bf16.xpose.msrb.mxu1 %v2171_v56 }
 0x395   : >> { %2093 = vmatpush.bf16.msra.mxu2 %v2066_v32  ;;  %v2165_v32 = vsel %vm1625_vm12, %v9564_v41, 0 }
 0x396   : >> { %3326 = vrot.lane.b32.xlu2 %v9590_v47, %s8401_s5 }
 0x398   : >> { %v9679_v43 = vpop.permute.xlu2 %1863 }
 0x399   : >> { %13636 = vst [vmem:[#allocation47_spill] sm:$0xff] %v9679_v43  ;;  %v2592_v33 = vpop.permute.xlu1 %2591  ;;  %2094 = vmatpush.bf16.msra.mxu2 %v2064_v13 }
 0x39a   : >> { %1911 = vmatpush.bf16.xpose.msra.mxu3 %v1894_v54  ;;  %2177 = vmatpush.bf16.xpose.msrb.mxu1 %v2168_v58 }
 0x39d   : >> { %2095 = vmatpush.bf16.msra.mxu2 %v2062_v19 }
 0x39e   : >> { %2322 = vrot.lane.b32.xlu2 %v9395_v8, %s8401_s5 }
 0x3a0   : >> { %v9687_v56 = vpop.permute.xlu2 %3585 }
 0x3a1   : >> { %13637 = vst [vmem:[#allocation48_spill] sm:$0xff] %v9687_v56  ;;  %v2327_v11 = vpop.permute.xlu1 %2326  ;;  %2096 = vmatpush.bf16.msra.mxu2 %v2060_v30  ;;  %v2159_v30 = vsel %vm1625_vm12, %v9526_v10, 0  ;;  %v1575_v10 = vpop.f32.mrf.mxu1 }
 0x3a2   : >> { %1912 = vmatpush.bf16.xpose.msra.mxu3 %v1891_v38  ;;  %2178 = vmatpush.bf16.xpose.msrb.mxu1 %v2165_v32 }
 0x3a8   : >> { %v9693_v42 = vpop.permute.xlu2 %3332 }
 0x3a9   : >> { %v2132_v54 = vpop.permute.xlu1 %2131  ;;  %v1577_v44 = vpop.f32.mrf.mxu1 }
 0x3aa   : >> { %2179 = vmatpush.bf16.xpose.msrb.mxu1 %v2162_v51 }
 0x3b0   : >> { %v9697_v8 = vpop.permute.xlu2 %3322 }
 0x3b1   : >> { %v2594_v13 = vpop.permute.xlu1 %2593 }
 0x3b2   : >> { %2618 = vmatpush.bf16.msrb.mxu2 %v2594_v13  ;;  %2180 = vmatpush.bf16.xpose.msrb.mxu1 %v2159_v30 }
 0x3b6   : >> { %2619 = vmatpush.bf16.msrb.mxu2 %v2592_v33 }
 0x3b8   : >> { %v2819_v5 = vpop.permute.xlu2 %2818 }
 0x3b9   : >> { %v2331_v41 = vpop.permute.xlu1 %2330  ;;  %6965 = vmatmul.msk.bf16.vlgmr.msrb.gmra.mxu1 %vm1625_vm12, %v9536_v50 }
 0x3ba   : >> { %2355 = vmatpush.bf16.msra.mxu1 %v2331_v41  ;;  %2620 = vmatpush.bf16.msrb.mxu2 %v2590_v59  ;;  %v1598_v41 = vadd.f32 %v9636_v34, %v9279_v52  ;;  %v1591_v34 = vadd.f32 %v9588_v60, %v9279_v52 }
 0x3be   : >> { %2356 = vmatpush.bf16.msra.mxu1 %v9624_v39  ;;  %2621 = vmatpush.bf16.msrb.mxu2 %v9632_v15  ;;  %v9716_v15 = vpop.permute.xlu0 %3064 }
 0x3bf   : >> { %13641 = vst [vmem:[#allocation52_spill] sm:$0xff] %v9716_v15 }
 0x3c0   : >> { %v9705_v4 = vpop.permute.xlu2 %3056 }
 0x3c1   : >> { %13638 = vst [vmem:[#allocation49_spill] sm:$0xff] %v9705_v4  ;;  %v2817_v33 = vpop.permute.xlu1 %2816 }
 0x3c2   : >> { %2357 = vmatpush.bf16.msra.mxu1 %v2327_v11  ;;  %2622 = vmatpush.bf16.msrb.mxu2 %v9640_v40  ;;  %v2845_v40 = vsel %vm1625_vm12, %v2819_v5, 0  ;;  %v3370_v11 = vsel %vm1625_vm12, %v9652_v17, 0 }
 0x3c6   : >> { %2358 = vmatpush.bf16.msra.mxu1 %v9648_v0  ;;  %v1580_v0 = vpop.f32.mrf.mxu1  ;;  %v9726_v38 = vpop.permute.xlu0 %3054 }
 0x3c7   : >> { %13643 = vst [vmem:[#allocation54_spill] sm:$0xff] %v9726_v38  ;;  %v1581_v60 = vadd.f32 %v1580_v0, %v9279_v52 }
 0x3c8   : >> { %v9709_v19 = vpop.permute.xlu2 %3597 }
 0x3c9   : >> { %13639 = vst [vmem:[#allocation50_spill] sm:$0xff] %v9709_v19  ;;  %6966 = vmatmul.msk.bf16.gmra.mxu1 %vm1625_vm12, %v9538_v18  ;;  %v2842_v18 = vsel %vm1625_vm12, %v2817_v33, 0 }
 0x3ce   : >> { %v1582_v32 = vpop.f32.mrf.mxu1  ;;  %v9734_v13 = vpop.permute.xlu0 %3595 }
 0x3cf   : >> { %13644 = vst [vmem:[#allocation55_spill] sm:$0xff] %v9734_v13 }
 0x3d0   : >> { %v2821_v50 = vpop.permute.xlu2 %2820 }
 0x3d1   : >> { %v2848_v59 = vsel %vm1625_vm12, %v2821_v50, 0 }
 0x3d2   : >> { %2861 = vmatpush.bf16.xpose.msrb.mxu0 %v2848_v59 }
 0x3d6   : >> { %v1585_v30 = vpop.f32.mrf.mxu1  ;;  %v3335_v50 = vpop.permute.xlu0 %3334 }
 0x3d7   : >> { %v3361_v33 = vsel %vm1625_vm12, %v3335_v50, 0 }
 0x3d8   : >> { %v9714_v39 = vpop.permute.xlu2 %3058 }
 0x3d9   : >> { %13640 = vst [vmem:[#allocation51_spill] sm:$0xff] %v9714_v39  ;;  %6967 = vmatmul.msk.bf16.gmra.mxu1 %vm1625_vm12, %v9558_v45  ;;  %v3367_v45 = vsel %vm1625_vm12, %v9614_v2, 0  ;;  %v1593_v2 = vadd.f32 %v9604_v55, %v9279_v52 }
 0x3da   : >> { %2862 = vmatpush.bf16.xpose.msrb.mxu0 %v2845_v40 }
 0x3de   : >> { %v1587_v40 = vpop.f32.mrf.mxu1 }
 0x3df   : >> { %v1588_v55 = vadd.f32 %v1587_v40, %v9279_v52 }
 0x3e0   : >> { %v9721_v58 = vpop.permute.xlu2 %3599 }
 0x3e1   : >> { %13642 = vst [vmem:[#allocation53_spill] sm:$0xff] %v9721_v58 }
 0x3e2   : >> { %2863 = vmatpush.bf16.xpose.msrb.mxu0 %v2842_v18  ;;  %v1586_v18 = vadd.f32 %v1585_v30, %v9279_v52  ;;  %v1576_v30 = vadd.f32 %v1575_v10, %v9279_v52  ;;  %v9789_v10 = vadd.f32 %v9644_v61, %v13576_v16 }
 0x3e8   : >> { %v3337_v51 = vpop.permute.xlu2 %3336 }
 0x3e9   : >> { %6968 = vmatmul.msk.bf16.gmra.mxu1 %vm1625_vm12, %v9634_v37  ;;  %6985 = vmatmul.msk.bf16.vlgmr.msrb.gmra.mxu0 %vm1625_vm12, %v9528_v22  ;;  %v3364_v5 = vsel %vm1625_vm12, %v3337_v51, 0  ;;  %v1596_v37 = vadd.f32 %v9620_v62, %v9279_v52  ;;  %v9754_v62 = vpack.c.bf16 %v1593_v2, %v1591_v34  ;;  %v1578_v51 = vadd.f32 %v1577_v44, %v9279_v52 }
 0x3ea   : >> { %3375 = vmatpush.bf16.xpose.msra.mxu0 %v3370_v11  ;;  %v3358_v11 = vsel %vm1625_vm12, %v9693_v42, 0 }
 0x3eb   : >> { %v9745_v59 = vpack.c.bf16 %v1598_v41, %v1596_v37 }
 0x3f0   : >> { %v9736_v17 = vpop.permute.xlu2 %3326 }
 0x3f2   : >> { %3376 = vmatpush.bf16.xpose.msra.mxu0 %v3367_v45 }
 0x3f8   : >> { %v2323_v22 = vpop.permute.xlu2 %2322 }
 0x3f9   : >> { %6969 = vmatmul.msk.bf16.gmra.mxu1 %vm1625_vm12, %v2132_v54  ;;  %6986 = vmatmul.msk.bf16.gmra.mxu0 %vm1625_vm12, %v9562_v53  ;;  %v1583_v53 = vadd.f32 %v1582_v32, %v9279_v52  ;;  %v9760_v54 = vpack.c.bf16 %v1588_v55, %v1586_v18 }
 0x3fa   : >> { %3377 = vmatpush.bf16.xpose.msra.mxu0 %v3364_v5  ;;  %2359 = vmatpush.bf16.msra.mxu1 %v2323_v22  ;;  %v9771_v5 = vpack.c.bf16 %v1578_v51, %v1576_v30 }
 0x3fb   : >> { %v9767_v45 = vpack.c.bf16 %v1583_v53, %v1581_v60 }
 0x3fe   : >> { %3023 = vmatpush.bf16.msrb.mxu1 %v9745_v59 }
 0x402   : >> { %3378 = vmatpush.bf16.xpose.msra.mxu0 %v3361_v33  ;;  %3024 = vmatpush.bf16.msrb.mxu1 %v9754_v62 }
 0x406   : >> { %3025 = vmatpush.bf16.msrb.mxu1 %v9760_v54 }
 0x409   : >> { %6987 = vmatmul.msk.bf16.gmra.mxu0 %vm1625_vm12, %v9590_v47  ;;  %v1670_v47 = vpop.f32.mrf.mxu2 }
 0x40a   : >> { %3379 = vmatpush.bf16.xpose.msra.mxu0 %v3358_v11  ;;  %3026 = vmatpush.bf16.msrb.mxu1 %v9767_v45  ;;  %v9807_v2 = vadd.f32 %v1670_v47, %v13573_v21 }
 0x40c   : >> { %v1697_v18 = vsel %vm1690_vm13, %v9807_v2, -inf }
 0x40e   : >> { %3027 = vmatpush.bf16.msrb.mxu1 %v9771_v5 }
 0x411   : >> { %v1672_v32 = vpop.f32.mrf.mxu2 }
 0x412   : >> { %v9817_v53 = vadd.f32 %v1672_v32, %v13572_v23 }
 0x414   : >> { %v1700_v30 = vsel %vm1690_vm13, %v9817_v53, -inf }
 0x419   : >> { %6988 = vmatmul.msk.bf16.gmra.mxu0 %vm1625_vm12, %v9439_v3  ;;  %v9791_v3 = vpop.permute.xlu1 %3066  ;;  %v1675_v33 = vpop.f32.mrf.mxu2 }
 0x41a   : >> { %13645 = vst [vmem:[#allocation56_spill] sm:$0xff] %v9791_v3 }
 0x421   : >> { %v3325_v50 = vpop.permute.xlu1 %3324  ;;  %v1677_v51 = vpop.f32.mrf.mxu2 }
 0x429   : >> { %6989 = vmatmul.msk.bf16.gmra.mxu0 %vm1625_vm12, %v9449_v36  ;;  %v1691_v36 = vsel %vm1690_vm13, %v9789_v10, -inf }
 0x436   : >> { %v2182_v42 = vpop.f32.mrf.mxu1 }
 0x437   : >> { %v9781_v44 = vadd.f32 %v2182_v42, %v13576_v16 }
 0x439   : >> { %7005 = vmatmul.msk.bf16.vlgmr.msra.gmra.mxu0 %vm1625_vm12, %v9697_v8  ;;  %v2207_v52 = vsel %vm1690_vm13, %v9781_v44, -inf }
 0x43a   : >> { %2208 = vmax.xlane.f32.xlu1 %v2207_v52 }
 0x43e   : >> { %v2184_v0 = vpop.f32.mrf.mxu1 }
 0x43f   : >> { %v9796_v41 = vadd.f32 %v2184_v0, %v13574_v20 }
 0x441   : >> { %v2210_v22 = vsel %vm1690_vm13, %v9796_v41, -inf }
 0x442   : >> { %1692 = vmax.xlane.f32.xlu1 %v1691_v36  ;;  %v1680_v36 = vpop.f32.mrf.mxu2 }
 0x446   : >> { %v2187_v8 = vpop.f32.mrf.mxu1 }
 0x447   : >> { %v9799_v37 = vadd.f32 %v2187_v8, %v13573_v21 }
 0x449   : >> { %7006 = vmatmul.msk.bf16.gmra.mxu0 %vm1625_vm12, %v3325_v50  ;;  %v2213_v61 = vsel %vm1690_vm13, %v9799_v37, -inf }
 0x44a   : >> { %2214 = vmax.xlane.f32.xlu0 %v2213_v61  ;;  %2211 = vmax.xlane.f32.xlu1 %v2210_v22  ;;  %v1682_v61 = vpop.f32.mrf.mxu2  ;;  %v9841_v22 = vadd.f32 %v1675_v33, %v13571_v24 }
 0x44c   : >> { %v1703_v33 = vsel %vm1690_vm13, %v9841_v22, -inf }
 0x44e   : >> { %v2189_v40 = vpop.f32.mrf.mxu1 }
 0x44f   : >> { %v9810_v34 = vadd.f32 %v2189_v40, %v13572_v23 }
 0x451   : >> { %v2216_v55 = vsel %vm1690_vm13, %v9810_v34, -inf }
 0x452   : >> { %2217 = vmax.xlane.f32.xlu2 %v2216_v55  ;;  %1698 = vmax.xlane.f32.xlu0 %v1697_v18 }
 0x456   : >> { %v2192_v11 = vpop.f32.mrf.mxu1 }
 0x457   : >> { %v9820_v60 = vadd.f32 %v2192_v11, %v13571_v24 }
 0x459   : >> { %7007 = vmatmul.msk.bf16.gmra.mxu0 %vm1625_vm12, %v9736_v17  ;;  %v2219_v42 = vsel %vm1690_vm13, %v9820_v60, -inf }
 0x45a   : >> { %1701 = vmax.xlane.f32.xlu2 %v1700_v30  ;;  %2220 = vmax.xlane.f32.xlu0 %v2219_v42  ;;  %v9856_v42 = vadd.f32 %v1677_v51, %v13570_v25 }
 0x45e   : >> { %v2194_v52 = vpop.f32.mrf.mxu1 }
 0x45f   : >> { %v9829_v47 = vadd.f32 %v2194_v52, %v13570_v25  ;;  %v9859_v52 = vadd.f32 %v1682_v61, %v13569_v27 }
 0x461   : >> { %v2222_v0 = vsel %vm1690_vm13, %v9829_v47, -inf }
 0x462   : >> { %2223 = vmax.xlane.f32.xlu0 %v2222_v0 }
 0x466   : >> { %v2197_v32 = vpop.f32.mrf.mxu1  ;;  %v2865_v8 = vpop.f32.mrf.mxu0 }
 0x467   : >> { %v9834_v17 = vadd.f32 %v2865_v8, %v13576_v16  ;;  %v9862_v0 = vadd.f32 %v2197_v32, %v13578_v26  ;;  %v9873_v32 = vadd.f32 %v1680_v36, %v13578_v26 }
 0x469   : >> { %7008 = vmatmul.msk.bf16.gmra.mxu0 %vm1625_vm12, %v9598_v9  ;;  %v2890_v50 = vsel %vm1690_vm13, %v9834_v17, -inf  ;;  %v2225_v51 = vsel %vm1690_vm13, %v9862_v0, -inf }
 0x46a   : >> { %2891 = vmax.xlane.f32.xlu2 %v2890_v50  ;;  %v1685_v50 = vpop.f32.mrf.mxu2 }
 0x46e   : >> { %v2199_v40 = vpop.f32.mrf.mxu1  ;;  %v2867_v55 = vpop.f32.mrf.mxu0 }
 0x46f   : >> { %v9844_v18 = vadd.f32 %v2199_v40, %v13569_v27  ;;  %v9847_v11 = vadd.f32 %v2867_v55, %v13574_v20  ;;  %v1712_v40 = vsel %vm1690_vm13, %v9859_v52, -inf  ;;  %v1706_v55 = vsel %vm1690_vm13, %v9856_v42, -inf }
 0x471   : >> { %v2228_v30 = vsel %vm1690_vm13, %v9844_v18, -inf  ;;  %v2893_v9 = vsel %vm1690_vm13, %v9847_v11, -inf }
 0x472   : >> { %2229 = vmax.xlane.f32.xlu0 %v2228_v30  ;;  %2894 = vmax.xlane.f32.xlu1 %v2893_v9  ;;  %v1709_v9 = vsel %vm1690_vm13, %v9873_v32, -inf }
 0x473   : >> { %1704 = vmax.xlane.f32.xlu2 %v1703_v33  ;;  %v1687_v33 = vpop.f32.mrf.mxu2 }
 0x476   : >> { %v2202_v8 = vpop.f32.mrf.mxu1 }
 0x479   : >> { %7009 = vmatmul.msk.bf16.gmra.mxu0 %vm1625_vm12, %v9612_v63 }
 0x47a   : >> { %1713 = vmax.xlane.f32.xlu0 %v1712_v40  ;;  %1707 = vmax.xlane.f32.xlu1 %v1706_v55  ;;  %v9883_v40 = vadd.f32 %v1687_v33, %v13575_v29  ;;  %v9886_v55 = vadd.f32 %v2202_v8, %v13577_v28 }
 0x47b   : >> { %2226 = vmax.xlane.f32.xlu2 %v2225_v51 }
 0x47c   : >> { %v1718_v36 = vsel %vm1690_vm13, %v9883_v40, -inf  ;;  %v2231_v51 = vsel %vm1690_vm13, %v9886_v55, -inf }
 0x47e   : >> { %v2204_v61 = vpop.f32.mrf.mxu1 }
 0x47f   : >> { %v9876_v30 = vadd.f32 %v2204_v61, %v13575_v29  ;;  %v9893_v61 = vadd.f32 %v1685_v50, %v13577_v28 }
 0x481   : >> { %v2234_v63 = vsel %vm1690_vm13, %v9876_v30, -inf }
 0x482   : >> { %2235 = vmax.xlane.f32.xlu0 %v2234_v63  ;;  %1710 = vmax.xlane.f32.xlu1 %v1709_v9  ;;  %v1715_v63 = vsel %vm1690_vm13, %v9893_v61, -inf  ;;  %v9897_v9 = vpop.permute.xlu0 %3587 }
 0x483   : >> { %13646 = vst [vmem:[#allocation57_spill] sm:$0xff] %v9897_v9 }
 0x48a   : >> { %1719 = vmax.xlane.f32.xlu0 %v1718_v36  ;;  %2232 = vmax.xlane.f32.xlu1 %v2231_v51  ;;  %v9899_v33 = vpop.permute.xlu0 %3068 }
 0x48b   : >> { %13647 = vst [vmem:[#allocation58_spill] sm:$0xff] %v9899_v33 }
 0x492   : >> { %1716 = vmax.xlane.f32.xlu1 %v1715_v63  ;;  %v9901_v8 = vpop.permute.xlu0 %3589 }
 0x493   : >> { %13648 = vst [vmem:[#allocation59_spill] sm:$0xff] %v9901_v8 }
 0x49a   : >> { %v1696_v36 = vpop.xlane.xlu0 %1695 }
 0x4ad   : >> { %v2209_v49 = vpop.xlane.xlu1 %2208 }
 0x4ae   : >> { %v2237_v56 = vsub.f32 %v9781_v44, %v2209_v49 }
 0x4b0   : >> { %v2247_v39 = vmul.f32 1.442695, %v2237_v56  ;;  %v1722_v56 = vsub.f32 %v9655_v7, %v1696_v36 }
 0x4b2   : >> { %7652 = vpow2.f32 %v2247_v39  ;;  %v1733_v44 = vmul.f32 1.442695, %v1722_v56 }
 0x4b5   : >> { %v1693_v51 = vpop.xlane.xlu1 %1692 }
 0x4b6   : >> { %v1721_v50 = vsub.f32 %v9789_v10, %v1693_v51 }
 0x4b8   : >> { %v9905_v4 = vpop.eup %7652  ;;  %v1731_v38 = vmul.f32 1.442695, %v1721_v50 }
 0x4b9   : >> { %v2267_v63 = vsel %vm1690_vm13, %v9905_v4, 0.0 }
 0x4ba   : >> { %7654 = vpow2.f32 %v1731_v38  ;;  %2268 = vadd.xlane.f32.xlu2 %v2267_v63 }
 0x4bd   : >> { %v2215_v9 = vpop.xlane.xlu0 %2214  ;;  %v2212_v13 = vpop.xlane.xlu1 %2211 }
 0x4be   : >> { %v2238_v8 = vsub.f32 %v9796_v41, %v2212_v13  ;;  %v2239_v41 = vsub.f32 %v9799_v37, %v2215_v9 }
 0x4c0   : >> { %v9910_v19 = vpop.eup %7654  ;;  %v2249_v49 = vmul.f32 1.442695, %v2238_v8  ;;  %v2251_v8 = vmul.f32 1.442695, %v2239_v41 }
 0x4c1   : >> { %v1751_v39 = vsel %vm1690_vm13, %v9910_v19, 0.0 }
 0x4c2   : >> { %1752 = vadd.xlane.f32.xlu2 %v1751_v39  ;;  %7656 = vpow2.f32 %v2249_v49 }
 0x4c3   : >> { %7658 = vpow2.f32 %v1733_v44 }
 0x4c5   : >> { %v1699_v10 = vpop.xlane.xlu0 %1698  ;;  %v2218_v51 = vpop.xlane.xlu2 %2217 }
 0x4c6   : >> { %v1723_v38 = vsub.f32 %v9807_v2, %v1699_v10  ;;  %v2240_v50 = vsub.f32 %v9810_v34, %v2218_v51 }
 0x4c8   : >> { %v1735_v63 = vmul.f32 1.442695, %v1723_v38  ;;  %v2253_v58 = vmul.f32 1.442695, %v2240_v50  ;;  %v9917_v13 = vpop.eup %7656 }
 0x4c9   : >> { %v2270_v7 = vsel %vm1690_vm13, %v9917_v13, 0.0  ;;  %v9923_v56 = vpop.eup %7658 }
 0x4ca   : >> { %7660 = vpow2.f32 %v1735_v63  ;;  %2271 = vadd.xlane.f32.xlu1 %v2270_v7  ;;  %v2870_v63 = vpop.f32.mrf.mxu0 }
 0x4cb   : >> { %7662 = vpow2.f32 %v2253_v58  ;;  %v1754_v58 = vsel %vm1690_vm13, %v9923_v56, 0.0 }
 0x4cc   : >> { %7664 = vpow2.f32 %v2251_v8 }
 0x4cd   : >> { %v2221_v36 = vpop.xlane.xlu0 %2220  ;;  %v1702_v2 = vpop.xlane.xlu2 %1701 }
 0x4ce   : >> { %v2241_v49 = vsub.f32 %v9820_v60, %v2221_v36  ;;  %v1724_v37 = vsub.f32 %v9817_v53, %v1702_v2 }
 0x4d0   : >> { %v9925_v34 = vpop.eup %7660  ;;  %v2255_v39 = vmul.f32 1.442695, %v2241_v49  ;;  %v1737_v44 = vmul.f32 1.442695, %v1724_v37 }
 0x4d1   : >> { %v9927_v10 = vpop.eup %7662  ;;  %v1757_v9 = vsel %vm1690_vm13, %v9925_v34, 0.0 }
 0x4d2   : >> { %7666 = vpow2.f32 %v2255_v39  ;;  %1758 = vadd.xlane.f32.xlu2 %v1757_v9  ;;  %v2276_v60 = vsel %vm1690_vm13, %v9927_v10, 0.0  ;;  %1755 = vadd.xlane.f32.xlu1 %v1754_v58  ;;  %v9937_v50 = vpop.eup %7664  ;;  %v2872_v39 = vpop.f32.mrf.mxu0 }
 0x4d3   : >> { %2277 = vadd.xlane.f32.xlu0 %v2276_v60  ;;  %7668 = vpow2.f32 %v1737_v44  ;;  %v2273_v8 = vsel %vm1690_vm13, %v9937_v50, 0.0  ;;  %v9956_v9 = vadd.f32 %v2872_v39, %v13572_v23 }
 0x4d5   : >> { %v2224_v51 = vpop.xlane.xlu0 %2223 }
 0x4d6   : >> { %v2242_v38 = vsub.f32 %v9829_v47, %v2224_v51 }
 0x4d8   : >> { %v9939_v53 = vpop.eup %7666  ;;  %v2257_v41 = vmul.f32 1.442695, %v2242_v38  ;;  %v2899_v38 = vsel %vm1690_vm13, %v9956_v9, -inf }
 0x4d9   : >> { %v2279_v7 = vsel %vm1690_vm13, %v9939_v53, 0.0  ;;  %v9947_v49 = vpop.eup %7668 }
 0x4da   : >> { %7670 = vpow2.f32 %v2257_v41  ;;  %2274 = vadd.xlane.f32.xlu1 %v2273_v8  ;;  %v1760_v37 = vsel %vm1690_vm13, %v9947_v49, 0.0 }
 0x4db   : >> { %2280 = vadd.xlane.f32.xlu0 %v2279_v7 }
 0x4dd   : >> { %v9945_v36 = vpop.xlane.xlu2 %2891 }
 0x4e0   : >> { %v9949_v47 = vpop.eup %7670 }
 0x4e1   : >> { %v2282_v2 = vsel %vm1690_vm13, %v9949_v47, 0.0 }
 0x4e2   : >> { %2283 = vadd.xlane.f32.xlu2 %v2282_v2  ;;  %1761 = vadd.xlane.f32.xlu1 %v1760_v37  ;;  %v2875_v2 = vpop.f32.mrf.mxu0 }
 0x4e5   : >> { %v9958_v58 = vpop.xlane.xlu1 %2894 }
 0x4e6   : >> { %v1705_v60 = vpop.xlane.xlu2 %1704 }
 0x4e7   : >> { %v1725_v44 = vsub.f32 %v9841_v22, %v1705_v60  ;;  %v9969_v60 = vpop.xlane.xlu0 %2229 }
 0x4e9   : >> { %v1739_v51 = vmul.f32 1.442695, %v1725_v44 }
 0x4ea   : >> { %2900 = vmax.xlane.f32.xlu2 %v2899_v38  ;;  %v2877_v15 = vpop.f32.mrf.mxu0 }
 0x4eb   : >> { %7672 = vpow2.f32 %v1739_v51 }
 0x4ed   : >> { %v1708_v41 = vpop.xlane.xlu1 %1707 }
 0x4ee   : >> { %v1726_v7 = vsub.f32 %v9856_v42, %v1708_v41  ;;  %v2227_v8 = vpop.xlane.xlu2 %2226  ;;  %v9973_v42 = vadd.f32 %v2875_v2, %v13571_v24 }
 0x4ef   : >> { %v2243_v39 = vsub.f32 %v9862_v0, %v2227_v8  ;;  %v1714_v2 = vpop.xlane.xlu0 %1713 }
 0x4f0   : >> { %v1741_v37 = vmul.f32 1.442695, %v1726_v7  ;;  %v2902_v8 = vsel %vm1690_vm13, %v9973_v42, -inf }
 0x4f1   : >> { %v9964_v43 = vpop.eup %7672  ;;  %v2259_v38 = vmul.f32 1.442695, %v2243_v39 }
 0x4f2   : >> { %7674 = vpow2.f32 %v1741_v37  ;;  %v1763_v22 = vsel %vm1690_vm13, %v9964_v43, 0.0 }
 0x4f3   : >> { %1764 = vadd.xlane.f32.xlu1 %v1763_v22  ;;  %7676 = vpow2.f32 %v2259_v38 }
 0x4f5   : >> { %v1711_v44 = vpop.xlane.xlu1 %1710 }
 0x4f6   : >> { %v1727_v51 = vsub.f32 %v9873_v32, %v1711_v44  ;;  %v9982_v32 = vadd.f32 %v2870_v63, %v13573_v21  ;;  %v1728_v44 = vsub.f32 %v9859_v52, %v1714_v2  ;;  %v2880_v63 = vpop.f32.mrf.mxu0 }
 0x4f7   : >> { %v9999_v3 = vadd.f32 %v2880_v63, %v13578_v26 }
 0x4f8   : >> { %v1743_v41 = vmul.f32 1.442695, %v1727_v51  ;;  %v9975_v7 = vpop.eup %7674  ;;  %v2896_v51 = vsel %vm1690_vm13, %v9982_v32, -inf }
 0x4f9   : >> { %v1766_v0 = vsel %vm1690_vm13, %v9975_v7, 0.0  ;;  %v9984_v39 = vpop.eup %7676 }
 0x4fa   : >> { %7678 = vpow2.f32 %v1743_v41  ;;  %1767 = vadd.xlane.f32.xlu0 %v1766_v0  ;;  %v2285_v41 = vsel %vm1690_vm13, %v9984_v39, 0.0  ;;  %v9996_v0 = vadd.f32 %v2877_v15, %v13570_v25 }
 0x4fb   : >> { %2903 = vmax.xlane.f32.xlu1 %v2902_v8  ;;  %v1745_v8 = vmul.f32 1.442695, %v1728_v44 }
 0x4fd   : >> { %v2233_v37 = vpop.xlane.xlu1 %2232  ;;  %7680 = vpow2.f32 %v1745_v8 }
 0x500   : >> { %v9986_v22 = vpop.eup %7678 }
 0x501   : >> { %v1769_v38 = vsel %vm1690_vm13, %v9986_v22, 0.0 }
 0x502   : >> { %1770 = vadd.xlane.f32.xlu2 %v1769_v38  ;;  %2897 = vmax.xlane.f32.xlu0 %v2896_v51  ;;  %v2905_v38 = vsel %vm1690_vm13, %v9996_v0, -inf  ;;  %v2908_v51 = vsel %vm1690_vm13, %v9999_v3, -inf }
 0x503   : >> { %2286 = vadd.xlane.f32.xlu1 %v2285_v41  ;;  %v2236_v41 = vpop.xlane.xlu0 %2235  ;;  %v10006_v15 = vpop.eup %7680 }
 0x504   : >> { %v2246_v44 = vsub.f32 %v9876_v30, %v2236_v41  ;;  %v1772_v63 = vsel %vm1690_vm13, %v10006_v15, 0.0 }
 0x505   : >> { %v1717_v52 = vpop.xlane.xlu1 %1716 }
 0x506   : >> { %v1729_v2 = vsub.f32 %v9893_v61, %v1717_v52  ;;  %v2265_v61 = vmul.f32 1.442695, %v2246_v44 }
 0x508   : >> { %v1747_v33 = vmul.f32 1.442695, %v1729_v2 }
 0x50a   : >> { %2906 = vmax.xlane.f32.xlu0 %v2905_v38  ;;  %7682 = vpow2.f32 %v1747_v33 }
 0x50b   : >> { %2909 = vmax.xlane.f32.xlu1 %v2908_v51  ;;  %v1720_v8 = vpop.xlane.xlu0 %1719  ;;  %7684 = vpow2.f32 %v2265_v61 }
 0x50c   : >> { %v1730_v38 = vsub.f32 %v9883_v40, %v1720_v8  ;;  %v2920_v40 = vsub.f32 %v9834_v17, %v9945_v36 }
 0x50e   : >> { %v1749_v30 = vmul.f32 1.442695, %v1730_v38  ;;  %v2930_v61 = vmul.f32 1.442695, %v2920_v40  ;;  %v2245_v38 = vsub.f32 %v9886_v55, %v2233_v37 }
 0x510   : >> { %v10011_v52 = vpop.eup %7682  ;;  %7686 = vpow2.f32 %v1749_v30  ;;  %v2244_v30 = vsub.f32 %v9844_v18, %v9969_v60  ;;  %v2263_v17 = vmul.f32 1.442695, %v2245_v38 }
 0x511   : >> { %v1775_v2 = vsel %vm1690_vm13, %v10011_v52, 0.0  ;;  %v10020_v33 = vpop.eup %7684  ;;  %7688 = vpow2.f32 %v2930_v61 }
 0x512   : >> { %v2294_v51 = vsel %vm1690_vm13, %v10020_v33, 0.0  ;;  %v2261_v26 = vmul.f32 1.442695, %v2244_v30  ;;  %7690 = vpow2.f32 %v2263_v17 }
 0x513   : >> { %1773 = vadd.xlane.f32.xlu1 %v1772_v63  ;;  %v2882_v63 = vpop.f32.mrf.mxu0 }
 0x514   : >> { %v10031_v8 = vadd.f32 %v2882_v63, %v13569_v27 }
 0x516   : >> { %v10024_v41 = vpop.eup %7686 }
 0x517   : >> { %v1778_v44 = vsel %vm1690_vm13, %v10024_v41, 0.0  ;;  %v10038_v36 = vpop.eup %7688 }
 0x518   : >> { %13649 = vst [vmem:[#allocation60_spill] sm:$0xff] %v10038_v36  ;;  %v2950_v40 = vsel %vm1690_vm13, %v10038_v36, 0.0  ;;  %v10042_v37 = vpop.eup %7690 }
 0x519   : >> { %v2291_v18 = vsel %vm1690_vm13, %v10042_v37, 0.0 }
 0x51a   : >> { %3264 = vrot.lane.b32.xlu2 %v9754_v62, %s8398_s26 }
 0x51b   : >> { %1776 = vadd.xlane.f32.xlu1 %v1775_v2  ;;  %v2911_v2 = vsel %vm1690_vm13, %v10031_v8, -inf  ;;  %v10053_v36 = vpop.f32.mrf.mxu0 }
 0x51e   : >> { %3266 = vrot.lane.b32.xlu0 %v9745_v59, %s8398_s26 }
 0x523   : >> { %2295 = vadd.xlane.f32.xlu1 %v2294_v51 }
 0x52b   : >> { %1779 = vadd.xlane.f32.xlu1 %v1778_v44 }
 0x52d   : >> { %v2269_v51 = vpop.xlane.xlu2 %2268 }
 0x52e   : >> { %7692 = vrcp.f32 %v2269_v51 }
 0x52f   : >> { %7694 = vpow2.f32 %v2261_v26 }
 0x533   : >> { %2912 = vmax.xlane.f32.xlu1 %v2911_v2 }
 0x534   : >> { %v7693_v63 = vpop.eup %7692 }
 0x535   : >> { %v1753_v44 = vpop.xlane.xlu2 %1752  ;;  %v10046_v60 = vpop.eup %7694  ;;  %v2307_v38 = vmul.f32 %v7693_v63, %v9905_v4 }
 0x536   : >> { %v2288_v17 = vsel %vm1690_vm13, %v10046_v60, 0.0 }
 0x53b   : >> { %2951 = vadd.xlane.f32.xlu1 %v2950_v40 }
 0x53d   : >> { %v2272_v55 = vpop.xlane.xlu1 %2271 }
 0x53e   : >> { %7696 = vrcp.f32 %v2272_v55 }
 0x53f   : >> { %7698 = vrcp.f32 %v1753_v44 }
 0x543   : >> { %2292 = vadd.xlane.f32.xlu2 %v2291_v18 }
 0x544   : >> { %v7697_v61 = vpop.eup %7696 }
 0x545   : >> { %v2308_v2 = vmul.f32 %v7697_v61, %v9917_v13  ;;  %v1756_v30 = vpop.xlane.xlu1 %1755  ;;  %v7699_v40 = vpop.eup %7698  ;;  %v2434_v61 = vsel %vm1625_vm12, %v9666_v12, 0 }
 0x546   : >> { %7700 = vrcp.f32 %v1756_v30  ;;  %v2278_v51 = vpop.xlane.xlu0 %2277  ;;  %v1791_v44 = vmul.f32 %v7699_v40, %v9910_v19  ;;  %v1759_v63 = vpop.xlane.xlu2 %1758  ;;  %v2431_v40 = vsel %vm1625_vm12, %v9429_v46, 0  ;;  %v2428_v46 = vsel %vm1625_vm12, %v9484_v1, 0 }
 0x547   : >> { %v2317_v26 = vpack.c.bf16 %v2308_v2, %v2307_v38  ;;  %7702 = vrcp.f32 %v2278_v51 }
 0x548   : >> { %2289 = vadd.xlane.f32.xlu0 %v2288_v17 }
 0x549   : >> { %6970 = vmatmul.msk.bf16.vlgmr.msra.gmra.mxu1 %vm1690_vm13, %v2317_v26  ;;  %v10064_v26 = vpop.f32.mrf.mxu0 }
 0x54c   : >> { %v7701_v55 = vpop.eup %7700 }
 0x54d   : >> { %v1792_v4 = vmul.f32 %v7701_v55, %v9923_v56  ;;  %v2275_v13 = vpop.xlane.xlu1 %2274  ;;  %v7703_v38 = vpop.eup %7702 }
 0x54e   : >> { %7704 = vrcp.f32 %v2275_v13  ;;  %v2310_v19 = vmul.f32 %v7703_v38, %v9927_v10  ;;  %v2281_v12 = vpop.xlane.xlu0 %2280 }
 0x54f   : >> { %v1801_v18 = vpack.c.bf16 %v1792_v4, %v1791_v44  ;;  %7706 = vrcp.f32 %v1759_v63 }
 0x551   : >> { %6950 = vmatmul.msk.bf16.vlgmr.msrb.gmra.mxu3 %vm1690_vm13, %v1801_v18  ;;  %v3381_v63 = vpop.f32.mrf.mxu0 }
 0x552   : >> { %2439 = vmatpush.bf16.xpose.msrb.mxu3 %v2434_v61 }
 0x554   : >> { %v7705_v2 = vpop.eup %7704  ;;  %3260 = vrot.lane.b32.xlu1 %v9767_v45, %s8398_s26 }
 0x555   : >> { %v2309_v56 = vmul.f32 %v7705_v2, %v9937_v50  ;;  %v1762_v30 = vpop.xlane.xlu1 %1761  ;;  %v2284_v17 = vpop.xlane.xlu2 %2283 }
 0x556   : >> { %7708 = vrcp.f32 %v1762_v30  ;;  %v7707_v55 = vpop.eup %7706  ;;  %v2921_v30 = vsub.f32 %v9847_v11, %v9958_v58 }
 0x557   : >> { %v2318_v51 = vpack.c.bf16 %v2310_v19, %v2309_v56  ;;  %7710 = vrcp.f32 %v2284_v17  ;;  %v1793_v50 = vmul.f32 %v7707_v55, %v9925_v34  ;;  %v2425_v34 = vsel %vm1625_vm12, %v9510_v6, 0 }
 0x558   : >> { %7712 = vrcp.f32 %v2281_v12  ;;  %v2932_v12 = vmul.f32 1.442695, %v2921_v30 }
 0x559   : >> { %6971 = vmatmul.msk.bf16.gmra.mxu1 %vm1690_vm13, %v2318_v51 }
 0x55a   : >> { %2440 = vmatpush.bf16.xpose.msrb.mxu3 %v2431_v40 }
 0x55b   : >> { %3262 = vrot.lane.b32.xlu2 %v9760_v54, %s8398_s26 }
 0x55c   : >> { %v7709_v10 = vpop.eup %7708  ;;  %3258 = vrot.lane.b32.xlu0 %v9771_v5, %s8398_s26  ;;  %s4010_s26 = scalar_lea.vmem %s8585_s30, %s7224_s24 }
 0x55d   : >> { %v1794_v44 = vmul.f32 %v7709_v10, %v9947_v49  ;;  %v7711_v13 = vpop.eup %7710  ;;  %v10083_v49 = vpop.f32.mrf.mxu0 }
 0x55e   : >> { %v7713_v18 = vpop.eup %7712  ;;  %v2312_v61 = vmul.f32 %v7711_v13, %v9949_v47 }
 0x55f   : >> { %v1802_v4 = vpack.c.bf16 %v1794_v44, %v1793_v50  ;;  %v2311_v38 = vmul.f32 %v7713_v18, %v9939_v53  ;;  %v2422_v53 = vsel %vm1625_vm12, %v9512_v14, 0  ;;  %v2901_v14 = vpop.xlane.xlu2 %2900 }
 0x561   : >> { %6951 = vmatmul.msk.bf16.gmra.mxu3 %vm1690_vm13, %v1802_v4  ;;  %v2319_v19 = vpack.c.bf16 %v2312_v61, %v2311_v38 }
 0x562   : >> { %2441 = vmatpush.bf16.xpose.msrb.mxu3 %v2428_v46 }
 0x565   : >> { %v3386_v51 = vpop.f32.mrf.mxu0 }
 0x566   : >> { %v1765_v2 = vpop.xlane.xlu1 %1764 }
 0x567   : >> { %7714 = vrcp.f32 %v1765_v2 }
 0x569   : >> { %6972 = vmatmul.msk.bf16.gmra.mxu1 %vm1690_vm13, %v2319_v19 }
 0x56a   : >> { %2442 = vmatpush.bf16.xpose.msrb.mxu3 %v2425_v34 }
 0x56d   : >> { %v1768_v56 = vpop.xlane.xlu0 %1767  ;;  %v7715_v47 = vpop.eup %7714 }
 0x56e   : >> { %7716 = vrcp.f32 %v1768_v56  ;;  %v2904_v1 = vpop.xlane.xlu1 %2903  ;;  %v1795_v6 = vmul.f32 %v7715_v47, %v9964_v43  ;;  %v3388_v46 = vpop.f32.mrf.mxu0  ;;  %v2923_v47 = vsub.f32 %v9956_v9, %v2901_v14 }
 0x56f   : >> { %v2924_v11 = vsub.f32 %v9973_v42, %v2904_v1  ;;  %7718 = vpow2.f32 %v2932_v12  ;;  %v10104_v42 = vadd.f32 %v3381_v63, %v13576_v16  ;;  %v10116_v63 = vadd.f32 %v10053_v36, %v13577_v28 }
 0x570   : >> { %v10137_v14 = vadd.f32 %v3388_v46, %v13572_v23 }
 0x571   : >> { %v2938_v4 = vmul.f32 1.442695, %v2924_v11  ;;  %v2914_v12 = vsel %vm1690_vm13, %v10116_v63, -inf  ;;  %v10134_v11 = vadd.f32 %v10064_v26, %v13575_v29 }
 0x572   : >> { %2443 = vmatpush.bf16.xpose.msrb.mxu3 %v2422_v53  ;;  %13651 = vst [vmem:[#allocation62_spill] sm:$0xff] %v10137_v14  ;;  %v3415_v26 = vsel %vm1690_vm13, %v10137_v14, -inf }
 0x574   : >> { %v7717_v17 = vpop.eup %7716 }
 0x575   : >> { %v2898_v40 = vpop.xlane.xlu0 %2897  ;;  %v1796_v55 = vmul.f32 %v7717_v17, %v9975_v7  ;;  %v10099_v7 = vpop.eup %7718 }
 0x576   : >> { %v2922_v10 = vsub.f32 %v9982_v32, %v2898_v40  ;;  %v10092_v50 = vpop.xlane.xlu1 %2286  ;;  %v1771_v2 = vpop.xlane.xlu2 %1770  ;;  %v2953_v19 = vsel %vm1690_vm13, %v10099_v7, 0.0 }
 0x577   : >> { %v1803_v44 = vpack.c.bf16 %v1796_v55, %v1795_v6  ;;  %v3391_v1 = vpop.f32.mrf.mxu0  ;;  %v10126_v6 = vadd.f32 %v3386_v51, %v13573_v21  ;;  %v2936_v55 = vmul.f32 1.442695, %v2923_v47 }
 0x578   : >> { %v2934_v58 = vmul.f32 1.442695, %v2922_v10 }
 0x579   : >> { %6952 = vmatmul.msk.bf16.gmra.mxu3 %vm1690_vm13, %v1803_v44  ;;  %13650 = vst [vmem:[#allocation61_spill] sm:$0xff] %v10126_v6  ;;  %v3412_v51 = vsel %vm1690_vm13, %v10126_v6, -inf }
 0x57a   : >> { %7720 = vpow2.f32 %v2934_v58 }
 0x57b   : >> { %7722 = vpow2.f32 %v2938_v4 }
 0x57d   : >> { %v2907_v13 = vpop.xlane.xlu0 %2906 }
 0x57e   : >> { %v2925_v43 = vsub.f32 %v9996_v0, %v2907_v13  ;;  %v10097_v18 = vpop.xlane.xlu1 %2909  ;;  %v3406_v0 = vsel %vm1690_vm13, %v10104_v42, -inf }
 0x57f   : >> { %v3393_v4 = vpop.f32.mrf.mxu0 }
 0x580   : >> { %v10101_v32 = vpop.eup %7720  ;;  %v2940_v61 = vmul.f32 1.442695, %v2925_v43 }
 0x581   : >> { %v2956_v38 = vsel %vm1690_vm13, %v10101_v32, 0.0  ;;  %v10112_v34 = vpop.eup %7722 }
 0x582   : >> { %2957 = vadd.xlane.f32.xlu1 %v2956_v38  ;;  %7724 = vpow2.f32 %v2940_v61  ;;  %v2962_v30 = vsel %vm1690_vm13, %v10112_v34, 0.0 }
 0x583   : >> { %7726 = vrcp.f32 %v1771_v2  ;;  %v10157_v2 = vadd.f32 %v10083_v49, %v13574_v20 }
 0x584   : >> { %2954 = vadd.xlane.f32.xlu2 %v2953_v19 }
 0x586   : >> { %v1774_v56 = vpop.xlane.xlu1 %1773  ;;  %3407 = vmax.xlane.f32.xlu0 %v3406_v0  ;;  %v3409_v0 = vsel %vm1690_vm13, %v10157_v2, -inf }
 0x587   : >> { %7728 = vrcp.f32 %v1774_v56 }
 0x588   : >> { %v10120_v53 = vpop.eup %7724  ;;  %7730 = vpow2.f32 %v2936_v55 }
 0x589   : >> { %v7727_v17 = vpop.eup %7726  ;;  %v2965_v36 = vsel %vm1690_vm13, %v10120_v53, 0.0 }
 0x58a   : >> { %2963 = vadd.xlane.f32.xlu1 %v2962_v30  ;;  %v1797_v44 = vmul.f32 %v7727_v17, %v9986_v22  ;;  %v2917_v22 = vsel %vm1690_vm13, %v10134_v11, -inf  ;;  %v10164_v17 = vadd.f32 %v3391_v1, %v13571_v24  ;;  %v10182_v1 = vpop.permute.xlu2 %3264 }
 0x58c   : >> { %2915 = vmax.xlane.f32.xlu2 %v2914_v12  ;;  %13653 = vst [vmem:[#allocation64_spill] sm:$0xff] %v10164_v17  ;;  %v3418_v49 = vsel %vm1690_vm13, %v10164_v17, -inf }
 0x58d   : >> { %v7729_v40 = vpop.eup %7728 }
 0x58e   : >> { %v1777_v10 = vpop.xlane.xlu1 %1776  ;;  %2966 = vadd.xlane.f32.xlu0 %v2965_v36  ;;  %v1798_v9 = vmul.f32 %v7729_v40, %v10006_v15  ;;  %v10145_v15 = vadd.f32 %v3393_v4, %v13570_v25  ;;  %v10149_v46 = vpop.eup %7730 }
 0x58f   : >> { %v2959_v61 = vsel %vm1690_vm13, %v10149_v46, 0.0  ;;  %7732 = vrcp.f32 %v1777_v10  ;;  %v3099_v10 = vsel %vm1625_vm12, %v9628_v35, 0 }
 0x590   : >> { %v1804_v58 = vpack.c.bf16 %v1798_v9, %v1797_v44  ;;  %13652 = vst [vmem:[#allocation63_spill] sm:$0xff] %v10145_v15  ;;  %v3421_v43 = vsel %vm1690_vm13, %v10145_v15, -inf  ;;  %v10173_v40 = vpop.permute.xlu0 %3266 }
 0x592   : >> { %6953 = vmatmul.msk.bf16.gmra.mxu3 %vm1690_vm13, %v1804_v58  ;;  %3413 = vmax.xlane.f32.xlu1 %v3412_v51  ;;  %v3396_v58 = vpop.f32.mrf.mxu0 }
 0x594   : >> { %2918 = vmax.xlane.f32.xlu2 %v2917_v22 }
 0x595   : >> { %v7733_v19 = vpop.eup %7732 }
 0x596   : >> { %v2296_v13 = vpop.xlane.xlu1 %2295  ;;  %3416 = vmax.xlane.f32.xlu0 %v3415_v26  ;;  %v1799_v30 = vmul.f32 %v7733_v19, %v10011_v52  ;;  %v3102_v52 = vsel %vm1625_vm12, %v9616_v48, 0  ;;  %v13657_v19 = vld [vmem:[#allocation34_spill] sm:$0xff] }
 0x59a   : >> { %3422 = vmax.xlane.f32.xlu1 %v3421_v43  ;;  %v3398_v43 = vpop.f32.mrf.mxu0 }
 0x59c   : >> { %2960 = vadd.xlane.f32.xlu2 %v2959_v61 }
 0x59e   : >> { %v1780_v38 = vpop.xlane.xlu1 %1779 }
 0x59f   : >> { %7734 = vrcp.f32 %v1780_v38  ;;  %v10202_v38 = vadd.f32 %v3398_v43, %v13569_v27 }
 0x5a0   : >> { %7736 = vrcp.f32 %v10092_v50  ;;  %v13654_v50 = vld [vmem:[#allocation58_spill] sm:$0xff] }
 0x5a1   : >> { %v3096_v35 = vsel %vm1625_vm12, %v13654_v50, 0  ;;  %13656 = vst [vmem:[#allocation58_spill] sm:$0xff] %v10202_v38 }
 0x5a4   : >> { %3410 = vmax.xlane.f32.xlu2 %v3409_v0 }
 0x5a5   : >> { %v7735_v56 = vpop.eup %7734 }
 0x5a6   : >> { %v1800_v47 = vmul.f32 %v7735_v56, %v10024_v41  ;;  %v7737_v36 = vpop.eup %7736  ;;  %v2913_v51 = vpop.xlane.xlu1 %2912  ;;  %v2926_v56 = vsub.f32 %v9999_v3, %v10097_v18 }
 0x5a7   : >> { %v2313_v44 = vmul.f32 %v7737_v36, %v9984_v39 }
 0x5a8   : >> { %v1805_v12 = vpack.c.bf16 %v1800_v47, %v1799_v30 }
 0x5aa   : >> { %6954 = vmatmul.msk.bf16.gmra.mxu3 %vm1690_vm13, %v1805_v12  ;;  %3790 = vrot.lane.b32.xlu0 %v9754_v62, %s8402_s15  ;;  %v2942_v12 = vmul.f32 1.442695, %v2926_v56 }
 0x5ac   : >> { %3419 = vmax.xlane.f32.xlu2 %v3418_v49  ;;  %v13660_v49 = vld [vmem:[#allocation9_spill] sm:$0xff] }
 0x5b2   : >> { %3788 = vrot.lane.b32.xlu0 %v9760_v54, %s8402_s15 }
 0x5b3   : >> { %3792 = vrot.lane.b32.xlu1 %v9745_v59, %s8402_s15 }
 0x5b6   : >> { %v2293_v48 = vpop.xlane.xlu2 %2292 }
 0x5ba   : >> { %6955 = vmatmul.msk.bf16.vlgmr.msra.gmra.mxu3 %vm1625_vm12, %v9434_v57 }
 0x5bb   : >> { %3107 = vmatpush.bf16.xpose.msra.mxu3 %v3102_v52  ;;  %v2290_v41 = vpop.xlane.xlu0 %2289  ;;  %v10219_v52 = vadd.f32 %v3396_v58, %v13660_v49  ;;  %v13666_v58 = vld [vmem:[#allocation60_spill] sm:$0xff] }
 0x5bc   : >> { %7738 = vrcp.f32 %v2290_v41  ;;  %v13662_v41 = vld [vmem:[#allocation35_spill] sm:$0xff] }
 0x5bd   : >> { %7740 = vrcp.f32 %v2293_v48  ;;  %13661 = vst [vmem:[#allocation34_spill] sm:$0xff] %v10219_v52  ;;  %v3424_v36 = vsel %vm1690_vm13, %v10219_v52, -inf }
 0x5be   : >> { %7742 = vrcp.f32 %v2296_v13  ;;  %v2927_v13 = vsub.f32 %v10031_v8, %v2913_v51  ;;  %v10227_v3 = vpop.permute.xlu2 %3262 }
 0x5c0   : >> { %v2944_v61 = vmul.f32 1.442695, %v2927_v13 }
 0x5c2   : >> { %v7739_v55 = vpop.eup %7738  ;;  %7744 = vpow2.f32 %v2944_v61 }
 0x5c3   : >> { %v2314_v9 = vmul.f32 %v7739_v55, %v10046_v60  ;;  %3108 = vmatpush.bf16.xpose.msra.mxu3 %v3099_v10  ;;  %v7741_v39 = vpop.eup %7740  ;;  %7746 = vpow2.f32 %v2942_v12  ;;  %v2952_v10 = vpop.xlane.xlu1 %2951 }
 0x5c4   : >> { %3529 = vrot.lane.b32.xlu2 %v9745_v59, %s8401_s5  ;;  %v7743_v60 = vpop.eup %7742  ;;  %v2315_v4 = vmul.f32 %v7741_v39, %v10042_v37  ;;  %v13655_v59 = vld [vmem:[#allocation56_spill] sm:$0xff]  ;;  %7748 = vrcp.f32 %v2952_v10 }
 0x5c5   : >> { %v2320_v57 = vpack.c.bf16 %v2314_v9, %v2313_v44  ;;  %v3093_v22 = vsel %vm1625_vm12, %v13655_v59, 0  ;;  %v2316_v26 = vmul.f32 %v7743_v60, %v10020_v33  ;;  %v13658_v37 = vld [vmem:[#allocation52_spill] sm:$0xff]  ;;  %v3427_v33 = vsel %vm1690_vm13, %v10202_v38, -inf }
 0x5c6   : >> { %v3090_v0 = vsel %vm1625_vm12, %v13658_v37, 0  ;;  %v13669_v37 = vld [vmem:[#allocation43_spill] sm:$0xff] }
 0x5c7   : >> { %6973 = vmatmul.msk.bf16.gmra.mxu1 %vm1690_vm13, %v2320_v57  ;;  %v13665_v57 = vld [vmem:[#allocation47_spill] sm:$0xff] }
 0x5c8   : >> { %v10210_v8 = vpop.eup %7744 }
 0x5c9   : >> { %v2971_v47 = vsel %vm1690_vm13, %v10210_v8, 0.0  ;;  %v10229_v18 = vpop.eup %7746 }
 0x5ca   : >> { %6956 = vmatmul.msk.bf16.gmra.mxu3 %vm1625_vm12, %v9431_v31  ;;  %v2321_v31 = vpack.c.bf16 %v2316_v26, %v2315_v4  ;;  %v2968_v44 = vsel %vm1690_vm13, %v10229_v18, 0.0  ;;  %v7749_v50 = vpop.eup %7748 }
 0x5cb   : >> { %3109 = vmatpush.bf16.xpose.msra.mxu3 %v3096_v35  ;;  %v2990_v39 = vmul.f32 %v7749_v50, %v13666_v58  ;;  %v10242_v13 = vpop.permute.xlu1 %3260 }
 0x5ce   : >> { %v10245_v43 = vpop.permute.xlu0 %3258 }
 0x5d3   : >> { %3110 = vmatpush.bf16.xpose.msra.mxu3 %v3093_v22 }
 0x5d4   : >> { %v10214_v30 = vpop.f32.mrf.mxu3 }
 0x5d5   : >> { %13659 = vst [vmem:[#allocation56_spill] sm:$0xff] %v10214_v30 }
 0x5d7   : >> { %6974 = vmatmul.msk.bf16.gmra.mxu1 %vm1690_vm13, %v2321_v31 }
 0x5da   : >> { %6957 = vmatmul.msk.bf16.gmra.mxu3 %vm1625_vm12, %v13657_v19 }
 0x5db   : >> { %3111 = vmatpush.bf16.xpose.msra.mxu3 %v3090_v0 }
 0x5dc   : >> { %v10225_v55 = vpop.f32.mrf.mxu3 }
 0x5dd   : >> { %3428 = vmax.xlane.f32.xlu1 %v3427_v33  ;;  %13663 = vst [vmem:[#allocation52_spill] sm:$0xff] %v10225_v55  ;;  %v13670_v33 = vld [vmem:[#allocation38_spill] sm:$0xff] }
 0x5e4   : >> { %v10233_v9 = vpop.f32.mrf.mxu3 }
 0x5e5   : >> { %2972 = vadd.xlane.f32.xlu1 %v2971_v47  ;;  %13664 = vst [vmem:[#allocation35_spill] sm:$0xff] %v10233_v9 }
 0x5ea   : >> { %6958 = vmatmul.msk.bf16.gmra.mxu3 %vm1625_vm12, %v13662_v41 }
 0x5ec   : >> { %v10240_v59 = vpop.f32.mrf.mxu3 }
 0x5ed   : >> { %3425 = vmax.xlane.f32.xlu2 %v3424_v36  ;;  %13667 = vst [vmem:[#allocation47_spill] sm:$0xff] %v10240_v59  ;;  %v13671_v36 = vld [vmem:[#allocation40_spill] sm:$0xff] }
 0x5ee   : >> { %v3630_v10 = vsel %vm1625_vm12, %v13671_v36, 0 }
 0x5f5   : >> { %2969 = vadd.xlane.f32.xlu2 %v2968_v44  ;;  %v2958_v56 = vpop.xlane.xlu1 %2957 }
 0x5f7   : >> { %v2955_v48 = vpop.xlane.xlu2 %2954 }
 0x5f8   : >> { %7750 = vrcp.f32 %v2955_v48 }
 0x5fa   : >> { %6959 = vmatmul.msk.bf16.gmra.mxu3 %vm1625_vm12, %v13665_v57 }
 0x5fc   : >> { %v10248_v19 = vpop.f32.mrf.mxu3 }
 0x5fd   : >> { %13668 = vst [vmem:[#allocation60_spill] sm:$0xff] %v10248_v19 }
 0x5fe   : >> { %v7751_v35 = vpop.eup %7750 }
 0x5ff   : >> { %v2991_v60 = vmul.f32 %v7751_v35, %v10099_v7  ;;  %v2916_v51 = vpop.xlane.xlu2 %2915 }
 0x600   : >> { %v2928_v4 = vsub.f32 %v10116_v63, %v2916_v51  ;;  %v3633_v63 = vsel %vm1625_vm12, %v13669_v37, 0  ;;  %v13677_v37 = vld [vmem:[#allocation50_spill] sm:$0xff] }
 0x601   : >> { %v3000_v22 = vpack.c.bf16 %v2991_v60, %v2990_v39 }
 0x602   : >> { %v2946_v26 = vmul.f32 1.442695, %v2928_v4  ;;  %v13673_v4 = vld [vmem:[#allocation41_spill] sm:$0xff] }
 0x603   : >> { %6990 = vmatmul.msk.bf16.vlgmr.msrb.gmra.mxu1 %vm1690_vm13, %v3000_v22  ;;  %v13674_v22 = vld [vmem:[#allocation53_spill] sm:$0xff] }
 0x604   : >> { %7752 = vpow2.f32 %v2946_v26  ;;  %v10264_v44 = vpop.f32.mrf.mxu3  ;;  %v3627_v26 = vsel %vm1625_vm12, %v13674_v22, 0 }
 0x605   : >> { %13672 = vst [vmem:[#allocation43_spill] sm:$0xff] %v10264_v44 }
 0x607   : >> { %v2919_v31 = vpop.xlane.xlu2 %2918 }
 0x608   : >> { %v2929_v61 = vsub.f32 %v10134_v11, %v2919_v31  ;;  %v10258_v11 = vpop.xlane.xlu0 %3407  ;;  %v2964_v31 = vpop.xlane.xlu1 %2963 }
 0x60a   : >> { %v10250_v7 = vpop.eup %7752  ;;  %v2948_v0 = vmul.f32 1.442695, %v2929_v61  ;;  %6975 = vmatmul.msk.bf16.vlgmr.msrb.gmra.mxu3 %vm1625_vm12, %v13670_v33 }
 0x60b   : >> { %3638 = vmatpush.bf16.xpose.msrb.mxu3 %v3633_v63  ;;  %v2974_v47 = vsel %vm1690_vm13, %v10250_v7, 0.0  ;;  %v3624_v63 = vsel %vm1625_vm12, %v13677_v37, 0 }
 0x60c   : >> { %7754 = vpow2.f32 %v2948_v0  ;;  %2975 = vadd.xlane.f32.xlu0 %v2974_v47 }
 0x60d   : >> { %7756 = vrcp.f32 %v2958_v56 }
 0x60f   : >> { %v2961_v12 = vpop.xlane.xlu2 %2960 }
 0x610   : >> { %7758 = vrcp.f32 %v2961_v12  ;;  %v2967_v60 = vpop.xlane.xlu0 %2966 }
 0x611   : >> { %7760 = vrcp.f32 %v2967_v60  ;;  %v10301_v60 = vpop.xlane.xlu1 %3413 }
 0x612   : >> { %v10260_v41 = vpop.eup %7754  ;;  %7762 = vrcp.f32 %v2964_v31 }
 0x613   : >> { %3639 = vmatpush.bf16.xpose.msrb.mxu3 %v3630_v10  ;;  %v2977_v48 = vsel %vm1690_vm13, %v10260_v41, 0.0  ;;  %v7757_v57 = vpop.eup %7756  ;;  %v13679_v10 = vld [vmem:[#allocation36_spill] sm:$0xff] }
 0x614   : >> { %2978 = vadd.xlane.f32.xlu2 %v2977_v48  ;;  %v2992_v35 = vmul.f32 %v7757_v57, %v10101_v32  ;;  %v13680_v48 = vld [vmem:[#allocation55_spill] sm:$0xff]  ;;  %13684 = vst [vmem:[#allocation36_spill] sm:$0xff] %v10301_v60 }
 0x615   : >> { %v10276_v61 = vpop.f32.mrf.mxu3  ;;  %v3621_v57 = vsel %vm1625_vm12, %v13680_v48, 0  ;;  %v13688_v48 = vld [vmem:[#allocation54_spill] sm:$0xff] }
 0x616   : >> { %v7759_v50 = vpop.eup %7758  ;;  %13675 = vst [vmem:[#allocation38_spill] sm:$0xff] %v10276_v61 }
 0x617   : >> { %v2993_v58 = vmul.f32 %v7759_v50, %v10149_v46  ;;  %v10270_v39 = vpop.xlane.xlu2 %3410  ;;  %v7761_v46 = vpop.eup %7760 }
 0x618   : >> { %v7763_v0 = vpop.eup %7762  ;;  %v2995_v33 = vmul.f32 %v7761_v46, %v10120_v53  ;;  %v13683_v53 = vld [vmem:[#allocation37_spill] sm:$0xff] }
 0x619   : >> { %v3001_v51 = vpack.c.bf16 %v2993_v58, %v2992_v35  ;;  %v2994_v47 = vmul.f32 %v7763_v0, %v10112_v34  ;;  %v10310_v31 = vpop.xlane.xlu1 %3422  ;;  %v13686_v46 = vld [vmem:[#allocation45_spill] sm:$0xff] }
 0x61a   : >> { %6976 = vmatmul.msk.bf16.gmra.mxu3 %vm1625_vm12, %v13673_v4  ;;  %13685 = vst [vmem:[#allocation55_spill] sm:$0xff] %v10310_v31 }
 0x61b   : >> { %3640 = vmatpush.bf16.xpose.msrb.mxu3 %v3627_v26  ;;  %6991 = vmatmul.msk.bf16.gmra.mxu1 %vm1690_vm13, %v3001_v51  ;;  %v3002_v36 = vpack.c.bf16 %v2995_v33, %v2994_v47 }
 0x61d   : >> { %v10284_v56 = vpop.f32.mrf.mxu3 }
 0x61e   : >> { %13678 = vst [vmem:[#allocation41_spill] sm:$0xff] %v10284_v56 }
 0x61f   : >> { %v10279_v32 = vpop.xlane.xlu2 %3419 }
 0x620   : >> { %13676 = vst [vmem:[#allocation40_spill] sm:$0xff] %v10279_v32 }
 0x623   : >> { %3641 = vmatpush.bf16.xpose.msrb.mxu3 %v3624_v63 }
 0x625   : >> { %v10319_v33 = vpop.permute.xlu1 %3792 }
 0x627   : >> { %v3530_v12 = vpop.permute.xlu2 %3529 }
 0x628   : >> { %3554 = vmatpush.bf16.msra.mxu1 %v3530_v12 }
 0x62a   : >> { %6977 = vmatmul.msk.bf16.gmra.mxu3 %vm1625_vm12, %v13679_v10 }
 0x62b   : >> { %3642 = vmatpush.bf16.xpose.msrb.mxu3 %v3621_v57  ;;  %6992 = vmatmul.msk.bf16.gmra.mxu1 %vm1690_vm13, %v3002_v36 }
 0x62d   : >> { %v10292_v50 = vpop.f32.mrf.mxu3 }
 0x62e   : >> { %13681 = vst [vmem:[#allocation53_spill] sm:$0xff] %v10292_v50 }
 0x635   : >> { %v10294_v35 = vpop.f32.mrf.mxu3 }
 0x636   : >> { %13682 = vst [vmem:[#allocation50_spill] sm:$0xff] %v10294_v35 }
 0x63a   : >> { %6978 = vmatmul.msk.bf16.gmra.mxu3 %vm1625_vm12, %v13683_v53 }
 0x63d   : >> { %v1914_v34 = vpop.f32.mrf.mxu3 }
 0x63e   : >> { %v10299_v58 = vadd.f32 %v1914_v34, %v13576_v16 }
 0x640   : >> { %v1939_v51 = vsel %vm1690_vm13, %v10299_v58, -inf }
 0x641   : >> { %1940 = vmax.xlane.f32.xlu0 %v1939_v51 }
 0x645   : >> { %v1916_v4 = vpop.f32.mrf.mxu3 }
 0x646   : >> { %v10306_v22 = vadd.f32 %v1916_v4, %v13574_v20 }
 0x648   : >> { %v1942_v26 = vsel %vm1690_vm13, %v10306_v22, -inf }
 0x649   : >> { %1943 = vmax.xlane.f32.xlu1 %v1942_v26 }
 0x64a   : >> { %6979 = vmatmul.msk.bf16.gmra.mxu3 %vm1625_vm12, %v13686_v46 }
 0x64d   : >> { %v1919_v37 = vpop.f32.mrf.mxu3 }
 0x64e   : >> { %v10315_v63 = vadd.f32 %v1919_v37, %v13573_v21 }
 0x650   : >> { %v1945_v0 = vsel %vm1690_vm13, %v10315_v63, -inf  ;;  %v10326_v10 = vpop.xlane.xlu1 %3428 }
 0x651   : >> { %1946 = vmax.xlane.f32.xlu2 %v1945_v0  ;;  %13687 = vst [vmem:[#allocation37_spill] sm:$0xff] %v10326_v10 }
 0x655   : >> { %v1921_v47 = vpop.f32.mrf.mxu3 }
 0x656   : >> { %v10322_v12 = vadd.f32 %v1921_v47, %v13572_v23  ;;  %v10342_v47 = vpop.xlane.xlu0 %3416 }
 0x657   : >> { %13690 = vst [vmem:[#allocation54_spill] sm:$0xff] %v10342_v47 }
 0x658   : >> { %v1948_v36 = vsel %vm1690_vm13, %v10322_v12, -inf  ;;  %v2973_v4 = vpop.xlane.xlu1 %2972 }
 0x659   : >> { %1949 = vmax.xlane.f32.xlu0 %v1948_v36  ;;  %7764 = vrcp.f32 %v2973_v4  ;;  %v13691_v36 = vld [vmem:[#allocation49_spill] sm:$0xff] }
 0x65a   : >> { %6995 = vmatmul.msk.bf16.vlgmr.msra.gmra.mxu3 %vm1625_vm12, %v13688_v48 }
 0x65d   : >> { %v1924_v57 = vpop.f32.mrf.mxu3 }
 0x65e   : >> { %v10331_v53 = vadd.f32 %v1924_v57, %v13571_v24  ;;  %v10353_v61 = vpop.permute.xlu0 %3790 }
 0x65f   : >> { %v7765_v48 = vpop.eup %7764 }
 0x660   : >> { %v1951_v34 = vsel %vm1690_vm13, %v10331_v53, -inf  ;;  %v10335_v51 = vpop.xlane.xlu2 %3425 }
 0x661   : >> { %13689 = vst [vmem:[#allocation45_spill] sm:$0xff] %v10335_v51  ;;  %1952 = vmax.xlane.f32.xlu0 %v1951_v34 }
 0x665   : >> { %v1926_v26 = vpop.f32.mrf.mxu3 }
 0x666   : >> { %v10338_v46 = vadd.f32 %v1926_v26, %v13570_v25  ;;  %v2997_v26 = vmul.f32 %v7765_v48, %v10210_v8  ;;  %v13692_v8 = vld [vmem:[#allocation51_spill] sm:$0xff] }
 0x668   : >> { %v1954_v37 = vsel %vm1690_vm13, %v10338_v46, -inf  ;;  %v2970_v0 = vpop.xlane.xlu2 %2969 }
 0x669   : >> { %1955 = vmax.xlane.f32.xlu1 %v1954_v37  ;;  %7766 = vrcp.f32 %v2970_v0 }
 0x66a   : >> { %6996 = vmatmul.msk.bf16.gmra.mxu3 %vm1625_vm12, %v13691_v36 }
 0x66d   : >> { %v1929_v57 = vpop.f32.mrf.mxu3 }
 0x66e   : >> { %v10347_v34 = vadd.f32 %v1929_v57, %v13660_v49 }
 0x66f   : >> { %v7767_v50 = vpop.eup %7766 }
 0x670   : >> { %v2996_v4 = vmul.f32 %v7767_v50, %v10229_v18  ;;  %v1957_v35 = vsel %vm1690_vm13, %v10347_v34, -inf  ;;  %v10363_v18 = vpop.permute.xlu0 %3788 }
 0x671   : >> { %1958 = vmax.xlane.f32.xlu1 %v1957_v35 }
 0x672   : >> { %v3003_v37 = vpack.c.bf16 %v2997_v26, %v2996_v4 }
 0x674   : >> { %6993 = vmatmul.msk.bf16.gmra.mxu1 %vm1690_vm13, %v3003_v37 }
 0x675   : >> { %v1931_v0 = vpop.f32.mrf.mxu3 }
 0x676   : >> { %v10357_v36 = vadd.f32 %v1931_v0, %v13569_v27 }
 0x678   : >> { %v1960_v57 = vsel %vm1690_vm13, %v10357_v36, -inf }
 0x679   : >> { %1961 = vmax.xlane.f32.xlu2 %v1960_v57 }
 0x67a   : >> { %6997 = vmatmul.msk.bf16.gmra.mxu3 %vm1625_vm12, %v13692_v8  ;;  %v13693_v8 = vld [vmem:[#allocation39_spill] sm:$0xff] }
 0x67d   : >> { %v1934_v50 = vpop.f32.mrf.mxu3 }
 0x67e   : >> { %v10366_v48 = vadd.f32 %v1934_v50, %v13577_v28 }
 0x67f   : >> { %v2976_v26 = vpop.xlane.xlu0 %2975 }
 0x680   : >> { %v1963_v35 = vsel %vm1690_vm13, %v10366_v48, -inf  ;;  %7768 = vrcp.f32 %v2976_v26 }
 0x681   : >> { %1964 = vmax.xlane.f32.xlu0 %v1963_v35 }
 0x685   : >> { %v1936_v4 = vpop.f32.mrf.mxu3 }
 0x686   : >> { %v10371_v37 = vadd.f32 %v1936_v4, %v13575_v29  ;;  %v7769_v50 = vpop.eup %7768 }
 0x687   : >> { %v2979_v0 = vpop.xlane.xlu2 %2978  ;;  %v2998_v26 = vmul.f32 %v7769_v50, %v10250_v7 }
 0x688   : >> { %7770 = vrcp.f32 %v2979_v0  ;;  %v1966_v57 = vsel %vm1690_vm13, %v10371_v37, -inf }
 0x689   : >> { %1967 = vmax.xlane.f32.xlu2 %v1966_v57 }
 0x68a   : >> { %6998 = vmatmul.msk.bf16.gmra.mxu3 %vm1625_vm12, %v13693_v8 }
 0x68d   : >> { %v2445_v56 = vpop.f32.mrf.mxu3 }
 0x68e   : >> { %v7771_v19 = vpop.eup %7770  ;;  %v10378_v35 = vadd.f32 %v2445_v56, %v13576_v16  ;;  %v13694_v56 = vld [vmem:[#allocation42_spill] sm:$0xff] }
 0x68f   : >> { %v2999_v4 = vmul.f32 %v7771_v19, %v10260_v41 }
 0x690   : >> { %v2470_v0 = vsel %vm1690_vm13, %v10378_v35, -inf }
 0x691   : >> { %2471 = vmax.xlane.f32.xlu1 %v2470_v0  ;;  %v3004_v44 = vpack.c.bf16 %v2999_v4, %v2998_v26 }
 0x693   : >> { %6994 = vmatmul.msk.bf16.gmra.mxu1 %vm1690_vm13, %v3004_v44 }
 0x695   : >> { %v2447_v57 = vpop.f32.mrf.mxu3 }
 0x696   : >> { %v10386_v8 = vadd.f32 %v2447_v57, %v13574_v20 }
 0x698   : >> { %v2473_v9 = vsel %vm1690_vm13, %v10386_v8, -inf }
 0x699   : >> { %2474 = vmax.xlane.f32.xlu1 %v2473_v9  ;;  %v13695_v9 = vld [vmem:[#allocation48_spill] sm:$0xff] }
 0x69a   : >> { %6999 = vmatmul.msk.bf16.gmra.mxu3 %vm1625_vm12, %v13694_v56 }
 0x69d   : >> { %v2450_v7 = vpop.f32.mrf.mxu3 }
 0x69e   : >> { %v10393_v19 = vadd.f32 %v2450_v7, %v13573_v21 }
 0x6a0   : >> { %v2476_v41 = vsel %vm1690_vm13, %v10393_v19, -inf }
 0x6a1   : >> { %2477 = vmax.xlane.f32.xlu2 %v2476_v41 }
 0x6a5   : >> { %v2452_v44 = vpop.f32.mrf.mxu3 }
 0x6a6   : >> { %v10398_v50 = vadd.f32 %v2452_v44, %v13572_v23 }
 0x6a8   : >> { %v2479_v26 = vsel %vm1690_vm13, %v10398_v50, -inf }
 0x6a9   : >> { %2480 = vmax.xlane.f32.xlu1 %v2479_v26 }
 0x6aa   : >> { %7015 = vmatmul.msk.bf16.vlgmr.msrb.gmra.mxu3 %vm1625_vm12, %v13695_v9  ;;  %v13696_v9 = vld [vmem:[#allocation57_spill] sm:$0xff] }
 0x6ad   : >> { %v2455_v4 = vpop.f32.mrf.mxu3 }
 0x6ae   : >> { %v10405_v0 = vadd.f32 %v2455_v4, %v13571_v24 }
 0x6b0   : >> { %v2482_v57 = vsel %vm1690_vm13, %v10405_v0, -inf }
 0x6b1   : >> { %2483 = vmax.xlane.f32.xlu2 %v2482_v57 }
 0x6b4   : >> { %v1941_v56 = vpop.xlane.xlu0 %1940 }
 0x6b5   : >> { %v1969_v7 = vsub.f32 %v10299_v58, %v1941_v56  ;;  %v2457_v41 = vpop.f32.mrf.mxu3 }
 0x6b6   : >> { %v10411_v44 = vadd.f32 %v2457_v41, %v13570_v25 }
 0x6b7   : >> { %v1979_v59 = vmul.f32 1.442695, %v1969_v7 }
 0x6b8   : >> { %v2485_v26 = vsel %vm1690_vm13, %v10411_v44, -inf }
 0x6b9   : >> { %7772 = vpow2.f32 %v1979_v59  ;;  %2486 = vmax.xlane.f32.xlu0 %v2485_v26 }
 0x6ba   : >> { %7016 = vmatmul.msk.bf16.gmra.mxu3 %vm1625_vm12, %v13696_v9 }
 0x6bc   : >> { %v1944_v4 = vpop.xlane.xlu1 %1943 }
 0x6bd   : >> { %v1970_v30 = vsub.f32 %v10306_v22, %v1944_v4  ;;  %v2460_v57 = vpop.f32.mrf.mxu3 }
 0x6be   : >> { %v10423_v7 = vadd.f32 %v2460_v57, %v13660_v49 }
 0x6bf   : >> { %v10418_v55 = vpop.eup %7772  ;;  %v1981_v58 = vmul.f32 1.442695, %v1970_v30 }
 0x6c0   : >> { %v1999_v56 = vsel %vm1690_vm13, %v10418_v55, 0.0 }
 0x6c1   : >> { %7774 = vpow2.f32 %v1981_v58  ;;  %2000 = vadd.xlane.f32.xlu0 %v1999_v56  ;;  %v2488_v58 = vsel %vm1690_vm13, %v10423_v7, -inf }
 0x6c4   : >> { %v1947_v59 = vpop.xlane.xlu2 %1946 }
 0x6c5   : >> { %v1971_v41 = vsub.f32 %v10315_v63, %v1947_v59  ;;  %v2462_v26 = vpop.f32.mrf.mxu3  ;;  %v13697_v63 = vld [vmem:[#allocation59_spill] sm:$0xff] }
 0x6c6   : >> { %v10427_v9 = vadd.f32 %v2462_v26, %v13569_v27 }
 0x6c7   : >> { %v10429_v22 = vpop.eup %7774  ;;  %v1983_v4 = vmul.f32 1.442695, %v1971_v41 }
 0x6c8   : >> { %v2002_v30 = vsel %vm1690_vm13, %v10429_v22, 0.0  ;;  %v2491_v57 = vsel %vm1690_vm13, %v10427_v9, -inf }
 0x6c9   : >> { %7776 = vpow2.f32 %v1983_v4  ;;  %2003 = vadd.xlane.f32.xlu1 %v2002_v30  ;;  %2489 = vmax.xlane.f32.xlu0 %v2488_v58 }
 0x6ca   : >> { %2492 = vmax.xlane.f32.xlu2 %v2491_v57  ;;  %7017 = vmatmul.msk.bf16.gmra.mxu3 %vm1625_vm12, %v13697_v63 }
 0x6cc   : >> { %v1950_v56 = vpop.xlane.xlu0 %1949 }
 0x6cd   : >> { %v1972_v59 = vsub.f32 %v10322_v12, %v1950_v56  ;;  %v2465_v41 = vpop.f32.mrf.mxu3 }
 0x6ce   : >> { %v10441_v26 = vadd.f32 %v2465_v41, %v13577_v28 }
 0x6cf   : >> { %v10443_v38 = vpop.eup %7776  ;;  %v1985_v10 = vmul.f32 1.442695, %v1972_v59 }
 0x6d0   : >> { %v2494_v52 = vsel %vm1690_vm13, %v10441_v26, -inf  ;;  %v2005_v4 = vsel %vm1690_vm13, %v10443_v38, 0.0 }
 0x6d1   : >> { %7778 = vpow2.f32 %v1985_v10  ;;  %2495 = vmax.xlane.f32.xlu0 %v2494_v52  ;;  %2006 = vadd.xlane.f32.xlu1 %v2005_v4  ;;  %v13698_v52 = vld [vmem:[#allocation46_spill] sm:$0xff] }
 0x6d4   : >> { %v1953_v30 = vpop.xlane.xlu0 %1952 }
 0x6d5   : >> { %v1973_v58 = vsub.f32 %v10331_v53, %v1953_v30  ;;  %v2467_v12 = vpop.f32.mrf.mxu3 }
 0x6d6   : >> { %v10451_v57 = vadd.f32 %v2467_v12, %v13575_v29 }
 0x6d7   : >> { %v10453_v63 = vpop.eup %7778  ;;  %v1987_v56 = vmul.f32 1.442695, %v1973_v58 }
 0x6d8   : >> { %v2008_v59 = vsel %vm1690_vm13, %v10453_v63, 0.0  ;;  %v2497_v41 = vsel %vm1690_vm13, %v10451_v57, -inf }
 0x6d9   : >> { %7780 = vpow2.f32 %v1987_v56  ;;  %2009 = vadd.xlane.f32.xlu0 %v2008_v59  ;;  %2498 = vmax.xlane.f32.xlu1 %v2497_v41 }
 0x6da   : >> { %7018 = vmatmul.msk.bf16.gmra.mxu3 %vm1625_vm12, %v13698_v52 }
 0x6dc   : >> { %v1956_v10 = vpop.xlane.xlu1 %1955 }
 0x6dd   : >> { %v1974_v53 = vsub.f32 %v10338_v46, %v1956_v10  ;;  %v3113_v4 = vpop.f32.mrf.mxu3 }
 0x6de   : >> { %v10463_v30 = vadd.f32 %v3113_v4, %v13576_v16 }
 0x6df   : >> { %v10465_v58 = vpop.eup %7780  ;;  %v1989_v12 = vmul.f32 1.442695, %v1974_v53 }
 0x6e0   : >> { %v2011_v51 = vsel %vm1690_vm13, %v10465_v58, 0.0  ;;  %v3138_v56 = vsel %vm1690_vm13, %v10463_v30, -inf }
 0x6e1   : >> { %7782 = vpow2.f32 %v1989_v12  ;;  %2012 = vadd.xlane.f32.xlu0 %v2011_v51  ;;  %3139 = vmax.xlane.f32.xlu1 %v3138_v56  ;;  %v13699_v51 = vld [vmem:[#allocation44_spill] sm:$0xff] }
 0x6e4   : >> { %v1959_v59 = vpop.xlane.xlu1 %1958 }
 0x6e5   : >> { %v1975_v41 = vsub.f32 %v10347_v34, %v1959_v59  ;;  %v3115_v46 = vpop.f32.mrf.mxu3 }
 0x6e6   : >> { %v10473_v52 = vadd.f32 %v3115_v46, %v13574_v20 }
 0x6e7   : >> { %v10475_v10 = vpop.eup %7782  ;;  %v1991_v4 = vmul.f32 1.442695, %v1975_v41 }
 0x6e8   : >> { %v3141_v53 = vsel %vm1690_vm13, %v10473_v52, -inf  ;;  %v2014_v15 = vsel %vm1690_vm13, %v10475_v10, 0.0 }
 0x6e9   : >> { %7784 = vpow2.f32 %v1991_v4  ;;  %3142 = vmax.xlane.f32.xlu0 %v3141_v53  ;;  %2015 = vadd.xlane.f32.xlu2 %v2014_v15 }
 0x6ea   : >> { %7019 = vmatmul.msk.bf16.gmra.mxu3 %vm1625_vm12, %v13699_v51 }
 0x6ec   : >> { %v1962_v34 = vpop.xlane.xlu2 %1961 }
 0x6ed   : >> { %v1976_v12 = vsub.f32 %v10357_v36, %v1962_v34  ;;  %v3118_v56 = vpop.f32.mrf.mxu3 }
 0x6ee   : >> { %v10485_v59 = vadd.f32 %v3118_v56, %v13573_v21 }
 0x6ef   : >> { %v10487_v41 = vpop.eup %7784  ;;  %v1993_v46 = vmul.f32 1.442695, %v1976_v12 }
 0x6f0   : >> { %v2017_v31 = vsel %vm1690_vm13, %v10487_v41, 0.0  ;;  %v3144_v4 = vsel %vm1690_vm13, %v10485_v59, -inf }
 0x6f1   : >> { %7786 = vpow2.f32 %v1993_v46  ;;  %2018 = vadd.xlane.f32.xlu2 %v2017_v31  ;;  %3145 = vmax.xlane.f32.xlu1 %v3144_v4 }
 0x6f4   : >> { %v1965_v15 = vpop.xlane.xlu0 %1964 }
 0x6f5   : >> { %v1977_v53 = vsub.f32 %v10366_v48, %v1965_v15  ;;  %v3120_v36 = vpop.f32.mrf.mxu3 }
 0x6f6   : >> { %v10495_v51 = vadd.f32 %v3120_v36, %v13572_v23 }
 0x6f7   : >> { %v10497_v34 = vpop.eup %7786  ;;  %v1995_v56 = vmul.f32 1.442695, %v1977_v53 }
 0x6f8   : >> { %v3147_v12 = vsel %vm1690_vm13, %v10495_v51, -inf  ;;  %v2020_v17 = vsel %vm1690_vm13, %v10497_v34, 0.0 }
 0x6f9   : >> { %7788 = vpow2.f32 %v1995_v56  ;;  %3148 = vmax.xlane.f32.xlu0 %v3147_v12  ;;  %2021 = vadd.xlane.f32.xlu2 %v2020_v17 }
 0x6fc   : >> { %v1968_v31 = vpop.xlane.xlu2 %1967 }
 0x6fd   : >> { %v1978_v46 = vsub.f32 %v10371_v37, %v1968_v31  ;;  %v3123_v48 = vpop.f32.mrf.mxu3 }
 0x6fe   : >> { %v10505_v4 = vadd.f32 %v3123_v48, %v13571_v24 }
 0x6ff   : >> { %v10507_v15 = vpop.eup %7788  ;;  %v1997_v36 = vmul.f32 1.442695, %v1978_v46 }
 0x700   : >> { %13700 = vst [vmem:[#allocation49_spill] sm:$0xff] %v10505_v4  ;;  %v2023_v53 = vsel %vm1690_vm13, %v10507_v15, 0.0  ;;  %v3150_v32 = vsel %vm1690_vm13, %v10505_v4, -inf }
 0x701   : >> { %7790 = vpow2.f32 %v1997_v36  ;;  %2024 = vadd.xlane.f32.xlu0 %v2023_v53  ;;  %3151 = vmax.xlane.f32.xlu2 %v3150_v32 }
 0x704   : >> { %v2472_v17 = vpop.xlane.xlu1 %2471 }
 0x705   : >> { %v3125_v56 = vpop.f32.mrf.mxu3  ;;  %v2500_v37 = vsub.f32 %v10378_v35, %v2472_v17 }
 0x706   : >> { %v10519_v48 = vadd.f32 %v3125_v56, %v13570_v25 }
 0x707   : >> { %v10513_v12 = vpop.eup %7790  ;;  %v2510_v46 = vmul.f32 1.442695, %v2500_v37 }
 0x708   : >> { %v2026_v31 = vsel %vm1690_vm13, %v10513_v12, 0.0  ;;  %v3153_v17 = vsel %vm1690_vm13, %v10519_v48, -inf }
 0x709   : >> { %2027 = vadd.xlane.f32.xlu1 %v2026_v31  ;;  %7792 = vpow2.f32 %v2510_v46 }
 0x70c   : >> { %v2475_v14 = vpop.xlane.xlu1 %2474 }
 0x70d   : >> { %v2501_v47 = vsub.f32 %v10386_v8, %v2475_v14  ;;  %v3128_v36 = vpop.f32.mrf.mxu3 }
 0x70e   : >> { %v10523_v32 = vadd.f32 %v3128_v36, %v13660_v49 }
 0x70f   : >> { %v2512_v53 = vmul.f32 1.442695, %v2501_v47  ;;  %v10529_v37 = vpop.eup %7792 }
 0x710   : >> { %v3156_v35 = vsel %vm1690_vm13, %v10523_v32, -inf  ;;  %v2530_v46 = vsel %vm1690_vm13, %v10529_v37, 0.0 }
 0x711   : >> { %7794 = vpow2.f32 %v2512_v53  ;;  %3157 = vmax.xlane.f32.xlu2 %v3156_v35  ;;  %3154 = vmax.xlane.f32.xlu1 %v3153_v17 }
 0x714   : >> { %v2478_v56 = vpop.xlane.xlu2 %2477 }
 0x715   : >> { %v2502_v14 = vsub.f32 %v10393_v19, %v2478_v56  ;;  %v3130_v8 = vpop.f32.mrf.mxu3 }
 0x716   : >> { %v10539_v53 = vadd.f32 %v3130_v8, %v13569_v27 }
 0x717   : >> { %v10532_v31 = vpop.eup %7794  ;;  %v2514_v36 = vmul.f32 1.442695, %v2502_v14 }
 0x718   : >> { %v2533_v47 = vsel %vm1690_vm13, %v10532_v31, 0.0  ;;  %13701 = vst [vmem:[#allocation51_spill] sm:$0xff] %v10539_v53  ;;  %v3159_v14 = vsel %vm1690_vm13, %v10539_v53, -inf }
 0x719   : >> { %7796 = vpow2.f32 %v2514_v36  ;;  %2534 = vadd.xlane.f32.xlu0 %v2533_v47  ;;  %2531 = vadd.xlane.f32.xlu1 %v2530_v46 }
 0x71c   : >> { %v2481_v35 = vpop.xlane.xlu1 %2480 }
 0x71d   : >> { %v2503_v17 = vsub.f32 %v10398_v50, %v2481_v35  ;;  %v3133_v19 = vpop.f32.mrf.mxu3 }
 0x71e   : >> { %v10549_v36 = vadd.f32 %v3133_v19, %v13577_v28 }
 0x71f   : >> { %v10542_v56 = vpop.eup %7796  ;;  %v2516_v6 = vmul.f32 1.442695, %v2503_v17 }
 0x720   : >> { %v2536_v60 = vsel %vm1690_vm13, %v10542_v56, 0.0  ;;  %13702 = vst [vmem:[#allocation39_spill] sm:$0xff] %v10549_v36  ;;  %v3162_v53 = vsel %vm1690_vm13, %v10549_v36, -inf }
 0x721   : >> { %7798 = vpow2.f32 %v2516_v6  ;;  %3160 = vmax.xlane.f32.xlu1 %v3159_v14  ;;  %2537 = vadd.xlane.f32.xlu2 %v2536_v60 }
 0x724   : >> { %v2484_v8 = vpop.xlane.xlu2 %2483 }
 0x725   : >> { %v2504_v47 = vsub.f32 %v10405_v0, %v2484_v8  ;;  %v3135_v50 = vpop.f32.mrf.mxu3 }
 0x726   : >> { %v10559_v6 = vadd.f32 %v3135_v50, %v13575_v29 }
 0x727   : >> { %v10552_v46 = vpop.eup %7798  ;;  %v2518_v35 = vmul.f32 1.442695, %v2504_v47 }
 0x728   : >> { %v2539_v17 = vsel %vm1690_vm13, %v10552_v46, 0.0  ;;  %v3165_v47 = vsel %vm1690_vm13, %v10559_v6, -inf }
 0x729   : >> { %7800 = vpow2.f32 %v2518_v35  ;;  %2540 = vadd.xlane.f32.xlu0 %v2539_v17  ;;  %3163 = vmax.xlane.f32.xlu1 %v3162_v53 }
 0x72c   : >> { %v2487_v60 = vpop.xlane.xlu0 %2486 }
 0x72d   : >> { %v2505_v19 = vsub.f32 %v10411_v44, %v2487_v60  ;;  %v3644_v8 = vpop.f32.mrf.mxu3 }
 0x72e   : >> { %v10569_v53 = vadd.f32 %v3644_v8, %v13576_v16 }
 0x72f   : >> { %v10562_v0 = vpop.eup %7800  ;;  %v2520_v14 = vmul.f32 1.442695, %v2505_v19 }
 0x730   : >> { %v2542_v28 = vsel %vm1690_vm13, %v10562_v0, 0.0  ;;  %13703 = vst [vmem:[#allocation42_spill] sm:$0xff] %v10569_v53  ;;  %v3669_v17 = vsel %vm1690_vm13, %v10569_v53, -inf }
 0x731   : >> { %7802 = vpow2.f32 %v2520_v14  ;;  %3166 = vmax.xlane.f32.xlu0 %v3165_v47  ;;  %2543 = vadd.xlane.f32.xlu1 %v2542_v28 }
 0x734   : >> { %v2001_v50 = vpop.xlane.xlu0 %2000 }
 0x735   : >> { %v3646_v60 = vpop.f32.mrf.mxu3  ;;  %7804 = vrcp.f32 %v2001_v50 }
 0x736   : >> { %v10578_v19 = vadd.f32 %v3646_v60, %v13574_v20 }
 0x737   : >> { %v10571_v35 = vpop.eup %7802 }
 0x738   : >> { %v2545_v44 = vsel %vm1690_vm13, %v10571_v35, 0.0  ;;  %v3672_v53 = vsel %vm1690_vm13, %v10578_v19, -inf }
 0x739   : >> { %2546 = vadd.xlane.f32.xlu0 %v2545_v44  ;;  %3670 = vmax.xlane.f32.xlu1 %v3669_v17 }
 0x73b   : >> { %v7805_v4 = vpop.eup %7804 }
 0x73c   : >> { %v2004_v28 = vpop.xlane.xlu1 %2003  ;;  %v2490_v14 = vpop.xlane.xlu0 %2489  ;;  %v2039_v44 = vmul.f32 %v7805_v4, %v10418_v55  ;;  %v3437_v4 = vsub.f32 %v10157_v2, %v10270_v39 }
 0x73d   : >> { %7806 = vrcp.f32 %v2004_v28  ;;  %v2506_v8 = vsub.f32 %v10423_v7, %v2490_v14  ;;  %v2493_v47 = vpop.xlane.xlu2 %2492 }
 0x73e   : >> { %v2507_v16 = vsub.f32 %v10427_v9, %v2493_v47  ;;  %v3448_v47 = vmul.f32 1.442695, %v3437_v4 }
 0x73f   : >> { %v2522_v29 = vmul.f32 1.442695, %v2506_v8 }
 0x740   : >> { %v2524_v36 = vmul.f32 1.442695, %v2507_v16  ;;  %v3436_v16 = vsub.f32 %v10104_v42, %v10258_v11 }
 0x741   : >> { %7808 = vpow2.f32 %v2522_v29  ;;  %3673 = vmax.xlane.f32.xlu0 %v3672_v53 }
 0x742   : >> { %7810 = vpow2.f32 %v2524_v36  ;;  %v3649_v36 = vpop.f32.mrf.mxu3 }
 0x743   : >> { %v7807_v50 = vpop.eup %7806  ;;  %v10601_v42 = vadd.f32 %v3649_v36, %v13573_v21 }
 0x744   : >> { %v2040_v17 = vmul.f32 %v7807_v50, %v10429_v22  ;;  %v10586_v60 = vpop.xlane.xlu0 %2495  ;;  %v2007_v14 = vpop.xlane.xlu1 %2006  ;;  %v3446_v22 = vmul.f32 1.442695, %v3436_v16 }
 0x745   : >> { %7812 = vrcp.f32 %v2007_v14  ;;  %v2508_v4 = vsub.f32 %v10441_v26, %v10586_v60 }
 0x746   : >> { %v2049_v7 = vpack.c.bf16 %v2040_v17, %v2039_v44 }
 0x747   : >> { %v10588_v28 = vpop.eup %7808 }
 0x748   : >> { %v10592_v9 = vpop.eup %7810  ;;  %6960 = vmatmul.msk.bf16.vlgmr.msra.gmra.mxu2 %vm1690_vm13, %v2049_v7  ;;  %v2548_v29 = vsel %vm1690_vm13, %v10588_v28, 0.0 }
 0x749   : >> { %3291 = vmatpush.bf16.msra.mxu2 %v10173_v40  ;;  %2549 = vadd.xlane.f32.xlu2 %v2548_v29  ;;  %v2551_v55 = vsel %vm1690_vm13, %v10592_v9, 0.0  ;;  %v3675_v40 = vsel %vm1690_vm13, %v10601_v42, -inf }
 0x74a   : >> { %2552 = vadd.xlane.f32.xlu1 %v2551_v55  ;;  %v3651_v55 = vpop.f32.mrf.mxu3 }
 0x74b   : >> { %v7813_v53 = vpop.eup %7812 }
 0x74c   : >> { %v2010_v11 = vpop.xlane.xlu0 %2009  ;;  %v2041_v50 = vmul.f32 %v7813_v53, %v10443_v38  ;;  %v2526_v53 = vmul.f32 1.442695, %v2508_v4 }
 0x74d   : >> { %3292 = vmatpush.bf16.msra.mxu2 %v10182_v1  ;;  %7814 = vrcp.f32 %v2010_v11 }
 0x74e   : >> { %7816 = vpow2.f32 %v3446_v22 }
 0x74f   : >> { %7818 = vpow2.f32 %v3448_v47 }
 0x751   : >> { %3293 = vmatpush.bf16.msra.mxu2 %v10227_v3  ;;  %3676 = vmax.xlane.f32.xlu2 %v3675_v40 }
 0x753   : >> { %v7815_v8 = vpop.eup %7814 }
 0x754   : >> { %v2042_v44 = vmul.f32 %v7815_v8, %v10453_v63  ;;  %v10611_v17 = vpop.eup %7816  ;;  %v2013_v1 = vpop.xlane.xlu0 %2012 }
 0x755   : >> { %3294 = vmatpush.bf16.msra.mxu2 %v10242_v13  ;;  %3525 = vrot.lane.b32.xlu0 %v9760_v54, %s8401_s5  ;;  %v3466_v3 = vsel %vm1690_vm13, %v10611_v17, 0.0  ;;  %7820 = vrcp.f32 %v2013_v1  ;;  %v10620_v39 = vpop.eup %7818  ;;  %v10624_v63 = vpop.xlane.xlu1 %2498 }
 0x756   : >> { %v2050_v2 = vpack.c.bf16 %v2042_v44, %v2041_v50  ;;  %v3469_v13 = vsel %vm1690_vm13, %v10620_v39, 0.0 }
 0x758   : >> { %6961 = vmatmul.msk.bf16.gmra.mxu2 %vm1690_vm13, %v2050_v2 }
 0x759   : >> { %3295 = vmatpush.bf16.msra.mxu2 %v10245_v43  ;;  %3467 = vadd.xlane.f32.xlu2 %v3466_v3 }
 0x75b   : >> { %v7821_v54 = vpop.eup %7820 }
 0x75c   : >> { %v2016_v38 = vpop.xlane.xlu2 %2015  ;;  %v2043_v43 = vmul.f32 %v7821_v54, %v10465_v58  ;;  %v3143_v29 = vpop.xlane.xlu0 %3142 }
 0x75d   : >> { %7822 = vrcp.f32 %v2016_v38  ;;  %v3140_v22 = vpop.xlane.xlu1 %3139  ;;  %v3654_v58 = vpop.f32.mrf.mxu3 }
 0x75e   : >> { %v10649_v3 = vadd.f32 %v3654_v58, %v13571_v24  ;;  %v3168_v54 = vsub.f32 %v10463_v30, %v3140_v22 }
 0x760   : >> { %v3178_v4 = vmul.f32 1.442695, %v3168_v54 }
 0x761   : >> { %3470 = vadd.xlane.f32.xlu2 %v3469_v13 }
 0x763   : >> { %v7823_v7 = vpop.eup %7822  ;;  %3527 = vrot.lane.b32.xlu1 %v9754_v62, %s8401_s5 }
 0x764   : >> { %v2019_v16 = vpop.xlane.xlu2 %2018  ;;  %v2044_v14 = vmul.f32 %v7823_v7, %v10475_v10  ;;  %v3169_v7 = vsub.f32 %v10473_v52, %v3143_v29 }
 0x765   : >> { %7824 = vrcp.f32 %v2019_v16  ;;  %v10635_v47 = vpop.xlane.xlu1 %3145  ;;  %v10644_v1 = vpop.f32.mrf.mxu3 }
 0x766   : >> { %v2051_v36 = vpack.c.bf16 %v2044_v14, %v2043_v43 }
 0x768   : >> { %6962 = vmatmul.msk.bf16.gmra.mxu2 %vm1690_vm13, %v2051_v36  ;;  %v3681_v36 = vsel %vm1690_vm13, %v10649_v3, -inf }
 0x76b   : >> { %v7825_v62 = vpop.eup %7824 }
 0x76c   : >> { %v2022_v11 = vpop.xlane.xlu2 %2021  ;;  %v10633_v40 = vpop.xlane.xlu0 %3148  ;;  %v2045_v10 = vmul.f32 %v7825_v62, %v10487_v41 }
 0x76d   : >> { %7826 = vrcp.f32 %v2022_v11  ;;  %v3659_v62 = vpop.f32.mrf.mxu3 }
 0x76e   : >> { %7828 = vpow2.f32 %v2526_v53  ;;  %v10660_v53 = vadd.f32 %v3651_v55, %v13572_v23  ;;  %v10664_v30 = vadd.f32 %v3659_v62, %v13660_v49 }
 0x770   : >> { %v3678_v22 = vsel %vm1690_vm13, %v10660_v53, -inf  ;;  %v3687_v55 = vsel %vm1690_vm13, %v10664_v30, -inf }
 0x773   : >> { %v7827_v8 = vpop.eup %7826 }
 0x774   : >> { %v2046_v50 = vmul.f32 %v7827_v8, %v10497_v34  ;;  %v2025_v2 = vpop.xlane.xlu0 %2024  ;;  %v10642_v26 = vpop.eup %7828  ;;  %v3180_v8 = vmul.f32 1.442695, %v3169_v7 }
 0x775   : >> { %7830 = vrcp.f32 %v2025_v2  ;;  %v2554_v41 = vsel %vm1690_vm13, %v10642_v26, 0.0  ;;  %v10651_v38 = vpop.xlane.xlu2 %3151 }
 0x776   : >> { %v2052_v44 = vpack.c.bf16 %v2046_v50, %v2045_v10  ;;  %v2509_v10 = vsub.f32 %v10451_v57, %v10624_v63 }
 0x778   : >> { %6963 = vmatmul.msk.bf16.gmra.mxu2 %vm1690_vm13, %v2052_v44 }
 0x779   : >> { %3786 = vrot.lane.b32.xlu2 %v9767_v45, %s8402_s15 }
 0x77b   : >> { %v7831_v34 = vpop.eup %7830 }
 0x77c   : >> { %v2028_v60 = vpop.xlane.xlu1 %2027  ;;  %v2047_v43 = vmul.f32 %v7831_v34, %v10507_v15 }
 0x77d   : >> { %7832 = vrcp.f32 %v2028_v60 }
 0x77e   : >> { %7834 = vpow2.f32 %v3178_v4 }
 0x77f   : >> { %2555 = vadd.xlane.f32.xlu0 %v2554_v41  ;;  %7836 = vpow2.f32 %v3180_v8 }
 0x783   : >> { %v7833_v13 = vpop.eup %7832 }
 0x784   : >> { %v3155_v16 = vpop.xlane.xlu1 %3154  ;;  %v2048_v14 = vmul.f32 %v7833_v13, %v10513_v12  ;;  %v3158_v52 = vpop.xlane.xlu2 %3157 }
 0x785   : >> { %v3173_v15 = vsub.f32 %v10519_v48, %v3155_v16  ;;  %v3174_v58 = vsub.f32 %v10523_v32, %v3158_v52  ;;  %v10674_v48 = vpop.eup %7834  ;;  %v2528_v32 = vmul.f32 1.442695, %v2509_v10 }
 0x786   : >> { %v2053_v11 = vpack.c.bf16 %v2048_v14, %v2047_v43  ;;  %v10676_v44 = vpop.eup %7836  ;;  %v3198_v13 = vsel %vm1690_vm13, %v10674_v48, 0.0 }
 0x787   : >> { %3682 = vmax.xlane.f32.xlu0 %v3681_v36  ;;  %v3188_v49 = vmul.f32 1.442695, %v3173_v15  ;;  %v3190_v50 = vmul.f32 1.442695, %v3174_v58  ;;  %v3201_v57 = vsel %vm1690_vm13, %v10676_v44, 0.0  ;;  %v3170_v58 = vsub.f32 %v10485_v59, %v10635_v47 }
 0x788   : >> { %6964 = vmatmul.msk.bf16.gmra.mxu2 %vm1690_vm13, %v2053_v11  ;;  %v3171_v59 = vsub.f32 %v10495_v51, %v10633_v40  ;;  %v13704_v40 = vld [vmem:[#allocation49_spill] sm:$0xff] }
 0x78c   : >> { %v2535_v12 = vpop.xlane.xlu0 %2534  ;;  %v2532_v29 = vpop.xlane.xlu1 %2531 }
 0x78d   : >> { %7838 = vrcp.f32 %v2535_v12  ;;  %3679 = vmax.xlane.f32.xlu1 %v3678_v22 }
 0x78e   : >> { %7840 = vrcp.f32 %v2532_v29 }
 0x78f   : >> { %3688 = vmax.xlane.f32.xlu0 %v3687_v55  ;;  %7842 = vpow2.f32 %v3188_v49 }
 0x790   : >> { %7844 = vpow2.f32 %v3190_v50 }
 0x791   : >> { %7846 = vpow2.f32 %v2528_v32 }
 0x793   : >> { %v7839_v2 = vpop.eup %7838 }
 0x794   : >> { %v7841_v60 = vpop.eup %7840  ;;  %v2571_v41 = vmul.f32 %v7839_v2, %v10532_v31  ;;  %v10679_v34 = vpop.xlane.xlu1 %3160 }
 0x795   : >> { %v2570_v54 = vmul.f32 %v7841_v60, %v10529_v37  ;;  %3199 = vadd.xlane.f32.xlu1 %v3198_v13  ;;  %v2538_v7 = vpop.xlane.xlu2 %2537  ;;  %v10686_v16 = vpop.eup %7842  ;;  %v3184_v60 = vmul.f32 1.442695, %v3171_v59 }
 0x796   : >> { %v10690_v31 = vpop.eup %7844  ;;  %7848 = vrcp.f32 %v2538_v7  ;;  %v3213_v37 = vsel %vm1690_vm13, %v10686_v16, 0.0 }
 0x797   : >> { %v2580_v63 = vpack.c.bf16 %v2571_v41, %v2570_v54  ;;  %3202 = vadd.xlane.f32.xlu0 %v3201_v57  ;;  %v10694_v14 = vpop.eup %7846  ;;  %v3216_v11 = vsel %vm1690_vm13, %v10690_v31, 0.0  ;;  %v3172_v57 = vsub.f32 %v13704_v40, %v10651_v38 }
 0x798   : >> { %v2557_v4 = vsel %vm1690_vm13, %v10694_v14, 0.0 }
 0x799   : >> { %6980 = vmatmul.msk.bf16.vlgmr.msrb.gmra.mxu2 %vm1690_vm13, %v2580_v63 }
 0x79a   : >> { %3817 = vmatpush.bf16.msrb.mxu2 %v10319_v33 }
 0x79c   : >> { %v2541_v43 = vpop.xlane.xlu0 %2540  ;;  %v10696_v36 = vpop.xlane.xlu1 %3163 }
 0x79d   : >> { %7850 = vrcp.f32 %v2541_v43  ;;  %3214 = vadd.xlane.f32.xlu1 %v3213_v37  ;;  %v7849_v33 = vpop.eup %7848  ;;  %v13705_v37 = vld [vmem:[#allocation51_spill] sm:$0xff] }
 0x79e   : >> { %3818 = vmatpush.bf16.msrb.mxu2 %v10353_v61  ;;  %v2572_v8 = vmul.f32 %v7849_v33, %v10542_v56  ;;  %v10708_v61 = vadd.f32 %v10644_v1, %v13570_v25  ;;  %v3661_v56 = vpop.f32.mrf.mxu3 }
 0x79f   : >> { %3217 = vadd.xlane.f32.xlu0 %v3216_v11  ;;  %v10717_v49 = vadd.f32 %v3661_v56, %v13569_v27  ;;  %v3175_v11 = vsub.f32 %v13705_v37, %v10679_v34 }
 0x7a1   : >> { %v3690_v50 = vsel %vm1690_vm13, %v10717_v49, -inf }
 0x7a2   : >> { %3819 = vmatpush.bf16.msrb.mxu2 %v10363_v18  ;;  %2558 = vadd.xlane.f32.xlu2 %v2557_v4  ;;  %v3684_v18 = vsel %vm1690_vm13, %v10708_v61, -inf }
 0x7a3   : >> { %v7851_v62 = vpop.eup %7850 }
 0x7a4   : >> { %v2573_v52 = vmul.f32 %v7851_v62, %v10552_v46  ;;  %v3167_v15 = vpop.xlane.xlu0 %3166  ;;  %v2544_v55 = vpop.xlane.xlu1 %2543  ;;  %v3182_v46 = vmul.f32 1.442695, %v3170_v58  ;;  %v3192_v62 = vmul.f32 1.442695, %v3175_v11 }
 0x7a5   : >> { %v3177_v12 = vsub.f32 %v10559_v6, %v3167_v15 }
 0x7a6   : >> { %v2581_v29 = vpack.c.bf16 %v2573_v52, %v2572_v8 }
 0x7a7   : >> { %v3196_v22 = vmul.f32 1.442695, %v3177_v12 }
 0x7a9   : >> { %7852 = vpow2.f32 %v3196_v22  ;;  %6981 = vmatmul.msk.bf16.gmra.mxu2 %vm1690_vm13, %v2581_v29 }
 0x7aa   : >> { %3685 = vmax.xlane.f32.xlu2 %v3684_v18  ;;  %7854 = vrcp.f32 %v2544_v55 }
 0x7ac   : >> { %v2547_v1 = vpop.xlane.xlu0 %2546  ;;  %v3671_v13 = vpop.xlane.xlu1 %3670 }
 0x7ad   : >> { %7856 = vrcp.f32 %v2547_v1 }
 0x7ae   : >> { %7858 = vpow2.f32 %v3182_v46 }
 0x7af   : >> { %v10719_v6 = vpop.eup %7852  ;;  %7860 = vpow2.f32 %v3184_v60 }
 0x7b0   : >> { %v3225_v47 = vsel %vm1690_vm13, %v10719_v6, 0.0  ;;  %v7855_v10 = vpop.eup %7854 }
 0x7b1   : >> { %3226 = vadd.xlane.f32.xlu0 %v3225_v47  ;;  %v2574_v32 = vmul.f32 %v7855_v10, %v10562_v0  ;;  %v3186_v0 = vmul.f32 1.442695, %v3172_v57  ;;  %v3664_v57 = vpop.f32.mrf.mxu3 }
 0x7b2   : >> { %3691 = vmax.xlane.f32.xlu2 %v3690_v50 }
 0x7b3   : >> { %v7857_v2 = vpop.eup %7856 }
 0x7b4   : >> { %v2575_v41 = vmul.f32 %v7857_v2, %v10571_v35  ;;  %v10729_v54 = vpop.eup %7858 }
 0x7b5   : >> { %v3204_v63 = vsel %vm1690_vm13, %v10729_v54, 0.0  ;;  %v10738_v43 = vpop.eup %7860 }
 0x7b6   : >> { %3784 = vrot.lane.b32.xlu1 %v9771_v5, %s8402_s15  ;;  %v2582_v51 = vpack.c.bf16 %v2575_v41, %v2574_v32  ;;  %v3207_v38 = vsel %vm1690_vm13, %v10738_v43, 0.0  ;;  %v13707_v32 = vld [vmem:[#allocation42_spill] sm:$0xff]  ;;  %s13724_s15 = scalar_lea.vmem %s13474_s6, %s8509_s0 }
 0x7b7   : >> { %v3699_v41 = vsub.f32 %v13707_v32, %v3671_v13  ;;  %s11081_s24 = scalar_lea.vmem %s13724_s15, %s8392_s3  ;;  %s12047_s15 = scalar_lea.vmem %s791_s23, %s8392_s3 }
 0x7b9   : >> { %6982 = vmatmul.msk.bf16.gmra.mxu2 %vm1690_vm13, %v2582_v51  ;;  %v3666_v11 = vpop.f32.mrf.mxu3 }
 0x7ba   : >> { %3205 = vadd.xlane.f32.xlu2 %v3204_v63 }
 0x7bc   : >> { %v2550_v7 = vpop.xlane.xlu2 %2549 }
 0x7bd   : >> { %v2553_v35 = vpop.xlane.xlu1 %2552  ;;  %7862 = vrcp.f32 %v2550_v7 }
 0x7be   : >> { %7864 = vrcp.f32 %v2553_v35 }
 0x7bf   : >> { %7866 = vpow2.f32 %v3186_v0  ;;  %v13708_v0 = vld [vmem:[#allocation11_spill] sm:$0xff] }
 0x7c0   : >> { %7868 = vpow2.f32 %v3192_v62  ;;  %v10776_v7 = vadd.f32 %v3664_v57, %v13708_v0 }
 0x7c2   : >> { %3208 = vadd.xlane.f32.xlu2 %v3207_v38 }
 0x7c3   : >> { %v7863_v33 = vpop.eup %7862 }
 0x7c4   : >> { %v7865_v4 = vpop.eup %7864  ;;  %v2576_v8 = vmul.f32 %v7863_v33, %v10588_v28  ;;  %v10745_v52 = vpop.xlane.xlu2 %3676  ;;  %v13706_v28 = vld [vmem:[#allocation39_spill] sm:$0xff] }
 0x7c5   : >> { %v2577_v15 = vmul.f32 %v7865_v4, %v10592_v9  ;;  %3523 = vrot.lane.b32.xlu0 %v9767_v45, %s8401_s5  ;;  %v10750_v12 = vpop.eup %7866  ;;  %v3176_v55 = vsub.f32 %v13706_v28, %v10696_v36  ;;  %v3674_v9 = vpop.xlane.xlu0 %3673  ;;  %v13709_v4 = vld [vmem:[#allocation12_spill] sm:$0xff] }
 0x7c6   : >> { %v3210_v34 = vsel %vm1690_vm13, %v10750_v12, 0.0  ;;  %v10755_v58 = vpop.eup %7868  ;;  %v3700_v60 = vsub.f32 %v10578_v19, %v3674_v9  ;;  %v3693_v19 = vsel %vm1690_vm13, %v10776_v7, -inf  ;;  %v10791_v62 = vadd.f32 %v3666_v11, %v13709_v4 }
 0x7c7   : >> { %v2583_v29 = vpack.c.bf16 %v2577_v15, %v2576_v8  ;;  %v3219_v45 = vsel %vm1690_vm13, %v10755_v58, 0.0  ;;  %v3194_v18 = vmul.f32 1.442695, %v3176_v55  ;;  %v13710_v15 = vld [vmem:[#allocation36_spill] sm:$0xff] }
 0x7c8   : >> { %v3711_v63 = vmul.f32 1.442695, %v3700_v60  ;;  %v13713_v60 = vld [vmem:[#allocation62_spill] sm:$0xff] }
 0x7c9   : >> { %6983 = vmatmul.msk.bf16.gmra.mxu2 %vm1690_vm13, %v2583_v29  ;;  %v13711_v29 = vld [vmem:[#allocation61_spill] sm:$0xff] }
 0x7ca   : >> { %3211 = vadd.xlane.f32.xlu2 %v3210_v34  ;;  %v3438_v34 = vsub.f32 %v13711_v29, %v13710_v15  ;;  %v10835_v29 = vpop.f32.mrf.mxu1 }
 0x7cb   : >> { %v10793_v8 = vpop.f32.mrf.mxu2 }
 0x7cc   : >> { %v3468_v22 = vpop.xlane.xlu2 %3467  ;;  %v3450_v55 = vmul.f32 1.442695, %v3438_v34  ;;  %v13717_v34 = vld [vmem:[#allocation63_spill] sm:$0xff] }
 0x7cd   : >> { %7870 = vrcp.f32 %v3468_v22  ;;  %v3526_v59 = vpop.permute.xlu0 %3525  ;;  %v3696_v22 = vsel %vm1690_vm13, %v10791_v62, -inf }
 0x7d2   : >> { %3220 = vadd.xlane.f32.xlu2 %v3219_v45 }
 0x7d3   : >> { %v7871_v1 = vpop.eup %7870  ;;  %v10807_v45 = vpop.f32.mrf.mxu2 }
 0x7d4   : >> { %v3471_v56 = vpop.xlane.xlu2 %3470  ;;  %v10764_v36 = vmul.f32 %v7871_v1, %v10611_v17  ;;  %v3709_v17 = vmul.f32 1.442695, %v3699_v41  ;;  %v3701_v1 = vsub.f32 %v10601_v42, %v10745_v52  ;;  %v13714_v52 = vld [vmem:[#allocation40_spill] sm:$0xff] }
 0x7d5   : >> { %v3528_v46 = vpop.permute.xlu1 %3527  ;;  %7872 = vrcp.f32 %v3471_v56 }
 0x7d6   : >> { %7874 = vpow2.f32 %v3194_v18  ;;  %3555 = vmatpush.bf16.msra.mxu1 %v3528_v46 }
 0x7d7   : >> { %7876 = vpow2.f32 %v3711_v63 }
 0x7d8   : >> { %7878 = vpow2.f32 %v3709_v17 }
 0x7d9   : >> { %7880 = vpow2.f32 %v3450_v55 }
 0x7da   : >> { %3556 = vmatpush.bf16.msra.mxu1 %v3526_v59 }
 0x7db   : >> { %v7873_v47 = vpop.eup %7872  ;;  %v10818_v57 = vpop.f32.mrf.mxu2 }
 0x7dc   : >> { %v10761_v10 = vpop.eup %7874  ;;  %v10767_v50 = vmul.f32 %v7873_v47, %v10620_v39  ;;  %v3787_v2 = vpop.permute.xlu2 %3786 }
 0x7dd   : >> { %3820 = vmatpush.bf16.msrb.mxu2 %v3787_v2  ;;  %v3222_v40 = vsel %vm1690_vm13, %v10761_v10, 0.0  ;;  %v3401_v39 = vpop.f32.mrf.mxu0  ;;  %v10782_v13 = vpop.eup %7876  ;;  %v13712_v2 = vld [vmem:[#allocation54_spill] sm:$0xff] }
 0x7de   : >> { %v3516_v51 = vpack.c.bf16 %v10767_v50, %v10764_v36  ;;  %v10784_v35 = vpop.eup %7878  ;;  %v3732_v37 = vsel %vm1690_vm13, %v10782_v13, 0.0  ;;  %v10805_v9 = vadd.f32 %v3401_v39, %v13708_v0  ;;  %v3439_v32 = vsub.f32 %v13713_v60, %v13712_v2  ;;  %v13715_v39 = vld [vmem:[#allocation64_spill] sm:$0xff]  ;;  %v13718_v60 = vld [vmem:[#allocation45_spill] sm:$0xff] }
 0x7df   : >> { %v3729_v38 = vsel %vm1690_vm13, %v10784_v35, 0.0  ;;  %v10814_v47 = vpop.eup %7880 }
 0x7e0   : >> { %3223 = vadd.xlane.f32.xlu1 %v3222_v40  ;;  %v3430_v56 = vsel %vm1690_vm13, %v10805_v9, -inf  ;;  %v3713_v40 = vmul.f32 1.442695, %v3701_v1  ;;  %v3472_v17 = vsel %vm1690_vm13, %v10814_v47, 0.0  ;;  %v3452_v0 = vmul.f32 1.442695, %v3439_v32 }
 0x7e1   : >> { %v13719_v32 = vld [vmem:[#allocation34_spill] sm:$0xff] }
 0x7e5   : >> { %v3403_v33 = vpop.f32.mrf.mxu0 }
 0x7e8   : >> { %3694 = vmax.xlane.f32.xlu1 %v3693_v19  ;;  %v3440_v19 = vsub.f32 %v13715_v39, %v13714_v52 }
 0x7ea   : >> { %3521 = vrot.lane.b32.xlu2 %v9771_v5, %s8401_s5  ;;  %v10796_v5 = vadd.f32 %v3403_v33, %v13709_v4  ;;  %v3454_v33 = vmul.f32 1.442695, %v3440_v19  ;;  %v10831_v4 = vpop.f32.mrf.mxu2 }
 0x7ec   : >> { %v3433_v28 = vsel %vm1690_vm13, %v10796_v5, -inf }
 0x7ef   : >> { %3733 = vadd.xlane.f32.xlu0 %v3732_v37 }
 0x7f0   : >> { %3730 = vadd.xlane.f32.xlu1 %v3729_v38 }
 0x7f2   : >> { %v2556_v18 = vpop.xlane.xlu0 %2555 }
 0x7f7   : >> { %3697 = vmax.xlane.f32.xlu0 %v3696_v22 }
 0x7f8   : >> { %3434 = vmax.xlane.f32.xlu1 %v3433_v28 }
 0x7fa   : >> { %v3683_v63 = vpop.xlane.xlu0 %3682 }
 0x7fb   : >> { %v3703_v42 = vsub.f32 %v10649_v3, %v3683_v63  ;;  %v13716_v3 = vld [vmem:[#allocation55_spill] sm:$0xff] }
 0x7fc   : >> { %v3441_v22 = vsub.f32 %v13717_v34, %v13716_v3 }
 0x7fd   : >> { %v3717_v11 = vmul.f32 1.442695, %v3703_v42 }
 0x7ff   : >> { %3431 = vmax.xlane.f32.xlu0 %v3430_v56 }
 0x800   : >> { %v3680_v46 = vpop.xlane.xlu1 %3679 }
 0x801   : >> { %v3702_v59 = vsub.f32 %v10660_v53, %v3680_v46  ;;  %v3456_v46 = vmul.f32 1.442695, %v3441_v22 }
 0x802   : >> { %v3689_v55 = vpop.xlane.xlu0 %3688 }
 0x803   : >> { %v3715_v41 = vmul.f32 1.442695, %v3702_v59 }
 0x805   : >> { %7882 = vpow2.f32 %v3715_v41  ;;  %v3442_v41 = vsub.f32 %v13719_v32, %v13718_v60 }
 0x806   : >> { %7884 = vpow2.f32 %v3713_v40 }
 0x807   : >> { %3473 = vadd.xlane.f32.xlu0 %v3472_v17  ;;  %7886 = vpow2.f32 %v3452_v0  ;;  %v10849_v17 = vpop.f32.mrf.mxu2  ;;  %v10853_v0 = vpop.f32.mrf.mxu1  ;;  %v3458_v52 = vmul.f32 1.442695, %v3442_v41 }
 0x808   : >> { %7888 = vpow2.f32 %v3717_v11  ;;  %v3200_v59 = vpop.xlane.xlu1 %3199 }
 0x809   : >> { %7890 = vpow2.f32 %v3454_v33 }
 0x80a   : >> { %7892 = vrcp.f32 %v2556_v18 }
 0x80b   : >> { %v10823_v53 = vpop.eup %7882 }
 0x80c   : >> { %v3738_v37 = vsel %vm1690_vm13, %v10823_v53, 0.0  ;;  %v10829_v38 = vpop.eup %7884 }
 0x80d   : >> { %3739 = vadd.xlane.f32.xlu1 %v3738_v37  ;;  %v10833_v15 = vpop.eup %7886  ;;  %v3735_v28 = vsel %vm1690_vm13, %v10829_v38, 0.0  ;;  %v3203_v37 = vpop.xlane.xlu0 %3202 }
 0x80e   : >> { %v3475_v56 = vsel %vm1690_vm13, %v10833_v15, 0.0  ;;  %v10843_v2 = vpop.eup %7888 }
 0x80f   : >> { %v10847_v40 = vpop.eup %7890  ;;  %v3741_v18 = vsel %vm1690_vm13, %v10843_v2, 0.0 }
 0x810   : >> { %v7893_v63 = vpop.eup %7892  ;;  %v3478_v39 = vsel %vm1690_vm13, %v10847_v40, 0.0 }
 0x811   : >> { %v2578_v19 = vmul.f32 %v7893_v63, %v10642_v26 }
 0x813   : >> { %3736 = vadd.xlane.f32.xlu2 %v3735_v28  ;;  %v3705_v28 = vsub.f32 %v10664_v30, %v3689_v55 }
 0x815   : >> { %3476 = vadd.xlane.f32.xlu1 %v3475_v56  ;;  %v2559_v1 = vpop.xlane.xlu2 %2558  ;;  %v10863_v56 = vpop.xlane.xlu1 %3214 }
 0x816   : >> { %7894 = vrcp.f32 %v2559_v1  ;;  %v10870_v1 = vpop.f32.mrf.mxu1  ;;  %v10875_v41 = vpop.xlane.xlu0 %3217 }
 0x817   : >> { %7896 = vpow2.f32 %v3456_v46 }
 0x818   : >> { %7898 = vpow2.f32 %v3458_v52 }
 0x819   : >> { %7900 = vrcp.f32 %v3203_v37 }
 0x81b   : >> { %3742 = vadd.xlane.f32.xlu2 %v3741_v18  ;;  %v13720_v18 = vld [vmem:[#allocation37_spill] sm:$0xff] }
 0x81c   : >> { %v7895_v42 = vpop.eup %7894 }
 0x81d   : >> { %v2579_v11 = vmul.f32 %v7895_v42, %v10694_v14  ;;  %3479 = vadd.xlane.f32.xlu1 %v3478_v39  ;;  %v3686_v33 = vpop.xlane.xlu2 %3685  ;;  %v10860_v34 = vpop.eup %7896  ;;  %v13721_v42 = vld [vmem:[#allocation58_spill] sm:$0xff] }
 0x81e   : >> { %v3704_v3 = vsub.f32 %v10708_v61, %v3686_v33  ;;  %v3481_v26 = vsel %vm1690_vm13, %v10860_v34, 0.0  ;;  %v10868_v14 = vpop.f32.mrf.mxu2  ;;  %v3721_v61 = vmul.f32 1.442695, %v3705_v28  ;;  %v10872_v32 = vpop.eup %7898  ;;  %v3443_v52 = vsub.f32 %v13721_v42, %v13720_v18 }
 0x81f   : >> { %v2584_v22 = vpack.c.bf16 %v2579_v11, %v2578_v19  ;;  %v7901_v55 = vpop.eup %7900 }
 0x820   : >> { %v3719_v46 = vmul.f32 1.442695, %v3704_v3  ;;  %v3239_v11 = vmul.f32 %v7901_v55, %v10676_v44  ;;  %v3460_v33 = vmul.f32 1.442695, %v3443_v52 }
 0x821   : >> { %6984 = vmatmul.msk.bf16.gmra.mxu2 %vm1690_vm13, %v2584_v22 }
 0x822   : >> { %7902 = vpow2.f32 %v3719_v46 }
 0x823   : >> { %3482 = vadd.xlane.f32.xlu2 %v3481_v26  ;;  %7904 = vrcp.f32 %v3200_v59  ;;  %v10891_v26 = vpop.f32.mrf.mxu1 }
 0x824   : >> { %7906 = vpow2.f32 %v3721_v61 }
 0x825   : >> { %v3692_v60 = vpop.xlane.xlu2 %3691 }
 0x826   : >> { %v3706_v30 = vsub.f32 %v10717_v49, %v3692_v60  ;;  %v3484_v49 = vsel %vm1690_vm13, %v10872_v32, 0.0  ;;  %v10889_v46 = vpop.f32.mrf.mxu2  ;;  %v3227_v60 = vpop.xlane.xlu0 %3226 }
 0x828   : >> { %v10877_v63 = vpop.eup %7902  ;;  %v3723_v39 = vmul.f32 1.442695, %v3706_v30  ;;  %v3785_v19 = vpop.permute.xlu1 %3784 }
 0x829   : >> { %3821 = vmatpush.bf16.msrb.mxu2 %v3785_v19  ;;  %v3744_v59 = vsel %vm1690_vm13, %v10877_v63, 0.0  ;;  %v7905_v37 = vpop.eup %7904 }
 0x82a   : >> { %7908 = vpow2.f32 %v3723_v39  ;;  %3745 = vadd.xlane.f32.xlu0 %v3744_v59  ;;  %v3238_v3 = vmul.f32 %v7905_v37, %v10674_v48  ;;  %v10887_v28 = vpop.eup %7906 }
 0x82b   : >> { %3485 = vadd.xlane.f32.xlu2 %v3484_v49  ;;  %7910 = vpow2.f32 %v3460_v33  ;;  %v3747_v44 = vsel %vm1690_vm13, %v10887_v28, 0.0  ;;  %v10904_v39 = vpop.f32.mrf.mxu1 }
 0x82c   : >> { %v3248_v61 = vpack.c.bf16 %v3239_v11, %v3238_v3 }
 0x82d   : >> { %v3206_v22 = vpop.xlane.xlu2 %3205 }
 0x82e   : >> { %7912 = vrcp.f32 %v3206_v22  ;;  %v10902_v52 = vpop.f32.mrf.mxu2 }
 0x830   : >> { %v10893_v30 = vpop.eup %7908 }
 0x831   : >> { %7000 = vmatmul.msk.bf16.vlgmr.msra.gmra.mxu2 %vm1690_vm13, %v3248_v61  ;;  %v3750_v48 = vsel %vm1690_vm13, %v10893_v30, 0.0  ;;  %v10900_v18 = vpop.eup %7910 }
 0x832   : >> { %3748 = vadd.xlane.f32.xlu0 %v3747_v44  ;;  %3751 = vadd.xlane.f32.xlu1 %v3750_v48  ;;  %v3487_v19 = vsel %vm1690_vm13, %v10900_v18, 0.0 }
 0x833   : >> { %v10913_v61 = vpop.f32.mrf.mxu1 }
 0x834   : >> { %v7913_v59 = vpop.eup %7912 }
 0x835   : >> { %v3209_v55 = vpop.xlane.xlu2 %3208  ;;  %v3240_v49 = vmul.f32 %v7913_v59, %v10729_v54 }
 0x836   : >> { %7914 = vrcp.f32 %v3209_v55  ;;  %v10911_v22 = vpop.f32.mrf.mxu2 }
 0x837   : >> { %v3524_v42 = vpop.permute.xlu0 %3523 }
 0x838   : >> { %3557 = vmatpush.bf16.msra.mxu1 %v3524_v42 }
 0x83a   : >> { %3488 = vadd.xlane.f32.xlu0 %v3487_v19 }
 0x83b   : >> { %v10916_v42 = vpop.f32.mrf.mxu1 }
 0x83c   : >> { %v7915_v37 = vpop.eup %7914 }
 0x83d   : >> { %v3241_v11 = vmul.f32 %v7915_v37, %v10738_v43  ;;  %v3212_v33 = vpop.xlane.xlu2 %3211 }
 0x83e   : >> { %7916 = vrcp.f32 %v3212_v33  ;;  %v10919_v19 = vpop.f32.mrf.mxu2 }
 0x83f   : >> { %v3249_v3 = vpack.c.bf16 %v3241_v11, %v3240_v49  ;;  %7918 = vrcp.f32 %v10863_v56 }
 0x841   : >> { %7001 = vmatmul.msk.bf16.gmra.mxu2 %vm1690_vm13, %v3249_v3 }
 0x843   : >> { %v10928_v49 = vpop.f32.mrf.mxu1 }
 0x844   : >> { %v7917_v48 = vpop.eup %7916 }
 0x845   : >> { %v3221_v44 = vpop.xlane.xlu2 %3220  ;;  %v7919_v55 = vpop.eup %7918  ;;  %v3242_v54 = vmul.f32 %v7917_v48, %v10750_v12 }
 0x846   : >> { %v3243_v43 = vmul.f32 %v7919_v55, %v10686_v16  ;;  %7920 = vrcp.f32 %v3221_v44  ;;  %v10930_v12 = vpop.f32.mrf.mxu2 }
 0x847   : >> { %7922 = vrcp.f32 %v10875_v41 }
 0x848   : >> { %v3250_v37 = vpack.c.bf16 %v3243_v43, %v3242_v54 }
 0x84b   : >> { %v10935_v50 = vpop.f32.mrf.mxu1 }
 0x84c   : >> { %v7921_v11 = vpop.eup %7920 }
 0x84d   : >> { %v3522_v59 = vpop.permute.xlu2 %3521  ;;  %v7923_v16 = vpop.eup %7922  ;;  %v3245_v33 = vmul.f32 %v7921_v11, %v10755_v58 }
 0x84e   : >> { %3558 = vmatpush.bf16.msra.mxu1 %v3522_v59  ;;  %v3244_v55 = vmul.f32 %v7923_v16, %v10690_v31  ;;  %v10937_v44 = vpop.f32.mrf.mxu2 }
 0x851   : >> { %7002 = vmatmul.msk.bf16.gmra.mxu2 %vm1690_vm13, %v3250_v37  ;;  %7010 = vmatmul.msk.bf16.vlgmr.msra.gmra.mxu1 %vm1690_vm13, %v3516_v51  ;;  %v3251_v51 = vpack.c.bf16 %v3245_v33, %v3244_v55 }
 0x853   : >> { %v3224_v56 = vpop.xlane.xlu1 %3223  ;;  %v10944_v31 = vpop.f32.mrf.mxu1 }
 0x856   : >> { %v10946_v37 = vpop.f32.mrf.mxu2 }
 0x85b   : >> { %v3695_v3 = vpop.xlane.xlu1 %3694 }
 0x85c   : >> { %v3707_v48 = vsub.f32 %v10776_v7, %v3695_v3 }
 0x85e   : >> { %v3725_v36 = vmul.f32 1.442695, %v3707_v48 }
 0x860   : >> { %7924 = vpow2.f32 %v3725_v36 }
 0x861   : >> { %7003 = vmatmul.msk.bf16.gmra.mxu2 %vm1690_vm13, %v3251_v51  ;;  %7926 = vrcp.f32 %v3224_v56  ;;  %v10953_v51 = vpop.f32.mrf.mxu1 }
 0x862   : >> { %v3734_v41 = vpop.xlane.xlu0 %3733  ;;  %7928 = vrcp.f32 %v3227_v60 }
 0x863   : >> { %v3731_v54 = vpop.xlane.xlu1 %3730 }
 0x866   : >> { %v10940_v43 = vpop.eup %7924 }
 0x867   : >> { %v3753_v58 = vsel %vm1690_vm13, %v10940_v43, 0.0  ;;  %v7927_v7 = vpop.eup %7926 }
 0x868   : >> { %3754 = vadd.xlane.f32.xlu1 %v3753_v58  ;;  %v7929_v59 = vpop.eup %7928  ;;  %v3246_v16 = vmul.f32 %v7927_v7, %v10761_v10  ;;  %v10956_v7 = vpop.f32.mrf.mxu2 }
 0x869   : >> { %v3247_v3 = vmul.f32 %v7929_v59, %v10719_v6 }
 0x86a   : >> { %v3698_v11 = vpop.xlane.xlu0 %3697 }
 0x86b   : >> { %v3435_v33 = vpop.xlane.xlu1 %3434  ;;  %v3708_v56 = vsub.f32 %v10791_v62, %v3698_v11  ;;  %v3252_v36 = vpack.c.bf16 %v3247_v3, %v3246_v16 }
 0x86c   : >> { %v3445_v60 = vsub.f32 %v10796_v5, %v3435_v33  ;;  %v10968_v33 = vpop.f32.mrf.mxu1 }
 0x86d   : >> { %v3727_v48 = vmul.f32 1.442695, %v3708_v56 }
 0x86e   : >> { %v3464_v55 = vmul.f32 1.442695, %v3445_v60 }
 0x86f   : >> { %7930 = vpow2.f32 %v3727_v48 }
 0x870   : >> { %7932 = vpow2.f32 %v3464_v55  ;;  %v10972_v60 = vpop.f32.mrf.mxu2 }
 0x871   : >> { %7934 = vrcp.f32 %v3734_v41  ;;  %7004 = vmatmul.msk.bf16.gmra.mxu2 %vm1690_vm13, %v3252_v36 }
 0x872   : >> { %7936 = vrcp.f32 %v3731_v54  ;;  %v3432_v58 = vpop.xlane.xlu0 %3431 }
 0x873   : >> { %v3444_v10 = vsub.f32 %v10805_v9, %v3432_v58 }
 0x874   : >> { %v10977_v58 = vpop.f32.mrf.mxu1 }
 0x875   : >> { %v10958_v62 = vpop.eup %7930  ;;  %v3462_v5 = vmul.f32 1.442695, %v3444_v10 }
 0x876   : >> { %v10960_v6 = vpop.eup %7932  ;;  %v3756_v59 = vsel %vm1690_vm13, %v10958_v62, 0.0 }
 0x877   : >> { %v7935_v11 = vpop.eup %7934  ;;  %7938 = vpow2.f32 %v3462_v5  ;;  %3757 = vadd.xlane.f32.xlu2 %v3756_v59  ;;  %v3493_v41 = vsel %vm1690_vm13, %v10960_v6, 0.0 }
 0x878   : >> { %v7937_v54 = vpop.eup %7936  ;;  %3494 = vadd.xlane.f32.xlu1 %v3493_v41  ;;  %v3770_v16 = vmul.f32 %v7935_v11, %v10782_v13  ;;  %v7454_v41 = vpack.i.bf16 %v10807_v45, %v10793_v8  ;;  %v7459_v8 = vpack.i.bf16 %v10853_v0, %v10835_v29  ;;  %v7489_v29 = vpack.i.bf16 %v10913_v61, %v10904_v39 }
 0x879   : >> { %v3769_v9 = vmul.f32 %v7937_v54, %v10784_v35  ;;  %v10979_v35 = vpop.f32.mrf.mxu2 }
 0x87a   : >> { %v3474_v36 = vpop.xlane.xlu0 %3473 }
 0x87b   : >> { %v3779_v48 = vpack.c.bf16 %v3770_v16, %v3769_v9 }
 0x87c   : >> { %v10983_v54 = vpop.f32.mrf.mxu1 }
 0x87d   : >> { %v10970_v56 = vpop.eup %7938 }
 0x87e   : >> { %v3490_v3 = vsel %vm1690_vm13, %v10970_v56, 0.0 }
 0x87f   : >> { %3491 = vadd.xlane.f32.xlu0 %v3490_v3 }
 0x880   : >> { %v3740_v55 = vpop.xlane.xlu1 %3739 }
 0x881   : >> { %7020 = vmatmul.msk.bf16.vlgmr.msrb.gmra.mxu2 %vm1690_vm13, %v3779_v48  ;;  %7940 = vrcp.f32 %v3740_v55  ;;  %v7464_v55 = vpack.i.bf16 %v10937_v44, %v10930_v12  ;;  %v10995_v45 = vpop.f32.mrf.mxu2  ;;  %v7469_v12 = vpack.i.bf16 %v10831_v4, %v10818_v57  ;;  %v7504_v57 = vpack.i.bf16 %v10928_v49, %v10916_v42 }
 0x882   : >> { %7942 = vrcp.f32 %v3474_v36 }
 0x884   : >> { %v11005_v0 = vpop.f32.mrf.mxu1 }
 0x886   : >> { %v3737_v13 = vpop.xlane.xlu2 %3736 }
 0x887   : >> { %7944 = vrcp.f32 %v3737_v13  ;;  %v7941_v5 = vpop.eup %7940 }
 0x888   : >> { %v3477_v10 = vpop.xlane.xlu1 %3476  ;;  %v7943_v59 = vpop.eup %7942  ;;  %v3772_v9 = vmul.f32 %v7941_v5, %v10823_v53 }
 0x889   : >> { %7946 = vrcp.f32 %v3477_v10  ;;  %v3508_v36 = vmul.f32 %v7943_v59, %v10814_v47  ;;  %v7474_v47 = vpack.i.bf16 %v10891_v26, %v10870_v1  ;;  %v2641_v5 = vpop.f32.mrf.mxu2  ;;  %v7484_v26 = vpack.i.bf16 %v10868_v14, %v10849_v17 }
 0x88d   : >> { %v7945_v11 = vpop.eup %7944 }
 0x88e   : >> { %v3771_v16 = vmul.f32 %v7945_v11, %v10829_v38  ;;  %v3743_v3 = vpop.xlane.xlu2 %3742  ;;  %v7479_v11 = vpack.i.bf16 %v10956_v7, %v10946_v37  ;;  %v7519_v37 = vpack.i.bf16 %v10944_v31, %v10935_v50 }
 0x88f   : >> { %v7947_v48 = vpop.eup %7946  ;;  %7455 = vrot.lane.b32.xlu2 %v7454_v41, %s8399_s19 }
 0x890   : >> { %v3509_v13 = vmul.f32 %v7947_v48, %v10833_v15  ;;  %v3780_v10 = vpack.c.bf16 %v3772_v9, %v3771_v16  ;;  %v3480_v53 = vpop.xlane.xlu1 %3479  ;;  %v11021_v9 = vpop.f32.mrf.mxu1 }
 0x891   : >> { %7465 = vrot.lane.b32.xlu1 %v7464_v55, %s8397_s22  ;;  %7948 = vrcp.f32 %v3480_v53 }
 0x892   : >> { %7021 = vmatmul.msk.bf16.gmra.mxu2 %vm1690_vm13, %v3780_v10  ;;  %v3517_v38 = vpack.c.bf16 %v3509_v13, %v3508_v36 }
 0x893   : >> { %7460 = vrot.lane.b32.xlu0 %v7459_v8, %s8400_s18 }
 0x894   : >> { %7011 = vmatmul.msk.bf16.gmra.mxu1 %vm1690_vm13, %v3517_v38 }
 0x896   : >> { %v3483_v15 = vpop.xlane.xlu2 %3482 }
 0x897   : >> { %7950 = vrcp.f32 %v3483_v15  ;;  %7475 = vrot.lane.b32.xlu2 %v7474_v47, %s8400_s18  ;;  %v7949_v44 = vpop.eup %7948 }
 0x898   : >> { %7952 = vrcp.f32 %v3743_v3  ;;  %v3510_v61 = vmul.f32 %v7949_v44, %v10847_v40  ;;  %v7494_v3 = vpack.i.bf16 %v10979_v35, %v10972_v60  ;;  %v7509_v60 = vpack.i.bf16 %v2641_v5, %v10995_v45 }
 0x899   : >> { %7490 = vrot.lane.b32.xlu1 %v7489_v29, %s8400_s18 }
 0x89b   : >> { %7470 = vrot.lane.b32.xlu0 %v7469_v12, %s8399_s19 }
 0x89d   : >> { %v7951_v1 = vpop.eup %7950  ;;  %v3746_v39 = vpop.xlane.xlu0 %3745 }
 0x89e   : >> { %v3511_v59 = vmul.f32 %v7951_v1, %v10860_v34  ;;  %7954 = vrcp.f32 %v3746_v39  ;;  %v7953_v41 = vpop.eup %7952  ;;  %v7499_v34 = vpack.i.bf16 %v10902_v52, %v10889_v46  ;;  %v3486_v48 = vpop.xlane.xlu2 %3485  ;;  %v7514_v46 = vpack.i.bf16 %v10919_v19, %v10911_v22 }
 0x89f   : >> { %7485 = vrot.lane.b32.xlu2 %v7484_v26, %s8399_s19  ;;  %v3773_v14 = vmul.f32 %v7953_v41, %v10843_v2  ;;  %v11036_v2 = vpop.f32.mrf.mxu1  ;;  %v7225_v41 = vld [vmem:[%s4010_s26] sm:$0xff] }
 0x8a0   : >> { %v3518_v4 = vpack.c.bf16 %v3511_v59, %v3510_v61  ;;  %v7228_v61 = vld [vmem:[%s4010_s26 + $0x18] sm:$0xff]  ;;  %v7227_v59 = vld [vmem:[%s4010_s26 + $0x10] sm:$0xff] }
 0x8a1   : >> { %7505 = vrot.lane.b32.xlu1 %v7504_v57, %s8400_s18  ;;  %4082 = vmatpush.bf16.msrb.mxu0 %v7228_v61 }
 0x8a3   : >> { %7480 = vrot.lane.b32.xlu0 %v7479_v11, %s8397_s22 }
 0x8a4   : >> { %v7955_v40 = vpop.eup %7954  ;;  %7012 = vmatmul.msk.bf16.gmra.mxu1 %vm1690_vm13, %v3518_v4  ;;  %v2644_v17 = vpop.f32.mrf.mxu2  ;;  %v7226_v4 = vld [vmem:[%s4010_s26 + $0x8] sm:$0xff]  ;;  %s13740_s26 = scalar_lea.vmem %s13475_s7, %s8509_s0 }
 0x8a5   : >> { %v3774_v42 = vmul.f32 %v7955_v40, %v10877_v63  ;;  %v3749_v49 = vpop.xlane.xlu0 %3748  ;;  %v3752_v7 = vpop.xlane.xlu1 %3751  ;;  %4083 = vmatpush.bf16.msrb.mxu0 %v7227_v59  ;;  %s11229_s5 = scalar_lea.vmem %s13740_s26, %s8392_s3  ;;  %s4667_s26 = scalar_lea.vmem %s8610_s28, %s6892_s9 }
 0x8a6   : >> { %7956 = vrcp.f32 %v3749_v49 }
 0x8a7   : >> { %7500 = vrot.lane.b32.xlu2 %v7499_v34, %s8399_s19  ;;  %v3781_v16 = vpack.c.bf16 %v3774_v42, %v3773_v14  ;;  %7958 = vrcp.f32 %v3752_v7  ;;  %v11046_v10 = vpop.f32.mrf.mxu1 }
 0x8a8   : >> { %7960 = vrcp.f32 %v3486_v48 }
 0x8a9   : >> { %7520 = vrot.lane.b32.xlu1 %v7519_v37, %s8400_s18  ;;  %7022 = vmatmul.msk.bf16.gmra.mxu2 %vm1690_vm13, %v3781_v16 }
 0x8aa   : >> { %4084 = vmatpush.bf16.msrb.mxu0 %v7226_v4 }
 0x8ab   : >> { %7495 = vrot.lane.b32.xlu0 %v7494_v3, %s8397_s22 }
 0x8ac   : >> { %v2646_v63 = vpop.f32.mrf.mxu2  ;;  %v7957_v50 = vpop.eup %7956 }
 0x8ad   : >> { %v3489_v52 = vpop.xlane.xlu0 %3488  ;;  %v7959_v31 = vpop.eup %7958  ;;  %v3775_v55 = vmul.f32 %v7957_v50, %v10887_v28  ;;  %v7524_v47 = vpack.i.bf16 %v2646_v63, %v2644_v17 }
 0x8ae   : >> { %7962 = vrcp.f32 %v3489_v52  ;;  %v7961_v35 = vpop.eup %7960  ;;  %v3776_v36 = vmul.f32 %v7959_v31, %v10893_v30  ;;  %4085 = vmatpush.bf16.msrb.mxu0 %v7225_v41 }
 0x8af   : >> { %7515 = vrot.lane.b32.xlu2 %v7514_v46, %s8399_s19  ;;  %v3512_v22 = vmul.f32 %v7961_v35, %v10872_v32  ;;  %v11053_v28 = vpop.f32.mrf.mxu1 }
 0x8b0   : >> { %v3782_v38 = vpack.c.bf16 %v3776_v36, %v3775_v55 }
 0x8b3   : >> { %7510 = vrot.lane.b32.xlu0 %v7509_v60, %s8397_s22 }
 0x8b4   : >> { %v7963_v13 = vpop.eup %7962  ;;  %v3297_v8 = vpop.f32.mrf.mxu2 }
 0x8b5   : >> { %v3513_v19 = vmul.f32 %v7963_v13, %v10900_v18 }
 0x8b7   : >> { %v3519_v53 = vpack.c.bf16 %v3513_v19, %v3512_v22  ;;  %v11056_v15 = vpop.f32.mrf.mxu1 }
 0x8b9   : >> { %7013 = vmatmul.msk.bf16.gmra.mxu1 %vm1690_vm13, %v3519_v53  ;;  %7023 = vmatmul.msk.bf16.gmra.mxu2 %vm1690_vm13, %v3782_v38  ;;  %v13723_v53 = vld [vmem:[#allocation56_spill] sm:$0xff] }
 0x8bb   : >> { %7525 = vrot.lane.b32.xlu0 %v7524_v47, %s8397_s22 }
 0x8bc   : >> { %v3299_v30 = vpop.f32.mrf.mxu2 }
 0x8bd   : >> { %v7529_v45 = vpack.i.bf16 %v3299_v30, %v3297_v8 }
 0x8bf   : >> { %7530 = vrot.lane.b32.xlu2 %v7529_v45, %s8399_s19 }
 0x8c4   : >> { %v3302_v32 = vpop.f32.mrf.mxu2 }
 0x8cc   : >> { %v3304_v18 = vpop.f32.mrf.mxu2 }
 0x8cd   : >> { %v7544_v29 = vpack.i.bf16 %v3304_v18, %v3302_v32 }
 0x8ce   : >> { %v3560_v12 = vpop.f32.mrf.mxu1 }
 0x8cf   : >> { %7545 = vrot.lane.b32.xlu2 %v7544_v29, %s8399_s19 }
 0x8d4   : >> { %v3307_v44 = vpop.f32.mrf.mxu2 }
 0x8d6   : >> { %v3562_v5 = vpop.f32.mrf.mxu1 }
 0x8d7   : >> { %v7534_v1 = vpack.i.bf16 %v3562_v5, %v3560_v12 }
 0x8d9   : >> { %7535 = vrot.lane.b32.xlu1 %v7534_v1, %s8400_s18 }
 0x8db   : >> { %v3755_v11 = vpop.xlane.xlu1 %3754 }
 0x8dc   : >> { %v3309_v26 = vpop.f32.mrf.mxu2  ;;  %7964 = vrcp.f32 %v3755_v11  ;;  %v13726_v11 = vld [vmem:[#allocation35_spill] sm:$0xff] }
 0x8dd   : >> { %v7559_v39 = vpack.i.bf16 %v3309_v26, %v3307_v44 }
 0x8df   : >> { %7560 = vrot.lane.b32.xlu2 %v7559_v39, %s8399_s19 }
 0x8e2   : >> { %v7965_v42 = vpop.eup %7964 }
 0x8e3   : >> { %v3777_v37 = vmul.f32 %v7965_v42, %v10940_v43 }
 0x8e4   : >> { %v3312_v57 = vpop.f32.mrf.mxu2 }
 0x8ea   : >> { %v3758_v40 = vpop.xlane.xlu2 %3757 }
 0x8eb   : >> { %7966 = vrcp.f32 %v3758_v40  ;;  %v3495_v14 = vpop.xlane.xlu1 %3494 }
 0x8ec   : >> { %v3314_v17 = vpop.f32.mrf.mxu2  ;;  %7968 = vrcp.f32 %v3495_v14 }
 0x8ed   : >> { %v7574_v34 = vpack.i.bf16 %v3314_v17, %v3312_v57  ;;  %v13725_v57 = vld [vmem:[#allocation47_spill] sm:$0xff] }
 0x8ef   : >> { %7575 = vrot.lane.b32.xlu2 %v7574_v34, %s8399_s19 }
 0x8f1   : >> { %v7967_v49 = vpop.eup %7966 }
 0x8f2   : >> { %v3778_v7 = vmul.f32 %v7967_v49, %v10958_v62  ;;  %v3492_v16 = vpop.xlane.xlu0 %3491  ;;  %v7969_v63 = vpop.eup %7968 }
 0x8f3   : >> { %7970 = vrcp.f32 %v3492_v16  ;;  %v3515_v52 = vmul.f32 %v7969_v63, %v10960_v6  ;;  %v7456_v43 = vpop.permute.xlu2 %7455 }
 0x8f4   : >> { %v3317_v3 = vpop.f32.mrf.mxu2  ;;  %v3783_v48 = vpack.c.bf16 %v3778_v7, %v3777_v37  ;;  %v7458_v62 = vunpack.i.h.bf16 %v7456_v43  ;;  %v7457_v55 = vunpack.i.l.bf16 %v7456_v43 }
 0x8f6   : >> { %7024 = vmatmul.msk.bf16.gmra.mxu2 %vm1690_vm13, %v3783_v48  ;;  %v2769_v38 = vsel %vm1625_vm12, %v13723_v53, %v7457_v55 }
 0x8f9   : >> { %v7971_v46 = vpop.eup %7970 }
 0x8fa   : >> { %v3514_v50 = vmul.f32 %v7971_v46, %v10970_v56  ;;  %v13722_v56 = vld [vmem:[#allocation52_spill] sm:$0xff] }
 0x8fb   : >> { %v2770_v19 = vsel %vm1625_vm12, %v13722_v56, %v7458_v62  ;;  %v7476_v59 = vpop.permute.xlu2 %7475 }
 0x8fc   : >> { %v3319_v31 = vpop.f32.mrf.mxu2  ;;  %v3520_v60 = vpack.c.bf16 %v3515_v52, %v3514_v50  ;;  %v7478_v40 = vunpack.i.h.bf16 %v7476_v59  ;;  %v7477_v17 = vunpack.i.l.bf16 %v7476_v59 }
 0x8fd   : >> { %v7589_v35 = vpack.i.bf16 %v3319_v31, %v3317_v3 }
 0x8fe   : >> { %7014 = vmatmul.msk.bf16.gmra.mxu1 %vm1690_vm13, %v3520_v60 }
 0x8ff   : >> { %7590 = vrot.lane.b32.xlu2 %v7589_v35, %s8399_s19 }
 0x903   : >> { %v7466_v36 = vpop.permute.xlu1 %7465  ;;  %v7486_v50 = vpop.permute.xlu2 %7485 }
 0x904   : >> { %v3823_v13 = vpop.f32.mrf.mxu2  ;;  %v7468_v47 = vunpack.i.h.bf16 %v7466_v36  ;;  %v7467_v30 = vunpack.i.l.bf16 %v7466_v36  ;;  %v7488_v43 = vunpack.i.h.bf16 %v7486_v50  ;;  %v7487_v62 = vunpack.i.l.bf16 %v7486_v50 }
 0x905   : >> { %v7461_v8 = vpop.permute.xlu0 %7460 }
 0x906   : >> { %v7463_v6 = vunpack.i.h.bf16 %v7461_v8  ;;  %v7462_v22 = vunpack.i.l.bf16 %v7461_v8 }
 0x908   : >> { %v2780_v45 = vsel %vm13542_vm14, %v2769_v38, %v7462_v22  ;;  %v2781_v32 = vsel %vm13542_vm14, %v2770_v19, %v7463_v6  ;;  %v13727_v22 = vld [vmem:[#allocation43_spill] sm:$0xff]  ;;  %v13728_v19 = vld [vmem:[#allocation60_spill] sm:$0xff] }
 0x909   : >> { %v2791_v18 = vsel %vm2790_vm15, %v2780_v45, %v7467_v30  ;;  %v2792_v29 = vsel %vm2790_vm15, %v2781_v32, %v7468_v47  ;;  %v2774_v56 = vsel %vm1625_vm12, %v13727_v22, %v7488_v43  ;;  %v2773_v53 = vsel %vm1625_vm12, %v13728_v19, %v7487_v62  ;;  %v13732_v22 = vld [vmem:[#allocation53_spill] sm:$0xff] }
 0x90a   : >> { %v3998_v12 = vpack.c.bf16 %v2792_v29, %v2791_v18 }
 0x90b   : >> { %v7491_v31 = vpop.permute.xlu1 %7490 }
 0x90c   : >> { %v3825_v44 = vpop.f32.mrf.mxu2  ;;  %7043 = vmatmul.msk.bf16.vlgmr.msrb.gmra.mxu0 %vm889_vm10, %v3998_v12  ;;  %v7493_v36 = vunpack.i.h.bf16 %v7491_v31 }
 0x90d   : >> { %v7539_v5 = vpack.i.bf16 %v3825_v44, %v3823_v13  ;;  %v7471_v1 = vpop.permute.xlu0 %7470  ;;  %v7492_v13 = vunpack.i.l.bf16 %v7491_v31  ;;  %v7501_v44 = vpop.permute.xlu2 %7500 }
 0x90e   : >> { %v7473_v26 = vunpack.i.h.bf16 %v7471_v1  ;;  %v7472_v39 = vunpack.i.l.bf16 %v7471_v1  ;;  %v2785_v47 = vsel %vm13542_vm14, %v2774_v56, %v7493_v36 }
 0x90f   : >> { %7540 = vrot.lane.b32.xlu0 %v7539_v5, %s8397_s22  ;;  %v2784_v38 = vsel %vm13542_vm14, %v2773_v53, %v7492_v13 }
 0x910   : >> { %v2772_v4 = vsel %vm1625_vm12, %v13725_v57, %v7473_v26  ;;  %v2771_v41 = vsel %vm1625_vm12, %v13726_v11, %v7472_v39  ;;  %v7503_v26 = vunpack.i.h.bf16 %v7501_v44  ;;  %v7502_v39 = vunpack.i.l.bf16 %v7501_v44 }
 0x911   : >> { %v3565_v61 = vpop.f32.mrf.mxu1  ;;  %v2782_v37 = vsel %vm13542_vm14, %v2771_v41, %v7477_v17  ;;  %v2783_v7 = vsel %vm13542_vm14, %v2772_v4, %v7478_v40  ;;  %v13729_v41 = vld [vmem:[#allocation41_spill] sm:$0xff]  ;;  %v13730_v17 = vld [vmem:[#allocation38_spill] sm:$0xff] }
 0x912   : >> { %v2776_v40 = vsel %vm1625_vm12, %v13729_v41, %v7503_v26 }
 0x913   : >> { %v7506_v5 = vpop.permute.xlu1 %7505 }
 0x914   : >> { %v7507_v59 = vunpack.i.l.bf16 %v7506_v5 }
 0x915   : >> { %v7481_v34 = vpop.permute.xlu0 %7480  ;;  %v3828_v14 = vpop.f32.mrf.mxu2 }
 0x916   : >> { %v7483_v42 = vunpack.i.h.bf16 %v7481_v34  ;;  %v7482_v49 = vunpack.i.l.bf16 %v7481_v34  ;;  %v2775_v34 = vsel %vm1625_vm12, %v13730_v17, %v7502_v39 }
 0x918   : >> { %v2793_v16 = vsel %vm2790_vm15, %v2782_v37, %v7482_v49  ;;  %v2794_v3 = vsel %vm2790_vm15, %v2783_v7, %v7483_v42  ;;  %v2786_v42 = vsel %vm13542_vm14, %v2775_v34, %v7507_v59 }
 0x919   : >> { %v3999_v48 = vpack.c.bf16 %v2794_v3, %v2793_v16  ;;  %v3567_v63 = vpop.f32.mrf.mxu1 }
 0x91a   : >> { %v7549_v46 = vpack.i.bf16 %v3567_v63, %v3565_v61  ;;  %v7508_v61 = vunpack.i.h.bf16 %v7506_v5  ;;  %v7516_v63 = vpop.permute.xlu2 %7515 }
 0x91c   : >> { %7550 = vrot.lane.b32.xlu1 %v7549_v46, %s8400_s18  ;;  %7044 = vmatmul.msk.bf16.gmra.mxu0 %vm889_vm10, %v3999_v48  ;;  %v2787_v49 = vsel %vm13542_vm14, %v2776_v40, %v7508_v61 }
 0x91d   : >> { %v3830_v52 = vpop.f32.mrf.mxu2  ;;  %v7496_v35 = vpop.permute.xlu0 %7495 }
 0x91e   : >> { %v7554_v60 = vpack.i.bf16 %v3830_v52, %v3828_v14  ;;  %v7498_v8 = vunpack.i.h.bf16 %v7496_v35  ;;  %v7497_v6 = vunpack.i.l.bf16 %v7496_v35  ;;  %v7521_v52 = vpop.permute.xlu1 %7520  ;;  %v7517_v35 = vunpack.i.l.bf16 %v7516_v63 }
 0x91f   : >> { %v7523_v43 = vunpack.i.h.bf16 %v7521_v52  ;;  %v7522_v62 = vunpack.i.l.bf16 %v7521_v52 }
 0x920   : >> { %7555 = vrot.lane.b32.xlu0 %v7554_v60, %s8397_s22  ;;  %v2795_v30 = vsel %vm2790_vm15, %v2784_v38, %v7497_v6  ;;  %v2796_v45 = vsel %vm2790_vm15, %v2785_v47, %v7498_v8  ;;  %v7518_v60 = vunpack.i.h.bf16 %v7516_v63  ;;  %v13731_v8 = vld [vmem:[#allocation50_spill] sm:$0xff]  ;;  %v2777_v56 = vsel %vm1625_vm12, %v13732_v22, %v7517_v35 }
 0x921   : >> { %v3570_v55 = vpop.f32.mrf.mxu1  ;;  %v4000_v18 = vpack.c.bf16 %v2796_v45, %v2795_v30  ;;  %v2788_v53 = vsel %vm13542_vm14, %v2777_v56, %v7522_v62 }
 0x922   : >> { %v2778_v6 = vsel %vm1625_vm12, %v13731_v8, %v7518_v60 }
 0x923   : >> { %v2789_v38 = vsel %vm13542_vm14, %v2778_v6, %v7523_v43 }
 0x925   : >> { %v7511_v1 = vpop.permute.xlu0 %7510 }
 0x926   : >> { %v7513_v57 = vunpack.i.h.bf16 %v7511_v1  ;;  %v7512_v4 = vunpack.i.l.bf16 %v7511_v1 }
 0x928   : >> { %v2797_v7 = vsel %vm2790_vm15, %v2786_v42, %v7512_v4  ;;  %v2798_v16 = vsel %vm2790_vm15, %v2787_v49, %v7513_v57 }
 0x929   : >> { %v3572_v32 = vpop.f32.mrf.mxu1  ;;  %v4001_v3 = vpack.c.bf16 %v2798_v16, %v2797_v7  ;;  %v13733_v16 = vld [vmem:[#allocation32_spill] sm:$0xff] }
 0x92a   : >> { %v7564_v29 = vpack.i.bf16 %v3572_v32, %v3570_v55 }
 0x92c   : >> { %7565 = vrot.lane.b32.xlu1 %v7564_v29, %s8400_s18  ;;  %v3833_v12 = vpop.f32.mrf.mxu2  ;;  %7045 = vmatmul.msk.bf16.gmra.mxu0 %vm889_vm10, %v4000_v18  ;;  %v7531_v18 = vpop.permute.xlu2 %7530 }
 0x92d   : >> { %v7526_v31 = vpop.permute.xlu0 %7525  ;;  %v7533_v44 = vunpack.i.h.bf16 %v7531_v18  ;;  %v7532_v5 = vunpack.i.l.bf16 %v7531_v18 }
 0x92e   : >> { %v7528_v55 = vunpack.i.h.bf16 %v7526_v31  ;;  %v7527_v36 = vunpack.i.l.bf16 %v7526_v31 }
 0x92f   : >> { %v3969_v39 = vsel %vm1625_vm12, %v10968_v33, %v7533_v44  ;;  %v3968_v57 = vsel %vm1625_vm12, %v10953_v51, %v7532_v5 }
 0x930   : >> { %v2799_v47 = vsel %vm2790_vm15, %v2788_v53, %v7527_v36  ;;  %v2800_v30 = vsel %vm2790_vm15, %v2789_v38, %v7528_v55 }
 0x931   : >> { %v4002_v45 = vpack.c.bf16 %v2800_v30, %v2799_v47 }
 0x934   : >> { %v3835_v11 = vpop.f32.mrf.mxu2 }
 0x935   : >> { %v7569_v14 = vpack.i.bf16 %v3835_v11, %v3833_v12 }
 0x936   : >> { %v3575_v37 = vpop.f32.mrf.mxu1 }
 0x937   : >> { %7570 = vrot.lane.b32.xlu0 %v7569_v14, %s8397_s22 }
 0x93c   : >> { %v3838_v48 = vpop.f32.mrf.mxu2  ;;  %7046 = vmatmul.msk.bf16.gmra.mxu0 %vm889_vm10, %v4001_v3 }
 0x93e   : >> { %v3577_v46 = vpop.f32.mrf.mxu1 }
 0x93f   : >> { %v7579_v50 = vpack.i.bf16 %v3577_v46, %v3575_v37  ;;  %v11142_v37 = vld [vmem:[%s11081_s24] ss:$0 sm:$0xff]  ;;  %s13741_s24 = scalar_lea.vmem %s13476_s8, %s8509_s0 }
 0x940   : >> { %s11237_s27 = scalar_lea.vmem %s13741_s24, %s8392_s3 }
 0x941   : >> { %7580 = vrot.lane.b32.xlu1 %v7579_v50, %s8400_s18 }
 0x944   : >> { %v3840_v13 = vpop.f32.mrf.mxu2 }
 0x945   : >> { %v7584_v19 = vpack.i.bf16 %v3840_v13, %v3838_v48  ;;  %v7546_v48 = vpop.permute.xlu2 %7545 }
 0x946   : >> { %v7548_v52 = vunpack.i.h.bf16 %v7546_v48  ;;  %v7547_v50 = vunpack.i.l.bf16 %v7546_v48 }
 0x947   : >> { %7585 = vrot.lane.b32.xlu0 %v7584_v19, %s8397_s22 }
 0x948   : >> { %v3971_v62 = vsel %vm1625_vm12, %v10983_v54, %v7548_v52  ;;  %v3970_v55 = vsel %vm1625_vm12, %v10977_v58, %v7547_v50  ;;  %v13734_v58 = vld [vmem:[#allocation29_spill] sm:$0xff]  ;;  %v13738_v52 = vld [vmem:[#allocation27_spill] sm:$0xff] }
 0x94b   : >> { %v7536_v12 = vpop.permute.xlu1 %7535 }
 0x94c   : >> { %7047 = vmatmul.msk.bf16.gmra.mxu0 %vm889_vm10, %v4002_v45  ;;  %v7538_v1 = vunpack.i.h.bf16 %v7536_v12  ;;  %v7537_v26 = vunpack.i.l.bf16 %v7536_v12 }
 0x94d   : >> { %v7561_v47 = vpop.permute.xlu2 %7560 }
 0x94e   : >> { %v3978_v40 = vsel %vm13542_vm14, %v3968_v57, %v7537_v26  ;;  %v3979_v17 = vsel %vm13542_vm14, %v3969_v39, %v7538_v1  ;;  %v7563_v18 = vunpack.i.h.bf16 %v7561_v47  ;;  %v13735_v26 = vld [vmem:[#allocation30_spill] sm:$0xff] }
 0x950   : >> { %v3973_v57 = vsel %vm1625_vm12, %v11021_v9, %v7563_v18 }
 0x979   : >> { %v3843_v32 = vpop.f32.mrf.mxu2 }
 0x97b   : >> { %v3580_v29 = vpop.f32.mrf.mxu1 }
 0x981   : >> { %v7541_v61 = vpop.permute.xlu0 %7540  ;;  %v3845_v59 = vpop.f32.mrf.mxu2 }
 0x982   : >> { %v7543_v4 = vunpack.i.h.bf16 %v7541_v61  ;;  %v7542_v11 = vunpack.i.l.bf16 %v7541_v61  ;;  %v7599_v41 = vpack.i.bf16 %v3845_v59, %v3843_v32 }
 0x983   : >> { %v3582_v34 = vpop.f32.mrf.mxu1 }
 0x984   : >> { %v3988_v14 = vsel %vm2790_vm15, %v3978_v40, %v7542_v11  ;;  %v3989_v42 = vsel %vm2790_vm15, %v3979_v17, %v7543_v4  ;;  %v7594_v49 = vpack.i.bf16 %v3582_v34, %v3580_v29  ;;  %7600 = vrot.lane.b32.xlu0 %v7599_v41, %s8397_s22  ;;  %v7562_v29 = vunpack.i.l.bf16 %v7561_v47  ;;  %v13736_v40 = vld [vmem:[#allocation31_spill] sm:$0xff]  ;;  %s11344_s22 = scalar_lea.vmem %s8605_s20, %s7215_s4  ;;  %s7238_s4 = sshll.u32 %s8392_s3, 7 }
 0x985   : >> { %v4003_v33 = vpack.c.bf16 %v3989_v42, %v3988_v14  ;;  %s864_s3 = sadd.s32 1, %s8392_s3  }
 0x986   : >> { %7595 = vrot.lane.b32.xlu1 %v7594_v49, %s8400_s18  ;;  %v3972_v4 = vsel %vm1625_vm12, %v11005_v0, %v7562_v29  ;;  %s11598_s18 = scalar_lea.vmem %s8637_s10, %s7238_s4  ;;  %p12723_p4 = scmp.ge.s32.totalorder %s864_s3, 12  }
 0x987   : >> { %7048 = vmatmul.msk.bf16.gmra.mxu0 %vm889_vm10, %v4003_v33  ;;  %s13893_s1 = scalar_lea.vmem (%p12723_p4), %s13481_s13, %s13930_s25  ;;  %s13894_s28 = scalar_lea.vmem (%p12723_p4), %s13482_s14, %s13930_s25 }
 0x988   : > { %s13911_s3 = sld [smem:[#allocation72_spill]] (%p12723_p4) }
 0x989   : >> { %v4087_v51 = vpop.f32.mrf.mxu0 }
 0x98a   : >> { %v4088_v7 = vadd.f32 %v11142_v37, %v4087_v51 }
 0x98c   : >> { %v11147_v3 = vadd.f32 %v13733_v16, %v4088_v7  ;;  %v7576_v16 = vpop.permute.xlu2 %7575 }
 0x98e   : >> { %v7551_v63 = vpop.permute.xlu1 %7550  ;;  %v4161_v46 = vsel %vm889_vm10, %v11147_v3, 0.0 }
 0x98f   : >> { %4162 = vadd.xlane.f32.xlu2 %v4161_v46  ;;  %v7553_v31 = vunpack.i.h.bf16 %v7551_v63  ;;  %v7552_v60 = vunpack.i.l.bf16 %v7551_v63  ;;  %v13737_v63 = vld [vmem:[#allocation28_spill] sm:$0xff] }
 0x991   : >> { %v4089_v35 = vpop.f32.mrf.mxu0  ;;  %v3980_v8 = vsel %vm13542_vm14, %v3970_v55, %v7552_v60  ;;  %v3981_v6 = vsel %vm13542_vm14, %v3971_v62, %v7553_v31  ;;  %v7578_v60 = vunpack.i.h.bf16 %v7576_v16 }
 0x992   : >> { %v7556_v43 = vpop.permute.xlu0 %7555  ;;  %v4090_v44 = vadd.f32 %v11142_v37, %v4089_v35  ;;  %v7577_v35 = vunpack.i.l.bf16 %v7576_v16  ;;  %v13743_v16 = vld [vmem:[#allocation25_spill] sm:$0xff] }
 0x993   : >> { %v7558_v36 = vunpack.i.h.bf16 %v7556_v43  ;;  %v7557_v13 = vunpack.i.l.bf16 %v7556_v43 }
 0x994   : >> { %v11176_v17 = vadd.f32 %v13736_v40, %v4090_v44 }
 0x995   : >> { %v3990_v22 = vsel %vm2790_vm15, %v3980_v8, %v7557_v13  ;;  %v3991_v56 = vsel %vm2790_vm15, %v3981_v6, %v7558_v36  ;;  %v3975_v13 = vsel %vm1625_vm12, %v11046_v10, %v7578_v60  ;;  %v13744_v60 = vld [vmem:[#allocation24_spill] sm:$0xff] }
 0x996   : >> { %v4004_v19 = vpack.c.bf16 %v3991_v56, %v3990_v22  ;;  %v4164_v51 = vsel %vm889_vm10, %v11176_v17, 0.0  ;;  %v3974_v22 = vsel %vm1625_vm12, %v11036_v2, %v7577_v35  ;;  %v7591_v2 = vpop.permute.xlu2 %7590 }
 0x997   : >> { %v7593_v29 = vunpack.i.h.bf16 %v7591_v2 }
 0x998   : >> { %7049 = vmatmul.msk.bf16.gmra.mxu0 %vm889_vm10, %v4004_v19 }
 0x999   : >> { %v4092_v53 = vpop.f32.mrf.mxu0 }
 0x99a   : >> { %v4093_v32 = vadd.f32 %v11142_v37, %v4092_v53 }
 0x99c   : >> { %v11169_v39 = vadd.f32 %v13735_v26, %v4093_v32 }
 0x99e   : >> { %v7566_v30 = vpop.permute.xlu1 %7565  ;;  %v4167_v9 = vsel %vm889_vm10, %v11169_v39, 0.0 }
 0x99f   : >> { %v7568_v5 = vunpack.i.h.bf16 %v7566_v30  ;;  %v7567_v1 = vunpack.i.l.bf16 %v7566_v30 }
 0x9a1   : >> { %v4094_v38 = vpop.f32.mrf.mxu0  ;;  %v3982_v34 = vsel %vm13542_vm14, %v3972_v4, %v7567_v1  ;;  %v3983_v14 = vsel %vm13542_vm14, %v3973_v57, %v7568_v5 }
 0x9a2   : >> { %v4095_v54 = vadd.f32 %v11142_v37, %v4094_v38 }
 0x9a4   : >> { %v11162_v45 = vadd.f32 %v13734_v58, %v4095_v54  ;;  %v13739_v58 = vld [vmem:[#allocation26_spill] sm:$0xff] }
 0x9a6   : >> { %v4170_v12 = vsel %vm889_vm10, %v11162_v45, 0.0 }
 0x9a7   : >> { %4171 = vadd.xlane.f32.xlu2 %v4170_v12  ;;  %v7592_v12 = vunpack.i.l.bf16 %v7591_v2 }
 0x9a9   : >> { %v7571_v61 = vpop.permute.xlu0 %7570  ;;  %v4097_v59 = vpop.f32.mrf.mxu0 }
 0x9aa   : >> { %v7573_v11 = vunpack.i.h.bf16 %v7571_v61  ;;  %v7572_v41 = vunpack.i.l.bf16 %v7571_v61  ;;  %v4098_v0 = vadd.f32 %v11142_v37, %v4097_v59  ;;  %v3977_v61 = vsel %vm1625_vm12, %v11056_v15, %v7593_v29  ;;  %v13742_v15 = vld [vmem:[#allocation33_spill] sm:$0xff] }
 0x9ab   : >> { %v3976_v59 = vsel %vm1625_vm12, %v11053_v28, %v7592_v12 }
 0x9ac   : >> { %v3992_v42 = vsel %vm2790_vm15, %v3982_v34, %v7572_v41  ;;  %v3993_v49 = vsel %vm2790_vm15, %v3983_v14, %v7573_v11  ;;  %v11190_v46 = vadd.f32 %v13737_v63, %v4098_v0 }
 0x9ad   : >> { %v4005_v33 = vpack.c.bf16 %v3993_v49, %v3992_v42 }
 0x9ae   : >> { %4168 = vadd.xlane.f32.xlu0 %v4167_v9  ;;  %v4173_v36 = vsel %vm889_vm10, %v11190_v46, 0.0 }
 0x9af   : >> { %7050 = vmatmul.msk.bf16.gmra.mxu0 %vm889_vm10, %v4005_v33 }
 0x9b0   : >> { %4165 = vadd.xlane.f32.xlu1 %v4164_v51 }
 0x9b1   : >> { %v4099_v7 = vpop.f32.mrf.mxu0 }
 0x9b2   : >> { %v4100_v48 = vadd.f32 %v11142_v37, %v4099_v7 }
 0x9b3   : >> { %v7581_v31 = vpop.permute.xlu1 %7580 }
 0x9b4   : >> { %v11193_v50 = vadd.f32 %v13738_v52, %v4100_v48  ;;  %v7583_v62 = vunpack.i.h.bf16 %v7581_v31  ;;  %v7582_v55 = vunpack.i.l.bf16 %v7581_v31 }
 0x9b6   : >> { %v4176_v43 = vsel %vm889_vm10, %v11193_v50, 0.0  ;;  %v3984_v38 = vsel %vm13542_vm14, %v3974_v22, %v7582_v55  ;;  %v3985_v54 = vsel %vm13542_vm14, %v3975_v13, %v7583_v62 }
 0x9b7   : >> { %4177 = vadd.xlane.f32.xlu0 %v4176_v43 }
 0x9b8   : >> { %4174 = vadd.xlane.f32.xlu1 %v4173_v36 }
 0x9b9   : >> { %v7586_v8 = vpop.permute.xlu0 %7585  ;;  %v4102_v6 = vpop.f32.mrf.mxu0 }
 0x9ba   : >> { %v7588_v56 = vunpack.i.h.bf16 %v7586_v8  ;;  %v7587_v19 = vunpack.i.l.bf16 %v7586_v8  ;;  %v4103_v53 = vadd.f32 %v11142_v37, %v4102_v6 }
 0x9bc   : >> { %v3994_v47 = vsel %vm2790_vm15, %v3984_v38, %v7587_v19  ;;  %v3995_v30 = vsel %vm2790_vm15, %v3985_v54, %v7588_v56  ;;  %v11209_v32 = vadd.f32 %v13739_v58, %v4103_v53 }
 0x9bd   : >> { %v4006_v10 = vpack.c.bf16 %v3995_v30, %v3994_v47 }
 0x9be   : >> { %v4179_v18 = vsel %vm889_vm10, %v11209_v32, 0.0 }
 0x9bf   : >> { %7051 = vmatmul.msk.bf16.gmra.mxu0 %vm889_vm10, %v4006_v10  ;;  %4180 = vadd.xlane.f32.xlu0 %v4179_v18 }
 0x9c1   : >> { %v4104_v40 = vpop.f32.mrf.mxu0 }
 0x9c2   : >> { %v4105_v51 = vadd.f32 %v11142_v37, %v4104_v40 }
 0x9c4   : >> { %v11248_v48 = vadd.f32 %v13743_v16, %v4105_v51 }
 0x9c6   : >> { %v4182_v31 = vsel %vm889_vm10, %v11248_v48, 0.0 }
 0x9c9   : >> { %v4107_v9 = vpop.f32.mrf.mxu0 }
 0x9ca   : >> { %v4108_v52 = vadd.f32 %v11142_v37, %v4107_v9 }
 0x9cc   : >> { %v11254_v35 = vadd.f32 %v13744_v60, %v4108_v52 }
 0x9ce   : >> { %v4185_v62 = vsel %vm889_vm10, %v11254_v35, 0.0 }
 0x9d1   : >> { %v4109_v63 = vpop.f32.mrf.mxu0 }
 0x9f6   : >> { %v7601_v44 = vpop.permute.xlu0 %7600 }
 0x9f7   : >> { %v7603_v57 = vunpack.i.h.bf16 %v7601_v44  ;;  %v7602_v4 = vunpack.i.l.bf16 %v7601_v44 }
 0x9f8   : >> { %v7596_v5 = vpop.permute.xlu1 %7595 }
 0x9f9   : >> { %v7598_v1 = vunpack.i.h.bf16 %v7596_v5  ;;  %v7597_v26 = vunpack.i.l.bf16 %v7596_v5 }
 0x9fb   : >> { %v3986_v11 = vsel %vm13542_vm14, %v3976_v59, %v7597_v26  ;;  %v3987_v41 = vsel %vm13542_vm14, %v3977_v61, %v7598_v1 }
 0x9fc   : >> { %v3996_v34 = vsel %vm2790_vm15, %v3986_v11, %v7602_v4  ;;  %v3997_v14 = vsel %vm2790_vm15, %v3987_v41, %v7603_v57  ;;  %v4110_v57 = vadd.f32 %v11142_v37, %v4109_v63 }
 0x9fd   : >> { %v4007_v42 = vpack.c.bf16 %v3997_v14, %v3996_v34 }
 0x9ff   : >> { %7052 = vmatmul.msk.bf16.gmra.mxu0 %vm889_vm10, %v4007_v42  ;;  %v13745_v42 = vld [vmem:[#allocation23_spill] sm:$0xff] }
 0xa02   : >> { %v4163_v28 = vpop.xlane.xlu2 %4162 }
 0xa03   : >> { %v4221_v49 = vmul.f32 %v4163_v28, %v13742_v15  ;;  %v11300_v28 = vadd.f32 %v13745_v42, %v4110_v57  ;;  %v7082_v42 = vld [vmem:[%s11344_s22 + $0x38] sm:$0xf0] }
 0xa04   : >> { %v4112_v43 = vpop.f32.mrf.mxu0 }
 0xa05   : >> { %v11241_v33 = vsub.f32 %v11147_v3, %v4221_v49  ;;  %v13746_v49 = vld [vmem:[#allocation21_spill] sm:$0xff]  ;;  %v4113_v63 = vadd.f32 %v11142_v37, %v4112_v43 }
 0xa07   : >> { %v4261_v0 = vmul.f32 %v11241_v33, %v11241_v33 }
 0xa09   : >> { %v4281_v7 = vsel %vm889_vm10, %v4261_v0, 0.0 }
 0xa0a   : >> { %4282 = vadd.xlane.f32.xlu2 %v4281_v7 }
 0xa0c   : >> { %v4114_v56 = vpop.f32.mrf.mxu0 }
 0xa0d   : >> { %v4115_v4 = vadd.f32 %v11142_v37, %v4114_v56 }
 0xa0f   : >> { %v11303_v9 = vadd.f32 %v13746_v49, %v4115_v4  ;;  %v7080_v4 = vld [vmem:[%s11344_s22 + $0x30] sm:$0xf] }
 0xa11   : >> { %v4194_v60 = vsel %vm889_vm10, %v11303_v9, 0.0 }
 0xa12   : >> { %4183 = vadd.xlane.f32.xlu2 %v4182_v31  ;;  %v4188_v31 = vsel %vm889_vm10, %v11300_v28, 0.0 }
 0xa15   : >> { %v4117_v29 = vpop.f32.mrf.mxu0 }
 0xa16   : >> { %v4118_v52 = vadd.f32 %v11142_v37, %v4117_v29 }
 0xa1a   : >> { %4186 = vadd.xlane.f32.xlu2 %v4185_v62  ;;  %v4172_v55 = vpop.xlane.xlu2 %4171  ;;  %v13747_v62 = vld [vmem:[#allocation19_spill] sm:$0xff] }
 0xa1b   : >> { %v4224_v36 = vmul.f32 %v4172_v55, %v13742_v15 }
 0xa1d   : >> { %v11260_v13 = vsub.f32 %v11162_v45, %v4224_v36  ;;  %v4119_v0 = vpop.f32.mrf.mxu0  ;;  %v13749_v36 = vld [vmem:[#allocation22_spill] sm:$0xff] }
 0xa1e   : >> { %v4120_v7 = vadd.f32 %v11142_v37, %v4119_v0 }
 0xa1f   : >> { %v4264_v8 = vmul.f32 %v11260_v13, %v11260_v13 }
 0xa20   : >> { %v11316_v55 = vadd.f32 %v13747_v62, %v4120_v7  ;;  %v7072_v7 = vld [vmem:[%s11344_s22 + $0x20] sm:$0xf] }
 0xa21   : >> { %v4169_v6 = vpop.xlane.xlu0 %4168  ;;  %v4290_v22 = vsel %vm889_vm10, %v4264_v8, 0.0  ;;  %v11319_v8 = vadd.f32 %v13749_v36, %v4113_v63  ;;  %v7234_v63 = vld [vmem:[%s11344_s22 + $0x24] sm:$0xf] }
 0xa22   : >> { %4291 = vadd.xlane.f32.xlu0 %v4290_v22  ;;  %v4223_v38 = vmul.f32 %v4169_v6, %v13742_v15  ;;  %13748 = vst [vmem:[#allocation48_spill] sm:$0xff] %v11316_v55  ;;  %v13750_v6 = vld [vmem:[#allocation20_spill] sm:$0xff] }
 0xa23   : >> { %v4166_v19 = vpop.xlane.xlu1 %4165  ;;  %v11322_v22 = vadd.f32 %v13750_v6, %v4118_v52 }
 0xa24   : >> { %v4222_v53 = vmul.f32 %v4166_v19, %v13742_v15  ;;  %v11273_v30 = vsub.f32 %v11169_v39, %v4223_v38  ;;  %v4200_v19 = vsel %vm889_vm10, %v11316_v55, 0.0 }
 0xa25   : >> { %13751 = vst [vmem:[#allocation57_spill] sm:$0xff] %v11322_v22  ;;  %v4197_v38 = vsel %vm889_vm10, %v11322_v22, 0.0 }
 0xa26   : >> { %v11268_v54 = vsub.f32 %v11176_v17, %v4222_v53  ;;  %v4263_v1 = vmul.f32 %v11273_v30, %v11273_v30  ;;  %v4191_v53 = vsel %vm889_vm10, %v11319_v8, 0.0 }
 0xa28   : >> { %v4262_v47 = vmul.f32 %v11268_v54, %v11268_v54  ;;  %v4287_v41 = vsel %vm889_vm10, %v4263_v1, 0.0 }
 0xa2a   : >> { %v4178_v58 = vpop.xlane.xlu0 %4177  ;;  %v4284_v10 = vsel %vm889_vm10, %v4262_v47, 0.0  ;;  %v13752_v47 = vld [vmem:[#allocation18_spill] sm:$0xff] }
 0xa2b   : >> { %v4226_v18 = vmul.f32 %v4178_v58, %v13742_v15  ;;  %4285 = vadd.xlane.f32.xlu1 %v4284_v10  ;;  %v4175_v2 = vpop.xlane.xlu1 %4174 }
 0xa2c   : >> { %v4225_v12 = vmul.f32 %v4175_v2, %v13742_v15  ;;  %v4122_v43 = vpop.f32.mrf.mxu0 }
 0xa2d   : >> { %v11279_v44 = vsub.f32 %v11193_v50, %v4226_v18  ;;  %v4123_v56 = vadd.f32 %v11142_v37, %v4122_v43 }
 0xa2e   : >> { %v11282_v5 = vsub.f32 %v11190_v46, %v4225_v12 }
 0xa2f   : >> { %v4266_v26 = vmul.f32 %v11279_v44, %v11279_v44  ;;  %v11332_v58 = vadd.f32 %v13752_v47, %v4123_v56  ;;  %v7064_v56 = vld [vmem:[%s11344_s22 + $0x10] sm:$0xf]  ;;  %v7066_v47 = vld [vmem:[%s11344_s22 + $0x18] sm:$0xf0] }
 0xa30   : >> { %v4265_v61 = vmul.f32 %v11282_v5, %v11282_v5 }
 0xa31   : >> { %v4296_v59 = vsel %vm889_vm10, %v4266_v26, 0.0  ;;  %13753 = vst [vmem:[#allocation59_spill] sm:$0xff] %v11332_v58  ;;  %v4203_v10 = vsel %vm889_vm10, %v11332_v58, 0.0 }
 0xa32   : >> { %v4181_v11 = vpop.xlane.xlu0 %4180  ;;  %4297 = vadd.xlane.f32.xlu2 %v4296_v59  ;;  %v4293_v40 = vsel %vm889_vm10, %v4265_v61, 0.0 }
 0xa33   : >> { %v4227_v34 = vmul.f32 %v4181_v11, %v13742_v15  ;;  %4288 = vadd.xlane.f32.xlu1 %v4287_v41  ;;  %4294 = vadd.xlane.f32.xlu0 %v4293_v40  ;;  %v7237_v11 = vld [vmem:[%s11344_s22 + $0x34] sm:$0xf0] }
 0xa34   : >> { %v7081_v40 = vor.u32 %v7237_v11, %v7080_v4  ;;  %v4124_v49 = vpop.f32.mrf.mxu0  ;;  %v7230_v4 = vld [vmem:[%s11344_s22 + $0x4] sm:$0xf] }
 0xa35   : >> { %v11297_v14 = vsub.f32 %v11209_v32, %v4227_v34  ;;  %v7236_v34 = vld [vmem:[%s11344_s22 + $0x34] sm:$0xf]  ;;  %v4125_v36 = vadd.f32 %v11142_v37, %v4124_v49 }
 0xa36   : >> { %v7085_v0 = vor.u32 %v7236_v34, %v7082_v42  ;;  %4748 = vmatpush.bf16.msrb.mxu1 %v7081_v40  ;;  %v7058_v40 = vld [vmem:[%s11344_s22 + $0x8] sm:$0xf0] }
 0xa37   : >> { %v4267_v51 = vmul.f32 %v11297_v14, %v11297_v14  ;;  %v7061_v34 = vor.u32 %v7230_v4, %v7058_v40 }
 0xa38   : >> { %4807 = vmatpush.bf16.msra.mxu3 %v7085_v0 }
 0xa39   : >> { %v4299_v16 = vsel %vm889_vm10, %v4267_v51, 0.0 }
 0xa3a   : >> { %4300 = vadd.xlane.f32.xlu2 %v4299_v16  ;;  %v7235_v16 = vld [vmem:[%s11344_s22 + $0x24] sm:$0xf0] }
 0xa3b   : >> { %4189 = vadd.xlane.f32.xlu1 %v4188_v31  ;;  %4195 = vadd.xlane.f32.xlu0 %v4194_v60  ;;  %v7073_v31 = vor.u32 %v7235_v16, %v7072_v7  ;;  %v7074_v60 = vld [vmem:[%s11344_s22 + $0x28] sm:$0xf0] }
 0xa3c   : >> { %v7077_v62 = vor.u32 %v7234_v63, %v7074_v60 }
 0xa3d   : >> { %4749 = vmatpush.bf16.msrb.mxu1 %v7073_v31 }
 0xa3e   : >> { %4808 = vmatpush.bf16.msra.mxu3 %v7077_v62 }
 0xa42   : >> { %4201 = vadd.xlane.f32.xlu2 %v4200_v19  ;;  %v7233_v19 = vld [vmem:[%s11344_s22 + $0x14] sm:$0xf0] }
 0xa43   : >> { %4192 = vadd.xlane.f32.xlu1 %v4191_v53  ;;  %4198 = vadd.xlane.f32.xlu0 %v4197_v38  ;;  %v7232_v53 = vld [vmem:[%s11344_s22 + $0x14] sm:$0xf]  ;;  %v7065_v38 = vor.u32 %v7233_v19, %v7064_v56 }
 0xa45   : >> { %4750 = vmatpush.bf16.msrb.mxu1 %v7065_v38 }
 0xa4a   : >> { %4204 = vadd.xlane.f32.xlu2 %v4203_v10 }
 0xa7d   : >> { %v4283_v18 = vpop.xlane.xlu2 %4282 }
 0xa7e   : >> { %v4341_v1 = vmul.f32 %v4283_v18, %v13742_v15  ;;  %v7069_v18 = vor.u32 %v7232_v53, %v7066_v47 }
 0xa80   : >> { %v11349_v59 = vadd.f32 1e-05, %v4341_v1  ;;  %4809 = vmatpush.bf16.msra.mxu3 %v7069_v18 }
 0xa82   : >> { %7972 = vrsqrt.f32 %v11349_v59  ;;  %vm4387_vm1 = vweird.f32 %v11349_v59 }
 0xa84   : >> { %4810 = vmatpush.bf16.msra.mxu3 %v7061_v34 }
 0xa85   : >> { %v4184_v2 = vpop.xlane.xlu2 %4183 }
 0xa86   : >> { %v4228_v29 = vmul.f32 %v4184_v2, %v13742_v15  ;;  %v13754_v2 = vld [vmem:[#allocation17_spill] sm:$0xff] }
 0xa88   : >> { %v11338_v12 = vsub.f32 %v11248_v48, %v4228_v29  ;;  %v11372_v10 = vpop.eup %7972  ;;  %v11375_v29 = vadd.f32 %v13754_v2, %v4125_v36 }
 0xa89   : >> { %v4382_v11 = vmul.f32 %v11372_v10, %v11349_v59  ;;  %vm4388_vm0 = vweird.f32 %v11372_v10 }
 0xa8a   : >> { %v4268_v26 = vmul.f32 %v11338_v12, %v11338_v12  ;;  %13755 = vst [vmem:[#allocation46_spill] sm:$0xff] %v11375_v29  ;;  %v4206_v0 = vsel %vm889_vm10, %v11375_v29, 0.0  ;;  %vm4389_vm2 = vmor %vm4387_vm1, %vm4388_vm0 }
 0xa8b   : >> { %v4383_v7 = vmul.f32 %v11372_v10, %v4382_v11 }
 0xa8c   : >> { %v4302_v61 = vsel %vm889_vm10, %v4268_v26, 0.0  ;;  %v4127_v26 = vpop.f32.mrf.mxu0 }
 0xa8d   : >> { %4303 = vadd.xlane.f32.xlu1 %v4302_v61  ;;  %v4187_v57 = vpop.xlane.xlu2 %4186  ;;  %v7056_v61 = vld [vmem:[%s11344_s22] sm:$0xf]  ;;  %v4128_v42 = vadd.f32 %v11142_v37, %v4127_v26  ;;  %v4384_v62 = vmul.f32 0.5, %v4383_v7 }
 0xa8e   : >> { %v4229_v41 = vmul.f32 %v4187_v57, %v13742_v15  ;;  %v7231_v57 = vld [vmem:[%s11344_s22 + $0x4] sm:$0xf0]  ;;  %s13927_s22 = scalar_lea.vmem (%p12723_p4), %s13484_s16, %s13930_s25 }
 0xa8f   : >> { %v4385_v56 = vsub.f32 1.5, %v4384_v62 }
 0xa90   : >> { %v11357_v51 = vsub.f32 %v11254_v35, %v4229_v41  ;;  %v7057_v41 = vor.u32 %v7231_v57, %v7056_v61 }
 0xa91   : >> { %v4386_v57 = vmul.f32 %v11372_v10, %v4385_v56 }
 0xa92   : >> { %v4269_v52 = vmul.f32 %v11357_v51, %v11357_v51  ;;  %4751 = vmatpush.bf16.msrb.mxu1 %v7057_v41 }
 0xa94   : >> { %v4305_v6 = vsel %vm889_vm10, %v4269_v52, 0.0  ;;  %v13756_v52 = vld [vmem:[#allocation16_spill] sm:$0xff]  ;;  %v11406_v61 = vpop.f32.mrf.mxu0 }
 0xa95   : >> { %v4292_v43 = vpop.xlane.xlu0 %4291  ;;  %4306 = vadd.xlane.f32.xlu1 %v4305_v6  ;;  %v11392_v31 = vadd.f32 %v13756_v52, %v4128_v42 }
 0xa96   : >> { %v4344_v1 = vmul.f32 %v4292_v43, %v13742_v15 }
 0xa97   : >> { %13757 = vst [vmem:[#allocation44_spill] sm:$0xff] %v11392_v31  ;;  %v4209_v36 = vsel %vm889_vm10, %v11392_v31, 0.0 }
 0xa98   : >> { %v11385_v49 = vadd.f32 1e-05, %v4344_v1 }
 0xa9a   : >> { %7974 = vrsqrt.f32 %v11385_v49  ;;  %vm4417_vm9 = vweird.f32 %v11385_v49 }
 0xa9d   : >> { %4207 = vadd.xlane.f32.xlu1 %v4206_v0  ;;  %v4390_v0 = vsel %vm4389_vm2, %v11372_v10, %v4386_v57 }
 0xa9e   : >> { %v4286_v16 = vpop.xlane.xlu1 %4285  ;;  %v4581_v10 = vmul.f32 %v4390_v0, %v11241_v33  ;;  %v11450_v0 = vld [vmem:[%s11237_s27] ss:$0 sm:$0xff] }
 0xa9f   : >> { %v4342_v63 = vmul.f32 %v4286_v16, %v13742_v15 }
 0xaa0   : >> { %v11397_v43 = vpop.eup %7974 }
 0xaa1   : >> { %v4362_v60 = vadd.f32 1e-05, %v4342_v63  ;;  %v4412_v1 = vmul.f32 %v11397_v43, %v11385_v49  ;;  %vm4418_vm7 = vweird.f32 %v11397_v43 }
 0xaa2   : >> { %vm11500_vm12 = vmor %vm4417_vm9, %vm4418_vm7 }
 0xaa3   : >> { %7976 = vrsqrt.f32 %v4362_v60  ;;  %v4413_v34 = vmul.f32 %v11397_v43, %v4412_v1  ;;  %vm4397_vm4 = vweird.f32 %v4362_v60 }
 0xaa5   : >> { %4210 = vadd.xlane.f32.xlu1 %v4209_v36  ;;  %v4298_v6 = vpop.xlane.xlu2 %4297  ;;  %v4414_v56 = vmul.f32 0.5, %v4413_v34 }
 0xaa6   : >> { %v4346_v19 = vmul.f32 %v4298_v6, %v13742_v15  ;;  %v4289_v53 = vpop.xlane.xlu1 %4288  ;;  %v4295_v38 = vpop.xlane.xlu0 %4294  ;;  %v11427_v6 = vld [vmem:[%s11229_s5] ss:$0 sm:$0xff] }
 0xaa7   : >> { %v4343_v47 = vmul.f32 %v4289_v53, %v13742_v15  ;;  %v4345_v18 = vmul.f32 %v4295_v38, %v13742_v15  ;;  %v11436_v38 = vpop.f32.mrf.mxu0 }
 0xaa8   : >> { %v11410_v11 = vadd.f32 1e-05, %v4346_v19 }
 0xaa9   : >> { %v7977_v2 = vpop.eup %7976  ;;  %v11404_v26 = vadd.f32 1e-05, %v4343_v47  ;;  %v11413_v41 = vadd.f32 1e-05, %v4345_v18 }
 0xaaa   : >> { %v4392_v4 = vmul.f32 %v7977_v2, %v4362_v60  ;;  %vm4398_vm3 = vweird.f32 %v7977_v2  ;;  %v4604_v60 = vmul.f32 %v11427_v6, %v4581_v10  ;;  %vm4437_vm0 = vweird.f32 %v11410_v11 }
 0xaab   : >> { %7978 = vrsqrt.f32 %v11404_v26  ;;  %vm4399_vm5 = vmor %vm4397_vm4, %vm4398_vm3  ;;  %vm4407_vm8 = vweird.f32 %v11404_v26  ;;  %vm4427_vm2 = vweird.f32 %v11413_v41 }
 0xaac   : >> { %v4393_v40 = vmul.f32 %v7977_v2, %v4392_v4  ;;  %7980 = vrsqrt.f32 %v11410_v11 }
 0xaad   : >> { %v11417_v42 = vpop.xlane.xlu2 %4300  ;;  %7982 = vrsqrt.f32 %v11413_v41 }
 0xaae   : >> { %v4394_v7 = vmul.f32 0.5, %v4393_v40  ;;  %v4190_v16 = vpop.xlane.xlu1 %4189  ;;  %v4196_v63 = vpop.xlane.xlu0 %4195 }
 0xaaf   : >> { %v4230_v52 = vmul.f32 %v4190_v16, %v13742_v15  ;;  %v4232_v59 = vmul.f32 %v4196_v63, %v13742_v15 }
 0xab0   : >> { %v4395_v62 = vsub.f32 1.5, %v4394_v7  ;;  %v4415_v7 = vsub.f32 1.5, %v4414_v56 }
 0xab1   : >> { %v11424_v36 = vpop.eup %7978  ;;  %v11431_v19 = vsub.f32 %v11300_v28, %v4230_v52  ;;  %v11434_v53 = vsub.f32 %v11303_v9, %v4232_v59 }
 0xab2   : >> { %v4396_v47 = vmul.f32 %v7977_v2, %v4395_v62  ;;  %v4402_v18 = vmul.f32 %v11424_v36, %v11404_v26  ;;  %v11440_v1 = vpop.eup %7980  ;;  %vm4408_vm6 = vweird.f32 %v11424_v36 }
 0xab3   : >> { %v4270_v4 = vmul.f32 %v11431_v19, %v11431_v19  ;;  %v4272_v40 = vmul.f32 %v11434_v53, %v11434_v53  ;;  %v11447_v34 = vpop.eup %7982  ;;  %v4432_v21 = vmul.f32 %v11440_v1, %v11410_v11  ;;  %vm11484_vm11 = vmor %vm4407_vm8, %vm4408_vm6  ;;  %vm4438_vm13 = vweird.f32 %v11440_v1 }
 0xab4   : >> { %v4400_v57 = vsel %vm4399_vm5, %v7977_v2, %v4396_v47  ;;  %v4403_v33 = vmul.f32 %v11424_v36, %v4402_v18  ;;  %v4422_v56 = vmul.f32 %v11447_v34, %v11413_v41  ;;  %vm4428_vm15 = vweird.f32 %v11447_v34  ;;  %vm4439_vm1 = vmor %vm4437_vm0, %vm4438_vm13 }
 0xab5   : >> { %v4582_v16 = vmul.f32 %v4400_v57, %v11268_v54  ;;  %v4202_v63 = vpop.xlane.xlu2 %4201  ;;  %v4308_v62 = vsel %vm889_vm10, %v4270_v4, 0.0  ;;  %v4314_v47 = vsel %vm889_vm10, %v4272_v40, 0.0  ;;  %v4627_v4 = vadd.f32 %v11450_v0, %v4604_v60  ;;  %vm4429_vm3 = vmor %vm4427_vm2, %vm4428_vm15 }
 0xab6   : >> { %v4404_v52 = vmul.f32 0.5, %v4403_v33  ;;  %v4234_v2 = vmul.f32 %v4202_v63, %v13742_v15  ;;  %v4193_v59 = vpop.xlane.xlu1 %4192  ;;  %v4199_v18 = vpop.xlane.xlu0 %4198  ;;  %4309 = vadd.xlane.f32.xlu0 %v4308_v62  ;;  %4315 = vadd.xlane.f32.xlu2 %v4314_v47  ;;  %v4416_v40 = vmul.f32 %v11397_v43, %v4415_v7  ;;  %v4433_v60 = vmul.f32 %v11440_v1, %v4432_v21 }
 0xab7   : >> { %v4605_v20 = vmul.f32 %v11427_v6, %v4582_v16  ;;  %v4231_v10 = vmul.f32 %v4193_v59, %v13742_v15  ;;  %v4233_v33 = vmul.f32 %v4199_v18, %v13742_v15  ;;  %v4423_v62 = vmul.f32 %v11447_v34, %v4422_v56 }
 0xab8   : >> { %v4405_v54 = vsub.f32 1.5, %v4404_v52  ;;  %v11465_v57 = vsub.f32 %v11316_v55, %v4234_v2  ;;  %v4130_v21 = vadd.f32 %v11142_v37, %v11406_v61 }
 0xab9   : >> { %v4628_v16 = vadd.f32 %v11450_v0, %v4605_v20  ;;  %v11475_v52 = vsub.f32 %v11319_v8, %v4231_v10  ;;  %v11478_v2 = vsub.f32 %v11322_v22, %v4233_v33  ;;  %v4134_v20 = vpop.f32.mrf.mxu0  ;;  %v4424_v7 = vmul.f32 0.5, %v4423_v62 }
 0xaba   : >> { %v4406_v63 = vmul.f32 %v11424_v36, %v4405_v54  ;;  %v4274_v47 = vmul.f32 %v11465_v57, %v11465_v57  ;;  %v4420_v54 = vsel %vm11500_vm12, %v11397_v43, %v4416_v40  ;;  %v13762_v40 = vld [vmem:[#allocation15_spill] sm:$0xff] }
 0xabb   : >> { %v4647_v59 = vpack.c.bf16 %v4628_v16, %v4627_v4  ;;  %v4271_v49 = vmul.f32 %v11475_v52, %v11475_v52  ;;  %v4273_v10 = vmul.f32 %v11478_v2, %v11478_v2  ;;  %v4135_v4 = vadd.f32 %v11142_v37, %v4134_v20 }
 0xabc   : >> { %v4410_v26 = vsel %vm11484_vm11, %v11424_v36, %v4406_v63  ;;  %v4320_v61 = vsel %vm889_vm10, %v4274_v47, 0.0  ;;  %v4584_v43 = vmul.f32 %v4420_v54, %v11260_v13  ;;  %v11522_v47 = vadd.f32 %v13762_v40, %v4130_v21 }
 0xabd   : >> { %7086 = vmatmul.msk.bf16.vlgmr.msrb.gmra.mxu1 %vm889_vm10, %v4647_v59  ;;  %7096 = vmatmul.msk.bf16.vlgmr.msra.gmra.mxu3 %vm889_vm10, %v4647_v59  ;;  %v4205_v36 = vpop.xlane.xlu2 %4204  ;;  %v4311_v33 = vsel %vm889_vm10, %v4271_v49, 0.0  ;;  %v4583_v16 = vmul.f32 %v4410_v26, %v11273_v30  ;;  %v4317_v63 = vsel %vm889_vm10, %v4273_v10, 0.0  ;;  %v4434_v59 = vmul.f32 0.5, %v4433_v60  ;;  %v13764_v49 = vld [vmem:[#allocation13_spill] sm:$0xff] }
 0xabe   : >> { %v4235_v56 = vmul.f32 %v4205_v36, %v13742_v15  ;;  %4321 = vadd.xlane.f32.xlu1 %v4320_v61  ;;  %4312 = vadd.xlane.f32.xlu0 %v4311_v33  ;;  %13763 = vst [vmem:[#allocation49_spill] sm:$0xff] %v11522_v47  ;;  %v11527_v30 = vadd.f32 %v13764_v49, %v4135_v4  ;;  %v4425_v60 = vsub.f32 1.5, %v4424_v7  ;;  %v4212_v21 = vsel %vm889_vm10, %v11522_v47, 0.0 }
 0xabf   : >> { %4318 = vadd.xlane.f32.xlu2 %v4317_v63  ;;  %v4606_v26 = vmul.f32 %v11427_v6, %v4583_v16  ;;  %v4435_v18 = vsub.f32 1.5, %v4434_v59  ;;  %v4607_v36 = vmul.f32 %v11427_v6, %v4584_v43  ;;  %v4133_v13 = vadd.f32 %v11142_v37, %v11436_v38  ;;  %v13766_v38 = vld [vmem:[#allocation14_spill] sm:$0xff] }
 0xac0   : >> { %v11518_v23 = vsub.f32 %v11332_v58, %v4235_v56  ;;  %13765 = vst [vmem:[#allocation51_spill] sm:$0xff] %v11527_v30  ;;  %v4218_v10 = vsel %vm889_vm10, %v11527_v30, 0.0  ;;  %v4426_v56 = vmul.f32 %v11447_v34, %v4425_v60 }
 0xac1   : >> { %v4629_v54 = vadd.f32 %v11450_v0, %v4606_v26  ;;  %v4436_v61 = vmul.f32 %v11440_v1, %v4435_v18  ;;  %v4630_v37 = vadd.f32 %v11450_v0, %v4607_v36  ;;  %v11546_v33 = vadd.f32 %v13766_v38, %v4133_v13 }
 0xac2   : >> { %v4275_v20 = vmul.f32 %v11518_v23, %v11518_v23  ;;  %v4430_v63 = vsel %vm4429_vm3, %v11447_v34, %v4426_v56 }
 0xac3   : >> { %13767 = vst [vmem:[#allocation39_spill] sm:$0xff] %v11546_v33  ;;  %v4648_v4 = vpack.c.bf16 %v4630_v37, %v4629_v54  ;;  %v4440_v16 = vsel %vm4439_vm1, %v11440_v1, %v4436_v61  ;;  %v4215_v11 = vsel %vm889_vm10, %v11546_v33, 0.0  ;;  %v4585_v7 = vmul.f32 %v4430_v63, %v11282_v5 }
 0xac4   : >> { %v4323_v62 = vsel %vm889_vm10, %v4275_v20, 0.0  ;;  %v4586_v59 = vmul.f32 %v4440_v16, %v11279_v44  ;;  %v4347_v20 = vmul.f32 %v11417_v42, %v13742_v15 }
 0xac5   : >> { %v4608_v41 = vmul.f32 %v11427_v6, %v4585_v7 }
 0xac6   : >> { %4324 = vadd.xlane.f32.xlu1 %v4323_v62  ;;  %4213 = vadd.xlane.f32.xlu0 %v4212_v21  ;;  %v4609_v43 = vmul.f32 %v11427_v6, %v4586_v59  ;;  %v4367_v44 = vadd.f32 1e-05, %v4347_v20 }
 0xac7   : >> { %4219 = vadd.xlane.f32.xlu2 %v4218_v10  ;;  %v4631_v1 = vadd.f32 %v11450_v0, %v4608_v41 }
 0xac8   : >> { %v4632_v34 = vadd.f32 %v11450_v0, %v4609_v43  ;;  %7984 = vrsqrt.f32 %v4367_v44  ;;  %vm4447_vm5 = vweird.f32 %v4367_v44 }
 0xaca   : >> { %v4649_v40 = vpack.c.bf16 %v4632_v34, %v4631_v1 }
 0xacd   : >> { %7087 = vmatmul.msk.bf16.gmra.mxu1 %vm889_vm10, %v4648_v4  ;;  %7097 = vmatmul.msk.bf16.gmra.mxu3 %vm889_vm10, %v4648_v4 }
 0xace   : >> { %4216 = vadd.xlane.f32.xlu0 %v4215_v11  ;;  %v7985_v5 = vpop.eup %7984 }
 0xacf   : >> { %v4442_v49 = vmul.f32 %v7985_v5, %v4367_v44  ;;  %vm4448_vm4 = vweird.f32 %v7985_v5 }
 0xad0   : >> { %vm4449_vm6 = vmor %vm4447_vm5, %vm4448_vm4 }
 0xad1   : >> { %v4443_v26 = vmul.f32 %v7985_v5, %v4442_v49 }
 0xad3   : >> { %v4444_v36 = vmul.f32 0.5, %v4443_v26 }
 0xad5   : >> { %v4445_v13 = vsub.f32 1.5, %v4444_v36 }
 0xad7   : >> { %v4446_v54 = vmul.f32 %v7985_v5, %v4445_v13 }
 0xad9   : >> { %v4450_v42 = vsel %vm4449_vm6, %v7985_v5, %v4446_v54 }
 0xada   : >> { %v4587_v63 = vmul.f32 %v4450_v42, %v11297_v14 }
 0xadc   : >> { %v4610_v34 = vmul.f32 %v11427_v6, %v4587_v63 }
 0xadd   : >> { %7088 = vmatmul.msk.bf16.gmra.mxu1 %vm889_vm10, %v4649_v40  ;;  %7098 = vmatmul.msk.bf16.gmra.mxu3 %vm889_vm10, %v4649_v40 }
 0xade   : >> { %v4633_v49 = vadd.f32 %v11450_v0, %v4610_v34 }
 0xb00   : >> { %v4304_v18 = vpop.xlane.xlu1 %4303 }
 0xb01   : >> { %v4348_v60 = vmul.f32 %v4304_v18, %v13742_v15 }
 0xb03   : >> { %v4368_v62 = vadd.f32 1e-05, %v4348_v60 }
 0xb05   : >> { %7986 = vrsqrt.f32 %v4368_v62  ;;  %vm4457_vm8 = vweird.f32 %v4368_v62 }
 0xb08   : >> { %v4307_v21 = vpop.xlane.xlu1 %4306 }
 0xb09   : >> { %v4349_v14 = vmul.f32 %v4307_v21, %v13742_v15 }
 0xb0b   : >> { %v7987_v10 = vpop.eup %7986  ;;  %v11584_v26 = vadd.f32 1e-05, %v4349_v14 }
 0xb0c   : >> { %v4452_v61 = vmul.f32 %v7987_v10, %v4368_v62  ;;  %vm4458_vm7 = vweird.f32 %v7987_v10 }
 0xb0d   : >> { %vm4459_vm9 = vmor %vm4457_vm8, %vm4458_vm7  ;;  %7988 = vrsqrt.f32 %v11584_v26  ;;  %vm4467_vm12 = vweird.f32 %v11584_v26 }
 0xb0e   : >> { %v4453_v56 = vmul.f32 %v7987_v10, %v4452_v61 }
 0xb10   : >> { %v4454_v37 = vmul.f32 0.5, %v4453_v56  ;;  %v4208_v38 = vpop.xlane.xlu1 %4207 }
 0xb11   : >> { %v4236_v4 = vmul.f32 %v4208_v38, %v13742_v15 }
 0xb12   : >> { %v4455_v16 = vsub.f32 1.5, %v4454_v37  ;;  %v7246_v37 = vld [vmem:[%s11598_s18 + $0x38] sm:$0xff] }
 0xb13   : >> { %v11569_v11 = vsub.f32 %v11375_v29, %v4236_v4  ;;  %v11592_v36 = vpop.eup %7988  ;;  %5853 = vmatpush.bf16.msra.mxu2 %v7246_v37  ;;  %v7245_v4 = vld [vmem:[%s11598_s18 + $0x30] sm:$0xff] }
 0xb14   : >> { %v4456_v59 = vmul.f32 %v7987_v10, %v4455_v16  ;;  %v4462_v13 = vmul.f32 %v11592_v36, %v11584_v26  ;;  %vm4468_vm11 = vweird.f32 %v11592_v36 }
 0xb15   : >> { %v4276_v7 = vmul.f32 %v11569_v11, %v11569_v11  ;;  %vm11650_vm13 = vmor %vm4467_vm12, %vm4468_vm11 }
 0xb16   : >> { %v4460_v41 = vsel %vm4459_vm9, %v7987_v10, %v4456_v59  ;;  %v4463_v38 = vmul.f32 %v11592_v36, %v4462_v13  ;;  %v7253_v13 = vld [vmem:[%s11598_s18 + $0x70] sm:$0xff] }
 0xb17   : >> { %v4588_v43 = vmul.f32 %v4460_v41, %v11338_v12  ;;  %v4326_v1 = vsel %vm889_vm10, %v4276_v7, 0.0  ;;  %5854 = vmatpush.bf16.msra.mxu2 %v7245_v4 }
 0xb18   : >> { %4327 = vadd.xlane.f32.xlu0 %v4326_v1  ;;  %v4211_v40 = vpop.xlane.xlu1 %4210  ;;  %v4464_v16 = vmul.f32 0.5, %v4463_v38  ;;  %v7254_v1 = vld [vmem:[%s11598_s18 + $0x78] sm:$0xff] }
 0xb19   : >> { %v4237_v20 = vmul.f32 %v4211_v40, %v13742_v15  ;;  %v4611_v44 = vmul.f32 %v11427_v6, %v4588_v43  ;;  %5912 = vmatpush.bf16.msra.mxu0 %v7254_v1 }
 0xb1b   : >> { %v11580_v5 = vsub.f32 %v11392_v31, %v4237_v20  ;;  %v4634_v12 = vadd.f32 %v11450_v0, %v4611_v44  ;;  %v7244_v44 = vld [vmem:[%s11598_s18 + $0x28] sm:$0xff] }
 0xb1c   : >> { %5855 = vmatpush.bf16.msra.mxu2 %v7244_v44 }
 0xb1d   : >> { %v4650_v18 = vpack.c.bf16 %v4634_v12, %v4633_v49  ;;  %v4277_v60 = vmul.f32 %v11580_v5, %v11580_v5  ;;  %v4465_v12 = vsub.f32 1.5, %v4464_v16  ;;  %5913 = vmatpush.bf16.msra.mxu0 %v7253_v13 }
 0xb1f   : >> { %7089 = vmatmul.msk.bf16.gmra.mxu1 %vm889_vm10, %v4650_v18  ;;  %7099 = vmatmul.msk.bf16.gmra.mxu3 %vm889_vm10, %v4650_v18  ;;  %v4329_v62 = vsel %vm889_vm10, %v4277_v60, 0.0 }
 0xb20   : >> { %4330 = vadd.xlane.f32.xlu2 %v4329_v62  ;;  %v4668_v62 = vld [vmem:[%s4667_s26] sm:$0x3] }
 0xb21   : >> { %v11641_v4 = vperm.slane %v4668_v62, 0 }
 0xb29   : >> { %v4310_v21 = vpop.xlane.xlu0 %4309  ;;  %v4316_v10 = vpop.xlane.xlu2 %4315 }
 0xb2a   : >> { %v4350_v54 = vmul.f32 %v4310_v21, %v13742_v15  ;;  %v4352_v61 = vmul.f32 %v4316_v10, %v13742_v15 }
 0xb2c   : >> { %v11602_v56 = vadd.f32 1e-05, %v4350_v54  ;;  %v11604_v42 = vadd.f32 1e-05, %v4352_v61  ;;  %v7243_v54 = vld [vmem:[%s11598_s18 + $0x20] sm:$0xff]  ;;  %v4466_v61 = vmul.f32 %v11592_v36, %v4465_v12 }
 0xb2d   : >> { %5856 = vmatpush.bf16.msra.mxu2 %v7243_v54 }
 0xb2e   : >> { %7990 = vrsqrt.f32 %v11602_v56  ;;  %vm4477_vm0 = vweird.f32 %v11602_v56  ;;  %vm4497_vm5 = vweird.f32 %v11604_v42 }
 0xb2f   : >> { %7992 = vrsqrt.f32 %v11604_v42 }
 0xb31   : >> { %v4322_v63 = vpop.xlane.xlu1 %4321  ;;  %v4313_v59 = vpop.xlane.xlu0 %4312 }
 0xb32   : >> { %v4354_v7 = vmul.f32 %v4322_v63, %v13742_v15  ;;  %v4351_v41 = vmul.f32 %v4313_v59, %v13742_v15  ;;  %v4319_v43 = vpop.xlane.xlu2 %4318 }
 0xb33   : >> { %v4353_v34 = vmul.f32 %v4319_v43, %v13742_v15 }
 0xb34   : >> { %v11618_v40 = vpop.eup %7990  ;;  %v11620_v14 = vadd.f32 1e-05, %v4354_v7  ;;  %v11622_v20 = vadd.f32 1e-05, %v4351_v41  ;;  %v7252_v7 = vld [vmem:[%s11598_s18 + $0x68] sm:$0xff] }
 0xb35   : >> { %v11625_v49 = vpop.eup %7992  ;;  %v4472_v18 = vmul.f32 %v11618_v40, %v11602_v56  ;;  %v11629_v60 = vadd.f32 1e-05, %v4353_v34  ;;  %5914 = vmatpush.bf16.msra.mxu0 %v7252_v7  ;;  %vm4478_vm15 = vweird.f32 %v11618_v40  ;;  %v7242_v7 = vld [vmem:[%s11598_s18 + $0x18] sm:$0xff] }
 0xb36   : >> { %7994 = vrsqrt.f32 %v11620_v14  ;;  %v4492_v10 = vmul.f32 %v11625_v49, %v11604_v42  ;;  %vm11681_vm1 = vmor %vm4477_vm0, %vm4478_vm15  ;;  %5857 = vmatpush.bf16.msra.mxu2 %v7242_v7  ;;  %vm4498_vm3 = vweird.f32 %v11625_v49  ;;  %vm4487_vm4 = vweird.f32 %v11622_v20 }
 0xb37   : >> { %v4473_v21 = vmul.f32 %v11618_v40, %v4472_v18  ;;  %7996 = vrsqrt.f32 %v11622_v20  ;;  %v4470_v18 = vsel %vm11650_vm13, %v11592_v36, %v4466_v61  ;;  %vm11733_vm7 = vmor %vm4497_vm5, %vm4498_vm3  ;;  %vm4507_vm9 = vweird.f32 %v11629_v60 }
 0xb38   : >> { %7998 = vrsqrt.f32 %v11629_v60  ;;  %v4493_v43 = vmul.f32 %v11625_v49, %v4492_v10  ;;  %vm4517_vm13 = vweird.f32 %v11620_v14 }
 0xb39   : >> { %v4474_v37 = vmul.f32 0.5, %v4473_v21  ;;  %v4214_v38 = vpop.xlane.xlu0 %4213 }
 0xb3a   : >> { %v4238_v16 = vmul.f32 %v4214_v38, %v13742_v15  ;;  %v4220_v63 = vpop.xlane.xlu2 %4219  ;;  %v4753_v59 = vpop.f32.mrf.mxu1  ;;  %v4494_v36 = vmul.f32 0.5, %v4493_v43 }
 0xb3b   : >> { %v4475_v41 = vsub.f32 1.5, %v4474_v37  ;;  %v4240_v1 = vmul.f32 %v4220_v63, %v13742_v15  ;;  %v11662_v13 = vadd.f32 %v4753_v59, %v11641_v4  ;;  %v11672_v37 = vperm.slane %v4668_v62, 1 }
 0xb3c   : >> { %v11648_v34 = vpop.eup %7994  ;;  %v11670_v54 = vsub.f32 %v11522_v47, %v4238_v16  ;;  %v4589_v62 = vmul.f32 %v4470_v18, %v11357_v51  ;;  %v4495_v18 = vsub.f32 1.5, %v4494_v36 }
 0xb3d   : >> { %v11654_v12 = vpop.eup %7996  ;;  %v4476_v26 = vmul.f32 %v11618_v40, %v4475_v41  ;;  %v4512_v61 = vmul.f32 %v11648_v34, %v11620_v14  ;;  %v11679_v63 = vsub.f32 %v11527_v30, %v4240_v1  ;;  %v7106_v44 = vmul.f32 -1.702, %v11662_v13  ;;  %v7251_v30 = vld [vmem:[%s11598_s18 + $0x60] sm:$0xff] }
 0xb3e   : >> { %v11664_v21 = vpop.eup %7998  ;;  %v4482_v10 = vmul.f32 %v11654_v12, %v11622_v20  ;;  %vm4488_vm2 = vweird.f32 %v11654_v12  ;;  %5915 = vmatpush.bf16.msra.mxu0 %v7251_v30  ;;  %vm4518_vm11 = vweird.f32 %v11648_v34 }
 0xb3f   : >> { %v4502_v38 = vmul.f32 %v11664_v21, %v11629_v60  ;;  %v4480_v41 = vsel %vm11681_vm1, %v11618_v40, %v4476_v26  ;;  %v4513_v40 = vmul.f32 %v11648_v34, %v4512_v61  ;;  %v4942_v26 = vmul.f32 1.442695, %v7106_v44  ;;  %vm11725_vm6 = vmor %vm4487_vm4, %vm4488_vm2 }
 0xb40   : >> { %v4812_v59 = vpop.f32.mrf.mxu3  ;;  %v4483_v16 = vmul.f32 %v11654_v12, %v4482_v10  ;;  %v4278_v10 = vmul.f32 %v11670_v54, %v11670_v54  ;;  %v4590_v56 = vmul.f32 %v4480_v41, %v11431_v19  ;;  %v4612_v61 = vmul.f32 %v11427_v6, %v4589_v62  ;;  %v7241_v41 = vld [vmem:[%s11598_s18 + $0x10] sm:$0xff]  ;;  %vm11791_vm15 = vmor %vm4517_vm13, %vm4518_vm11 }
 0xb41   : >> { %v4503_v43 = vmul.f32 %v11664_v21, %v4502_v38  ;;  %v4217_v1 = vpop.xlane.xlu0 %4216  ;;  %v11694_v25 = vadd.f32 %v4812_v59, %v11672_v37  ;;  %v4280_v38 = vmul.f32 %v11679_v63, %v11679_v63  ;;  %8000 = vpow2.f32 %v4942_v26  ;;  %5858 = vmatpush.bf16.msra.mxu2 %v7241_v41  ;;  %v7250_v26 = vld [vmem:[%s11598_s18 + $0x58] sm:$0xff] }
 0xb42   : >> { %v4484_v24 = vmul.f32 0.5, %v4483_v16  ;;  %v4239_v27 = vmul.f32 %v4217_v1, %v13742_v15  ;;  %v4755_v51 = vpop.f32.mrf.mxu1  ;;  %v4332_v1 = vsel %vm889_vm10, %v4278_v10, 0.0  ;;  %v4496_v44 = vmul.f32 %v11625_v49, %v4495_v18  ;;  %5916 = vmatpush.bf16.msra.mxu0 %v7250_v26 }
 0xb43   : >> { %v7107_v59 = vmul.f32 -1.702, %v11694_v25  ;;  %v4504_v47 = vmul.f32 0.5, %v4503_v43  ;;  %4333 = vadd.xlane.f32.xlu1 %v4332_v1  ;;  %v4514_v10 = vmul.f32 0.5, %v4513_v40  ;;  %v4613_v62 = vmul.f32 %v11427_v6, %v4590_v56 }
 0xb44   : >> { %v4485_v16 = vsub.f32 1.5, %v4484_v24  ;;  %v11708_v36 = vsub.f32 %v11546_v33, %v4239_v27  ;;  %v4338_v24 = vsel %vm889_vm10, %v4280_v38, 0.0  ;;  %v11717_v27 = vadd.f32 %v4755_v51, %v11641_v4 }
 0xb45   : >> { %v4944_v19 = vmul.f32 1.442695, %v7107_v59  ;;  %4339 = vadd.xlane.f32.xlu2 %v4338_v24  ;;  %v4505_v51 = vsub.f32 1.5, %v4504_v47  ;;  %v4635_v40 = vadd.f32 %v11450_v0, %v4612_v61  ;;  %v4636_v38 = vadd.f32 %v11450_v0, %v4613_v62  ;;  %v7240_v59 = vld [vmem:[%s11598_s18 + $0x8] sm:$0xff] }
 0xb46   : >> { %v4486_v7 = vmul.f32 %v11654_v12, %v4485_v16  ;;  %v7108_v18 = vmul.f32 -1.702, %v11717_v27  ;;  %v4279_v47 = vmul.f32 %v11708_v36, %v11708_v36  ;;  %v4500_v1 = vsel %vm11733_vm7, %v11625_v49, %v4496_v44  ;;  %5859 = vmatpush.bf16.msra.mxu2 %v7240_v59  ;;  %v7249_v44 = vld [vmem:[%s11598_s18 + $0x50] sm:$0xff]  ;;  %v7248_v59 = vld [vmem:[%s11598_s18 + $0x48] sm:$0xff] }
 0xb47   : >> { %8002 = vpow2.f32 %v4944_v19  ;;  %v4651_v24 = vpack.c.bf16 %v4636_v38, %v4635_v40  ;;  %vm4508_vm8 = vweird.f32 %v11664_v21  ;;  %v4325_v40 = vpop.xlane.xlu1 %4324  ;;  %5917 = vmatpush.bf16.msra.mxu0 %v7249_v44 }
 0xb48   : >> { %v4814_v43 = vpop.f32.mrf.mxu3  ;;  %v4490_v42 = vsel %vm11725_vm6, %v11654_v12, %v4486_v7  ;;  %v4946_v61 = vmul.f32 1.442695, %v7108_v18  ;;  %v8001_v12 = vpop.eup %8000  ;;  %v4515_v7 = vsub.f32 1.5, %v4514_v10  ;;  %v4506_v18 = vmul.f32 %v11664_v21, %v4505_v51  ;;  %vm11774_vm12 = vmor %vm4507_vm9, %vm4508_vm8 }
 0xb49   : >> { %v11742_v56 = vadd.f32 %v4814_v43, %v11672_v37  ;;  %v4335_v43 = vsel %vm889_vm10, %v4279_v47, 0.0  ;;  %v4591_v62 = vmul.f32 %v4490_v42, %v11475_v52  ;;  %v11756_v26 = vadd.f32 1.0, %v8001_v12  ;;  %7090 = vmatmul.msk.bf16.gmra.mxu1 %vm889_vm10, %v4651_v24  ;;  %7100 = vmatmul.msk.bf16.gmra.mxu3 %vm889_vm10, %v4651_v24  ;;  %v7239_v42 = vld [vmem:[%s11598_s18] sm:$0xff] }
 0xb4a   : >> { %v4758_v16 = vpop.f32.mrf.mxu1  ;;  %8004 = vpow2.f32 %v4946_v61  ;;  %4336 = vadd.xlane.f32.xlu0 %v4335_v43  ;;  %v4592_v52 = vmul.f32 %v4500_v1, %v11434_v53  ;;  %v4516_v51 = vmul.f32 %v11648_v34, %v4515_v7  ;;  %5860 = vmatpush.bf16.msra.mxu2 %v7239_v42  ;;  %v4510_v1 = vsel %vm11774_vm12, %v11664_v21, %v4506_v18 }
 0xb4b   : >> { %v11751_v19 = vadd.f32 %v4758_v16, %v11641_v4  ;;  %v7109_v41 = vmul.f32 -1.702, %v11742_v56  ;;  %8006 = vrcp.f32 %v11756_v26  ;;  %v4614_v16 = vmul.f32 %v11427_v6, %v4591_v62  ;;  %5918 = vmatpush.bf16.msra.mxu0 %v7248_v59 }
 0xb4c   : >> { %v4355_v61 = vmul.f32 %v4325_v40, %v13742_v15  ;;  %v4615_v21 = vmul.f32 %v11427_v6, %v4592_v52  ;;  %v4520_v43 = vsel %vm11791_vm15, %v11648_v34, %v4516_v51  ;;  %v4593_v44 = vmul.f32 %v4510_v1, %v11478_v2 }
 0xb4d   : >> { %v7110_v49 = vmul.f32 -1.702, %v11751_v19  ;;  %v8003_v30 = vpop.eup %8002  ;;  %v4948_v10 = vmul.f32 1.442695, %v7109_v41  ;;  %v5073_v42 = vand.u32 2147483648, %v11756_v26  ;;  %vm5067_vm0 = vweird.f32 %v11756_v26 }
 0xb4e   : >> { %v11770_v38 = vadd.f32 1.0, %v8003_v30  ;;  %v11815_v34 = vadd.f32 1e-05, %v4355_v61  ;;  %v4638_v2 = vadd.f32 %v11450_v0, %v4615_v21 }
 0xb4f   : >> { %8008 = vpow2.f32 %v4948_v10  ;;  %v4950_v60 = vmul.f32 1.442695, %v7110_v49  ;;  %v4637_v10 = vadd.f32 %v11450_v0, %v4614_v16  ;;  %v4594_v16 = vmul.f32 %v4520_v43, %v11465_v57 }
 0xb50   : >> { %v4817_v20 = vpop.f32.mrf.mxu3  ;;  %8010 = vrcp.f32 %v11770_v38  ;;  %v8005_v7 = vpop.eup %8004  ;;  %v5074_v57 = vor.u32 1.1754944e-38, %v5073_v42  ;;  %v5088_v43 = vand.u32 2147483648, %v11770_v38  ;;  %vm5082_vm3 = vweird.f32 %v11770_v38 }
 0xb51   : >> { %v11779_v47 = vadd.f32 %v4817_v20, %v11672_v37  ;;  %8012 = vpow2.f32 %v4950_v60  ;;  %v11803_v62 = vadd.f32 1.0, %v8005_v7  ;;  %v11805_v49 = vpop.eup %8006  ;;  %v5071_v20 = vand.u32 2147483647, %v11756_v26 }
 0xb52   : >> { %v4760_v12 = vpop.f32.mrf.mxu1  ;;  %v5063_v52 = vmul.f32 %v11805_v49, %v11756_v26  ;;  %v4652_v24 = vpack.c.bf16 %v4638_v2, %v4637_v10  ;;  %vm5068_vm2 = vweird.f32 %v11805_v49 }
 0xb53   : >> { %v7111_v41 = vmul.f32 -1.702, %v11779_v47  ;;  %v11797_v14 = vadd.f32 %v4760_v12, %v11641_v4  ;;  %8014 = vrcp.f32 %v11803_v62  ;;  %vm11831_vm1 = vcmp.eq.f32.partialorder %v5071_v20, 8.507059e+37  ;;  %vm11859_vm4 = vmor %vm5067_vm0, %vm5068_vm2 }
 0xb54   : >> { %v5064_v59 = vsub.f32 1.0, %v5063_v52  ;;  %v5103_v33 = vand.u32 2147483648, %v11803_v62  ;;  %vm5097_vm7 = vweird.f32 %v11803_v62 }
 0xb55   : >> { %v4952_v30 = vmul.f32 1.442695, %v7111_v41  ;;  %v7112_v18 = vmul.f32 -1.702, %v11797_v14  ;;  %v8009_v40 = vpop.eup %8008  ;;  %v4616_v41 = vmul.f32 %v11427_v6, %v4593_v44 }
 0xb56   : >> { %v11817_v51 = vadd.f32 1.0, %v8009_v40  ;;  %v11820_v60 = vpop.eup %8010  ;;  %v5065_v21 = vmul.f32 %v11805_v49, %v5064_v59  ;;  %v5086_v40 = vand.u32 2147483647, %v11770_v38  ;;  %v5104_v22 = vor.u32 1.1754944e-38, %v5103_v33 }
 0xb57   : >> { %8016 = vpow2.f32 %v4952_v30  ;;  %v4954_v1 = vmul.f32 1.442695, %v7112_v18  ;;  %v8013_v7 = vpop.eup %8012  ;;  %v5078_v61 = vmul.f32 %v11820_v60, %v11770_v38  ;;  %vm5083_vm5 = vweird.f32 %v11820_v60 }
 0xb58   : >> { %v4819_v53 = vpop.f32.mrf.mxu3  ;;  %8018 = vrcp.f32 %v11817_v51  ;;  %v11838_v52 = vadd.f32 1.0, %v8013_v7  ;;  %v5066_v44 = vadd.f32 %v11805_v49, %v5065_v21  ;;  %v11848_v7 = vadd.f32 %v11450_v0, %v4616_v41  ;;  %vm11892_vm11 = vmor %vm5082_vm3, %vm5083_vm5 }
 0xb59   : >> { %v11824_v12 = vadd.f32 %v4819_v53, %v11672_v37  ;;  %v5079_v18 = vsub.f32 1.0, %v5078_v61  ;;  %8020 = vpow2.f32 %v4954_v1  ;;  %v8015_v10 = vpop.eup %8014  ;;  %v4617_v61 = vmul.f32 %v11427_v6, %v4594_v16  ;;  %7091 = vmatmul.msk.bf16.gmra.mxu1 %vm889_vm10, %v4652_v24  ;;  %7101 = vmatmul.msk.bf16.gmra.mxu3 %vm889_vm10, %v4652_v24 }
 0xb5a   : >> { %v4763_v42 = vpop.f32.mrf.mxu1  ;;  %v5093_v59 = vmul.f32 %v8015_v10, %v11803_v62  ;;  %v5089_v1 = vor.u32 1.1754944e-38, %v5088_v43  ;;  %v5101_v21 = vand.u32 2147483647, %v11803_v62  ;;  %8022 = vrcp.f32 %v11838_v52 }
 0xb5b   : >> { %v7113_v20 = vmul.f32 -1.702, %v11824_v12  ;;  %v5080_v53 = vmul.f32 %v11820_v60, %v5079_v18  ;;  %vm11864_vm6 = vcmp.eq.f32.partialorder %v5086_v40, 8.507059e+37  ;;  %v11870_v43 = vadd.f32 %v4763_v42, %v11641_v4 }
 0xb5c   : >> { %v5094_v41 = vsub.f32 1.0, %v5093_v59  ;;  %v5070_v26 = vsel %vm11859_vm4, %v11805_v49, %v5066_v44  ;;  %vm5098_vm8 = vweird.f32 %v8015_v10  ;;  %v4640_v55 = vadd.f32 %v11450_v0, %v4617_v61 }
 0xb5d   : >> { %v8017_v2 = vpop.eup %8016  ;;  %v5081_v18 = vadd.f32 %v11820_v60, %v5080_v53  ;;  %v4956_v29 = vmul.f32 1.442695, %v7113_v20  ;;  %vm11880_vm9 = vcmp.eq.f32.partialorder %v5101_v21, 8.507059e+37  ;;  %v5116_v6 = vand.u32 2147483647, %v11817_v51  ;;  %vm5099_vm12 = vmor %vm5097_vm7, %vm5098_vm8 }
 0xb5e   : >> { %v8019_v24 = vpop.eup %8018  ;;  %v11876_v31 = vadd.f32 1.0, %v8017_v2  ;;  %v5095_v58 = vmul.f32 %v8015_v10, %v5094_v41  ;;  %v5075_v49 = vsel %vm11831_vm1, %v5074_v57, %v5070_v26  ;;  %v5118_v2 = vand.u32 2147483648, %v11817_v51 }
 0xb5f   : >> { %v8021_v40 = vpop.eup %8020  ;;  %v5108_v59 = vmul.f32 %v8019_v24, %v11817_v51  ;;  %v5085_v30 = vsel %vm11892_vm11, %v11820_v60, %v5081_v18  ;;  %vm5113_vm13 = vweird.f32 %v8019_v24  ;;  %vm5112_vm15 = vweird.f32 %v11817_v51 }
 0xb60   : >> { %8024 = vrcp.f32 %v11876_v31  ;;  %v5096_v0 = vadd.f32 %v8015_v10, %v5095_v58  ;;  %v4822_v33 = vpop.f32.mrf.mxu3  ;;  %v11897_v53 = vpop.eup %8022  ;;  %v11905_v38 = vadd.f32 1.0, %v8021_v40  ;;  %v7114_v58 = vmul.f32 -1.702, %v11870_v43  ;;  %vm5114_vm1 = vmor %vm5112_vm15, %vm5113_vm13 }
 0xb61   : >> { %v5109_v20 = vsub.f32 1.0, %v5108_v59  ;;  %8026 = vpow2.f32 %v4956_v29  ;;  %v5123_v21 = vmul.f32 %v11897_v53, %v11838_v52  ;;  %vm11913_vm0 = vcmp.eq.f32.partialorder %v5116_v6, 8.507059e+37  ;;  %v7247_v29 = vld [vmem:[%s11598_s18 + $0x40] sm:$0xff] }
 0xb62   : >> { %v5100_v57 = vsel %vm5099_vm12, %v8015_v10, %v5096_v0  ;;  %8028 = vrcp.f32 %v11905_v38  ;;  %v5662_v62 = vmul.f32 %v5075_v49, %v11662_v13  ;;  %v5119_v51 = vor.u32 1.1754944e-38, %v5118_v2  ;;  %5919 = vmatpush.bf16.msra.mxu0 %v7247_v29  ;;  %v4765_v49 = vpop.f32.mrf.mxu1 }
 0xb63   : >> { %v5110_v61 = vmul.f32 %v8019_v24, %v5109_v20  ;;  %v5105_v41 = vsel %vm11880_vm9, %v5104_v22, %v5100_v57  ;;  %v5124_v18 = vsub.f32 1.0, %v5123_v21  ;;  %v5090_v22 = vsel %vm11864_vm6, %v5089_v1, %v5085_v30 }
 0xb64   : >> { %v5664_v10 = vmul.f32 %v5105_v41, %v11717_v27  ;;  %v4958_v59 = vmul.f32 1.442695, %v7114_v58  ;;  %v11926_v42 = vadd.f32 %v4822_v33, %v11672_v37  ;;  %8030 = vrsqrt.f32 %v11815_v34 }
 0xb65   : >> { %v5111_v26 = vadd.f32 %v8019_v24, %v5110_v61  ;;  %v5125_v13 = vmul.f32 %v11897_v53, %v5124_v18  ;;  %v5131_v16 = vand.u32 2147483647, %v11838_v52  ;;  %v5663_v20 = vmul.f32 %v5090_v22, %v11694_v25 }
 0xb66   : >> { %v11921_v40 = vpop.eup %8024  ;;  %v5702_v6 = vpack.c.bf16 %v5664_v10, %v5662_v62  ;;  %8032 = vpow2.f32 %v4958_v59  ;;  %v7115_v58 = vmul.f32 -1.702, %v11926_v42  ;;  %v11941_v57 = vadd.f32 %v4765_v49, %v11641_v4 }
 0xb67   : >> { %v5115_v44 = vsel %vm5114_vm1, %v8019_v24, %v5111_v26  ;;  %v5138_v27 = vmul.f32 %v11921_v40, %v11876_v31  ;;  %v8027_v0 = vpop.eup %8026  ;;  %v4653_v61 = vpack.c.bf16 %v4640_v55, %v11848_v7  ;;  %v5126_v41 = vadd.f32 %v11897_v53, %v5125_v13 }
 0xb68   : >> { %v5120_v1 = vsel %vm11913_vm0, %v5119_v51, %v5115_v44  ;;  %v11937_v24 = vadd.f32 1.0, %v8027_v0  ;;  %5861 = vmatmul.bf16.vlgmr.msra.gmra.mxu2 %v5702_v6  ;;  %v8029_v30 = vpop.eup %8028  ;;  %vm5128_vm2 = vweird.f32 %v11897_v53  ;;  %v5133_v60 = vand.u32 2147483648, %v11838_v52 }
 0xb69   : >> { %v5665_v2 = vmul.f32 %v5120_v1, %v11742_v56  ;;  %v5139_v33 = vsub.f32 1.0, %v5138_v27  ;;  %v5153_v25 = vmul.f32 %v8029_v30, %v11905_v38  ;;  %v4824_v56 = vpop.f32.mrf.mxu3  ;;  %7092 = vmatmul.msk.bf16.gmra.mxu1 %vm889_vm10, %v4653_v61  ;;  %7102 = vmatmul.msk.bf16.gmra.mxu3 %vm889_vm10, %v4653_v61  ;;  %vm5127_vm3 = vweird.f32 %v11838_v52 }
 0xb6a   : >> { %8034 = vrcp.f32 %v11937_v24  ;;  %vm11952_vm4 = vcmp.eq.f32.partialorder %v5131_v16, 8.507059e+37  ;;  %v5163_v29 = vand.u32 2147483648, %v11905_v38  ;;  %v11957_v62 = vpop.eup %8030  ;;  %vm11959_vm5 = vmor %vm5127_vm3, %vm5128_vm2  ;;  %v4960_v18 = vmul.f32 1.442695, %v7115_v58 }
 0xb6b   : >> { %v5703_v21 = vpack.c.bf16 %v5665_v2, %v5663_v20  ;;  %v5154_v7 = vsub.f32 1.0, %v5153_v25  ;;  %v5140_v26 = vmul.f32 %v11921_v40, %v5139_v33  ;;  %v7116_v22 = vmul.f32 -1.702, %v11941_v57 }
 0xb6c   : >> { %v11966_v52 = vadd.f32 %v4824_v56, %v11672_v37  ;;  %v5130_v51 = vsel %vm11959_vm5, %v11897_v53, %v5126_v41  ;;  %vm5158_vm6 = vweird.f32 %v8029_v30  ;;  %v5161_v6 = vand.u32 2147483647, %v11905_v38  ;;  %v8033_v44 = vpop.eup %8032 }
 0xb6d   : >> { %5920 = vmatmul.bf16.vlgmr.msra.gmra.mxu0 %v5703_v21  ;;  %v5155_v59 = vmul.f32 %v8029_v30, %v5154_v7  ;;  %v5134_v13 = vor.u32 1.1754944e-38, %v5133_v60  ;;  %vm5157_vm7 = vweird.f32 %v11905_v38  ;;  %8036 = vpow2.f32 %v4960_v18 }
 0xb6e   : >> { %v4962_v27 = vmul.f32 1.442695, %v7116_v22  ;;  %vm5143_vm8 = vweird.f32 %v11921_v40  ;;  %v11974_v0 = vadd.f32 1.0, %v8033_v44  ;;  %v7117_v1 = vmul.f32 -1.702, %v11966_v52  ;;  %vm5159_vm9 = vmor %vm5157_vm7, %vm5158_vm6 }
 0xb6f   : >> { %v5156_v49 = vadd.f32 %v8029_v30, %v5155_v59  ;;  %v5135_v53 = vsel %vm11952_vm4, %v5134_v13, %v5130_v51  ;;  %v5141_v20 = vadd.f32 %v11921_v40, %v5140_v26  ;;  %v5164_v2 = vor.u32 1.1754944e-38, %v5163_v29 }
 0xb70   : >> { %v8035_v16 = vpop.eup %8034  ;;  %8038 = vpow2.f32 %v4962_v27  ;;  %vm5162_vm11 = vcmp.eq.f32.partialorder %v5161_v6, 8.507059e+37  ;;  %vm5142_vm12 = vweird.f32 %v11876_v31  ;;  %v5146_v58 = vand.u32 2147483647, %v11876_v31 }
 0xb71   : >> { %v5160_v33 = vsel %vm5159_vm9, %v8029_v30, %v5156_v49  ;;  %v5168_v38 = vmul.f32 %v8035_v16, %v11937_v24  ;;  %8040 = vrcp.f32 %v11974_v0  ;;  %v5148_v61 = vand.u32 2147483648, %v11876_v31  ;;  %vm11988_vm13 = vmor %vm5142_vm12, %vm5143_vm8 }
 0xb72   : >> { %v5165_v21 = vsel %vm5162_vm11, %v5164_v2, %v5160_v33  ;;  %v5666_v41 = vmul.f32 %v5135_v53, %v11751_v19  ;;  %v4964_v60 = vmul.f32 1.442695, %v7117_v1  ;;  %v5145_v7 = vsel %vm11988_vm13, %v11921_v40, %v5141_v20 }
 0xb73   : >> { %v5668_v30 = vmul.f32 %v5165_v21, %v11797_v14  ;;  %v5169_v56 = vsub.f32 1.0, %v5168_v38  ;;  %v8037_v55 = vpop.eup %8036  ;;  %vm5173_vm15 = vweird.f32 %v8035_v16  ;;  %v5176_v31 = vand.u32 2147483647, %v11937_v24 }
 0xb74   : >> { %v5178_v19 = vand.u32 2147483648, %v11937_v24  ;;  %v11998_v10 = vadd.f32 1.0, %v8037_v55  ;;  %8042 = vpow2.f32 %v4964_v60  ;;  %v5149_v22 = vor.u32 1.1754944e-38, %v5148_v61 }
 0xb75   : >> { %v5170_v29 = vmul.f32 %v8035_v16, %v5169_v56  ;;  %v5704_v26 = vpack.c.bf16 %v5668_v30, %v5666_v41  ;;  %vm5147_vm0 = vcmp.eq.f32.partialorder %v5146_v58, 8.507059e+37  ;;  %vm5172_vm1 = vweird.f32 %v11937_v24 }
 0xb76   : >> { %v8039_v18 = vpop.eup %8038  ;;  %8044 = vrcp.f32 %v11998_v10  ;;  %v5150_v40 = vsel %vm5147_vm0, %v5149_v22, %v5145_v7  ;;  %vm5174_vm2 = vmor %vm5172_vm1, %vm5173_vm15  ;;  %v5179_v59 = vor.u32 1.1754944e-38, %v5178_v19  ;;  %vm5177_vm3 = vcmp.eq.f32.partialorder %v5176_v31, 8.507059e+37 }
 0xb77   : >> { %v12000_v14 = vpop.eup %8040  ;;  %v5171_v51 = vadd.f32 %v8035_v16, %v5170_v29  ;;  %v5032_v44 = vadd.f32 1.0, %v8039_v18  ;;  %v4522_v24 = vmul.f32 %v11957_v62, %v11815_v34  ;;  %v5667_v53 = vmul.f32 %v5150_v40, %v11779_v47 }
 0xb78   : >> { %5866 = vmatmul.bf16.gmra.mxu2 %v5704_v26  ;;  %v5183_v6 = vmul.f32 %v12000_v14, %v11974_v0  ;;  %v5191_v21 = vand.u32 2147483647, %v11974_v0  ;;  %vm5188_vm4 = vweird.f32 %v12000_v14  ;;  %vm5187_vm5 = vweird.f32 %v11974_v0 }
 0xb79   : >> { %v5175_v13 = vsel %vm5174_vm2, %v8035_v16, %v5171_v51  ;;  %8046 = vrcp.f32 %v5032_v44  ;;  %v4523_v61 = vmul.f32 %v11957_v62, %v4522_v24  ;;  %v5221_v60 = vand.u32 2147483647, %v5032_v44  ;;  %vm12022_vm6 = vmor %vm5187_vm5, %vm5188_vm4 }
 0xb7a   : >> { %v5180_v27 = vsel %vm5177_vm3, %v5179_v59, %v5175_v13  ;;  %v5184_v49 = vsub.f32 1.0, %v5183_v6  ;;  %v8043_v1 = vpop.eup %8042  ;;  %vm12026_vm7 = vcmp.eq.f32.partialorder %v5191_v21, 8.507059e+37  ;;  %v5223_v29 = vand.u32 2147483648, %v5032_v44 }
 0xb7b   : >> { %v5669_v20 = vmul.f32 %v5180_v27, %v11824_v12  ;;  %v12012_v33 = vadd.f32 1.0, %v8043_v1  ;;  %v5193_v12 = vand.u32 2147483648, %v11974_v0  ;;  %v4524_v55 = vmul.f32 0.5, %v4523_v61 }
 0xb7c   : >> { %v5185_v2 = vmul.f32 %v12000_v14, %v5184_v49  ;;  %v8045_v38 = vpop.eup %8044  ;;  %vm5202_vm8 = vweird.f32 %v11998_v10  ;;  %v5206_v59 = vand.u32 2147483647, %v11998_v10  ;;  %v5208_v6 = vand.u32 2147483648, %v11998_v10 }
 0xb7d   : >> { %v5705_v58 = vpack.c.bf16 %v5669_v20, %v5667_v53  ;;  %v5198_v16 = vmul.f32 %v8045_v38, %v11998_v10  ;;  %8048 = vrcp.f32 %v12012_v33  ;;  %v5194_v18 = vor.u32 1.1754944e-38, %v5193_v12 }
 0xb7e   : >> { %v5186_v47 = vadd.f32 %v12000_v14, %v5185_v2  ;;  %vm5203_vm9 = vweird.f32 %v8045_v38  ;;  %vm5217_vm12 = vweird.f32 %v5032_v44  ;;  %vm12037_vm13 = vcmp.eq.f32.partialorder %v5221_v60, 8.507059e+37 }
 0xb7f   : >> { %5925 = vmatmul.bf16.gmra.mxu0 %v5705_v58  ;;  %v8047_v41 = vpop.eup %8046  ;;  %v5199_v25 = vsub.f32 1.0, %v5198_v16  ;;  %vm12049_vm15 = vmor %vm5202_vm8, %vm5203_vm9  ;;  %v5224_v1 = vor.u32 1.1754944e-38, %v5223_v29  ;;  %v5236_v53 = vand.u32 2147483647, %v12012_v33  ;;  %v5238_v20 = vand.u32 2147483648, %v12012_v33 }
 0xb80   : >> { %v5213_v30 = vmul.f32 %v8047_v41, %v5032_v44  ;;  %v5190_v0 = vsel %vm12022_vm6, %v12000_v14, %v5186_v47  ;;  %vm5218_vm11 = vweird.f32 %v8047_v41  ;;  %vm5207_vm2 = vcmp.eq.f32.partialorder %v5206_v59, 8.507059e+37 }
 0xb81   : >> { %v5200_v56 = vmul.f32 %v8045_v38, %v5199_v25  ;;  %v5195_v44 = vsel %vm12026_vm7, %v5194_v18, %v5190_v0  ;;  %vm5219_vm0 = vmor %vm5217_vm12, %vm5218_vm11  ;;  %v5209_v21 = vor.u32 1.1754944e-38, %v5208_v6  ;;  %vm5232_vm3 = vweird.f32 %v12012_v33 }
 0xb82   : >> { %v5214_v19 = vsub.f32 1.0, %v5213_v30  ;;  %v5670_v12 = vmul.f32 %v5195_v44, %v11870_v43  ;;  %vm5237_vm5 = vcmp.eq.f32.partialorder %v5236_v53, 8.507059e+37  ;;  %v4525_v7 = vsub.f32 1.5, %v4524_v55 }
 0xb83   : >> { %v8049_v26 = vpop.eup %8048  ;;  %v5201_v22 = vadd.f32 %v8045_v38, %v5200_v56  ;;  %vm4528_vm6 = vweird.f32 %v11957_v62  ;;  %vm4527_vm7 = vweird.f32 %v11815_v34 }
 0xb84   : >> { %v5215_v51 = vmul.f32 %v8047_v41, %v5214_v19  ;;  %v5228_v40 = vmul.f32 %v8049_v26, %v12012_v33  ;;  %vm5233_vm1 = vweird.f32 %v8049_v26  ;;  %vm4529_vm8 = vmor %vm4527_vm7, %vm4528_vm6 }
 0xb85   : >> { %v5205_v2 = vsel %vm12049_vm15, %v8045_v38, %v5201_v22  ;;  %vm5234_vm4 = vmor %vm5232_vm3, %vm5233_vm1  ;;  %v5239_v38 = vor.u32 1.1754944e-38, %v5238_v20 }
 0xb86   : >> { %v5216_v49 = vadd.f32 %v8047_v41, %v5215_v51  ;;  %v5229_v24 = vsub.f32 1.0, %v5228_v40  ;;  %v5210_v56 = vsel %vm5207_vm2, %v5209_v21, %v5205_v2 }
 0xb87   : >> { %v5671_v19 = vmul.f32 %v5210_v56, %v11926_v42 }
 0xb88   : >> { %v5220_v58 = vsel %vm5219_vm0, %v8047_v41, %v5216_v49  ;;  %v5230_v16 = vmul.f32 %v8049_v26, %v5229_v24 }
 0xb89   : >> { %v5225_v47 = vsel %vm12037_vm13, %v5224_v1, %v5220_v58  ;;  %v12083_v1 = vld [vmem:[%s11229_s5] ss:$0 sm:$0xff] }
 0xb8a   : >> { %v5672_v25 = vmul.f32 %v5225_v47, %v11941_v57  ;;  %v5231_v30 = vadd.f32 %v8049_v26, %v5230_v16  ;;  %v4526_v57 = vmul.f32 %v11957_v62, %v4525_v7 }
 0xb8b   : >> { %v4328_v27 = vpop.xlane.xlu0 %4327 }
 0xb8c   : >> { %v4356_v10 = vmul.f32 %v4328_v27, %v13742_v15  ;;  %v5235_v41 = vsel %vm5234_vm4, %v8049_v26, %v5231_v30  ;;  %v5706_v60 = vpack.c.bf16 %v5672_v25, %v5670_v12  ;;  %v4530_v42 = vsel %vm4529_vm8, %v11957_v62, %v4526_v57 }
 0xb8d   : >> { %v5240_v31 = vsel %vm5237_vm5, %v5239_v38, %v5235_v41  ;;  %v4595_v59 = vmul.f32 %v4530_v42, %v11518_v23 }
 0xb8e   : >> { %v4376_v61 = vadd.f32 1e-05, %v4356_v10  ;;  %v5673_v29 = vmul.f32 %v5240_v31, %v11966_v52  ;;  %5871 = vmatmul.bf16.gmra.mxu2 %v5706_v60 }
 0xb8f   : >> { %v4618_v24 = vmul.f32 %v12083_v1, %v4595_v59 }
 0xb90   : >> { %8050 = vrsqrt.f32 %v4376_v61  ;;  %v5707_v43 = vpack.c.bf16 %v5673_v29, %v5671_v19  ;;  %vm4537_vm11 = vweird.f32 %v4376_v61 }
 0xb92   : >> { %5930 = vmatmul.bf16.gmra.mxu0 %v5707_v43 }
 0xb93   : >> { %v4331_v18 = vpop.xlane.xlu2 %4330 }
 0xb94   : >> { %v4357_v55 = vmul.f32 %v4331_v18, %v13742_v15 }
 0xb96   : >> { %v8051_v33 = vpop.eup %8050  ;;  %v12077_v6 = vadd.f32 1e-05, %v4357_v55 }
 0xb97   : >> { %v4532_v0 = vmul.f32 %v8051_v33, %v4376_v61  ;;  %vm4538_vm9 = vweird.f32 %v8051_v33 }
 0xb98   : >> { %vm4539_vm12 = vmor %vm4537_vm11, %vm4538_vm9  ;;  %8052 = vrsqrt.f32 %v12077_v6  ;;  %vm4547_vm4 = vweird.f32 %v12077_v6 }
 0xb99   : >> { %v4533_v26 = vmul.f32 %v8051_v33, %v4532_v0 }
 0xb9b   : >> { %v4534_v22 = vmul.f32 0.5, %v4533_v26 }
 0xb9c   : >> { %v4768_v52 = vpop.f32.mrf.mxu1 }
 0xb9d   : >> { %v4535_v51 = vsub.f32 1.5, %v4534_v22  ;;  %v12074_v40 = vadd.f32 %v4768_v52, %v11641_v4 }
 0xb9e   : >> { %v12100_v21 = vpop.eup %8052 }
 0xb9f   : >> { %v4536_v13 = vmul.f32 %v8051_v33, %v4535_v51  ;;  %v7118_v34 = vmul.f32 -1.702, %v12074_v40  ;;  %v4542_v41 = vmul.f32 %v12100_v21, %v12077_v6  ;;  %vm4548_vm1 = vweird.f32 %v12100_v21 }
 0xba1   : >> { %v4540_v27 = vsel %vm4539_vm12, %v8051_v33, %v4536_v13  ;;  %v4966_v62 = vmul.f32 1.442695, %v7118_v34  ;;  %v4543_v19 = vmul.f32 %v12100_v21, %v4542_v41 }
 0xba2   : >> { %v4596_v14 = vmul.f32 %v4540_v27, %v11569_v11  ;;  %v4827_v49 = vpop.f32.mrf.mxu3  ;;  %v12095_v11 = vld [vmem:[%s11237_s27] ss:$0 sm:$0xff] }
 0xba3   : >> { %8054 = vpow2.f32 %v4966_v62  ;;  %v12087_v23 = vadd.f32 %v4827_v49, %v11672_v37  ;;  %v4641_v2 = vadd.f32 %v12095_v11, %v4618_v24  ;;  %v4544_v18 = vmul.f32 0.5, %v4543_v19 }
 0xba4   : >> { %v4770_v10 = vpop.f32.mrf.mxu1  ;;  %v4619_v44 = vmul.f32 %v12083_v1, %v4596_v14 }
 0xba5   : >> { %v7119_v53 = vmul.f32 -1.702, %v12087_v23  ;;  %v12092_v20 = vadd.f32 %v4770_v10, %v11641_v4  ;;  %v4545_v52 = vsub.f32 1.5, %v4544_v18 }
 0xba6   : >> { %v4642_v58 = vadd.f32 %v12095_v11, %v4619_v44 }
 0xba7   : >> { %v4968_v16 = vmul.f32 1.442695, %v7119_v53  ;;  %v7120_v61 = vmul.f32 -1.702, %v12092_v20  ;;  %v12123_v44 = vmul.f32 %v12100_v21, %v4545_v52 }
 0xba8   : >> { %v4654_v47 = vpack.c.bf16 %v4642_v58, %v4641_v2 }
 0xba9   : >> { %v8055_v12 = vpop.eup %8054  ;;  %8056 = vpow2.f32 %v4968_v16  ;;  %v4970_v25 = vmul.f32 1.442695, %v7120_v61 }
 0xbaa   : >> { %v5034_v30 = vadd.f32 1.0, %v8055_v12  ;;  %7093 = vmatmul.msk.bf16.gmra.mxu1 %vm889_vm10, %v4654_v47  ;;  %v4829_v56 = vpop.f32.mrf.mxu3  ;;  %7103 = vmatmul.msk.bf16.gmra.mxu3 %vm889_vm10, %v4654_v47 }
 0xbab   : >> { %8058 = vpow2.f32 %v4970_v25  ;;  %v12105_v38 = vadd.f32 %v4829_v56, %v11672_v37 }
 0xbac   : >> { %8060 = vrcp.f32 %v5034_v30  ;;  %v5251_v59 = vand.u32 2147483647, %v5034_v30  ;;  %v5253_v27 = vand.u32 2147483648, %v5034_v30  ;;  %vm5247_vm15 = vweird.f32 %v5034_v30 }
 0xbad   : >> { %v7121_v60 = vmul.f32 -1.702, %v12105_v38 }
 0xbae   : >> { %vm12125_vm0 = vcmp.eq.f32.partialorder %v5251_v59, 8.507059e+37  ;;  %v5254_v47 = vor.u32 1.1754944e-38, %v5253_v27 }
 0xbaf   : >> { %v8057_v7 = vpop.eup %8056  ;;  %v4972_v31 = vmul.f32 1.442695, %v7121_v60 }
 0xbb0   : >> { %v12111_v29 = vadd.f32 1.0, %v8057_v7 }
 0xbb1   : >> { %v8059_v33 = vpop.eup %8058  ;;  %8062 = vpow2.f32 %v4972_v31 }
 0xbb2   : >> { %v8061_v43 = vpop.eup %8060  ;;  %8064 = vrcp.f32 %v12111_v29  ;;  %v5036_v0 = vadd.f32 1.0, %v8059_v33  ;;  %vm5262_vm6 = vweird.f32 %v12111_v29  ;;  %v5266_v33 = vand.u32 2147483647, %v12111_v29 }
 0xbb3   : >> { %v5243_v57 = vmul.f32 %v8061_v43, %v5034_v30  ;;  %vm5248_vm13 = vweird.f32 %v8061_v43 }
 0xbb4   : >> { %8066 = vrcp.f32 %v5036_v0  ;;  %vm12133_vm2 = vmor %vm5247_vm15, %vm5248_vm13  ;;  %v5281_v25 = vand.u32 2147483647, %v5036_v0  ;;  %v5283_v41 = vand.u32 2147483648, %v5036_v0  ;;  %vm5277_vm8 = vweird.f32 %v5036_v0 }
 0xbb5   : >> { %v5244_v26 = vsub.f32 1.0, %v5243_v57  ;;  %vm5267_vm13 = vcmp.eq.f32.partialorder %v5266_v33, 8.507059e+37 }
 0xbb6   : >> { %v4334_v34 = vpop.xlane.xlu1 %4333  ;;  %vm5282_vm9 = vcmp.eq.f32.partialorder %v5281_v25, 8.507059e+37  ;;  %v5284_v52 = vor.u32 1.1754944e-38, %v5283_v41 }
 0xbb7   : >> { %v8063_v55 = vpop.eup %8062  ;;  %v5245_v42 = vmul.f32 %v8061_v43, %v5244_v26  ;;  %v4358_v24 = vmul.f32 %v4334_v34, %v13742_v15 }
 0xbb8   : >> { %v12114_v22 = vpop.eup %8064  ;;  %v12116_v51 = vadd.f32 1.0, %v8063_v55  ;;  %v4340_v10 = vpop.xlane.xlu2 %4339 }
 0xbb9   : >> { %v5258_v13 = vmul.f32 %v12114_v22, %v12111_v29  ;;  %v5246_v14 = vadd.f32 %v8061_v43, %v5245_v42  ;;  %v12130_v16 = vadd.f32 1e-05, %v4358_v24  ;;  %v4360_v56 = vmul.f32 %v4340_v10, %v13742_v15 }
 0xbba   : >> { %8068 = vrcp.f32 %v12116_v51  ;;  %v8067_v62 = vpop.eup %8066  ;;  %vm5263_vm3 = vweird.f32 %v12114_v22  ;;  %v5296_v27 = vand.u32 2147483647, %v12116_v51  ;;  %vm5292_vm15 = vweird.f32 %v12116_v51 }
 0xbbb   : >> { %v5259_v49 = vsub.f32 1.0, %v5258_v13  ;;  %v5273_v53 = vmul.f32 %v8067_v62, %v5036_v0  ;;  %v5250_v30 = vsel %vm12133_vm2, %v8061_v43, %v5246_v14  ;;  %8070 = vrsqrt.f32 %v12130_v16  ;;  %vm12150_vm7 = vmor %vm5262_vm6, %vm5263_vm3 }
 0xbbc   : >> { %vm5278_vm5 = vweird.f32 %v8067_v62  ;;  %v12144_v19 = vadd.f32 1e-05, %v4360_v56  ;;  %v5268_v43 = vand.u32 2147483648, %v12111_v29  ;;  %v5255_v42 = vsel %vm12125_vm0, %v5254_v47, %v5250_v30  ;;  %vm4549_vm2 = vmor %vm4547_vm4, %vm4548_vm1 }
 0xbbd   : >> { %v5260_v58 = vmul.f32 %v12114_v22, %v5259_v49  ;;  %v5274_v12 = vsub.f32 1.0, %v5273_v53  ;;  %v4337_v18 = vpop.xlane.xlu0 %4336  ;;  %vm5279_vm11 = vmor %vm5277_vm8, %vm5278_vm5  ;;  %v5298_v0 = vand.u32 2147483648, %v12116_v51  ;;  %v5674_v53 = vmul.f32 %v5255_v42, %v12074_v40 }
 0xbbe   : >> { %8072 = vrsqrt.f32 %v12144_v19  ;;  %v4359_v29 = vmul.f32 %v4337_v18, %v13742_v15  ;;  %v5269_v2 = vor.u32 1.1754944e-38, %v5268_v43  ;;  %vm5297_vm3 = vcmp.eq.f32.partialorder %v5296_v27, 8.507059e+37 }
 0xbbf   : >> { %v5261_v7 = vadd.f32 %v12114_v22, %v5260_v58  ;;  %v5275_v31 = vmul.f32 %v8067_v62, %v5274_v12  ;;  %v5299_v47 = vor.u32 1.1754944e-38, %v5298_v0  ;;  %vm4557_vm1 = vweird.f32 %v12130_v16 }
 0xbc0   : >> { %v8069_v60 = vpop.eup %8068  ;;  %v4379_v10 = vadd.f32 1e-05, %v4359_v29 }
 0xbc1   : >> { %v5288_v57 = vmul.f32 %v8069_v60, %v12116_v51  ;;  %v5276_v55 = vadd.f32 %v8067_v62, %v5275_v31  ;;  %v5265_v13 = vsel %vm12150_vm7, %v12114_v22, %v5261_v7  ;;  %v8071_v14 = vpop.eup %8070  ;;  %vm5293_vm12 = vweird.f32 %v8069_v60 }
 0xbc2   : >> { %v4552_v15 = vmul.f32 %v8071_v14, %v12130_v16  ;;  %8074 = vrsqrt.f32 %v4379_v10  ;;  %vm5294_vm0 = vmor %vm5292_vm15, %vm5293_vm12  ;;  %v4550_v51 = vsel %vm4549_vm2, %v12100_v21, %v12123_v44  ;;  %vm4558_vm5 = vweird.f32 %v8071_v14 }
 0xbc3   : >> { %v5289_v59 = vsub.f32 1.0, %v5288_v57  ;;  %v5280_v34 = vsel %vm5279_vm11, %v8067_v62, %v5276_v55  ;;  %v5270_v62 = vsel %vm5267_vm13, %v5269_v2, %v5265_v13  ;;  %v4597_v43 = vmul.f32 %v4550_v51, %v11580_v5  ;;  %vm4559_vm4 = vmor %vm4557_vm1, %vm4558_vm5 }
 0xbc4   : >> { %v5285_v49 = vsel %vm5282_vm9, %v5284_v52, %v5280_v34  ;;  %v12167_v22 = vpop.eup %8072  ;;  %v4553_v12 = vmul.f32 %v8071_v14, %v4552_v15  ;;  %v5675_v41 = vmul.f32 %v5270_v62, %v12087_v23  ;;  %vm4567_vm8 = vweird.f32 %v4379_v10 }
 0xbc5   : >> { %v5290_v24 = vmul.f32 %v8069_v60, %v5289_v59  ;;  %v5676_v58 = vmul.f32 %v5285_v49, %v12092_v20  ;;  %v4572_v20 = vmul.f32 %v12167_v22, %v12144_v19  ;;  %v4620_v5 = vmul.f32 %v12083_v1, %v4597_v43 }
 0xbc6   : >> { %v4554_v30 = vmul.f32 0.5, %v4553_v12  ;;  %v4773_v6 = vpop.f32.mrf.mxu1  ;;  %vm4578_vm7 = vweird.f32 %v12167_v22  ;;  %vm4577_vm11 = vweird.f32 %v12144_v19 }
 0xbc7   : >> { %v5291_v61 = vadd.f32 %v8069_v60, %v5290_v24  ;;  %v5708_v25 = vpack.c.bf16 %v5676_v58, %v5674_v53  ;;  %v4573_v31 = vmul.f32 %v12167_v22, %v4572_v20  ;;  %v12182_v57 = vadd.f32 %v4773_v6, %v11641_v4  ;;  %vm4579_vm12 = vmor %vm4577_vm11, %vm4578_vm7 }
 0xbc8   : >> { %v4555_v33 = vsub.f32 1.5, %v4554_v30 }
 0xbc9   : >> { %v5295_v40 = vsel %vm5294_vm0, %v8069_v60, %v5291_v61  ;;  %5876 = vmatmul.bf16.gmra.mxu2 %v5708_v25  ;;  %v8075_v60 = vpop.eup %8074  ;;  %v4574_v44 = vmul.f32 0.5, %v4573_v31  ;;  %v7122_v23 = vmul.f32 -1.702, %v12182_v57 }
 0xbca   : >> { %v5300_v56 = vsel %vm5297_vm3, %v5299_v47, %v5295_v40  ;;  %v4556_v21 = vmul.f32 %v8071_v14, %v4555_v33  ;;  %v4562_v26 = vmul.f32 %v8075_v60, %v4379_v10  ;;  %vm4568_vm6 = vweird.f32 %v8075_v60 }
 0xbcb   : >> { %v5677_v7 = vmul.f32 %v5300_v56, %v12105_v38  ;;  %v4974_v52 = vmul.f32 1.442695, %v7122_v23  ;;  %v4575_v59 = vsub.f32 1.5, %v4574_v44  ;;  %vm4569_vm9 = vmor %vm4567_vm8, %vm4568_vm6 }
 0xbcc   : >> { %v4560_v38 = vsel %vm4559_vm4, %v8071_v14, %v4556_v21  ;;  %v4563_v55 = vmul.f32 %v8075_v60, %v4562_v26  ;;  %v4832_v13 = vpop.f32.mrf.mxu3 }
 0xbcd   : >> { %v5709_v18 = vpack.c.bf16 %v5677_v7, %v5675_v41  ;;  %v4598_v42 = vmul.f32 %v4560_v38, %v11670_v54  ;;  %8076 = vpow2.f32 %v4974_v52  ;;  %v12189_v34 = vadd.f32 %v4832_v13, %v11672_v37 }
 0xbce   : >> { %v4564_v29 = vmul.f32 0.5, %v4563_v55  ;;  %v4775_v0 = vpop.f32.mrf.mxu1  ;;  %v4643_v54 = vadd.f32 %v12095_v11, %v4620_v5  ;;  %v4576_v53 = vmul.f32 %v12167_v22, %v4575_v59 }
 0xbcf   : >> { %5935 = vmatmul.bf16.gmra.mxu0 %v5709_v18  ;;  %v4621_v16 = vmul.f32 %v12083_v1, %v4598_v42  ;;  %v7123_v14 = vmul.f32 -1.702, %v12189_v34  ;;  %v12194_v49 = vadd.f32 %v4775_v0, %v11641_v4 }
 0xbd0   : >> { %v4565_v27 = vsub.f32 1.5, %v4564_v29  ;;  %v4580_v25 = vsel %vm4579_vm12, %v12167_v22, %v4576_v53 }
 0xbd1   : >> { %v4644_v24 = vadd.f32 %v12095_v11, %v4621_v16  ;;  %v4976_v58 = vmul.f32 1.442695, %v7123_v14  ;;  %v7124_v15 = vmul.f32 -1.702, %v12194_v49  ;;  %v4600_v56 = vmul.f32 %v4580_v25, %v11679_v63 }
 0xbd2   : >> { %v4566_v2 = vmul.f32 %v8075_v60, %v4565_v27 }
 0xbd3   : >> { %v4655_v61 = vpack.c.bf16 %v4644_v24, %v4643_v54  ;;  %v8077_v47 = vpop.eup %8076  ;;  %8078 = vpow2.f32 %v4976_v58  ;;  %v4978_v12 = vmul.f32 1.442695, %v7124_v15  ;;  %v4623_v43 = vmul.f32 %v12083_v1, %v4600_v56 }
 0xbd4   : >> { %v4570_v62 = vsel %vm4569_vm9, %v8075_v60, %v4566_v2  ;;  %v12205_v40 = vadd.f32 1.0, %v8077_v47  ;;  %v4834_v10 = vpop.f32.mrf.mxu3 }
 0xbd5   : >> { %7094 = vmatmul.msk.bf16.gmra.mxu1 %vm889_vm10, %v4655_v61  ;;  %7104 = vmatmul.msk.bf16.gmra.mxu3 %vm889_vm10, %v4655_v61  ;;  %v4599_v20 = vmul.f32 %v4570_v62, %v11708_v36  ;;  %8080 = vpow2.f32 %v4978_v12  ;;  %v12209_v51 = vadd.f32 %v4834_v10, %v11672_v37 }
 0xbd6   : >> { %8082 = vrcp.f32 %v12205_v40  ;;  %v4778_v19 = vpop.f32.mrf.mxu1  ;;  %v5313_v13 = vand.u32 2147483648, %v12205_v40  ;;  %v5311_v14 = vand.u32 2147483647, %v12205_v40  ;;  %vm5307_vm13 = vweird.f32 %v12205_v40 }
 0xbd7   : >> { %v7125_v30 = vmul.f32 -1.702, %v12209_v51  ;;  %v12215_v41 = vadd.f32 %v4778_v19, %v11641_v4  ;;  %v4622_v36 = vmul.f32 %v12083_v1, %v4599_v20  ;;  %v4646_v1 = vadd.f32 %v12095_v11, %v4623_v43 }
 0xbd8   : >> { %v5314_v47 = vor.u32 1.1754944e-38, %v5313_v13  ;;  %vm12260_vm0 = vcmp.eq.f32.partialorder %v5311_v14, 8.507059e+37 }
 0xbd9   : >> { %v8079_v22 = vpop.eup %8078  ;;  %v4980_v7 = vmul.f32 1.442695, %v7125_v30  ;;  %v7126_v31 = vmul.f32 -1.702, %v12215_v41  ;;  %v4645_v26 = vadd.f32 %v12095_v11, %v4622_v36 }
 0xbda   : >> { %v12219_v33 = vadd.f32 1.0, %v8079_v22 }
 0xbdb   : >> { %v8081_v6 = vpop.eup %8080  ;;  %8084 = vpow2.f32 %v4980_v7  ;;  %v4982_v60 = vmul.f32 1.442695, %v7126_v31  ;;  %v4656_v59 = vpack.c.bf16 %v4646_v1, %v4645_v26 }
 0xbdc   : >> { %v12222_v18 = vpop.eup %8082  ;;  %8086 = vrcp.f32 %v12219_v33  ;;  %v4837_v63 = vpop.f32.mrf.mxu3  ;;  %v12227_v44 = vadd.f32 1.0, %v8081_v6  ;;  %v5328_v54 = vand.u32 2147483648, %v12219_v33  ;;  %v5326_v19 = vand.u32 2147483647, %v12219_v33 }
 0xbdd   : >> { %v5303_v21 = vmul.f32 %v12222_v18, %v12205_v40  ;;  %8088 = vpow2.f32 %v4982_v60  ;;  %v12231_v23 = vadd.f32 %v4837_v63, %v11672_v37  ;;  %vm5308_vm15 = vweird.f32 %v12222_v18 }
 0xbde   : >> { %v4780_v38 = vpop.f32.mrf.mxu1  ;;  %8090 = vrcp.f32 %v12227_v44  ;;  %v5341_v24 = vand.u32 2147483647, %v12227_v44  ;;  %v5343_v53 = vand.u32 2147483648, %v12227_v44  ;;  %v12265_v56 = vor.u32 1.1754944e-38, %v5328_v54  ;;  %vm12289_vm6 = vmor %vm5307_vm13, %vm5308_vm15 }
 0xbdf   : >> { %v7127_v55 = vmul.f32 -1.702, %v12231_v23  ;;  %v5304_v52 = vsub.f32 1.0, %v5303_v21  ;;  %v12237_v5 = vadd.f32 %v4780_v38, %v11641_v4  ;;  %vm5322_vm2 = vweird.f32 %v12219_v33 }
 0xbe0   : >> { %vm5337_vm3 = vweird.f32 %v12227_v44  ;;  %vm12270_vm5 = vcmp.eq.f32.partialorder %v5341_v24, 8.507059e+37  ;;  %v5344_v31 = vor.u32 1.1754944e-38, %v5343_v53  ;;  %vm5327_vm15 = vcmp.eq.f32.partialorder %v5326_v19, 8.507059e+37 }
 0xbe1   : >> { %v8085_v42 = vpop.eup %8084  ;;  %v4984_v27 = vmul.f32 1.442695, %v7127_v55  ;;  %v5305_v58 = vmul.f32 %v12222_v18, %v5304_v52  ;;  %v7128_v61 = vmul.f32 -1.702, %v12237_v5 }
 0xbe2   : >> { %v12239_v29 = vpop.eup %8086  ;;  %v12242_v16 = vadd.f32 1.0, %v8085_v42 }
 0xbe3   : >> { %v8089_v0 = vpop.eup %8088  ;;  %v5318_v11 = vmul.f32 %v12239_v29, %v12219_v33  ;;  %v5306_v36 = vadd.f32 %v12222_v18, %v5305_v58  ;;  %v4986_v6 = vmul.f32 1.442695, %v7128_v61  ;;  %vm5323_vm4 = vweird.f32 %v12239_v29  ;;  %v12307_v58 = vld [vmem:[%s12047_s15] ss:$0 sm:$0xff] }
 0xbe4   : >> { %8092 = vrcp.f32 %v12242_v16  ;;  %v8091_v2 = vpop.eup %8090  ;;  %v12254_v15 = vadd.f32 1.0, %v8089_v0  ;;  %v4839_v62 = vpop.f32.mrf.mxu3  ;;  %v5356_v52 = vand.u32 2147483647, %v12242_v16  ;;  %vm5352_vm8 = vweird.f32 %v12242_v16  ;;  %vm12326_vm12 = vmor %vm5322_vm2, %vm5323_vm4 }
 0xbe5   : >> { %7095 = vmatmul.msk.bf16.gmra.mxu1 %vm889_vm10, %v4656_v59  ;;  %7105 = vmatmul.msk.bf16.gmra.mxu3 %vm889_vm10, %v4656_v59  ;;  %8094 = vpow2.f32 %v4984_v27  ;;  %v5319_v12 = vsub.f32 1.0, %v5318_v11  ;;  %v5333_v25 = vmul.f32 %v8091_v2, %v12227_v44  ;;  %v12276_v60 = vadd.f32 %v4839_v62, %v11672_v37 }
 0xbe6   : >> { %v4783_v10 = vpop.f32.mrf.mxu1  ;;  %8096 = vrcp.f32 %v12254_v15  ;;  %vm5338_vm1 = vweird.f32 %v8091_v2  ;;  %v5358_v27 = vand.u32 2147483648, %v12242_v16  ;;  %v5310_v54 = vsel %vm12289_vm6, %v12222_v18, %v5306_v36 }
 0xbe7   : >> { %v5334_v22 = vsub.f32 1.0, %v5333_v25  ;;  %v12279_v43 = vadd.f32 %v4783_v10, %v11641_v4  ;;  %v5320_v26 = vmul.f32 %v12239_v29, %v5319_v12  ;;  %8098 = vpow2.f32 %v4986_v6  ;;  %vm5339_vm7 = vmor %vm5337_vm3, %vm5338_vm1 }
 0xbe8   : >> { %v7129_v14 = vmul.f32 -1.702, %v12276_v60  ;;  %vm12318_vm11 = vcmp.eq.f32.partialorder %v5356_v52, 8.507059e+37  ;;  %v5371_v33 = vand.u32 2147483647, %v12254_v15  ;;  %vm5367_vm2 = vweird.f32 %v12254_v15 }
 0xbe9   : >> { %v5335_v38 = vmul.f32 %v8091_v2, %v5334_v22  ;;  %v7130_v24 = vmul.f32 -1.702, %v12279_v43  ;;  %v5321_v61 = vadd.f32 %v12239_v29, %v5320_v26 }
 0xbea   : >> { %v5921_v30 = vpop.f32.mrf.mxu0  ;;  %v8093_v21 = vpop.eup %8092  ;;  %vm12373_vm3 = vcmp.eq.f32.partialorder %v5371_v33, 8.507059e+37 }
 0xbeb   : >> { %v5862_v63 = vpop.f32.mrf.mxu2  ;;  %v8095_v55 = vpop.eup %8094  ;;  %v5348_v42 = vmul.f32 %v8093_v21, %v12242_v16  ;;  %v5336_v13 = vadd.f32 %v8091_v2, %v5335_v38  ;;  %vm5353_vm9 = vweird.f32 %v8093_v21  ;;  %v4990_v20 = vmul.f32 1.442695, %v7130_v24 }
 0xbec   : >> { %v5922_v1 = vadd.f32 %v5921_v30, %v5862_v63  ;;  %v12294_v0 = vadd.f32 1.0, %v8095_v55  ;;  %v12297_v11 = vpop.eup %8096  ;;  %v4842_v25 = vpop.f32.mrf.mxu3  ;;  %v4988_v30 = vmul.f32 1.442695, %v7129_v14  ;;  %v5325_v38 = vsel %vm12326_vm12, %v12239_v29, %v5321_v61  ;;  %vm5354_vm13 = vmor %vm5352_vm8, %vm5353_vm9 }
 0xbed   : >> { %v5349_v40 = vsub.f32 1.0, %v5348_v42  ;;  %v5340_v62 = vsel %vm5339_vm7, %v8091_v2, %v5336_v13  ;;  %v5363_v12 = vmul.f32 %v12297_v11, %v12254_v15  ;;  %v5359_v2 = vor.u32 1.1754944e-38, %v5358_v27  ;;  %v8099_v36 = vpop.eup %8098 }
 0xbee   : >> { %v5971_v53 = vadd.f32 %v5922_v1, %v11147_v3  ;;  %8100 = vrcp.f32 %v12294_v0  ;;  %v5345_v18 = vsel %vm12270_vm5, %v5344_v31, %v5340_v62  ;;  %v5315_v3 = vsel %vm12260_vm0, %v5314_v47, %v5310_v54  ;;  %v4785_v22 = vpop.f32.mrf.mxu1 }
 0xbef   : >> { %v5350_v44 = vmul.f32 %v8093_v21, %v5349_v40  ;;  %v5364_v6 = vsub.f32 1.0, %v5363_v12  ;;  %v5680_v1 = vmul.f32 %v5345_v18, %v12194_v49  ;;  %v12340_v55 = vadd.f32 1.0, %v8099_v36 }
 0xbf0   : >> { %v12331_v12 = vadd.f32 %v12307_v58, %v5971_v53   ;;  %8102 = vpow2.f32 %v4988_v30  ;;  %v12343_v52 = vadd.f32 %v4842_v25, %v11672_v37  ;;  %v12346_v59 = vadd.f32 %v4785_v22, %v11641_v4 }
 0xbf1   : >> { %v5351_v31 = vadd.f32 %v8093_v21, %v5350_v44  ;;  %8104 = vpow2.f32 %v4990_v20  ;;  %v5678_v29 = vmul.f32 %v5315_v3, %v12182_v57  ;;  %v5330_v16 = vsel %vm5327_vm15, %v12265_v56, %v5325_v38 }
 0xbf2   : >> { %v13822_v47 = vmov %v12331_v12  ;;  %v5923_v26 = vpop.f32.mrf.mxu0  ;;  %8106 = vrcp.f32 %v12340_v55  ;;  %v7131_v54 = vmul.f32 -1.702, %v12343_v52  ;;  %v7132_v19 = vmul.f32 -1.702, %v12346_v59 }
 0xbf3   : >> { %v5864_v63 = vpop.f32.mrf.mxu2  ;;  %v5355_v42 = vsel %vm5354_vm13, %v8093_v21, %v5351_v31  ;;  %v5365_v21 = vmul.f32 %v12297_v11, %v5364_v6  ;;  %v5710_v40 = vpack.c.bf16 %v5680_v1, %v5678_v29  ;;  %v5679_v53 = vmul.f32 %v5330_v16, %v12189_v34 }
 0xbf4   : >> { %v12348_v13 = vpop.eup %8100  ;;  %v5360_v49 = vsel %vm12318_vm11, %v5359_v2, %v5355_v42  ;;  %vm5368_vm0 = vweird.f32 %v12297_v11  ;;  %v5373_v57 = vand.u32 2147483648, %v12254_v15  ;;  %v4992_v56 = vmul.f32 1.442695, %v7131_v54  ;;  %v4844_v44 = vpop.f32.mrf.mxu3 }
 0xbf5   : >> { %v5378_v27 = vmul.f32 %v12348_v13, %v12294_v0  ;;  %v5681_v14 = vmul.f32 %v5360_v49, %v12209_v51  ;;  %v5366_v62 = vadd.f32 %v12297_v11, %v5365_v21  ;;  %5881 = vmatmul.bf16.gmra.mxu2 %v5710_v40  ;;  %v5924_v18 = vadd.f32 %v5923_v26, %v5864_v63  ;;  %vm12381_vm5 = vmor %vm5367_vm2, %vm5368_vm0 }
 0xbf6   : >> { %v8103_v24 = vpop.eup %8102  ;;  %8108 = vpow2.f32 %v4992_v56  ;;  %v4994_v22 = vmul.f32 1.442695, %v7132_v19  ;;  %v5374_v15 = vor.u32 1.1754944e-38, %v5373_v57  ;;  %vm5382_vm1 = vweird.f32 %v12294_v0 }
 0xbf7   : >> { %v8105_v61 = vpop.eup %8104  ;;  %v5379_v12 = vsub.f32 1.0, %v5378_v27  ;;  %v12368_v51 = vadd.f32 1.0, %v8103_v24  ;;  %v5711_v34 = vpack.c.bf16 %v5681_v14, %v5679_v53  ;;  %v12388_v31 = vadd.f32 %v4844_v44, %v11672_v37 }
 0xbf8   : >> { %v8107_v25 = vpop.eup %8106  ;;  %v12371_v3 = vadd.f32 1.0, %v8105_v61  ;;  %v5370_v6 = vsel %vm12381_vm5, %v12297_v11, %v5366_v62  ;;  %v5401_v26 = vand.u32 2147483647, %v12340_v55  ;;  %v5386_v38 = vand.u32 2147483647, %v12294_v0 }
 0xbf9   : >> { %v5393_v30 = vmul.f32 %v8107_v25, %v12340_v55  ;;  %8110 = vrcp.f32 %v12368_v51  ;;  %5940 = vmatmul.bf16.gmra.mxu0 %v5711_v34  ;;  %v5380_v20 = vmul.f32 %v12348_v13, %v5379_v12  ;;  %v5388_v1 = vand.u32 2147483648, %v12294_v0 }
 0xbfa   : >> { %8112 = vrcp.f32 %v12371_v3  ;;  %vm5397_vm4 = vweird.f32 %v12340_v55  ;;  %v5403_v42 = vand.u32 2147483648, %v12340_v55  ;;  %vm5383_vm6 = vweird.f32 %v12348_v13 }
 0xbfb   : >> { %v5867_v10 = vpop.f32.mrf.mxu2  ;;  %v5394_v63 = vsub.f32 1.0, %v5393_v30  ;;  %vm5398_vm7 = vweird.f32 %v8107_v25  ;;  %8114 = vpow2.f32 %v4994_v22  ;;  %v5375_v11 = vsel %vm12373_vm3, %v5374_v15, %v5370_v6  ;;  %vm12423_vm11 = vmor %vm5382_vm1, %vm5383_vm6 }
 0xbfc   : >> { %v5926_v36 = vpop.f32.mrf.mxu0  ;;  %v8109_v29 = vpop.eup %8108  ;;  %v5972_v16 = vadd.f32 %v5924_v18, %v11176_v17  ;;  %v7133_v21 = vmul.f32 -1.702, %v12388_v31  ;;  %v5381_v54 = vadd.f32 %v12348_v13, %v5380_v20  ;;  %vm5402_vm8 = vcmp.eq.f32.partialorder %v5401_v26, 8.507059e+37  ;;  %vm5399_vm9 = vmor %vm5397_vm4, %vm5398_vm7 }
 0xbfd   : >> { %v5395_v49 = vmul.f32 %v8107_v25, %v5394_v63  ;;  %v5927_v27 = vadd.f32 %v5926_v36, %v5867_v10  ;;  %v12405_v19 = vadd.f32 1.0, %v8109_v29  ;;  %v5404_v24 = vor.u32 1.1754944e-38, %v5403_v42 }
 0xbfe   : >> { %v12413_v17 = vadd.f32 %v12307_v58, %v5972_v16   ;;  %v4996_v56 = vmul.f32 1.442695, %v7133_v21  ;;  %v5682_v61 = vmul.f32 %v5375_v11, %v12215_v41  ;;  %v5416_v34 = vand.u32 2147483647, %v12368_v51 }
 0xbff   : >> { %v8111_v14 = vpop.eup %8110  ;;  %v5396_v33 = vadd.f32 %v8107_v25, %v5395_v49  ;;  %8116 = vrcp.f32 %v12405_v19  ;;  %v5418_v41 = vand.u32 2147483648, %v12368_v51  ;;  %v5385_v30 = vsel %vm12423_vm11, %v12348_v13, %v5381_v54 }
 0xc00   : >> { %v12407_v40 = vpop.eup %8112  ;;  %v5408_v53 = vmul.f32 %v8111_v14, %v12368_v51  ;;  %v13827_v57 = vmov %v12413_v17  ;;  %vm5413_vm12 = vweird.f32 %v8111_v14  ;;  %8118 = vpow2.f32 %v4996_v56 }
 0xc01   : >> { %v5400_v62 = vsel %vm5399_vm9, %v8107_v25, %v5396_v33  ;;  %v5423_v12 = vmul.f32 %v12407_v40, %v12371_v3  ;;  %v8115_v2 = vpop.eup %8114  ;;  %v5973_v15 = vadd.f32 %v5927_v27, %v11169_v39  ;;  %v5389_v6 = vor.u32 1.1754944e-38, %v5388_v1 }
 0xc02   : >> { %v5405_v18 = vsel %vm5402_vm8, %v5404_v24, %v5400_v62  ;;  %v5409_v44 = vsub.f32 1.0, %v5408_v53  ;;  %v12433_v7 = vadd.f32 1.0, %v8115_v2  ;;  %vm5387_vm13 = vcmp.eq.f32.partialorder %v5386_v38, 8.507059e+37 }
 0xc03   : >> { %v5869_v25 = vpop.f32.mrf.mxu2  ;;  %v5684_v22 = vmul.f32 %v5405_v18, %v12237_v5  ;;  %v5424_v36 = vsub.f32 1.0, %v5423_v12  ;;  %vm5412_vm15 = vweird.f32 %v12368_v51  ;;  %v5390_v5 = vsel %vm5387_vm13, %v5389_v6, %v5385_v30 }
 0xc04   : >> { %v5928_v10 = vpop.f32.mrf.mxu0  ;;  %v5410_v0 = vmul.f32 %v8111_v14, %v5409_v44  ;;  %8120 = vrcp.f32 %v12433_v7  ;;  %vm5414_vm0 = vmor %vm5412_vm15, %vm5413_vm12  ;;  %v5419_v42 = vor.u32 1.1754944e-38, %v5418_v41  ;;  %v12442_v49 = vadd.f32 %v12307_v58, %v5973_v15  }
 0xc05   : >> { %v5712_v20 = vpack.c.bf16 %v5684_v22, %v5682_v61  ;;  %v5929_v63 = vadd.f32 %v5928_v10, %v5869_v25  ;;  %v12438_v13 = vpop.eup %8116  ;;  %vm5417_vm2 = vcmp.eq.f32.partialorder %v5416_v34, 8.507059e+37  ;;  %v5425_v38 = vmul.f32 %v12407_v40, %v5424_v36 }
 0xc06   : >> { %v5411_v26 = vadd.f32 %v8111_v14, %v5410_v0  ;;  %v5438_v51 = vmul.f32 %v12438_v13, %v12405_v19  ;;  %v8119_v29 = vpop.eup %8118  ;;  %v5683_v54 = vmul.f32 %v5390_v5, %v12231_v23  ;;  %vm5428_vm3 = vweird.f32 %v12407_v40 }
 0xc07   : >> { %5886 = vmatmul.bf16.gmra.mxu2 %v5712_v20  ;;  %v5974_v39 = vadd.f32 %v5929_v63, %v11162_v45  ;;  %v12452_v27 = vadd.f32 1.0, %v8119_v29  ;;  %v5433_v24 = vand.u32 2147483648, %v12371_v3  ;;  %vm5427_vm5 = vweird.f32 %v12371_v3 }
 0xc08   : >> { %v5415_v1 = vsel %vm5414_vm0, %v8111_v14, %v5411_v26  ;;  %v5439_v33 = vsub.f32 1.0, %v5438_v51  ;;  %v5426_v14 = vadd.f32 %v12407_v40, %v5425_v38  ;;  %vm12462_vm1 = vmor %vm5427_vm5, %vm5428_vm3  ;;  %v5463_v18 = vand.u32 2147483648, %v12433_v7 }
 0xc09   : >> { %v5420_v11 = vsel %vm5417_vm2, %v5419_v42, %v5415_v1  ;;  %v12449_v17 = vadd.f32 %v12307_v58, %v5974_v39   ;;  %8122 = vrcp.f32 %v12452_v27  ;;  %v5434_v34 = vor.u32 1.1754944e-38, %v5433_v24 }
 0xc0a   : >> { %v5685_v21 = vmul.f32 %v5420_v11, %v12276_v60  ;;  %v8121_v45 = vpop.eup %8120  ;;  %v5431_v60 = vand.u32 2147483647, %v12371_v3  ;;  %v5440_v61 = vmul.f32 %v12438_v13, %v5439_v33  ;;  %v5430_v55 = vsel %vm12462_vm1, %v12407_v40, %v5426_v14 }
 0xc0b   : >> { %v13830_v16 = vmov %v12449_v17  ;;  %v5453_v53 = vmul.f32 %v8121_v45, %v12433_v7  ;;  %vm5458_vm4 = vweird.f32 %v8121_v45  ;;  %v5461_v3 = vand.u32 2147483647, %v12433_v7 }
 0xc0c   : >> { %v5713_v56 = vpack.c.bf16 %v5685_v21, %v5683_v54  ;;  %vm5432_vm6 = vcmp.eq.f32.partialorder %v5431_v60, 8.507059e+37  ;;  %vm5443_vm7 = vweird.f32 %v12438_v13  ;;  %vm5457_vm8 = vweird.f32 %v12433_v7 }
 0xc0d   : >> { %v5454_v62 = vsub.f32 1.0, %v5453_v53  ;;  %v5435_v2 = vsel %vm5432_vm6, %v5434_v34, %v5430_v55  ;;  %v5441_v30 = vadd.f32 %v12438_v13, %v5440_v61  ;;  %vm5442_vm9 = vweird.f32 %v12405_v19  ;;  %vm5459_vm11 = vmor %vm5457_vm8, %vm5458_vm4 }
 0xc0e   : >> { %5945 = vmatmul.bf16.gmra.mxu0 %v5713_v56  ;;  %v5448_v0 = vand.u32 2147483648, %v12405_v19  ;;  %v5464_v36 = vor.u32 1.1754944e-38, %v5463_v18  ;;  %v5446_v6 = vand.u32 2147483647, %v12405_v19  ;;  %vm5462_vm12 = vcmp.eq.f32.partialorder %v5461_v3, 8.507059e+37  ;;  %vm12486_vm13 = vmor %vm5442_vm9, %vm5443_vm7 }
 0xc0f   : >> { %v5931_v17 = vpop.f32.mrf.mxu0  ;;  %v5455_v41 = vmul.f32 %v8121_v45, %v5454_v62  ;;  %v8123_v25 = vpop.eup %8122  ;;  %v5686_v63 = vmul.f32 %v5435_v2, %v12279_v43  ;;  %v5476_v42 = vand.u32 2147483647, %v12452_v27  ;;  %v5478_v39 = vand.u32 2147483648, %v12452_v27 }
 0xc10   : >> { %v5468_v22 = vmul.f32 %v8123_v25, %v12452_v27  ;;  %v5445_v19 = vsel %vm12486_vm13, %v12438_v13, %v5441_v30  ;;  %vm5473_vm15 = vweird.f32 %v8123_v25  ;;  %v5449_v51 = vor.u32 1.1754944e-38, %v5448_v0 }
 0xc11   : >> { %v5872_v12 = vpop.f32.mrf.mxu2  ;;  %v5456_v40 = vadd.f32 %v8121_v45, %v5455_v41  ;;  %vm5447_vm0 = vcmp.eq.f32.partialorder %v5446_v6, 8.507059e+37  ;;  %vm5472_vm2 = vweird.f32 %v12452_v27  ;;  %v5479_v33 = vor.u32 1.1754944e-38, %v5478_v39 }
 0xc12   : >> { %v5932_v44 = vadd.f32 %v5931_v17, %v5872_v12  ;;  %v5450_v54 = vsel %vm5447_vm0, %v5449_v51, %v5445_v19  ;;  %vm5474_vm3 = vmor %vm5472_vm2, %vm5473_vm15  ;;  %vm5477_vm5 = vcmp.eq.f32.partialorder %v5476_v42, 8.507059e+37 }
 0xc13   : >> { %v5460_v7 = vsel %vm5459_vm11, %v8121_v45, %v5456_v40  ;;  %v5687_v24 = vmul.f32 %v5450_v54, %v12343_v52 }
 0xc14   : >> { %v5975_v10 = vadd.f32 %v5932_v44, %v11190_v46  ;;  %v5469_v46 = vsub.f32 1.0, %v5468_v22  ;;  %v5465_v5 = vsel %vm5462_vm12, %v5464_v36, %v5460_v7 }
 0xc15   : >> { %v5688_v1 = vmul.f32 %v5465_v5, %v12346_v59 }
 0xc16   : >> { %v12480_v18 = vadd.f32 %v12307_v58, %v5975_v10   ;;  %v5470_v38 = vmul.f32 %v8123_v25, %v5469_v46 }
 0xc17   : >> { %v5933_v20 = vpop.f32.mrf.mxu0  ;;  %v5714_v21 = vpack.c.bf16 %v5688_v1, %v5686_v63 }
 0xc18   : >> { %v13833_v15 = vmov %v12480_v18  ;;  %v5471_v11 = vadd.f32 %v8123_v25, %v5470_v38 }
 0xc19   : >> { %v5874_v43 = vpop.f32.mrf.mxu2  ;;  %5891 = vmatmul.bf16.gmra.mxu2 %v5714_v21 }
 0xc1a   : >> { %v5934_v29 = vadd.f32 %v5933_v20, %v5874_v43  ;;  %v5475_v14 = vsel %vm5474_vm3, %v8123_v25, %v5471_v11 }
 0xc1b   : >> { %v5480_v13 = vsel %vm5477_vm5, %v5479_v33, %v5475_v14 }
 0xc1c   : >> { %v5976_v45 = vadd.f32 %v5934_v29, %v11193_v50  ;;  %v5689_v53 = vmul.f32 %v5480_v13, %v12388_v31 }
 0xc1e   : >> { %v12499_v19 = vadd.f32 %v12307_v58, %v5976_v45   ;;  %v5715_v56 = vpack.c.bf16 %v5689_v53, %v5687_v24 }
 0xc20   : >> { %v13836_v59 = vmov %v12499_v19  ;;  %5950 = vmatmul.bf16.gmra.mxu0 %v5715_v56 }
 0xc27   : >> { %v4788_v17 = vpop.f32.mrf.mxu1 }
 0xc28   : >> { %v12504_v27 = vadd.f32 %v4788_v17, %v11641_v4 }
 0xc2a   : >> { %v7134_v60 = vmul.f32 -1.702, %v12504_v27 }
 0xc2c   : >> { %v4998_v50 = vmul.f32 1.442695, %v7134_v60 }
 0xc2d   : >> { %v4847_v23 = vpop.f32.mrf.mxu3 }
 0xc2e   : >> { %8124 = vpow2.f32 %v4998_v50  ;;  %v12508_v61 = vadd.f32 %v4847_v23, %v11672_v37 }
 0xc2f   : >> { %v4790_v62 = vpop.f32.mrf.mxu1 }
 0xc30   : >> { %v7135_v12 = vmul.f32 -1.702, %v12508_v61  ;;  %v12512_v52 = vadd.f32 %v4790_v62, %v11641_v4 }
 0xc32   : >> { %v5000_v31 = vmul.f32 1.442695, %v7135_v12  ;;  %v7136_v55 = vmul.f32 -1.702, %v12512_v52 }
 0xc34   : >> { %v8125_v18 = vpop.eup %8124  ;;  %8126 = vpow2.f32 %v5000_v31  ;;  %v5002_v44 = vmul.f32 1.442695, %v7136_v55 }
 0xc35   : >> { %v5050_v34 = vadd.f32 1.0, %v8125_v18  ;;  %v4849_v41 = vpop.f32.mrf.mxu3 }
 0xc36   : >> { %8128 = vpow2.f32 %v5002_v44  ;;  %v12516_v3 = vadd.f32 %v4849_v41, %v11672_v37 }
 0xc37   : >> { %8130 = vrcp.f32 %v5050_v34  ;;  %v5491_v42 = vand.u32 2147483647, %v5050_v34  ;;  %v5493_v38 = vand.u32 2147483648, %v5050_v34  ;;  %vm5487_vm4 = vweird.f32 %v5050_v34 }
 0xc38   : >> { %v7137_v25 = vmul.f32 -1.702, %v12516_v3 }
 0xc39   : >> { %vm12523_vm7 = vcmp.eq.f32.partialorder %v5491_v42, 8.507059e+37  ;;  %v5494_v24 = vor.u32 1.1754944e-38, %v5493_v38 }
 0xc3a   : >> { %v8127_v10 = vpop.eup %8126  ;;  %v5004_v2 = vmul.f32 1.442695, %v7137_v25 }
 0xc3b   : >> { %v5051_v30 = vadd.f32 1.0, %v8127_v10 }
 0xc3c   : >> { %v8129_v40 = vpop.eup %8128  ;;  %8132 = vpow2.f32 %v5004_v2 }
 0xc3d   : >> { %v8131_v22 = vpop.eup %8130  ;;  %8134 = vrcp.f32 %v5051_v30  ;;  %v5052_v36 = vadd.f32 1.0, %v8129_v40  ;;  %vm5502_vm11 = vweird.f32 %v5051_v30  ;;  %v5506_v53 = vand.u32 2147483647, %v5051_v30 }
 0xc3e   : >> { %v5483_v0 = vmul.f32 %v8131_v22, %v5050_v34  ;;  %vm5488_vm1 = vweird.f32 %v8131_v22  ;;  %v5508_v50 = vand.u32 2147483648, %v5051_v30 }
 0xc3f   : >> { %8136 = vrcp.f32 %v5052_v36  ;;  %v5521_v29 = vand.u32 2147483647, %v5052_v36  ;;  %vm12519_vm6 = vmor %vm5487_vm4, %vm5488_vm1  ;;  %v5523_v54 = vand.u32 2147483648, %v5052_v36  ;;  %vm5517_vm13 = vweird.f32 %v5052_v36 }
 0xc40   : >> { %v5484_v6 = vsub.f32 1.0, %v5483_v0  ;;  %vm5507_vm3 = vcmp.eq.f32.partialorder %v5506_v53, 8.507059e+37 }
 0xc41   : >> { %vm5522_vm15 = vcmp.eq.f32.partialorder %v5521_v29, 8.507059e+37  ;;  %v5524_v31 = vor.u32 1.1754944e-38, %v5523_v54 }
 0xc42   : >> { %v8133_v7 = vpop.eup %8132  ;;  %v5485_v20 = vmul.f32 %v8131_v22, %v5484_v6 }
 0xc43   : >> { %v8135_v46 = vpop.eup %8134  ;;  %v5053_v63 = vadd.f32 1.0, %v8133_v7 }
 0xc44   : >> { %v5498_v26 = vmul.f32 %v8135_v46, %v5051_v30  ;;  %v5486_v19 = vadd.f32 %v8131_v22, %v5485_v20  ;;  %vm5503_vm8 = vweird.f32 %v8135_v46 }
 0xc45   : >> { %8138 = vrcp.f32 %v5053_v63  ;;  %v8137_v5 = vpop.eup %8136  ;;  %vm12529_vm12 = vmor %vm5502_vm11, %vm5503_vm8  ;;  %v5536_v41 = vand.u32 2147483647, %v5053_v63  ;;  %v5538_v25 = vand.u32 2147483648, %v5053_v63  ;;  %vm5532_vm5 = vweird.f32 %v5053_v63 }
 0xc46   : >> { %v5499_v39 = vsub.f32 1.0, %v5498_v26  ;;  %v5513_v1 = vmul.f32 %v8137_v5, %v5052_v36  ;;  %v5490_v45 = vsel %vm12519_vm6, %v8131_v22, %v5486_v19  ;;  %vm5518_vm9 = vweird.f32 %v8137_v5 }
 0xc47   : >> { %v5495_v12 = vsel %vm12523_vm7, %v5494_v24, %v5490_v45  ;;  %vm5519_vm0 = vmor %vm5517_vm13, %vm5518_vm9  ;;  %v5509_v22 = vor.u32 1.1754944e-38, %v5508_v50  ;;  %vm5537_vm4 = vcmp.eq.f32.partialorder %v5536_v41, 8.507059e+37 }
 0xc48   : >> { %v5500_v43 = vmul.f32 %v8135_v46, %v5499_v39  ;;  %v5514_v51 = vsub.f32 1.0, %v5513_v1  ;;  %v5690_v40 = vmul.f32 %v5495_v12, %v12504_v27 }
 0xc4a   : >> { %v5501_v14 = vadd.f32 %v8135_v46, %v5500_v43  ;;  %v5515_v13 = vmul.f32 %v8137_v5, %v5514_v51 }
 0xc4b   : >> { %v8139_v33 = vpop.eup %8138 }
 0xc4c   : >> { %v5528_v56 = vmul.f32 %v8139_v33, %v5053_v63  ;;  %v5936_v17 = vpop.f32.mrf.mxu0  ;;  %v5516_v23 = vadd.f32 %v8137_v5, %v5515_v13  ;;  %v5877_v62 = vpop.f32.mrf.mxu2  ;;  %v5505_v44 = vsel %vm12529_vm12, %v8135_v46, %v5501_v14  ;;  %vm5533_vm2 = vweird.f32 %v8139_v33 }
 0xc4d   : >> { %v5937_v18 = vadd.f32 %v5936_v17, %v5877_v62  ;;  %v5510_v7 = vsel %vm5507_vm3, %v5509_v22, %v5505_v44  ;;  %vm5534_vm1 = vmor %vm5532_vm5, %vm5533_vm2  ;;  %v5539_v46 = vor.u32 1.1754944e-38, %v5538_v25 }
 0xc4e   : >> { %v5529_v55 = vsub.f32 1.0, %v5528_v56  ;;  %v5520_v34 = vsel %vm5519_vm0, %v8137_v5, %v5516_v23  ;;  %v5691_v27 = vmul.f32 %v5510_v7, %v12508_v61 }
 0xc4f   : >> { %v5525_v10 = vsel %vm5522_vm15, %v5524_v31, %v5520_v34  ;;  %v5977_v30 = vadd.f32 %v5937_v18, %v11209_v32 }
 0xc50   : >> { %v5530_v2 = vmul.f32 %v8139_v33, %v5529_v55  ;;  %v5692_v0 = vmul.f32 %v5525_v10, %v12512_v52 }
 0xc51   : >> { %v12541_v6 = vadd.f32 %v12307_v58, %v5977_v30  }
 0xc52   : >> { %v5531_v36 = vadd.f32 %v8139_v33, %v5530_v2  ;;  %v5716_v20 = vpack.c.bf16 %v5692_v0, %v5690_v40  ;;  %v4793_v39 = vpop.f32.mrf.mxu1 }
 0xc53   : >> { %v12546_v63 = vadd.f32 %v4793_v39, %v11641_v4 }
 0xc54   : >> { %v5535_v26 = vsel %vm5534_vm1, %v8139_v33, %v5531_v36  ;;  %v5938_v5 = vpop.f32.mrf.mxu0  ;;  %v5879_v32 = vpop.f32.mrf.mxu2  ;;  %5896 = vmatmul.bf16.gmra.mxu2 %v5716_v20 }
 0xc55   : >> { %v5540_v42 = vsel %vm5537_vm4, %v5539_v46, %v5535_v26  ;;  %v5939_v19 = vadd.f32 %v5938_v5, %v5879_v32  ;;  %v7138_v43 = vmul.f32 -1.702, %v12546_v63 }
 0xc56   : >> { %v5693_v52 = vmul.f32 %v5540_v42, %v12516_v3 }
 0xc57   : >> { %v5978_v1 = vadd.f32 %v5939_v19, %v11248_v48  ;;  %v5006_v29 = vmul.f32 1.442695, %v7138_v43 }
 0xc58   : >> { %v5717_v38 = vpack.c.bf16 %v5693_v52, %v5691_v27  ;;  %v4852_v11 = vpop.f32.mrf.mxu3 }
 0xc59   : >> { %v12551_v30 = vadd.f32 %v12307_v58, %v5978_v1   ;;  %8140 = vpow2.f32 %v5006_v29  ;;  %v12554_v61 = vadd.f32 %v4852_v11, %v11672_v37 }
 0xc5a   : >> { %5955 = vmatmul.bf16.gmra.mxu0 %v5717_v38  ;;  %v4795_v3 = vpop.f32.mrf.mxu1 }
 0xc5b   : >> { %v13843_v51 = vmov %v12551_v30  ;;  %v7139_v21 = vmul.f32 -1.702, %v12554_v61  ;;  %v12558_v54 = vadd.f32 %v4795_v3, %v11641_v4 }
 0xc5d   : >> { %v5008_v48 = vmul.f32 1.442695, %v7139_v21  ;;  %v7140_v33 = vmul.f32 -1.702, %v12558_v54 }
 0xc5f   : >> { %v8141_v45 = vpop.eup %8140  ;;  %8142 = vpow2.f32 %v5008_v48  ;;  %v5010_v14 = vmul.f32 1.442695, %v7140_v33 }
 0xc60   : >> { %v5054_v13 = vadd.f32 1.0, %v8141_v45  ;;  %v4854_v24 = vpop.f32.mrf.mxu3 }
 0xc61   : >> { %8144 = vpow2.f32 %v5010_v14  ;;  %v12562_v53 = vadd.f32 %v4854_v24, %v11672_v37 }
 0xc62   : >> { %8146 = vrcp.f32 %v5054_v13  ;;  %v4798_v56 = vpop.f32.mrf.mxu1  ;;  %v5551_v36 = vand.u32 2147483647, %v5054_v13  ;;  %v5553_v7 = vand.u32 2147483648, %v5054_v13  ;;  %vm5547_vm6 = vweird.f32 %v5054_v13 }
 0xc63   : >> { %v7141_v17 = vmul.f32 -1.702, %v12562_v53  ;;  %v12566_v60 = vadd.f32 %v4798_v56, %v11641_v4 }
 0xc64   : >> { %vm12593_vm7 = vcmp.eq.f32.partialorder %v5551_v36, 8.507059e+37  ;;  %v5554_v19 = vor.u32 1.1754944e-38, %v5553_v7 }
 0xc65   : >> { %v8143_v50 = vpop.eup %8142  ;;  %v5012_v23 = vmul.f32 1.442695, %v7141_v17  ;;  %v7142_v62 = vmul.f32 -1.702, %v12566_v60 }
 0xc66   : >> { %v12569_v12 = vadd.f32 1.0, %v8143_v50 }
 0xc67   : >> { %v8145_v31 = vpop.eup %8144  ;;  %8148 = vpow2.f32 %v5012_v23  ;;  %v5014_v55 = vmul.f32 1.442695, %v7142_v62 }
 0xc68   : >> { %v12571_v18 = vpop.eup %8146  ;;  %8150 = vrcp.f32 %v12569_v12  ;;  %v4857_v44 = vpop.f32.mrf.mxu3  ;;  %v5056_v41 = vadd.f32 1.0, %v8145_v31  ;;  %vm5562_vm9 = vweird.f32 %v12569_v12  ;;  %v5566_v11 = vand.u32 2147483647, %v12569_v12 }
 0xc69   : >> { %v5543_v34 = vmul.f32 %v12571_v18, %v5054_v13  ;;  %8152 = vpow2.f32 %v5014_v55  ;;  %v12576_v25 = vadd.f32 %v4857_v44, %v11672_v37  ;;  %vm5548_vm8 = vweird.f32 %v12571_v18 }
 0xc6a   : >> { %v4800_v10 = vpop.f32.mrf.mxu1  ;;  %8154 = vrcp.f32 %v5056_v41  ;;  %v5581_v21 = vand.u32 2147483647, %v5056_v41  ;;  %v5583_v48 = vand.u32 2147483648, %v5056_v41  ;;  %vm12608_vm12 = vmor %vm5547_vm6, %vm5548_vm8  ;;  %v5568_v17 = vand.u32 2147483648, %v12569_v12 }
 0xc6b   : >> { %v5544_v2 = vsub.f32 1.0, %v5543_v34  ;;  %v7143_v30 = vmul.f32 -1.702, %v12576_v25  ;;  %v12580_v22 = vadd.f32 %v4800_v10, %v11641_v4  ;;  %vm5577_vm15 = vweird.f32 %v5056_v41 }
 0xc6c   : >> { %vm5582_vm2 = vcmp.eq.f32.partialorder %v5581_v21, 8.507059e+37  ;;  %vm5567_vm1 = vcmp.eq.f32.partialorder %v5566_v11, 8.507059e+37 }
 0xc6d   : >> { %v8149_v40 = vpop.eup %8148  ;;  %v5016_v20 = vmul.f32 1.442695, %v7143_v30  ;;  %v5545_v5 = vmul.f32 %v12571_v18, %v5544_v2  ;;  %v7144_v4 = vmul.f32 -1.702, %v12580_v22 }
 0xc6e   : >> { %v12582_v0 = vpop.eup %8150  ;;  %v12584_v46 = vadd.f32 1.0, %v8149_v40 }
 0xc6f   : >> { %v8153_v26 = vpop.eup %8152  ;;  %v5558_v42 = vmul.f32 %v12582_v0, %v12569_v12  ;;  %v5546_v43 = vadd.f32 %v12571_v18, %v5545_v5  ;;  %vm5563_vm11 = vweird.f32 %v12582_v0  ;;  %v5018_v33 = vmul.f32 1.442695, %v7144_v4 }
 0xc70   : >> { %8156 = vrcp.f32 %v12584_v46  ;;  %v8155_v32 = vpop.eup %8154  ;;  %v12590_v52 = vadd.f32 1.0, %v8153_v26  ;;  %v4859_v38 = vpop.f32.mrf.mxu3  ;;  %vm12622_vm0 = vmor %vm5562_vm9, %vm5563_vm11  ;;  %v5596_v10 = vand.u32 2147483647, %v12584_v46  ;;  %v5598_v2 = vand.u32 2147483648, %v12584_v46 }
 0xc71   : >> { %v5559_v27 = vsub.f32 1.0, %v5558_v42  ;;  %8158 = vpow2.f32 %v5016_v20  ;;  %v5573_v1 = vmul.f32 %v8155_v32, %v5056_v41  ;;  %v12605_v45 = vadd.f32 %v4859_v38, %v11672_v37 }
 0xc72   : >> { %8160 = vrcp.f32 %v12590_v52  ;;  %vm5578_vm13 = vweird.f32 %v8155_v32  ;;  %v5550_v62 = vsel %vm12608_vm12, %v12571_v18, %v5546_v43  ;;  %v5584_v18 = vor.u32 1.1754944e-38, %v5583_v48 }
 0xc73   : >> { %v5560_v29 = vmul.f32 %v12582_v0, %v5559_v27  ;;  %v5574_v3 = vsub.f32 1.0, %v5573_v1  ;;  %8162 = vpow2.f32 %v5018_v33  ;;  %v7145_v44 = vmul.f32 -1.702, %v12605_v45  ;;  %vm5579_vm3 = vmor %vm5577_vm15, %vm5578_vm13 }
 0xc74   : >> { %v5555_v12 = vsel %vm12593_vm7, %v5554_v19, %v5550_v62  ;;  %v5569_v5 = vor.u32 1.1754944e-38, %v5568_v17  ;;  %vm5592_vm4 = vweird.f32 %v12584_v46  ;;  %vm5597_vm6 = vcmp.eq.f32.partialorder %v5596_v10, 8.507059e+37 }
 0xc75   : >> { %v5561_v56 = vadd.f32 %v12582_v0, %v5560_v29  ;;  %v5575_v50 = vmul.f32 %v8155_v32, %v5574_v3  ;;  %v5020_v27 = vmul.f32 1.442695, %v7145_v44  ;;  %v5694_v39 = vmul.f32 %v5555_v12, %v12546_v63 }
 0xc76   : >> { %v8157_v14 = vpop.eup %8156  ;;  %v5941_v26 = vpop.f32.mrf.mxu0  ;;  %vm5607_vm9 = vweird.f32 %v12590_v52 }
 0xc77   : >> { %v8159_v23 = vpop.eup %8158  ;;  %v5588_v37 = vmul.f32 %v8157_v14, %v12584_v46  ;;  %v5576_v31 = vadd.f32 %v8155_v32, %v5575_v50  ;;  %v5565_v30 = vsel %vm12622_vm0, %v12582_v0, %v5561_v56  ;;  %vm5593_vm5 = vweird.f32 %v8157_v14 }
 0xc78   : >> { %v12626_v55 = vadd.f32 1.0, %v8159_v23  ;;  %v12629_v34 = vpop.eup %8160  ;;  %v5570_v0 = vsel %vm5567_vm1, %v5569_v5, %v5565_v30  ;;  %vm5594_vm7 = vmor %vm5592_vm4, %vm5593_vm5  ;;  %v5882_v38 = vpop.f32.mrf.mxu2 }
 0xc79   : >> { %v5589_v41 = vsub.f32 1.0, %v5588_v37  ;;  %v5580_v40 = vsel %vm5579_vm3, %v8155_v32, %v5576_v31  ;;  %v5603_v20 = vmul.f32 %v12629_v34, %v12590_v52  ;;  %v8163_v4 = vpop.eup %8162  ;;  %v5599_v32 = vor.u32 1.1754944e-38, %v5598_v2 }
 0xc7a   : >> { %8164 = vrcp.f32 %v12626_v55  ;;  %v5585_v36 = vsel %vm5582_vm2, %v5584_v18, %v5580_v40  ;;  %v5060_v1 = vadd.f32 1.0, %v8163_v4  ;;  %v5942_v11 = vadd.f32 %v5941_v26, %v5882_v38 }
 0xc7b   : >> { %v5590_v7 = vmul.f32 %v8157_v14, %v5589_v41  ;;  %v5696_v42 = vmul.f32 %v5585_v36, %v12558_v54  ;;  %8166 = vpow2.f32 %v5020_v27  ;;  %v5604_v29 = vsub.f32 1.0, %v5603_v20 }
 0xc7c   : >> { %8168 = vrcp.f32 %v5060_v1  ;;  %v5695_v63 = vmul.f32 %v5570_v0, %v12554_v61  ;;  %v5979_v33 = vadd.f32 %v5942_v11, %v11254_v35  ;;  %vm5608_vm8 = vweird.f32 %v12629_v34 }
 0xc7d   : >> { %v5591_v19 = vadd.f32 %v8157_v14, %v5590_v7  ;;  %v5718_v3 = vpack.c.bf16 %v5696_v42, %v5694_v39  ;;  %v5605_v24 = vmul.f32 %v12629_v34, %v5604_v29  ;;  %v5613_v35 = vand.u32 2147483648, %v12590_v52  ;;  %vm12663_vm11 = vmor %vm5607_vm9, %vm5608_vm8 }
 0xc7e   : >> { %v12653_v31 = vadd.f32 %v12307_v58, %v5979_v33   ;;  %v5943_v23 = vpop.f32.mrf.mxu0  ;;  %v5643_v2 = vand.u32 2147483648, %v5060_v1  ;;  %v5641_v36 = vand.u32 2147483647, %v5060_v1  ;;  %vm5637_vm0 = vweird.f32 %v5060_v1  ;;  %v8174_v33 = vld [vmem:[%s12047_s15] ss:$0 sm:$0xff] }
 0xc7f   : >> { %v5595_v43 = vsel %vm5594_vm7, %v8157_v14, %v5591_v19  ;;  %5901 = vmatmul.bf16.gmra.mxu2 %v5718_v3  ;;  %v5606_v37 = vadd.f32 %v12629_v34, %v5605_v24  ;;  %v5614_v7 = vor.u32 1.1754944e-38, %v5613_v35  ;;  %v5628_v4 = vand.u32 2147483648, %v12626_v55 }
 0xc80   : >> { %v12644_v21 = vpop.eup %8164  ;;  %v5600_v54 = vsel %vm5597_vm6, %v5599_v32, %v5595_v43  ;;  %v13850_v50 = vmov %v12653_v31  ;;  %v5611_v31 = vand.u32 2147483647, %v12590_v52  ;;  %v5644_v42 = vor.u32 1.1754944e-38, %v5643_v2 }
 0xc81   : >> { %v5697_v48 = vmul.f32 %v5600_v54, %v12562_v53  ;;  %v5618_v46 = vmul.f32 %v12644_v21, %v12626_v55  ;;  %v8167_v56 = vpop.eup %8166  ;;  %v5884_v53 = vpop.f32.mrf.mxu2  ;;  %v5610_v30 = vsel %vm12663_vm11, %v12629_v34, %v5606_v37  ;;  %vm5623_vm15 = vweird.f32 %v12644_v21 }
 0xc82   : >> { %v12655_v17 = vadd.f32 1.0, %v8167_v56  ;;  %v8169_v61 = vpop.eup %8168  ;;  %v5944_v44 = vadd.f32 %v5943_v23, %v5884_v53  ;;  %vm5612_vm13 = vcmp.eq.f32.partialorder %v5611_v31, 8.507059e+37  ;;  %vm5642_vm3 = vcmp.eq.f32.partialorder %v5641_v36, 8.507059e+37  ;;  %v13855_v31 = vld [vmem:[#allocation57_spill] sm:$0xff] }
 0xc83   : >> { %v5719_v14 = vpack.c.bf16 %v5697_v48, %v5695_v63  ;;  %v5619_v62 = vsub.f32 1.0, %v5618_v46  ;;  %v5633_v13 = vmul.f32 %v8169_v61, %v5060_v1  ;;  %vm5638_vm12 = vweird.f32 %v8169_v61 }
 0xc84   : >> { %8170 = vrcp.f32 %v12655_v17  ;;  %v5980_v12 = vadd.f32 %v5944_v44, %v11300_v28  ;;  %v5615_v5 = vsel %vm5612_vm13, %v5614_v7, %v5610_v30  ;;  %vm5639_vm2 = vmor %vm5637_vm0, %vm5638_vm12  ;;  %vm5622_vm5 = vweird.f32 %v12626_v55 }
 0xc85   : >> { %5960 = vmatmul.bf16.gmra.mxu0 %v5719_v14  ;;  %v5634_v18 = vsub.f32 1.0, %v5633_v13  ;;  %v5620_v10 = vmul.f32 %v12644_v21, %v5619_v62  ;;  %v5698_v1 = vmul.f32 %v5615_v5, %v12566_v60  ;;  %vm5624_vm1 = vmor %vm5622_vm5, %vm5623_vm15  ;;  %v5658_v43 = vand.u32 2147483648, %v12655_v17 }
 0xc86   : >> { %v12673_v32 = vadd.f32 %v12307_v58, %v5980_v12   ;;  %v5626_v58 = vand.u32 2147483647, %v12626_v55  ;;  %v5656_v55 = vand.u32 2147483647, %v12655_v17  ;;  %v5629_v54 = vor.u32 1.1754944e-38, %v5628_v4  ;;  %v13857_v12 = vld [vmem:[#allocation48_spill] sm:$0xff] }
 0xc87   : >> { %v5635_v40 = vmul.f32 %v8169_v61, %v5634_v18  ;;  %v5621_v28 = vadd.f32 %v12644_v21, %v5620_v10  ;;  %vm5652_vm7 = vweird.f32 %v12655_v17 }
 0xc88   : >> { %v13853_v52 = vmov %v12673_v32  ;;  %vm5627_vm6 = vcmp.eq.f32.partialorder %v5626_v58, 8.507059e+37  ;;  %vm5657_vm9 = vcmp.eq.f32.partialorder %v5656_v55, 8.507059e+37 }
 0xc89   : >> { %v5636_v26 = vadd.f32 %v8169_v61, %v5635_v40  ;;  %v5625_v11 = vsel %vm5624_vm1, %v12644_v21, %v5621_v28 }
 0xc8a   : >> { %v8171_v20 = vpop.eup %8170  ;;  %v5887_v27 = vpop.f32.mrf.mxu2  ;;  %v5630_v46 = vsel %vm5627_vm6, %v5629_v54, %v5625_v11 }
 0xc8b   : >> { %v5648_v34 = vmul.f32 %v8171_v20, %v12655_v17  ;;  %v5640_v39 = vsel %vm5639_vm2, %v8169_v61, %v5636_v26  ;;  %v5946_v32 = vpop.f32.mrf.mxu0  ;;  %vm5653_vm4 = vweird.f32 %v8171_v20  ;;  %v5699_v23 = vmul.f32 %v5630_v46, %v12576_v25  ;;  %v13867_v46 = vld [vmem:[#allocation39_spill] sm:$0xff] }
 0xc8c   : >> { %v5645_v19 = vsel %vm5642_vm3, %v5644_v42, %v5640_v39  ;;  %v5947_v29 = vadd.f32 %v5946_v32, %v5887_v27  ;;  %vm5654_vm8 = vmor %vm5652_vm7, %vm5653_vm4  ;;  %v13861_v27 = vld [vmem:[#allocation46_spill] sm:$0xff]  ;;  %v13863_v32 = vld [vmem:[#allocation44_spill] sm:$0xff] }
 0xc8d   : >> { %v5649_v0 = vsub.f32 1.0, %v5648_v34  ;;  %v5700_v38 = vmul.f32 %v5645_v19, %v12580_v22  ;;  %v5659_v22 = vor.u32 1.1754944e-38, %v5658_v43 }
 0xc8e   : >> { %v5981_v63 = vadd.f32 %v5947_v29, %v11319_v8 }
 0xc8f   : >> { %v5650_v3 = vmul.f32 %v8171_v20, %v5649_v0  ;;  %v5720_v48 = vpack.c.bf16 %v5700_v38, %v5698_v1 }
 0xc90   : >> { %v12691_v24 = vadd.f32 %v8174_v33, %v5981_v63  }
 0xc91   : >> { %v5651_v60 = vadd.f32 %v8171_v20, %v5650_v3  ;;  %5906 = vmatmul.bf16.gmra.mxu2 %v5720_v48  ;;  %v13865_v3 = vld [vmem:[#allocation49_spill] sm:$0xff] }
 0xc92   : >> { %v5889_v14 = vpop.f32.mrf.mxu2 }
 0xc93   : >> { %v5655_v21 = vsel %vm5654_vm8, %v8171_v20, %v5651_v60  ;;  %v5948_v61 = vpop.f32.mrf.mxu0  ;;  %v13859_v20 = vld [vmem:[#allocation59_spill] sm:$0xff] }
 0xc94   : >> { %v5660_v56 = vsel %vm5657_vm9, %v5659_v22, %v5655_v21  ;;  %v5949_v62 = vadd.f32 %v5948_v61, %v5889_v14 }
 0xc95   : >> { %v5701_v8 = vmul.f32 %v5660_v56, %v12605_v45 }
 0xc96   : >> { %v5982_v17 = vadd.f32 %v5949_v62, %v11303_v9 }
 0xc97   : >> { %v5721_v53 = vpack.c.bf16 %v5701_v8, %v5699_v23  ;;  %v13869_v23 = vld [vmem:[#allocation51_spill] sm:$0xff] }
 0xc98   : >> { %v12696_v34 = vadd.f32 %v8174_v33, %v5982_v17   ;;  %v13888_v17 = vmov %v13830_v16 }
 0xc99   : >> { %5965 = vmatmul.bf16.gmra.mxu0 %v5721_v53  ;;  %v6046_v17 = vsel (%p12723_p4), %vm889_vm10, %v13853_v52, 0.0 }
 0xc9a   : >> { %v13854_v44 = vmov %v12696_v34 }
 0xc9c   : >> { %v5892_v37 = vpop.f32.mrf.mxu2 }
 0xc9d   : >> { %v5951_v13 = vpop.f32.mrf.mxu0 }
 0xc9e   : >> { %v5952_v35 = vadd.f32 %v5951_v13, %v5892_v37  ;;  %v13890_v13 = vmov %v13827_v57 }
 0xc9f   : > { %v6040_v13 = vsel (%p12723_p4), %vm889_vm10, %v13843_v51, 0.0 }
 0xca0   : >> { %v5983_v18 = vadd.f32 %v5952_v35, %v13855_v31  ;;  %v13883_v31 = vmov %v13850_v50 }
 0xca1   : > { %v6034_v31 = vsel (%p12723_p4), %vm889_vm10, %v13836_v59, 0.0 }
 0xca2   : >> { %v12699_v35 = vadd.f32 %v8174_v33, %v5983_v18   ;;  %v13887_v18 = vmov %v13833_v15 }
 0xca3   : > { %v6031_v18 = vsel (%p12723_p4), %vm889_vm10, %v13833_v15, 0.0 }
 0xca4   : >> { %v13856_v10 = vmov %v12699_v35  ;;  %v5894_v41 = vpop.f32.mrf.mxu2 }
 0xca5   : >> { %v5953_v2 = vpop.f32.mrf.mxu0  ;;  %v13879_v35 = vmov %v13856_v10 }
 0xca6   : >> { %v5954_v25 = vadd.f32 %v5953_v2, %v5894_v41  ;;  %v6052_v2 = vsel (%p12723_p4), %vm889_vm10, %v13854_v44, 0.0  ;;  %v6037_v35 = vsel (%p12723_p4), %vm889_vm10, %v12541_v6, 0.0 }
 0xca7   : > { %6053 = vadd.xlane.f32.xlu2 (%p12723_p4), %v6052_v2 }
 0xca8   : >> { %v5984_v45 = vadd.f32 %v5954_v25, %v13857_v12  ;;  %v13891_v12 = vmov %v13822_v47 }
 0xca9   : > { %v6055_v12 = vsel (%p12723_p4), %vm889_vm10, %v13856_v10, 0.0 }
 0xcaa   : >> { %v12702_v36 = vadd.f32 %v8174_v33, %v5984_v45  }
 0xcac   : >> { %v13858_v7 = vmov %v12702_v36 }
 0xcad   : > { %v6058_v53 = vsel (%p12723_p4), %vm889_vm10, %v13858_v7, 0.0 }
 0xcae   : > { %6059 = vadd.xlane.f32.xlu1 (%p12723_p4), %v6058_v53 }
 0xcb6   : > { %6056 = vadd.xlane.f32.xlu1 (%p12723_p4), %v6055_v12 }
 0xcd7   : >> { %v5956_v30 = vpop.f32.mrf.mxu0  ;;  %v5897_v40 = vpop.f32.mrf.mxu2 }
 0xcd8   : >> { %v5957_v9 = vadd.f32 %v5956_v30, %v5897_v40  ;;  %v13884_v30 = vmov %v13843_v51 }
 0xcd9   : > { %v6025_v30 = vsel (%p12723_p4), %vm889_vm10, %v12442_v49, 0.0 }
 0xcda   : >> { %v5985_v26 = vadd.f32 %v5957_v9, %v13859_v20  ;;  %v6022_v9 = vsel (%p12723_p4), %vm889_vm10, %v13827_v57, 0.0 }
 0xcdc   : >> { %v12705_v37 = vadd.f32 %v8174_v33, %v5985_v26   ;;  %v6019_v26 = vsel (%p12723_p4), %vm889_vm10, %v13822_v47, 0.0 }
 0xcde   : >> { %v13860_v5 = vmov %v12705_v37 }
 0xcdf   : >> { %v5958_v28 = vpop.f32.mrf.mxu0  ;;  %v5899_v42 = vpop.f32.mrf.mxu2  ;;  %v13877_v37 = vmov %v13860_v5  ;;  %v6061_v25 = vsel (%p12723_p4), %vm889_vm10, %v13860_v5, 0.0 }
 0xce0   : >> { %v5959_v34 = vadd.f32 %v5958_v28, %v5899_v42  ;;  %v6043_v37 = vsel (%p12723_p4), %vm889_vm10, %v13850_v50, 0.0 }
 0xce1   : > { %6044 = vadd.xlane.f32.xlu1 (%p12723_p4), %v6043_v37 }
 0xce2   : >> { %v5986_v4 = vadd.f32 %v5959_v34, %v13861_v27  ;;  %v13880_v34 = vmov %v13854_v44  ;;  %v13892_v27 = vld [vmem:[#allocation33_spill] sm:$0xff] (%p12723_p4) }
 0xce4   : >> { %v12708_v38 = vadd.f32 %v8174_v33, %v5986_v4  }
 0xce6   : >> { %v13862_v58 = vmov %v12708_v38 }
 0xce7   : > { %v6064_v62 = vsel (%p12723_p4), %vm889_vm10, %v13862_v58, 0.0 }
 0xce8   : > { %6065 = vadd.xlane.f32.xlu0 (%p12723_p4), %v6064_v62 }
 0xce9   : > { %6035 = vadd.xlane.f32.xlu1 (%p12723_p4), %v6034_v31 }
 0xcf0   : > { %6062 = vadd.xlane.f32.xlu0 (%p12723_p4), %v6061_v25 }
 0xcf8   : > { %6047 = vadd.xlane.f32.xlu0 (%p12723_p4), %v6046_v17 }
 0xd00   : > { %6038 = vadd.xlane.f32.xlu0 (%p12723_p4), %v6037_v35 }
 0xd02   : >> { %v5961_v39 = vpop.f32.mrf.mxu0  ;;  %v5902_v19 = vpop.f32.mrf.mxu2 }
 0xd03   : >> { %v5962_v0 = vadd.f32 %v5961_v39, %v5902_v19  ;;  %v13886_v19 = vmov %v13836_v59 }
 0xd05   : >> { %v5987_v1 = vadd.f32 %v5962_v0, %v13863_v32  ;;  %v13882_v32 = vmov %v13853_v52 }
 0xd07   : >> { %v12711_v39 = vadd.f32 %v8174_v33, %v5987_v1  }
 0xd09   : >> { %v13864_v43 = vmov %v12711_v39 }
 0xd0a   : >> { %v5963_v36 = vpop.f32.mrf.mxu0  ;;  %v5904_v29 = vpop.f32.mrf.mxu2  ;;  %v13875_v39 = vmov %v13864_v43  ;;  %v6067_v28 = vsel (%p12723_p4), %vm889_vm10, %v13864_v43, 0.0 }
 0xd0b   : >> { %v5964_v11 = vadd.f32 %v5963_v36, %v5904_v29  ;;  %v13878_v36 = vmov %v13858_v7 }
 0xd0d   : >> { %v5988_v55 = vadd.f32 %v5964_v11, %v13865_v3 }
 0xd0f   : >> { %v12714_v40 = vadd.f32 %v8174_v33, %v5988_v55  }
 0xd11   : >> { %v13866_v54 = vmov %v12714_v40 }
 0xd12   : >> { %v13874_v40 = vmov %v13866_v54  ;;  %v6070_v20 = vsel (%p12723_p4), %vm889_vm10, %v13866_v54, 0.0 }
 0xd14   : >> { %v5907_v63 = vpop.f32.mrf.mxu2 }
 0xd16   : >> { %v5966_v48 = vpop.f32.mrf.mxu0 }
 0xd17   : >> { %v5967_v60 = vadd.f32 %v5966_v48, %v5907_v63 }
 0xd19   : >> { %v5989_v22 = vadd.f32 %v5967_v60, %v13867_v46 }
 0xd1a   : > { %v6054_v19 = vpop.xlane.xlu2 (%p12723_p4), %6053 }
 0xd1b   : >> { %v12717_v41 = vadd.f32 %v8174_v33, %v5989_v22   ;;  %v13885_v22 = vmov %v12541_v6  ;;  %v6097_v60 = vmul.f32 (%p12723_p4), %v6054_v19, %v13892_v27 }
 0xd1c   : >> { %v5909_v38 = vpop.f32.mrf.mxu2 }
 0xd1d   : >> { %v13868_v21 = vmov %v12717_v41 }
 0xd1e   : >> { %v5968_v14 = vpop.f32.mrf.mxu0  ;;  %v13873_v41 = vmov %v13868_v21  ;;  %v6073_v40 = vsel (%p12723_p4), %vm889_vm10, %v13868_v21, 0.0 }
 0xd1f   : >> { %v5969_v56 = vadd.f32 %v5968_v14, %v5909_v38  ;;  %v13876_v38 = vmov %v13862_v58  ;;  %v13889_v14 = vmov %v12442_v49  ;;  %v6028_v41 = vsel (%p12723_p4), %vm889_vm10, %v13830_v16, 0.0 }
 0xd20   : > { %6029 = vadd.xlane.f32.xlu0 (%p12723_p4), %v6028_v41 }
 0xd21   : >> { %v5990_v8 = vadd.f32 %v5969_v56, %v13869_v23  ;;  %v6060_v34 = vpop.xlane.xlu1 (%p12723_p4), %6059 }
 0xd22   : > { %863 = sbr.rel (!%p12723_p4) target bundleno = 38 (0x26), region = 182  ;;  %v6099_v39 = vmul.f32 (%p12723_p4), %v6060_v34, %v13892_v27 }
 0xd23   : >> { %v12720_v42 = vadd.f32 %v8174_v33, %v5990_v8   ;;  %v13881_v33 = vmov %v12691_v24  ;;  %v12865_v8 = vsub.f32 (%p12723_p4), %v13854_v44, %v6097_v60 }
 0xd24   : > { %v6049_v33 = vsel (%p12723_p4), %vm889_vm10, %v12691_v24, 0.0  ;;  %v12837_v32 = vsub.f32 (%p12723_p4), %v13858_v7, %v6099_v39 }
 0xd25   : >> { %v13870_v61 = vmov %v12720_v42  ;;  %6050 = vadd.xlane.f32.xlu2 (%p12723_p4), %v6049_v33  ;;  %v6137_v17 = vmul.f32 (%p12723_p4), %v12865_v8, %v12865_v8 }
 0xd26   : >> { %v13872_v42 = vmov %v13870_v61  ;;  %v6076_v45 = vsel (%p12723_p4), %vm889_vm10, %v13870_v61, 0.0  ;;  %v6139_v36 = vmul.f32 (%p12723_p4), %v12837_v32, %v12837_v32 }
 0xd27   : > { %6077 = vadd.xlane.f32.xlu1 %v6076_v45 }
 0xd28   : > { %6074 = vadd.xlane.f32.xlu0 %v6073_v40  ;;  %v6185_v11 = vsel %vm889_vm10, %v6139_v36, 0.0 }
 0xd29   : > { %v6057_v55 = vpop.xlane.xlu1 %6056 }
 0xd2a   : > { %v6098_v63 = vmul.f32 %v6057_v55, %v13892_v27 }
 0xd2c   : > { %v12853_v22 = vsub.f32 %v13856_v10, %v6098_v63 }
 0xd2d   : > { %6041 = vadd.xlane.f32.xlu2 %v6040_v13 }
 0xd2e   : > { %v6138_v14 = vmul.f32 %v12853_v22, %v12853_v22 }
 0xd2f   : > { %6023 = vadd.xlane.f32.xlu1 %v6022_v9 }
 0xd30   : > { %6020 = vadd.xlane.f32.xlu0 %v6019_v26 }
 0xd35   : > { %6032 = vadd.xlane.f32.xlu2 %v6031_v18 }
 0xd37   : > { %6068 = vadd.xlane.f32.xlu1 %v6067_v28 }
 0xd3d   : > { %6026 = vadd.xlane.f32.xlu2 %v6025_v30 }
 0xd3f   : > { %6186 = vadd.xlane.f32.xlu1 %v6185_v11 }
 0xd45   : > { %6071 = vadd.xlane.f32.xlu2 %v6070_v20 }
 0xd54   : > { %v6045_v53 = vpop.xlane.xlu1 %6044 }
 0xd55   : > { %v6094_v12 = vmul.f32 %v6045_v53, %v13892_v27 }
 0xd57   : > { %v12882_v13 = vsub.f32 %v13850_v50, %v6094_v12 }
 0xd59   : > { %v6134_v9 = vmul.f32 %v12882_v13, %v12882_v13 }
 0xd5b   : > { %v6066_v42 = vpop.xlane.xlu0 %6065 }
 0xd5c   : > { %v6101_v4 = vmul.f32 %v6066_v42, %v13892_v27 }
 0xd5e   : > { %v12834_v0 = vsub.f32 %v13862_v58, %v6101_v4  ;;  %v6170_v4 = vsel %vm889_vm10, %v6134_v9, 0.0 }
 0xd60   : > { %v6141_v1 = vmul.f32 %v12834_v0, %v12834_v0 }
 0xd62   : > { %v6191_v29 = vsel %vm889_vm10, %v6141_v1, 0.0 }
 0xd63   : > { %v6063_v3 = vpop.xlane.xlu0 %6062  ;;  %6192 = vadd.xlane.f32.xlu2 %v6191_v29 }
 0xd64   : > { %v6100_v58 = vmul.f32 %v6063_v3, %v13892_v27 }
 0xd66   : > { %v12850_v46 = vsub.f32 %v13860_v5, %v6100_v58  ;;  %v6182_v5 = vsel %vm889_vm10, %v6138_v14, 0.0 }
 0xd68   : > { %v6140_v56 = vmul.f32 %v12850_v46, %v12850_v46 }
 0xd6a   : > { %v6188_v10 = vsel %vm889_vm10, %v6140_v56, 0.0 }
 0xd6b   : > { %v6048_v62 = vpop.xlane.xlu0 %6047  ;;  %6183 = vadd.xlane.f32.xlu2 %v6182_v5  ;;  %6189 = vadd.xlane.f32.xlu0 %v6188_v10 }
 0xd6c   : > { %v6095_v2 = vmul.f32 %v6048_v62, %v13892_v27 }
 0xd6e   : > { %v12874_v44 = vsub.f32 %v13853_v52, %v6095_v2  ;;  %v6179_v52 = vsel %vm889_vm10, %v6137_v17, 0.0 }
 0xd70   : > { %v6135_v35 = vmul.f32 %v12874_v44, %v12874_v44 }
 0xd72   : > { %v6173_v18 = vsel %vm889_vm10, %v6135_v35, 0.0 }
 0xd73   : > { %v6039_v41 = vpop.xlane.xlu0 %6038  ;;  %6174 = vadd.xlane.f32.xlu2 %v6173_v18  ;;  %6180 = vadd.xlane.f32.xlu0 %v6179_v52 }
 0xd74   : > { %v6092_v30 = vmul.f32 %v6039_v41, %v13892_v27 }
 0xd76   : > { %v12897_v26 = vsub.f32 %v12541_v6, %v6092_v30 }
 0xd78   : > { %v6132_v34 = vmul.f32 %v12897_v26, %v12897_v26 }
 0xd7a   : > { %v6164_v19 = vsel %vm889_vm10, %v6132_v34, 0.0 }
 0xd7b   : > { %6165 = vadd.xlane.f32.xlu2 %v6164_v19  ;;  %6171 = vadd.xlane.f32.xlu0 %v6170_v4 }
 0xd93   : > { %v6030_v1 = vpop.xlane.xlu0 %6029 }
 0xd94   : > { %v6089_v36 = vmul.f32 %v6030_v1, %v13892_v27 }
 0xd96   : > { %v12918_v55 = vsub.f32 %v13830_v16, %v6089_v36 }
 0xd98   : > { %v6051_v7 = vpop.xlane.xlu2 %6050 }
 0xd99   : > { %v6096_v48 = vmul.f32 %v6051_v7, %v13892_v27  ;;  %v6129_v7 = vmul.f32 %v12918_v55, %v12918_v55 }
 0xd9b   : > { %v12856_v38 = vsub.f32 %v12691_v24, %v6096_v48  ;;  %v6155_v14 = vsel %vm889_vm10, %v6129_v7, 0.0  ;;  %v6075_v56 = vpop.xlane.xlu0 %6074 }
 0xd9c   : > { %6156 = vadd.xlane.f32.xlu2 %v6155_v14 }
 0xd9d   : > { %v6136_v23 = vmul.f32 %v12856_v38, %v12856_v38 }
 0xd9f   : > { %v6176_v24 = vsel %vm889_vm10, %v6136_v23, 0.0  ;;  %v6104_v23 = vmul.f32 %v6075_v56, %v13892_v27 }
 0xda0   : > { %v6042_v25 = vpop.xlane.xlu2 %6041  ;;  %6177 = vadd.xlane.f32.xlu1 %v6176_v24 }
 0xda1   : > { %v6093_v33 = vmul.f32 %v6042_v25, %v13892_v27  ;;  %v12939_v24 = vsub.f32 %v13868_v21, %v6104_v23 }
 0xda3   : > { %v12879_v37 = vsub.f32 %v13843_v51, %v6093_v33  ;;  %v6036_v51 = vpop.xlane.xlu1 %6035  ;;  %v6144_v2 = vmul.f32 %v12939_v24, %v12939_v24  ;;  %v6021_v35 = vpop.xlane.xlu0 %6020 }
 0xda4   : > { %v6091_v40 = vmul.f32 %v6036_v51, %v13892_v27 }
 0xda5   : > { %v6133_v31 = vmul.f32 %v12879_v37, %v12879_v37  ;;  %v6200_v17 = vsel %vm889_vm10, %v6144_v2, 0.0 }
 0xda6   : > { %v12903_v42 = vsub.f32 %v13836_v59, %v6091_v40  ;;  %6201 = vadd.xlane.f32.xlu2 %v6200_v17 }
 0xda7   : > { %v6167_v45 = vsel %vm889_vm10, %v6133_v31, 0.0  ;;  %v6086_v31 = vmul.f32 %v6021_v35, %v13892_v27 }
 0xda8   : > { %v6033_v50 = vpop.xlane.xlu2 %6032  ;;  %6168 = vadd.xlane.f32.xlu1 %v6167_v45  ;;  %v6131_v11 = vmul.f32 %v12903_v42, %v12903_v42 }
 0xda9   : > { %v6090_v20 = vmul.f32 %v6033_v50, %v13892_v27  ;;  %v12959_v52 = vsub.f32 %v13822_v47, %v6086_v31 }
 0xdaa   : > { %v6161_v48 = vsel %vm889_vm10, %v6131_v11, 0.0 }
 0xdab   : > { %v12900_v28 = vsub.f32 %v13833_v15, %v6090_v20  ;;  %v6078_v15 = vpop.xlane.xlu1 %6077  ;;  %6162 = vadd.xlane.f32.xlu0 %v6161_v48  ;;  %v6126_v51 = vmul.f32 %v12959_v52, %v12959_v52 }
 0xdac   : > { %v6105_v29 = vmul.f32 %v6078_v15, %v13892_v27 }
 0xdad   : > { %v6130_v39 = vmul.f32 %v12900_v28, %v12900_v28  ;;  %v6146_v30 = vsel %vm889_vm10, %v6126_v51, 0.0 }
 0xdae   : > { %v12924_v63 = vsub.f32 %v13870_v61, %v6105_v29  ;;  %6147 = vadd.xlane.f32.xlu2 %v6146_v30 }
 0xdaf   : > { %v6158_v6 = vsel %vm889_vm10, %v6130_v39, 0.0 }
 0xdb0   : > { %v6027_v59 = vpop.xlane.xlu2 %6026  ;;  %6159 = vadd.xlane.f32.xlu1 %v6158_v6  ;;  %v6145_v10 = vmul.f32 %v12924_v63, %v12924_v63 }
 0xdb1   : > { %v6088_v3 = vmul.f32 %v6027_v59, %v13892_v27 }
 0xdb2   : > { %v6203_v12 = vsel %vm889_vm10, %v6145_v10, 0.0 }
 0xdb3   : > { %v12921_v58 = vsub.f32 %v12442_v49, %v6088_v3  ;;  %v6024_v49 = vpop.xlane.xlu1 %6023  ;;  %6204 = vadd.xlane.f32.xlu0 %v6203_v12 }
 0xdb4   : > { %v6087_v5 = vmul.f32 %v6024_v49, %v13892_v27 }
 0xdb5   : > { %v6128_v60 = vmul.f32 %v12921_v58, %v12921_v58 }
 0xdb6   : > { %v12947_v25 = vsub.f32 %v13827_v57, %v6087_v5 }
 0xdb7   : > { %v6152_v16 = vsel %vm889_vm10, %v6128_v60, 0.0 }
 0xdb8   : > { %v6072_v61 = vpop.xlane.xlu2 %6071  ;;  %6153 = vadd.xlane.f32.xlu1 %v6152_v16  ;;  %v6127_v57 = vmul.f32 %v12947_v25, %v12947_v25 }
 0xdb9   : > { %v6103_v62 = vmul.f32 %v6072_v61, %v13892_v27 }
 0xdba   : > { %v6149_v45 = vsel %vm889_vm10, %v6127_v57, 0.0 }
 0xdbb   : > { %v12942_v53 = vsub.f32 %v13866_v54, %v6103_v62  ;;  %v6069_v54 = vpop.xlane.xlu1 %6068  ;;  %6150 = vadd.xlane.f32.xlu0 %v6149_v45 }
 0xdbc   : > { %v6102_v18 = vmul.f32 %v6069_v54, %v13892_v27 }
 0xdbd   : > { %v6143_v33 = vmul.f32 %v12942_v53, %v12942_v53 }
 0xdbe   : > { %v12962_v41 = vsub.f32 %v13864_v43, %v6102_v18 }
 0xdbf   : > { %v6197_v21 = vsel %vm889_vm10, %v6143_v33, 0.0 }
 0xdc0   : > { %6198 = vadd.xlane.f32.xlu1 %v6197_v21  ;;  %v6142_v50 = vmul.f32 %v12962_v41, %v12962_v41 }
 0xdc2   : > { %v6194_v40 = vsel %vm889_vm10, %v6142_v50, 0.0 }
 0xdc3   : > { %6195 = vadd.xlane.f32.xlu0 %v6194_v40  ;;  %v6187_v9 = vpop.xlane.xlu1 %6186 }
 0xdc4   : > { %v6219_v20 = vmul.f32 %v6187_v9, %v13892_v27 }
 0xdc6   : > { %v12973_v4 = vadd.f32 1e-05, %v6219_v20 }
 0xdc8   : > { %vm6382_vm13 = vweird.f32 %v12973_v4 }
 0xdd6   : > { %v6193_v47 = vpop.xlane.xlu2 %6192 }
 0xdd7   : > { %v6221_v43 = vmul.f32 %v6193_v47, %v13892_v27 }
 0xdd9   : > { %v6241_v34 = vadd.f32 1e-05, %v6221_v43 }
 0xddb   : > { %8178 = vrsqrt.f32 %v6241_v34  ;;  %vm6402_vm11 = vweird.f32 %v6241_v34 }
 0xddc   : > { %8180 = vrsqrt.f32 %v12973_v4 }
 0xdde   : > { %v6184_v39 = vpop.xlane.xlu2 %6183  ;;  %v6190_v19 = vpop.xlane.xlu0 %6189 }
 0xddf   : > { %v6218_v1 = vmul.f32 %v6184_v39, %v13892_v27  ;;  %v6220_v15 = vmul.f32 %v6190_v19, %v13892_v27 }
 0xde1   : > { %v8179_v59 = vpop.eup %8178  ;;  %v12979_v29 = vadd.f32 1e-05, %v6218_v1  ;;  %v12981_v11 = vadd.f32 1e-05, %v6220_v15 }
 0xde2   : > { %v6397_v3 = vmul.f32 %v8179_v59, %v6241_v34  ;;  %v12986_v60 = vpop.eup %8180  ;;  %vm6403_vm10 = vweird.f32 %v8179_v59  ;;  %v13026_v34 = vld [vmem:[%s13893_s1] ss:$0 sm:$0xff] }
 0xde3   : > { %8182 = vrsqrt.f32 %v12979_v29  ;;  %v6377_v10 = vmul.f32 %v12986_v60, %v12973_v4  ;;  %vm6404_vm12 = vmor %vm6402_vm11, %vm6403_vm10  ;;  %vm6383_vm0 = vweird.f32 %v12986_v60  ;;  %vm6392_vm2 = vweird.f32 %v12981_v11 }
 0xde4   : > { %v6398_v48 = vmul.f32 %v8179_v59, %v6397_v3  ;;  %8184 = vrsqrt.f32 %v12981_v11  ;;  %vm6372_vm5 = vweird.f32 %v12979_v29  ;;  %vm13096_vm4 = vmor %vm6382_vm13, %vm6383_vm0 }
 0xde5   : > { %v6378_v31 = vmul.f32 %v12986_v60, %v6377_v10 }
 0xde6   : > { %v6399_v14 = vmul.f32 0.5, %v6398_v48  ;;  %v6175_v56 = vpop.xlane.xlu2 %6174  ;;  %v6181_v16 = vpop.xlane.xlu0 %6180 }
 0xde7   : > { %v6215_v49 = vmul.f32 %v6175_v56, %v13892_v27  ;;  %v6217_v61 = vmul.f32 %v6181_v16, %v13892_v27  ;;  %v6379_v39 = vmul.f32 0.5, %v6378_v31  ;;  %v13048_v16 = vld [vmem:[%s13894_s28] ss:$0 sm:$0xff] }
 0xde8   : > { %v6400_v5 = vsub.f32 1.5, %v6399_v14 }
 0xde9   : > { %v12995_v2 = vadd.f32 1e-05, %v6215_v49  ;;  %v12997_v12 = vpop.eup %8182  ;;  %v13001_v17 = vadd.f32 1e-05, %v6217_v61 }
 0xdea   : > { %v6401_v21 = vmul.f32 %v8179_v59, %v6400_v5  ;;  %v13003_v35 = vpop.eup %8184  ;;  %v6367_v57 = vmul.f32 %v12997_v12, %v12979_v29  ;;  %vm6373_vm1 = vweird.f32 %v12997_v12 }
 0xdeb   : > { %v6387_v18 = vmul.f32 %v13003_v35, %v12981_v11  ;;  %vm6393_vm15 = vweird.f32 %v13003_v35  ;;  %vm6362_vm8 = vweird.f32 %v13001_v17  ;;  %vm6342_vm9 = vweird.f32 %v12995_v2 }
 0xdec   : > { %v6405_v50 = vsel %vm6404_vm12, %v8179_v59, %v6401_v21  ;;  %vm13065_vm3 = vmor %vm6392_vm2, %vm6393_vm15 }
 0xded   : > { %v6388_v45 = vmul.f32 %v13003_v35, %v6387_v18  ;;  %v6461_v20 = vmul.f32 %v6405_v50, %v12834_v0  ;;  %vm13158_vm15 = vmor %vm6372_vm5, %vm6373_vm1 }
 0xdee   : > { %v6166_v51 = vpop.xlane.xlu2 %6165  ;;  %v6172_v30 = vpop.xlane.xlu0 %6171 }
 0xdef   : > { %v6212_v47 = vmul.f32 %v6166_v51, %v13892_v27  ;;  %v6214_v43 = vmul.f32 %v6172_v30, %v13892_v27  ;;  %v6389_v19 = vmul.f32 0.5, %v6388_v45  ;;  %v6484_v56 = vmul.f32 %v13026_v34, %v6461_v20 }
 0xdf1   : > { %v6390_v59 = vsub.f32 1.5, %v6389_v19  ;;  %v13034_v3 = vadd.f32 1e-05, %v6214_v43  ;;  %v6507_v51 = vadd.f32 %v13048_v16, %v6484_v56 }
 0xdf3   : > { %v6391_v61 = vmul.f32 %v13003_v35, %v6390_v59  ;;  %6521 = vmatpush.msra.mxu0 %v6507_v51  ;;  %vm6332_vm0 = vweird.f32 %v13034_v3 }
 0xdf5   : > { %v6395_v43 = vsel %vm13065_vm3, %v13003_v35, %v6391_v61 }
 0xe0f   : > { %v6157_v31 = vpop.xlane.xlu2 %6156 }
 0xe10   : > { %v6209_v30 = vmul.f32 %v6157_v31, %v13892_v27 }
 0xe12   : > { %v13081_v19 = vadd.f32 1e-05, %v6209_v30 }
 0xe13   : > { %v6178_v6 = vpop.xlane.xlu1 %6177 }
 0xe14   : > { %v6216_v36 = vmul.f32 %v6178_v6, %v13892_v27  ;;  %v13029_v6 = vadd.f32 1e-05, %v6212_v47 }
 0xe16   : > { %v12983_v7 = vadd.f32 1e-05, %v6216_v36  ;;  %v6368_v36 = vmul.f32 %v12997_v12, %v6367_v57  ;;  %vm6312_vm5 = vweird.f32 %v13029_v6 }
 0xe18   : > { %8186 = vrsqrt.f32 %v12983_v7  ;;  %vm6352_vm6 = vweird.f32 %v12983_v7 }
 0xe19   : > { %8188 = vrsqrt.f32 %v12995_v2  ;;  %v6202_v51 = vpop.xlane.xlu2 %6201 }
 0xe1b   : > { %v6169_v23 = vpop.xlane.xlu1 %6168 }
 0xe1c   : > { %v6213_v62 = vmul.f32 %v6169_v23, %v13892_v27  ;;  %v6380_v23 = vsub.f32 1.5, %v6379_v39 }
 0xe1e   : > { %v12999_v33 = vadd.f32 1e-05, %v6213_v62  ;;  %v13005_v54 = vpop.eup %8186  ;;  %v6369_v62 = vmul.f32 0.5, %v6368_v36  ;;  %v6163_v18 = vpop.xlane.xlu0 %6162  ;;  %v6381_v11 = vmul.f32 %v12986_v60, %v6380_v23 }
 0xe1f   : > { %v6347_v40 = vmul.f32 %v13005_v54, %v12983_v7  ;;  %v13031_v15 = vpop.eup %8188  ;;  %vm6353_vm7 = vweird.f32 %v13005_v54 }
 0xe20   : > { %8190 = vrsqrt.f32 %v12999_v33  ;;  %v6337_v5 = vmul.f32 %v13031_v15, %v12995_v2  ;;  %vm6343_vm10 = vweird.f32 %v13031_v15  ;;  %vm6322_vm11 = vweird.f32 %v12999_v33  ;;  %vm13173_vm2 = vmor %vm6352_vm6, %vm6353_vm7 }
 0xe21   : > { %8192 = vrsqrt.f32 %v13001_v17  ;;  %v6348_v48 = vmul.f32 %v13005_v54, %v6347_v40  ;;  %v6211_v40 = vmul.f32 %v6163_v18, %v13892_v27 }
 0xe22   : > { %8194 = vrsqrt.f32 %v13029_v6  ;;  %v6338_v39 = vmul.f32 %v13031_v15, %v6337_v5  ;;  %v6460_v5 = vmul.f32 %v6395_v43, %v12850_v46 }
 0xe23   : > { %v6160_v9 = vpop.xlane.xlu1 %6159  ;;  %v6349_v57 = vmul.f32 0.5, %v6348_v48  ;;  %v13088_v48 = vadd.f32 1e-05, %v6211_v40 }
 0xe24   : > { %v6210_v1 = vmul.f32 %v6160_v9, %v13892_v27  ;;  %v6339_v31 = vmul.f32 0.5, %v6338_v39  ;;  %v6483_v40 = vmul.f32 %v13026_v34, %v6460_v5  ;;  %v6224_v39 = vmul.f32 %v6202_v51, %v13892_v27 }
 0xe25   : > { %v6350_v23 = vsub.f32 1.5, %v6349_v57  ;;  %vm6302_vm14 = vweird.f32 %v13088_v48 }
 0xe26   : > { %v13036_v0 = vpop.eup %8190  ;;  %v13040_v14 = vadd.f32 1e-05, %v6210_v1  ;;  %v6370_v1 = vsub.f32 1.5, %v6369_v62  ;;  %v6205_v30 = vpop.xlane.xlu0 %6204 }
 0xe27   : > { %v13050_v49 = vpop.eup %8192  ;;  %v6317_v21 = vmul.f32 %v13036_v0, %v12999_v33  ;;  %vm6323_vm12 = vweird.f32 %v13036_v0 }
 0xe28   : > { %v6357_v10 = vmul.f32 %v13050_v49, %v13001_v17  ;;  %8196 = vrsqrt.f32 %v13040_v14  ;;  %v13078_v20 = vpop.eup %8194  ;;  %v6371_v46 = vmul.f32 %v12997_v12, %v6370_v1  ;;  %vm6363_vm13 = vweird.f32 %v13050_v49 }
 0xe29   : > { %8198 = vrsqrt.f32 %v13034_v3  ;;  %v6318_v36 = vmul.f32 %v13036_v0, %v6317_v21  ;;  %v6307_v59 = vmul.f32 %v13078_v20, %v13029_v6  ;;  %v6385_v21 = vsel %vm13096_vm4, %v12986_v60, %v6381_v11  ;;  %vm13186_vm3 = vmor %vm6362_vm8, %vm6363_vm13 }
 0xe2a   : > { %v6358_v47 = vmul.f32 %v13050_v49, %v6357_v10  ;;  %8200 = vrsqrt.f32 %v13081_v19  ;;  %v6459_v11 = vmul.f32 %v6385_v21, %v12837_v32  ;;  %vm6313_vm1 = vweird.f32 %v13078_v20  ;;  %vm13227_vm8 = vmor %vm6342_vm9, %vm6343_vm10 }
 0xe2b   : > { %v6154_v50 = vpop.xlane.xlu1 %6153  ;;  %v6308_v18 = vmul.f32 %v13078_v20, %v6307_v59  ;;  %v6319_v45 = vmul.f32 0.5, %v6318_v36  ;;  %v6340_v59 = vsub.f32 1.5, %v6339_v31  ;;  %vm6292_vm6 = vweird.f32 %v13040_v14  ;;  %vm13244_vm9 = vmor %vm6322_vm11, %vm6323_vm12 }
 0xe2c   : > { %v6208_v9 = vmul.f32 %v6154_v50, %v13892_v27  ;;  %v6359_v62 = vmul.f32 0.5, %v6358_v47  ;;  %v13121_v50 = vmul.f32 %v13005_v54, %v6350_v23  ;;  %v6506_v23 = vadd.f32 %v13048_v16, %v6483_v40 }
 0xe2d   : > { %v6309_v56 = vmul.f32 0.5, %v6308_v18  ;;  %v6482_v32 = vmul.f32 %v13026_v34, %v6459_v11  ;;  %v6320_v5 = vsub.f32 1.5, %v6319_v45  ;;  %v13143_v18 = vadd.f32 1e-05, %v6224_v39 }
 0xe2e   : > { %v13090_v35 = vpop.eup %8196  ;;  %v13102_v61 = vadd.f32 1e-05, %v6208_v9  ;;  %v6360_v9 = vsub.f32 1.5, %v6359_v62  ;;  %6522 = vmatpush.msra.mxu0 %v6506_v23  ;;  %v6225_v45 = vmul.f32 %v6205_v30, %v13892_v27  ;;  %v13163_v30 = vmul.f32 %v13031_v15, %v6340_v59 }
 0xe2f   : > { %v13105_v10 = vpop.eup %8198  ;;  %v6287_v4 = vmul.f32 %v13090_v35, %v13040_v14  ;;  %v6505_v31 = vadd.f32 %v13048_v16, %v6482_v32  ;;  %v13180_v23 = vmul.f32 %v13036_v0, %v6320_v5  ;;  %vm6293_vm7 = vweird.f32 %v13090_v35 }
 0xe30   : > { %v6327_v57 = vmul.f32 %v13105_v10, %v13034_v3  ;;  %8202 = vrsqrt.f32 %v13102_v61  ;;  %v13129_v36 = vpop.eup %8200  ;;  %v6361_v40 = vmul.f32 %v13050_v49, %v6360_v9  ;;  %vm6333_vm4 = vweird.f32 %v13105_v10 }
 0xe31   : > { %8204 = vrsqrt.f32 %v13088_v48  ;;  %v6288_v43 = vmul.f32 %v13090_v35, %v6287_v4  ;;  %v6277_v4 = vmul.f32 %v13129_v36, %v13081_v19  ;;  %6523 = vmatpush.msra.mxu0 %v6505_v31  ;;  %vm6282_vm13 = vweird.f32 %v13081_v19  ;;  %vm13261_vm11 = vmor %vm6332_vm0, %vm6333_vm4 }
 0xe32   : > { %v6328_v60 = vmul.f32 %v13105_v10, %v6327_v57  ;;  %8206 = vrsqrt.f32 %v13143_v18  ;;  %v6365_v31 = vsel %vm13186_vm3, %v13050_v49, %v6361_v40  ;;  %v6355_v49 = vsel %vm13173_vm2, %v13005_v54, %v13121_v50 }
 0xe33   : > { %v6199_v47 = vpop.xlane.xlu1 %6198  ;;  %v6289_v11 = vmul.f32 0.5, %v6288_v43  ;;  %vm6272_vm10 = vweird.f32 %v13102_v61  ;;  %v6345_v3 = vsel %vm13227_vm8, %v13031_v15, %v13163_v30  ;;  %vm6432_vm12 = vweird.f32 %v13143_v18  ;;  %vm13306_vm8 = vmor %vm6312_vm5, %vm6313_vm1 }
 0xe34   : > { %v6223_v1 = vmul.f32 %v6199_v47, %v13892_v27  ;;  %v6329_v62 = vmul.f32 0.5, %v6328_v60  ;;  %v6278_v60 = vmul.f32 %v13129_v36, %v6277_v4  ;;  %v13191_v4 = vadd.f32 1e-05, %v6225_v45  ;;  %v6151_v45 = vpop.xlane.xlu0 %6150 }
 0xe35   : > { %v6290_v5 = vsub.f32 1.5, %v6289_v11  ;;  %v6457_v11 = vmul.f32 %v6365_v31, %v12865_v8 }
 0xe36   : > { %v13140_v21 = vpop.eup %8202  ;;  %v13145_v57 = vadd.f32 1e-05, %v6223_v1  ;;  %v6310_v1 = vsub.f32 1.5, %v6309_v56  ;;  %v6330_v43 = vsub.f32 1.5, %v6329_v62  ;;  %v6279_v59 = vmul.f32 0.5, %v6278_v60  ;;  %v6148_v60 = vpop.xlane.xlu2 %6147 }
 0xe37   : > { %v13148_v51 = vpop.eup %8204  ;;  %v6267_v47 = vmul.f32 %v13140_v21, %v13102_v61  ;;  %v6375_v62 = vsel %vm13158_vm15, %v12997_v12, %v6371_v46  ;;  %v6206_v8 = vmul.f32 %v6148_v60, %v13892_v27  ;;  %v13232_v54 = vmul.f32 %v13090_v35, %v6290_v5 }
 0xe38   : > { %v6297_v9 = vmul.f32 %v13148_v51, %v13088_v48  ;;  %8208 = vrsqrt.f32 %v13145_v57  ;;  %v6458_v17 = vmul.f32 %v6375_v62, %v12853_v22  ;;  %v6280_v12 = vsub.f32 1.5, %v6279_v59  ;;  %v13216_v40 = vpop.eup %8206 }
 0xe39   : > { %v6268_v56 = vmul.f32 %v13140_v21, %v6267_v47  ;;  %8210 = vrsqrt.f32 %v13191_v4  ;;  %v13208_v47 = vmul.f32 %v13078_v20, %v6310_v1  ;;  %v6331_v22 = vmul.f32 %v13105_v10, %v6330_v43 }
 0xe3a   : > { %v6298_v7 = vmul.f32 %v13148_v51, %v6297_v9  ;;  %v6481_v39 = vmul.f32 %v13026_v34, %v6458_v17  ;;  %v6480_v59 = vmul.f32 %v13026_v34, %v6457_v11  ;;  %vm6283_vm15 = vweird.f32 %v13129_v36 }
 0xe3b   : > { %v6269_v46 = vmul.f32 0.5, %v6268_v56  ;;  %v6456_v56 = vmul.f32 %v6355_v49, %v12856_v38  ;;  %vm6303_vm2 = vweird.f32 %v13148_v51  ;;  %v6427_v38 = vmul.f32 %v13216_v40, %v13143_v18 }
 0xe3c   : > { %v6299_v9 = vmul.f32 0.5, %v6298_v7  ;;  %v6504_v50 = vadd.f32 %v13048_v16, %v6481_v39  ;;  %v13249_v29 = vmul.f32 %v13129_v36, %v6280_v12  ;;  %vm6273_vm3 = vweird.f32 %v13140_v21 }
 0xe3d   : > { %v6270_v32 = vsub.f32 1.5, %v6269_v46  ;;  %v6503_v62 = vadd.f32 %v13048_v16, %v6480_v59  ;;  %v6428_v5 = vmul.f32 %v13216_v40, %v6427_v38  ;;  %v6479_v17 = vmul.f32 %v13026_v34, %v6456_v56 }
 0xe3e   : > { %v13221_v1 = vpop.eup %8208  ;;  %6524 = vmatpush.msra.mxu0 %v6504_v50  ;;  %v13267_v31 = vadd.f32 1e-05, %v6206_v8  ;;  %v6207_v60 = vmul.f32 %v6151_v45, %v13892_v27  ;;  %v6300_v46 = vsub.f32 1.5, %v6299_v9  ;;  %v6335_v39 = vsel %vm13261_vm11, %v13105_v10, %v6331_v22  ;;  %v6512_v22 = vld [vmem:[%s13911_s3] sm:$0xf]  ;;  %v6196_v8 = vpop.xlane.xlu0 %6195 }
 0xe3f   : > { %v6417_v7 = vmul.f32 %v13221_v1, %v13145_v57  ;;  %v13270_v12 = vpop.eup %8210  ;;  %v6429_v49 = vmul.f32 0.5, %v6428_v5  ;;  %v6502_v9 = vadd.f32 %v13048_v16, %v6479_v17  ;;  %v6325_v59 = vsel %vm13244_vm9, %v13036_v0, %v13180_v23  ;;  %6514 = vst [vmem:[#allocation1] ss:$4 sm:$0xff] %v6512_v22  ;;  %vm13317_vm9 = vmor %vm6292_vm6, %vm6293_vm7 }
 0xe40   : > { %v6437_v45 = vmul.f32 %v13270_v12, %v13191_v4  ;;  %6525 = vmatpush.msra.mxu0 %v6503_v62  ;;  %v13289_v15 = vmul.f32 %v13140_v21, %v6270_v32  ;;  %vm6422_vm0 = vweird.f32 %v13145_v57  ;;  %8212 = vrsqrt.f32 %v13267_v31  ;;  %vm13335_vm6 = vmor %vm6302_vm14, %vm6303_vm2 }
 0xe41   : > { %v6418_v11 = vmul.f32 %v13221_v1, %v6417_v7  ;;  %v13293_v10 = vadd.f32 1e-05, %v6207_v60  ;;  %vm6433_vm4 = vweird.f32 %v13216_v40  ;;  %v6455_v0 = vmul.f32 %v6345_v3, %v12874_v44  ;;  %vm13350_vm14 = vmor %vm6282_vm13, %vm6283_vm15 }
 0xe42   : > { %v6438_v56 = vmul.f32 %v13270_v12, %v6437_v45  ;;  %6526 = vmatpush.msra.mxu0 %v6502_v9  ;;  %v6454_v23 = vmul.f32 %v6335_v39, %v12882_v13  ;;  %v6301_v38 = vmul.f32 %v13148_v51, %v6300_v46  ;;  %v6430_v50 = vsub.f32 1.5, %v6429_v49  ;;  %vm13368_vm13 = vmor %vm6272_vm10, %vm6273_vm3 }
 0xe43   : > { %v6419_v30 = vmul.f32 0.5, %v6418_v11  ;;  %8214 = vrsqrt.f32 %v13293_v10  ;;  %v6453_v2 = vmul.f32 %v6325_v59, %v12879_v37  ;;  %vm6423_vm5 = vweird.f32 %v13221_v1  ;;  %vm13391_vm15 = vmor %vm6432_vm12, %vm6433_vm4 }
 0xe44   : > { %v6439_v13 = vmul.f32 0.5, %v6438_v56  ;;  %vm6442_vm1 = vweird.f32 %v13191_v4  ;;  %v6478_v6 = vmul.f32 %v13026_v34, %v6455_v0  ;;  %v6477_v32 = vmul.f32 %v13026_v34, %v6454_v23  ;;  %vm13406_vm2 = vmor %vm6422_vm0, %vm6423_vm5 }
 0xe45   : > { %v6420_v7 = vsub.f32 1.5, %v6419_v30  ;;  %vm6443_vm11 = vweird.f32 %v13270_v12  ;;  %v6222_v37 = vmul.f32 %v6196_v8, %v13892_v27  ;;  %v6315_v14 = vsel %vm13306_vm8, %v13078_v20, %v13208_v47 }
 0xe46   : > { %vm6252_vm7 = vweird.f32 %v13267_v31  ;;  %v6501_v33 = vadd.f32 %v13048_v16, %v6478_v6  ;;  %v6500_v5 = vadd.f32 %v13048_v16, %v6477_v32  ;;  %v6476_v27 = vmul.f32 %v13026_v34, %v6453_v2  ;;  %v13344_v60 = vpop.eup %8212  ;;  %vm6444_vm10 = vmor %vm6442_vm1, %vm6443_vm11 }
 0xe47   : > { %v6452_v17 = vmul.f32 %v6315_v14, %v12897_v26  ;;  %v6431_v48 = vmul.f32 %v13216_v40, %v6430_v50  ;;  %v13355_v47 = vadd.f32 1e-05, %v6222_v37  ;;  %v6305_v46 = vsel %vm13335_vm6, %v13148_v51, %v6301_v38 }
 0xe48   : > { %v6295_v26 = vsel %vm13317_vm9, %v13090_v35, %v13232_v54  ;;  %v6440_v11 = vsub.f32 1.5, %v6439_v13  ;;  %v6247_v3 = vmul.f32 %v13344_v60, %v13267_v31  ;;  %6527 = vmatpush.msra.mxu0 %v6501_v33  ;;  %v6451_v39 = vmul.f32 %v6305_v46, %v12903_v42 }
 0xe49   : > { %v6475_v51 = vmul.f32 %v13026_v34, %v6452_v17  ;;  %v8215_v49 = vpop.eup %8214  ;;  %v6421_v35 = vmul.f32 %v13221_v1, %v6420_v7  ;;  %8216 = vrsqrt.f32 %v13355_v47  ;;  %v6450_v61 = vmul.f32 %v6295_v26, %v12900_v28 }
 0xe4a   : > { %v6285_v54 = vsel %vm13350_vm14, %v13129_v36, %v13249_v29  ;;  %v6248_v45 = vmul.f32 %v13344_v60, %v6247_v3  ;;  %v6257_v9 = vmul.f32 %v8215_v49, %v13293_v10  ;;  %6528 = vmatpush.msra.mxu0 %v6500_v5  ;;  %v6499_v59 = vadd.f32 %v13048_v16, %v6476_v27  ;;  %v6515_v3 = vld.sshfl [vmem:[#allocation1] sm:$0xff pattern:$0x73625140] }
 0xe4b   : > { %v6498_v42 = vadd.f32 %v13048_v16, %v6475_v51  ;;  %v6474_v30 = vmul.f32 %v13026_v34, %v6451_v39  ;;  %v6473_v36 = vmul.f32 %v13026_v34, %v6450_v61  ;;  %v6449_v29 = vmul.f32 %v6285_v54, %v12918_v55 }
 0xe4c   : > { %v6275_v22 = vsel %vm13368_vm13, %v13140_v21, %v13289_v15  ;;  %v6249_v56 = vmul.f32 0.5, %v6248_v45  ;;  %v6258_v0 = vmul.f32 %v8215_v49, %v6257_v9  ;;  %6529 = vmatpush.msra.mxu0 %v6499_v59  ;;  %v6441_v55 = vmul.f32 %v13270_v12, %v6440_v11 }
 0xe4d   : > { %v6448_v23 = vmul.f32 %v6275_v22, %v12921_v58  ;;  %vm6253_vm3 = vweird.f32 %v13344_v60  ;;  %vm6263_vm12 = vweird.f32 %v8215_v49  ;;  %v6497_v21 = vadd.f32 %v13048_v16, %v6474_v30 }
 0xe4e   : > { %v6435_v57 = vsel %vm13391_vm15, %v13216_v40, %v6431_v48  ;;  %v6250_v15 = vsub.f32 1.5, %v6249_v56  ;;  %v6259_v8 = vmul.f32 0.5, %v6258_v0  ;;  %6530 = vmatpush.msra.mxu0 %v6498_v42  ;;  %v6472_v58 = vmul.f32 %v13026_v34, %v6449_v29  ;;  %vm6254_vm0 = vmor %vm6252_vm7, %vm6253_vm3 }
 0xe4f   : > { %v6445_v43 = vsel %vm6444_vm10, %v13270_v12, %v6441_v55  ;;  %v8217_v38 = vpop.eup %8216  ;;  %v6496_v4 = vadd.f32 %v13048_v16, %v6473_v36  ;;  %v6464_v2 = vmul.f32 %v6435_v57, %v12939_v24  ;;  %v6425_v44 = vsel %vm13406_vm2, %v13221_v1, %v6421_v35  ;;  %v8177_v35 = vld [vmem:[%s13927_s22] ss:$0 sm:$0xff] }
 0xe50   : > { %v6465_v50 = vmul.f32 %v6445_v43, %v12924_v63  ;;  %v6251_v40 = vmul.f32 %v13344_v60, %v6250_v15  ;;  %v6260_v13 = vsub.f32 1.5, %v6259_v8  ;;  %v6407_v6 = vmul.f32 %v8217_v38, %v13355_v47  ;;  %6531 = vmatpush.msra.mxu0 %v6497_v21 }
 0xe51   : > { %v6471_v32 = vmul.f32 %v13026_v34, %v6448_v23  ;;  %vm6262_vm4 = vweird.f32 %v13293_v10  ;;  %v6487_v24 = vmul.f32 %v13026_v34, %v6464_v2  ;;  %v6463_v1 = vmul.f32 %v6425_v44, %v12942_v53 }
 0xe52   : > { %v6488_v63 = vmul.f32 %v13026_v34, %v6465_v50  ;;  %v6261_v12 = vmul.f32 %v8215_v49, %v6260_v13  ;;  %v6408_v7 = vmul.f32 %v8217_v38, %v6407_v6  ;;  %6532 = vmatpush.msra.mxu0 %v6496_v4  ;;  %v6495_v37 = vadd.f32 %v13048_v16, %v6472_v58  ;;  %vm6264_vm8 = vmor %vm6262_vm4, %vm6263_vm12 }
 0xe53   : > { %v6255_v14 = vsel %vm6254_vm0, %v13344_v60, %v6251_v40  ;;  %v6486_v62 = vmul.f32 %v13026_v34, %v6463_v1  ;;  %v6494_v5 = vadd.f32 %v13048_v16, %v6471_v32  ;;  %v6510_v27 = vadd.f32 %v13048_v16, %v6487_v24 }
 0xe54   : > { %v6511_v31 = vadd.f32 %v13048_v16, %v6488_v63  ;;  %v6446_v10 = vmul.f32 %v6255_v14, %v12959_v52  ;;  %v6409_v33 = vmul.f32 0.5, %v6408_v7  ;;  %6533 = vmatpush.msra.mxu0 %v6495_v37  ;;  %v6265_v53 = vsel %vm6264_vm8, %v8215_v49, %v6261_v12 }
 0xe55   : > { %v6447_v17 = vmul.f32 %v6265_v53, %v12947_v25  ;;  %vm6413_vm9 = vweird.f32 %v8217_v38  ;;  %v6509_v60 = vadd.f32 %v13048_v16, %v6486_v62  ;;  %vm6412_vm5 = vweird.f32 %v13355_v47  ;;  %v6516_v47 = vld.sshfl [vmem:[#allocation1 + $0x8] sm:$0xff pattern:$0x73625140] }
 0xe56   : > { %6553 = vmatpush.msra.mxu1 %v6511_v31  ;;  %v6410_v20 = vsub.f32 1.5, %v6409_v33  ;;  %6534 = vmatpush.msra.mxu0 %v6494_v5  ;;  %v6469_v52 = vmul.f32 %v13026_v34, %v6446_v10  ;;  %vm6414_vm1 = vmor %vm6412_vm5, %vm6413_vm9  ;;  %vm13926_vm11 = vcmask 261120   ;;  %vm6566_vm6 = vcmask 517120  }
 0xe57   : > { %v6470_v48 = vmul.f32 %v13026_v34, %v6447_v17  ;;  %vm6570_vm7 = vcmask 1024  }
 0xe58   : > { %6554 = vmatpush.msra.mxu1 %v6510_v27  ;;  %v6411_v46 = vmul.f32 %v8217_v38, %v6410_v20  ;;  %v6492_v25 = vadd.f32 %v13048_v16, %v6469_v52 }
 0xe59   : > { %v6493_v26 = vadd.f32 %v13048_v16, %v6470_v48 }
 0xe5a   : > { %6555 = vmatpush.msra.mxu1 %v6509_v60  ;;  %v6415_v19 = vsel %vm6414_vm1, %v8217_v38, %v6411_v46 }
 0xe5b   : > { %6535 = vmatpush.msra.mxu0 %v6493_v26  ;;  %v6462_v11 = vmul.f32 %v6415_v19, %v12962_v41 }
 0xe5d   : > { %6536 = vmatpush.msra.mxu0 %v6492_v25  ;;  %v6485_v51 = vmul.f32 %v13026_v34, %v6462_v11 }
 0xe5e   : > { %6537 = vmatmul.f32.vlgmr.msra.gmra.mxu0 %v6515_v3 }
 0xe5f   : > { %v6508_v39 = vadd.f32 %v13048_v16, %v6485_v51 }
 0xe61   : > { %6556 = vmatpush.msra.mxu1 %v6508_v39 }
 0xe62   : > { %7212 = vmatmul.msk.f32.vlgmr.msra.gmra.mxu1 %vm13926_vm11, %v6516_v47 }
 0xedb   : > { %v6538_v49 = vpop.f32.mrf.mxu0 }
 0xedf   : > { %v6558_v61 = vpop.f32.mrf.mxu1 }
 0xee0   : > { %v6559_v41 = vadd.f32 %v6558_v61, %v6538_v49 }
 0xee2   : > { %v6565_v54 = vmul.f32 %v8177_v35, %v6559_v41 }
 0xee4   : > { %v6567_v45 = vsel %vm6566_vm6, %v6565_v54, 0.0 }
 0xee5   : > { %6568 = vadd.xlane.f32.xlu1 %v6567_v45 }
 0xf58   : > { %v6569_v34 = vpop.xlane.xlu1 %6568 }
 0xf59   : > { %6571 = vst.msk [vmem:[%s8642_s21] sm:$0x3] %vm6570_vm7, %v6569_v34 }
 0xf5a PF: > { %s13928_s4 = sld [smem:[#allocation2_spill]] }
 0xf60   : > { %s27_s24 = sadd.s32 1, %s13928_s4  }
 0xf61   : > { %p24_p5 = scmp.ge.s32.totalorder %s27_s24, 4  }
 0xf63   :  { %26 = sbr.rel (!%p24_p5) target bundleno = 9 (0x9), region = 193 }

</bundles_post_ra>
